<compile_context>
chip_gen: v6e
topology: v6e:2x2x1
jax: 0.10.0
libtpu: 0.0.40
codegen_flags: <defaults>
</compile_context>

<pallas_src>
import math

import jax
import jax.numpy as jnp
from jax.experimental import pallas as pl
from jax.experimental.pallas import tpu as pltpu


def _round_up(x, m):
    return ((x + m - 1) // m) * m


def _pad2(w, rows, cols):
    """Zero-pad a 2-D array to (rows, cols)."""
    out = jnp.zeros((rows, cols), w.dtype)
    return out.at[:w.shape[0], :w.shape[1]].set(w)


def _scatter_gate_cols(w, H, Hp, n_gates):
    """(..., n_gates*H) -> (..., n_gates*Hp): gate block k moved to [k*Hp, k*Hp+H)."""
    out = jnp.zeros(w.shape[:-1] + (n_gates * Hp,), w.dtype)
    for k in range(n_gates):
        out = out.at[..., k * Hp:k * Hp + H].set(w[..., k * H:(k + 1) * H])
    return out


# ---------------------------------------------------------------------------
# Kernel 1: the sequential T-step recurrence (text LSTM + attention + CaptionNet)
# for one batch block.  Grid axis = batch blocks ("parallel": independent
# recurrences).  The whole T loop runs in-kernel, unrolled.
# ---------------------------------------------------------------------------
def cap_recurrent_kernel(
    x_ref,        # (T, Bb, Ep)  f32   embedded + ReLU'd tokens
    wvv_ref,      # (Bb, L, Hp)  f32   precomputed Wv_V = w_v(v) + b_v
    v_ref,        # (Bb, L, Hp)  f32   visual features
    h20_ref,      # (Bb, Hp)     f32   initial CaptionNet hidden
    c20_ref,      # (Bb, Hp)     f32   initial CaptionNet cell
    w_lstm_ref,   # (Ep+Hp, 4Hp) bf16  [Wih ; Whh]  (pre-transposed, gate-padded)
    b_lstm_ref,   # (1, 4Hp)     f32   b_ih + b_hh
    w_gc_ref,     # (2Hp, Hp)    bf16  [Wg ; Wc]
    b_gc_ref,     # (1, Hp)      f32   b_g + b_c
    wh_ref,       # (1, Hp)      f32   w_h weight row
    bh_ref,       # (1, 1)       f32   w_h bias
    w_cap_ref,    # (3Hp, 4Hp)   bf16  [i2h ; h2h ; t2h->(o,f) cols]
    b_cap_ref,    # (1, 4Hp)     f32   bi2h + bh2h (+ bt2h in o/f cols)
    h_out_ref,    # (T, Bb, Hp)  f32   per-step CaptionNet hidden h2
):
    T, Bb, _ = x_ref.shape
    L = v_ref.shape[1]
    Hp = h20_ref.shape[-1]

    # ---- loop-invariant loads / broadcasts, hoisted out of the recurrence ----
    wvv = wvv_ref[...]
    v_bf = v_ref[...].astype(jnp.bfloat16)
    w_lstm = w_lstm_ref[...]
    w_gc = w_gc_ref[...]
    w_cap = w_cap_ref[...]
    b_lstm = jnp.broadcast_to(b_lstm_ref[...], (Bb, 4 * Hp))
    b_gc = jnp.broadcast_to(b_gc_ref[...], (Bb, Hp))
    b_cap = jnp.broadcast_to(b_cap_ref[...], (Bb, 4 * Hp))
    wh_b = jnp.broadcast_to(wh_ref[...].reshape(1, 1, Hp), (Bb, L, Hp))
    bh_b = jnp.broadcast_to(bh_ref[...], (Bb, L))

    def step(t, carry):
        h1, c1, h2, c2 = carry

        # ---- text_cap: nn.LSTMCell(E, H); gates = [x, h1] @ [Wih ; Whh] ----
        x1 = x_ref[t]                                            # (Bb, Ep)
        xh = jnp.concatenate([x1, h1], axis=1).astype(jnp.bfloat16)
        gates = jnp.dot(xh, w_lstm, preferred_element_type=jnp.float32) + b_lstm
        i_g = jax.nn.sigmoid(gates[:, 0 * Hp:1 * Hp])
        f_g = jax.nn.sigmoid(gates[:, 1 * Hp:2 * Hp])
        g_g = jnp.tanh(gates[:, 2 * Hp:3 * Hp])
        o_g = jax.nn.sigmoid(gates[:, 3 * Hp:4 * Hp])
        c1n = f_g * c1 + i_g * g_g
        h1n = o_g * jnp.tanh(c1n)

        # ---- attention: alpha = w_h(tanh(Wv_V + Wg_H + Wg_C)), softmax over L ----
        hc = jnp.concatenate([h1n, c2], axis=1).astype(jnp.bfloat16)
        wg_hc = jnp.dot(hc, w_gc, preferred_element_type=jnp.float32) + b_gc
        e = jnp.tanh(wvv + wg_hc[:, None, :])                    # (Bb, L, Hp)
        score = jnp.sum(e * wh_b, axis=-1) + bh_b                # (Bb, L)
        score = score - jnp.max(score, axis=1, keepdims=True)
        p = jnp.exp(score)
        att = p / jnp.sum(p, axis=1, keepdims=True)
        # alpha_v = bmm(att, v).squeeze(1): batched dot (MXU), not bcast+reduce
        alpha_v = jnp.einsum(
            "bqk,bkd->bqd", att[:, None, :].astype(jnp.bfloat16), v_bf,
            preferred_element_type=jnp.float32)[:, 0, :]         # (Bb, Hp)

        # ---- CaptionNet(alpha_v, text=h1n, hidden=(h2, c2)) ----
        ahh = jnp.concatenate([alpha_v, h2, h1n], axis=1).astype(jnp.bfloat16)
        big = jnp.dot(ahh, w_cap, preferred_element_type=jnp.float32) + b_cap
        i_t = jax.nn.sigmoid(big[:, 0 * Hp:1 * Hp])
        g_t = jnp.tanh(big[:, 1 * Hp:2 * Hp])
        o_t = jax.nn.sigmoid(big[:, 2 * Hp:3 * Hp])
        f_t = jax.nn.sigmoid(big[:, 3 * Hp:4 * Hp])
        c2n = g_t * i_t + c2 * f_t
        h2n = jnp.tanh(c2n) * o_t

        h_out_ref[t] = h2n
        return (h1n, c1n, h2n, c2n)

    zeros = jnp.zeros((Bb, Hp), jnp.float32)
    jax.lax.fori_loop(0, T, step, (zeros, zeros, h20_ref[...], c20_ref[...]),
                      unroll=True)


# ---------------------------------------------------------------------------
# Kernel 2: vocab projection, off the recurrent critical path.  One lane-dense
# (T*Bp, Hp) @ (Hp, Vp) matmul, fully parallel over 128-wide vocab tiles.
# ---------------------------------------------------------------------------
def vocab_mlp_kernel(h_ref, wm_ref, bm_ref, out_ref):
    out_ref[...] = (
        jnp.dot(h_ref[...].astype(jnp.bfloat16), wm_ref[...],
                preferred_element_type=jnp.float32) + bm_ref[...])


@jax.jit
def cap_decoder_forward(params, v, h2_0, c2_0, captions):
    """Pallas implementation of CAPDecoder.forward.  Returns (B, T, vocab)."""
    B, T = captions.shape
    _, L, H = v.shape
    V, E = params["embed"].shape

    Hp = _round_up(H, 128)
    Ep = _round_up(E, 128)
    Vp = _round_up(V, 128)
    Bp = _round_up(B, 8)
    Bb = min(Bp, 8)            # batch block per ("parallel") grid step
    f32 = jnp.float32
    bf16 = jnp.bfloat16

    # ---- glue: embedding lookup + ReLU (dropout == identity in eval mode) ----
    captions_p = jnp.zeros((Bp, T), captions.dtype).at[:B].set(captions)
    embed_p = jnp.zeros((V, Ep), f32).at[:, :E].set(params["embed"])
    x_emb = jnp.maximum(embed_p[captions_p], 0.0)                # (Bp, T, Ep)
    x_emb = jnp.transpose(x_emb, (1, 0, 2))                      # (T, Bp, Ep)

    # ---- glue: zero-pad batch / feature dims (padded lanes stay zero) ----
    v_p = jnp.zeros((Bp, L, Hp), f32).at[:B, :, :H].set(v)
    h2_0p = jnp.zeros((Bp, Hp), f32).at[:B, :H].set(h2_0)
    c2_0p = jnp.zeros((Bp, Hp), f32).at[:B, :H].set(c2_0)

    # ---- hoisted time-invariant visual projection Wv_V = w_v(v) + b_v ----
    wvv = jnp.einsum("blh,kh->blk", v, params["wv"]) + params["bv"]
    wvv_p = jnp.zeros((Bp, L, Hp), f32).at[:B, :, :H].set(wvv)

    # ---- fused / padded weights (Linear weights are (out, in) -> transpose) ----
    # text LSTMCell: [x, h1] @ [Wih ; Whh], gate order (i, f, g, o)
    wih_t = _scatter_gate_cols(params["wih"].T, H, Hp, 4)        # (E, 4Hp)
    whh_t = _scatter_gate_cols(params["whh"].T, H, Hp, 4)        # (H, 4Hp)
    w_lstm = jnp.concatenate(
        [_pad2(wih_t, Ep, 4 * Hp), _pad2(whh_t, Hp, 4 * Hp)], axis=0).astype(bf16)
    b_lstm = _scatter_gate_cols(params["bih"] + params["bhh"], H, Hp, 4
                                ).reshape(1, 4 * Hp)
    # attention gates: [h1, c2] @ [Wg ; Wc]
    w_gc = jnp.concatenate(
        [_pad2(params["wg"].T, Hp, Hp), _pad2(params["wc"].T, Hp, Hp)],
        axis=0).astype(bf16)
    b_gc = _pad2((params["bg"] + params["bc"]).reshape(1, H), 1, Hp)
    wh = _pad2(params["wh"], 1, Hp)                              # (1, Hp)
    bh = params["bh"].reshape(1, 1)
    # CaptionNet: [alpha_v, h2, h1] @ [i2h ; h2h ; t2h (into o/f columns)]
    i2h_t = _scatter_gate_cols(params["i2h"].T, H, Hp, 4)        # (H, 4Hp)
    h2h_t = _scatter_gate_cols(params["h2h"].T, H, Hp, 4)        # (H, 4Hp)
    t2h_ext = jnp.concatenate(
        [jnp.zeros((H, 2 * H), f32), params["t2h"].T], axis=1)   # (H, 4H)
    t2h_g = _scatter_gate_cols(t2h_ext, H, Hp, 4)                # (H, 4Hp)
    w_cap = jnp.concatenate(
        [_pad2(i2h_t, Hp, 4 * Hp), _pad2(h2h_t, Hp, 4 * Hp),
         _pad2(t2h_g, Hp, 4 * Hp)], axis=0).astype(bf16)         # (3Hp, 4Hp)
    b_ig = params["bi2h"] + params["bh2h"]
    b_cap = _scatter_gate_cols(
        jnp.concatenate([b_ig[:2 * H], b_ig[2 * H:] + params["bt2h"]]),
        H, Hp, 4).reshape(1, 4 * Hp)
    # vocab MLP
    wm_p = _pad2(params["wm"].T, Hp, Vp).astype(bf16)            # (Hp, Vp)
    bm_p = _pad2(params["bm"].reshape(1, V), 1, Vp)              # (1, Vp)

    def full(shape):
        return pl.BlockSpec(shape, lambda b, _n=len(shape): (0,) * _n)

    # ---- recurrent kernel: one call, T loop inside, batch blocks in parallel ----
    h_seq = pl.pallas_call(
        cap_recurrent_kernel,
        out_shape=jax.ShapeDtypeStruct((T, Bp, Hp), f32),
        grid_spec=pltpu.PrefetchScalarGridSpec(
            num_scalar_prefetch=0,
            grid=(Bp // Bb,),
            in_specs=[
                pl.BlockSpec((T, Bb, Ep), lambda b: (0, b, 0)),   # x_emb
                pl.BlockSpec((Bb, L, Hp), lambda b: (b, 0, 0)),   # Wv_V
                pl.BlockSpec((Bb, L, Hp), lambda b: (b, 0, 0)),   # v
                pl.BlockSpec((Bb, Hp), lambda b: (b, 0)),         # h2_0
                pl.BlockSpec((Bb, Hp), lambda b: (b, 0)),         # c2_0
                full((Ep + Hp, 4 * Hp)),                          # w_lstm
                full((1, 4 * Hp)),                                # b_lstm
                full((2 * Hp, Hp)),                               # w_gc
                full((1, Hp)),                                    # b_gc
                full((1, Hp)),                                    # wh
                full((1, 1)),                                     # bh
                full((3 * Hp, 4 * Hp)),                           # w_cap
                full((1, 4 * Hp)),                                # b_cap
            ],
            out_specs=pl.BlockSpec((T, Bb, Hp), lambda b: (0, b, 0)),
        ),
        compiler_params=pltpu.CompilerParams(
            dimension_semantics=("parallel",)),
    )(x_emb, wvv_p, v_p, h2_0p, c2_0p,
      w_lstm, b_lstm, w_gc, b_gc, wh, bh, w_cap, b_cap)

    # ---- vocab projection: one big lane-dense matmul, parallel over V tiles ----
    rows = T * Bp
    h_flat = h_seq.reshape(rows, Hp)
    VT = 128
    logits_p = pl.pallas_call(
        vocab_mlp_kernel,
        out_shape=jax.ShapeDtypeStruct((rows, Vp), f32),
        grid_spec=pltpu.PrefetchScalarGridSpec(
            num_scalar_prefetch=0,
            grid=(Vp // VT,),
            in_specs=[
                pl.BlockSpec((rows, Hp), lambda j: (0, 0)),
                pl.BlockSpec((Hp, VT), lambda j: (0, j)),
                pl.BlockSpec((1, VT), lambda j: (0, j)),
            ],
            out_specs=pl.BlockSpec((rows, VT), lambda j: (0, j)),
        ),
        compiler_params=pltpu.CompilerParams(
            dimension_semantics=("parallel",)),
    )(h_flat, wm_p, bm_p)

    logits = logits_p.reshape(T, Bp, Vp)[:, :B, :V]              # strip padding
    return jnp.transpose(logits, (1, 0, 2))                      # (B, T, V)


# ------------------------- pure-JAX reference -------------------------------
def ref_forward(p, v, h2_0, c2_0, captions):
    B, T = captions.shape
    H = h2_0.shape[1]
    h1 = jnp.zeros((B, H), jnp.float32)
    c1 = jnp.zeros((B, H), jnp.float32)
    h2, c2 = h2_0, c2_0
    outs = []
    for t in range(T):
        x1 = jnp.maximum(p["embed"][captions[:, t]], 0.0)
        gates = x1 @ p["wih"].T + p["bih"] + h1 @ p["whh"].T + p["bhh"]
        i = jax.nn.sigmoid(gates[:, :H]); f = jax.nn.sigmoid(gates[:, H:2 * H])
        g = jnp.tanh(gates[:, 2 * H:3 * H]); o = jax.nn.sigmoid(gates[:, 3 * H:])
        c1 = f * c1 + i * g
        h1 = o * jnp.tanh(c1)
        Wv_V = v @ p["wv"].T + p["bv"]
        Wg_H = (h1 @ p["wg"].T + p["bg"])[:, None, :]
        Wg_C = (c2 @ p["wc"].T + p["bc"])[:, None, :]
        alpha = jnp.tanh(Wv_V + Wg_H + Wg_C) @ p["wh"].T + p["bh"]   # (B, L, 1)
        att = jax.nn.softmax(alpha, axis=1)
        alpha_v = jnp.sum(att * v, axis=1)                           # (B, H)
        i_g = alpha_v @ p["i2h"].T + p["bi2h"] + h2 @ p["h2h"].T + p["bh2h"]
        i_t = jax.nn.sigmoid(i_g[:, :H]); g_t = jnp.tanh(i_g[:, H:2 * H])
        o_f = jax.nn.sigmoid(i_g[:, 2 * H:] + h1 @ p["t2h"].T + p["bt2h"])
        o_t = o_f[:, :H]; f_t = o_f[:, H:2 * H]
        c2 = g_t * i_t + c2 * f_t
        h2 = jnp.tanh(c2) * o_t
        outs.append(h2 @ p["wm"].T + p["bm"])
    return jnp.stack(outs, axis=1)


# ------------------------- deterministic init -------------------------------
def init_params(key, V, E, H):
    ks = iter(jax.random.split(key, 32))
    u = lambda k, shape, s: jax.random.uniform(k, shape, jnp.float32, -s, s)
    std = 1.0 / math.sqrt(H)
    p = {}
    p["embed"] = u(next(ks), (V, E), 0.1)
    p["wih"] = u(next(ks), (4 * H, E), std); p["whh"] = u(next(ks), (4 * H, H), std)
    p["bih"] = u(next(ks), (4 * H,), std);   p["bhh"] = u(next(ks), (4 * H,), std)
    for name in ("wv", "wg", "wc"):
        p[name] = u(next(ks), (H, H), std)
        p["b" + name[-1]] = u(next(ks), (H,), std)
    p["wh"] = u(next(ks), (1, H), std); p["bh"] = u(next(ks), (1,), std)
    p["i2h"] = u(next(ks), (4 * H, H), std); p["bi2h"] = u(next(ks), (4 * H,), std)
    p["h2h"] = u(next(ks), (4 * H, H), std); p["bh2h"] = u(next(ks), (4 * H,), std)
    p["t2h"] = u(next(ks), (2 * H, H), std); p["bt2h"] = u(next(ks), (2 * H,), std)
    p["wm"] = u(next(ks), (V, H), std);      p["bm"] = u(next(ks), (V,), std)
    return p


if __name__ == "__main__":
    B, T, L = 2, 6, 8       # batch, caption length, number of visual regions
    H, E, V = 32, 32, 48    # hidden_size, embed_size, vocab_size

    key = jax.random.PRNGKey(0)
    kp, kv, kh, kc, kcap = jax.random.split(key, 5)
    params = init_params(kp, V, E, H)

    v = 0.5 * jax.random.normal(kv, (B, L, H), jnp.float32)
    h_stack = 0.5 * jax.random.normal(kh, (1, B, H), jnp.float32)   # h_c[0]
    c_stack = 0.5 * jax.random.normal(kc, (1, B, H), jnp.float32)   # h_c[1]
    captions = jax.random.randint(kcap, (B, T), 0, V)
    lengths = jnp.full((B,), T, jnp.int32)   # unused by forward (as in PyTorch)

    # CAPDecoder: h_c, v = h_c ; h_c2 = (h_c[0][0], h_c[1][0])
    h2_0, c2_0 = h_stack[0], c_stack[0]

    out = cap_decoder_forward(params, v, h2_0, c2_0, captions)
    out = jax.block_until_ready(out)

    ref = ref_forward(params, v, h2_0, c2_0, captions)
    assert out.shape == (B, T, V)
    # bf16 MXU inputs (f32 accumulation) vs f32 reference -> relaxed tolerance.
    err = float(jnp.max(jnp.abs(out - ref)))
    assert err < 2e-2, f"max abs err = {err}"
    print("KERNEL_OK")
</pallas_src>

<mosaic_0001>
module attributes {stable_mosaic.version = 11 : i64} {
  func.func @vocab_mlp_kernel(%arg0: i32, %arg1: memref<48x128xf32, #tpu.memory_space<vmem>>, %arg2: memref<128x128xbf16, #tpu.memory_space<vmem>>, %arg3: memref<1x128xf32, #tpu.memory_space<vmem>>, %arg4: memref<48x128xf32, #tpu.memory_space<vmem>>) attributes {dimension_semantics = [#tpu.dimension_semantics<parallel>], iteration_bounds = array<i64: 1>, scalar_prefetch = 0 : i64, scratch_operands = 0 : i64, tpu.core_type = #tpu.core_type<tc>, window_params = [{pipeline_mode = #tpu.pipeline_mode<synchronous>, transform_indices = @transform_0, window_bounds = array<i64: 48, 128>}, {transform_indices = @transform_1, window_bounds = array<i64: 128, 128>}, {transform_indices = @transform_2, window_bounds = array<i64: 1, 128>}, {transform_indices = @transform_3, window_bounds = array<i64: 48, 128>}]} {
    %c0 = arith.constant 0 : index
    %c0_0 = arith.constant 0 : index
    %0 = vector.load %arg1[%c0, %c0_0] : memref<48x128xf32, #tpu.memory_space<vmem>>, vector<48x128xf32>
    %1 = arith.truncf %0 : vector<48x128xf32> to vector<48x128xbf16>
    %c0_1 = arith.constant 0 : index
    %c0_2 = arith.constant 0 : index
    %2 = vector.load %arg2[%c0_1, %c0_2] : memref<128x128xbf16, #tpu.memory_space<vmem>>, vector<128x128xbf16>
    %cst = arith.constant dense<0.000000e+00> : vector<48x128xf32>
    %3 = tpu.matmul %1, %2, %cst {dimension_numbers = #tpu.dot_dimension_numbers<[1], [0], [0], [1], [0, 0, 1, 1], [], []>} : vector<48x128xbf16>, vector<128x128xbf16>, vector<48x128xf32> -> vector<48x128xf32>
    %c0_3 = arith.constant 0 : index
    %c0_4 = arith.constant 0 : index
    %4 = vector.load %arg3[%c0_3, %c0_4] : memref<1x128xf32, #tpu.memory_space<vmem>>, vector<1x128xf32>
    %5 = vector.broadcast %4 : vector<1x128xf32> to vector<48x128xf32>
    %6 = arith.addf %3, %5 : vector<48x128xf32>
    %c0_5 = arith.constant 0 : index
    %c0_6 = arith.constant 0 : index
    %7 = vector.load %arg4[%c0_5, %c0_6] : memref<48x128xf32, #tpu.memory_space<vmem>>, vector<48x128xf32>
    tpu.vector_store %arg4[%c0_5, %c0_6], %6 {strides = array<i32>} : memref<48x128xf32, #tpu.memory_space<vmem>>, vector<48x128xf32>,
    return
  }
  func.func @transform_0(%arg0: i32) -> (i32, i32) {
    %c0_i32 = arith.constant 0 : i32
    %c0_i32_0 = arith.constant 0 : i32
    %c0_i32_1 = arith.constant 0 : i32
    return %c0_i32, %c0_i32_0 : i32, i32
  }
  func.func @transform_1(%arg0: i32) -> (i32, i32) {
    %c0_i32 = arith.constant 0 : i32
    %c0_i32_0 = arith.constant 0 : i32
    return %c0_i32, %arg0 : i32, i32
  }
  func.func @transform_2(%arg0: i32) -> (i32, i32) {
    %c0_i32 = arith.constant 0 : i32
    %c0_i32_0 = arith.constant 0 : i32
    return %c0_i32, %arg0 : i32, i32
  }
  func.func @transform_3(%arg0: i32) -> (i32, i32) {
    %c0_i32 = arith.constant 0 : i32
    %c0_i32_0 = arith.constant 0 : i32
    return %c0_i32, %arg0 : i32, i32
  }
}

module attributes {stable_mosaic.version = 11 : i64} {
  func.func @cap_recurrent_kernel(%arg0: i32, %arg1: memref<6x8x128xf32, #tpu.memory_space<vmem>>, %arg2: memref<8x8x128xf32, #tpu.memory_space<vmem>>, %arg3: memref<8x8x128xf32, #tpu.memory_space<vmem>>, %arg4: memref<8x128xf32, #tpu.memory_space<vmem>>, %arg5: memref<8x128xf32, #tpu.memory_space<vmem>>, %arg6: memref<256x512xbf16, #tpu.memory_space<vmem>>, %arg7: memref<1x512xf32, #tpu.memory_space<vmem>>, %arg8: memref<256x128xbf16, #tpu.memory_space<vmem>>, %arg9: memref<1x128xf32, #tpu.memory_space<vmem>>, %arg10: memref<1x128xf32, #tpu.memory_space<vmem>>, %arg11: memref<1x1xf32, #tpu.memory_space<vmem>>, %arg12: memref<384x512xbf16, #tpu.memory_space<vmem>>, %arg13: memref<1x512xf32, #tpu.memory_space<vmem>>, %arg14: memref<6x8x128xf32, #tpu.memory_space<vmem>>) attributes {dimension_semantics = [#tpu.dimension_semantics<parallel>], iteration_bounds = array<i64: 1>, scalar_prefetch = 0 : i64, scratch_operands = 0 : i64, tpu.core_type = #tpu.core_type<tc>, window_params = [{transform_indices = @transform_0, window_bounds = array<i64: 6, 8, 128>}, {transform_indices = @transform_1, window_bounds = array<i64: 8, 8, 128>}, {transform_indices = @transform_2, window_bounds = array<i64: 8, 8, 128>}, {transform_indices = @transform_3, window_bounds = array<i64: 8, 128>}, {transform_indices = @transform_4, window_bounds = array<i64: 8, 128>}, {pipeline_mode = #tpu.pipeline_mode<synchronous>, transform_indices = @transform_5, window_bounds = array<i64: 256, 512>}, {pipeline_mode = #tpu.pipeline_mode<synchronous>, transform_indices = @transform_6, window_bounds = array<i64: 1, 512>}, {pipeline_mode = #tpu.pipeline_mode<synchronous>, transform_indices = @transform_7, window_bounds = array<i64: 256, 128>}, {pipeline_mode = #tpu.pipeline_mode<synchronous>, transform_indices = @transform_8, window_bounds = array<i64: 1, 128>}, {pipeline_mode = #tpu.pipeline_mode<synchronous>, transform_indices = @transform_9, window_bounds = array<i64: 1, 128>}, {pipeline_mode = #tpu.pipeline_mode<synchronous>, transform_indices = @transform_10, window_bounds = array<i64: 1, 1>}, {pipeline_mode = #tpu.pipeline_mode<synchronous>, transform_indices = @transform_11, window_bounds = array<i64: 384, 512>}, {pipeline_mode = #tpu.pipeline_mode<synchronous>, transform_indices = @transform_12, window_bounds = array<i64: 1, 512>}, {transform_indices = @transform_13, window_bounds = array<i64: 6, 8, 128>}]} {
    %c0 = arith.constant 0 : index
    %c0_0 = arith.constant 0 : index
    %c0_1 = arith.constant 0 : index
    %0 = vector.load %arg2[%c0, %c0_0, %c0_1] : memref<8x8x128xf32, #tpu.memory_space<vmem>>, vector<8x8x128xf32>
    %c0_2 = arith.constant 0 : index
    %c0_3 = arith.constant 0 : index
    %c0_4 = arith.constant 0 : index
    %1 = vector.load %arg3[%c0_2, %c0_3, %c0_4] : memref<8x8x128xf32, #tpu.memory_space<vmem>>, vector<8x8x128xf32>
    %2 = arith.truncf %1 : vector<8x8x128xf32> to vector<8x8x128xbf16>
    %c0_5 = arith.constant 0 : index
    %c0_6 = arith.constant 0 : index
    %3 = vector.load %arg6[%c0_5, %c0_6] : memref<256x512xbf16, #tpu.memory_space<vmem>>, vector<256x512xbf16>
    %c0_7 = arith.constant 0 : index
    %c0_8 = arith.constant 0 : index
    %4 = vector.load %arg8[%c0_7, %c0_8] : memref<256x128xbf16, #tpu.memory_space<vmem>>, vector<256x128xbf16>
    %c0_9 = arith.constant 0 : index
    %c0_10 = arith.constant 0 : index
    %5 = vector.load %arg12[%c0_9, %c0_10] : memref<384x512xbf16, #tpu.memory_space<vmem>>, vector<384x512xbf16>
    %c0_11 = arith.constant 0 : index
    %c0_12 = arith.constant 0 : index
    %6 = vector.load %arg7[%c0_11, %c0_12] : memref<1x512xf32, #tpu.memory_space<vmem>>, vector<1x512xf32>
    %7 = vector.shape_cast %6 : vector<1x512xf32> to vector<1x512xf32>
    %8 = vector.broadcast %7 : vector<1x512xf32> to vector<8x512xf32>
    %c0_13 = arith.constant 0 : index
    %c0_14 = arith.constant 0 : index
    %9 = vector.load %arg9[%c0_13, %c0_14] : memref<1x128xf32, #tpu.memory_space<vmem>>, vector<1x128xf32>
    %10 = vector.shape_cast %9 : vector<1x128xf32> to vector<1x128xf32>
    %11 = vector.broadcast %10 : vector<1x128xf32> to vector<8x128xf32>
    %c0_15 = arith.constant 0 : index
    %c0_16 = arith.constant 0 : index
    %12 = vector.load %arg13[%c0_15, %c0_16] : memref<1x512xf32, #tpu.memory_space<vmem>>, vector<1x512xf32>
    %13 = vector.shape_cast %12 : vector<1x512xf32> to vector<1x512xf32>
    %14 = vector.broadcast %13 : vector<1x512xf32> to vector<8x512xf32>
    %c0_17 = arith.constant 0 : index
    %c0_18 = arith.constant 0 : index
    %15 = vector.load %arg10[%c0_17, %c0_18] : memref<1x128xf32, #tpu.memory_space<vmem>>, vector<1x128xf32>
    %16 = vector.shape_cast %15 : vector<1x128xf32> to vector<1x1x128xf32>
    %17 = vector.shape_cast %16 : vector<1x1x128xf32> to vector<1x1x128xf32>
    %18 = vector.broadcast %17 : vector<1x1x128xf32> to vector<8x8x128xf32>
    %c0_19 = arith.constant 0 : index
    %c0_20 = arith.constant 0 : index
    %19 = vector.load %arg11[%c0_19, %c0_20] : memref<1x1xf32, #tpu.memory_space<vmem>>, vector<1x1xf32>
    %20 = vector.shape_cast %19 : vector<1x1xf32> to vector<1x1xf32>
    %21 = vector.broadcast %20 : vector<1x1xf32> to vector<8x8xf32>
    %cst = arith.constant 0.000000e+00 : f32
    %22 = vector.broadcast %cst : f32 to vector<8x128xf32>
    %c0_21 = arith.constant 0 : index
    %c0_22 = arith.constant 0 : index
    %23 = vector.load %arg4[%c0_21, %c0_22] : memref<8x128xf32, #tpu.memory_space<vmem>>, vector<8x128xf32>
    %c0_23 = arith.constant 0 : index
    %c0_24 = arith.constant 0 : index
    %24 = vector.load %arg5[%c0_23, %c0_24] : memref<8x128xf32, #tpu.memory_space<vmem>>, vector<8x128xf32>
    %c0_i32 = arith.constant 0 : i32
    %25 = arith.index_cast %c0_i32 : i32 to index
    %c0_25 = arith.constant 0 : index
    %c0_26 = arith.constant 0 : index
    %26 = vector.load %arg1[%25, %c0_25, %c0_26] : memref<6x8x128xf32, #tpu.memory_space<vmem>>, vector<1x8x128xf32>
    %27 = vector.shape_cast %26 : vector<1x8x128xf32> to vector<8x128xf32>
    %28 = tpu.concatenate %27, %22 in 1 : vector<8x128xf32>, vector<8x128xf32> -> vector<8x256xf32>
    %29 = arith.truncf %28 : vector<8x256xf32> to vector<8x256xbf16>
    %cst_27 = arith.constant dense<0.000000e+00> : vector<8x512xf32>
    %30 = tpu.matmul %29, %3, %cst_27 {dimension_numbers = #tpu.dot_dimension_numbers<[1], [0], [0], [1], [0, 0, 1, 1], [], []>} : vector<8x256xbf16>, vector<256x512xbf16>, vector<8x512xf32> -> vector<8x512xf32>
    %31 = arith.addf %30, %8 : vector<8x512xf32>
    %32 = vector.extract_strided_slice %31 {offsets = [0, 0], sizes = [8, 128], strides = [1, 1]} : vector<8x512xf32> to vector<8x128xf32>
    %33 = arith.negf %32 : vector<8x128xf32>
    %34 = math.exp %33 : vector<8x128xf32>
    %cst_28 = arith.constant 1.000000e+00 : f32
    %35 = vector.broadcast %cst_28 : f32 to vector<8x128xf32>
    %36 = arith.addf %35, %34 : vector<8x128xf32>
    %37 = arith.divf %35, %36 : vector<8x128xf32>
    %38 = vector.extract_strided_slice %31 {offsets = [0, 128], sizes = [8, 128], strides = [1, 1]} : vector<8x512xf32> to vector<8x128xf32>
    %39 = arith.negf %38 : vector<8x128xf32>
    %40 = math.exp %39 : vector<8x128xf32>
    %cst_29 = arith.constant 1.000000e+00 : f32
    %41 = vector.broadcast %cst_29 : f32 to vector<8x128xf32>
    %42 = arith.addf %41, %40 : vector<8x128xf32>
    %43 = arith.divf %41, %42 : vector<8x128xf32>
    %44 = vector.extract_strided_slice %31 {offsets = [0, 256], sizes = [8, 128], strides = [1, 1]} : vector<8x512xf32> to vector<8x128xf32>
    %45 = math.tanh %44 : vector<8x128xf32>
    %46 = vector.extract_strided_slice %31 {offsets = [0, 384], sizes = [8, 128], strides = [1, 1]} : vector<8x512xf32> to vector<8x128xf32>
    %47 = arith.negf %46 : vector<8x128xf32>
    %48 = math.exp %47 : vector<8x128xf32>
    %cst_30 = arith.constant 1.000000e+00 : f32
    %49 = vector.broadcast %cst_30 : f32 to vector<8x128xf32>
    %50 = arith.addf %49, %48 : vector<8x128xf32>
    %51 = arith.divf %49, %50 : vector<8x128xf32>
    %52 = arith.mulf %43, %22 : vector<8x128xf32>
    %53 = arith.mulf %37, %45 : vector<8x128xf32>
    %54 = arith.addf %52, %53 : vector<8x128xf32>
    %55 = math.tanh %54 : vector<8x128xf32>
    %56 = arith.mulf %51, %55 : vector<8x128xf32>
    %57 = tpu.concatenate %56, %24 in 1 : vector<8x128xf32>, vector<8x128xf32> -> vector<8x256xf32>
    %58 = arith.truncf %57 : vector<8x256xf32> to vector<8x256xbf16>
    %cst_31 = arith.constant dense<0.000000e+00> : vector<8x128xf32>
    %59 = tpu.matmul %58, %4, %cst_31 {dimension_numbers = #tpu.dot_dimension_numbers<[1], [0], [0], [1], [0, 0, 1, 1], [], []>} : vector<8x256xbf16>, vector<256x128xbf16>, vector<8x128xf32> -> vector<8x128xf32>
    %60 = arith.addf %59, %11 : vector<8x128xf32>
    %61 = vector.shape_cast %60 : vector<8x128xf32> to vector<8x1x128xf32>
    %62 = vector.broadcast %61 : vector<8x1x128xf32> to vector<8x8x128xf32>
    %63 = arith.addf %0, %62 : vector<8x8x128xf32>
    %64 = math.tanh %63 : vector<8x8x128xf32>
    %65 = arith.mulf %64, %18 : vector<8x8x128xf32>
    %cst_32 = arith.constant dense<0.000000e+00> : vector<8x8xf32>
    %66 = vector.multi_reduction <add>, %65, %cst_32 [2] : vector<8x8x128xf32> to vector<8x8xf32>
    %67 = arith.addf %66, %21 : vector<8x8xf32>
    %cst_33 = arith.constant dense<0xFF800000> : vector<8xf32>
    %68 = vector.multi_reduction <maximumf>, %67, %cst_33 [1] : vector<8x8xf32> to vector<8xf32>
    %69 = vector.shape_cast %68 : vector<8xf32> to vector<8x1xf32>
    %70 = vector.broadcast %69 : vector<8x1xf32> to vector<8x8xf32>
    %71 = arith.subf %67, %70 : vector<8x8xf32>
    %72 = math.exp %71 : vector<8x8xf32>
    %cst_34 = arith.constant dense<0.000000e+00> : vector<8xf32>
    %73 = vector.multi_reduction <add>, %72, %cst_34 [1] : vector<8x8xf32> to vector<8xf32>
    %74 = vector.shape_cast %73 : vector<8xf32> to vector<8x1xf32>
    %75 = vector.broadcast %74 : vector<8x1xf32> to vector<8x8xf32>
    %76 = arith.divf %72, %75 : vector<8x8xf32>
    %77 = vector.shape_cast %76 : vector<8x8xf32> to vector<8x1x8xf32>
    %78 = arith.truncf %77 : vector<8x1x8xf32> to vector<8x1x8xbf16>
    "tpu.trace_start"() <{level = 10 : i32, message = "bqk,bkd->bqd"}> : () -> ()
    %cst_35 = arith.constant dense<0.000000e+00> : vector<8x1x128xf32>
    %79 = tpu.matmul %78, %2, %cst_35 {dimension_numbers = #tpu.dot_dimension_numbers<[2], [1], [1], [2], [0, 0, 0, 1, 1, 2], [0], [0]>} : vector<8x1x8xbf16>, vector<8x8x128xbf16>, vector<8x1x128xf32> -> vector<8x1x128xf32>
    "tpu.trace_stop"() : () -> ()
    %80 = vector.shape_cast %79 : vector<8x1x128xf32> to vector<8x128xf32>
    %81 = tpu.concatenate %80, %23, %56 in 1 : vector<8x128xf32>, vector<8x128xf32>, vector<8x128xf32> -> vector<8x384xf32>
    %82 = arith.truncf %81 : vector<8x384xf32> to vector<8x384xbf16>
    %cst_36 = arith.constant dense<0.000000e+00> : vector<8x512xf32>
    %83 = tpu.matmul %82, %5, %cst_36 {dimension_numbers = #tpu.dot_dimension_numbers<[1], [0], [0], [1], [0, 0, 1, 1], [], []>} : vector<8x384xbf16>, vector<384x512xbf16>, vector<8x512xf32> -> vector<8x512xf32>
    %84 = arith.addf %83, %14 : vector<8x512xf32>
    %85 = vector.extract_strided_slice %84 {offsets = [0, 0], sizes = [8, 128], strides = [1, 1]} : vector<8x512xf32> to vector<8x128xf32>
    %86 = arith.negf %85 : vector<8x128xf32>
    %87 = math.exp %86 : vector<8x128xf32>
    %cst_37 = arith.constant 1.000000e+00 : f32
    %88 = vector.broadcast %cst_37 : f32 to vector<8x128xf32>
    %89 = arith.addf %88, %87 : vector<8x128xf32>
    %90 = arith.divf %88, %89 : vector<8x128xf32>
    %91 = vector.extract_strided_slice %84 {offsets = [0, 128], sizes = [8, 128], strides = [1, 1]} : vector<8x512xf32> to vector<8x128xf32>
    %92 = math.tanh %91 : vector<8x128xf32>
    %93 = vector.extract_strided_slice %84 {offsets = [0, 256], sizes = [8, 128], strides = [1, 1]} : vector<8x512xf32> to vector<8x128xf32>
    %94 = arith.negf %93 : vector<8x128xf32>
    %95 = math.exp %94 : vector<8x128xf32>
    %cst_38 = arith.constant 1.000000e+00 : f32
    %96 = vector.broadcast %cst_38 : f32 to vector<8x128xf32>
    %97 = arith.addf %96, %95 : vector<8x128xf32>
    %98 = arith.divf %96, %97 : vector<8x128xf32>
    %99 = vector.extract_strided_slice %84 {offsets = [0, 384], sizes = [8, 128], strides = [1, 1]} : vector<8x512xf32> to vector<8x128xf32>
    %100 = arith.negf %99 : vector<8x128xf32>
    %101 = math.exp %100 : vector<8x128xf32>
    %cst_39 = arith.constant 1.000000e+00 : f32
    %102 = vector.broadcast %cst_39 : f32 to vector<8x128xf32>
    %103 = arith.addf %102, %101 : vector<8x128xf32>
    %104 = arith.divf %102, %103 : vector<8x128xf32>
    %105 = arith.mulf %92, %90 : vector<8x128xf32>
    %106 = arith.mulf %24, %104 : vector<8x128xf32>
    %107 = arith.addf %105, %106 : vector<8x128xf32>
    %108 = math.tanh %107 : vector<8x128xf32>
    %109 = arith.mulf %108, %98 : vector<8x128xf32>
    %110 = arith.index_cast %c0_i32 : i32 to index
    %c0_40 = arith.constant 0 : index
    %c0_41 = arith.constant 0 : index
    %111 = vector.load %arg14[%110, %c0_40, %c0_41] : memref<6x8x128xf32, #tpu.memory_space<vmem>>, vector<1x8x128xf32>
    %112 = vector.shape_cast %111 : vector<1x8x128xf32> to vector<8x128xf32>
    %113 = vector.shape_cast %109 : vector<8x128xf32> to vector<1x8x128xf32>
    tpu.vector_store %arg14[%110, %c0_40, %c0_41], %113 {strides = array<i32>} : memref<6x8x128xf32, #tpu.memory_space<vmem>>, vector<1x8x128xf32>,
    %c1_i32 = arith.constant 1 : i32
    %114 = arith.index_cast %c1_i32 : i32 to index
    %c0_42 = arith.constant 0 : index
    %c0_43 = arith.constant 0 : index
    %115 = vector.load %arg1[%114, %c0_42, %c0_43] : memref<6x8x128xf32, #tpu.memory_space<vmem>>, vector<1x8x128xf32>
    %116 = vector.shape_cast %115 : vector<1x8x128xf32> to vector<8x128xf32>
    %117 = tpu.concatenate %116, %56 in 1 : vector<8x128xf32>, vector<8x128xf32> -> vector<8x256xf32>
    %118 = arith.truncf %117 : vector<8x256xf32> to vector<8x256xbf16>
    %cst_44 = arith.constant dense<0.000000e+00> : vector<8x512xf32>
    %119 = tpu.matmul %118, %3, %cst_44 {dimension_numbers = #tpu.dot_dimension_numbers<[1], [0], [0], [1], [0, 0, 1, 1], [], []>} : vector<8x256xbf16>, vector<256x512xbf16>, vector<8x512xf32> -> vector<8x512xf32>
    %120 = arith.addf %119, %8 : vector<8x512xf32>
    %121 = vector.extract_strided_slice %120 {offsets = [0, 0], sizes = [8, 128], strides = [1, 1]} : vector<8x512xf32> to vector<8x128xf32>
    %122 = arith.negf %121 : vector<8x128xf32>
    %123 = math.exp %122 : vector<8x128xf32>
    %cst_45 = arith.constant 1.000000e+00 : f32
    %124 = vector.broadcast %cst_45 : f32 to vector<8x128xf32>
    %125 = arith.addf %124, %123 : vector<8x128xf32>
    %126 = arith.divf %124, %125 : vector<8x128xf32>
    %127 = vector.extract_strided_slice %120 {offsets = [0, 128], sizes = [8, 128], strides = [1, 1]} : vector<8x512xf32> to vector<8x128xf32>
    %128 = arith.negf %127 : vector<8x128xf32>
    %129 = math.exp %128 : vector<8x128xf32>
    %cst_46 = arith.constant 1.000000e+00 : f32
    %130 = vector.broadcast %cst_46 : f32 to vector<8x128xf32>
    %131 = arith.addf %130, %129 : vector<8x128xf32>
    %132 = arith.divf %130, %131 : vector<8x128xf32>
    %133 = vector.extract_strided_slice %120 {offsets = [0, 256], sizes = [8, 128], strides = [1, 1]} : vector<8x512xf32> to vector<8x128xf32>
    %134 = math.tanh %133 : vector<8x128xf32>
    %135 = vector.extract_strided_slice %120 {offsets = [0, 384], sizes = [8, 128], strides = [1, 1]} : vector<8x512xf32> to vector<8x128xf32>
    %136 = arith.negf %135 : vector<8x128xf32>
    %137 = math.exp %136 : vector<8x128xf32>
    %cst_47 = arith.constant 1.000000e+00 : f32
    %138 = vector.broadcast %cst_47 : f32 to vector<8x128xf32>
    %139 = arith.addf %138, %137 : vector<8x128xf32>
    %140 = arith.divf %138, %139 : vector<8x128xf32>
    %141 = arith.mulf %132, %54 : vector<8x128xf32>
    %142 = arith.mulf %126, %134 : vector<8x128xf32>
    %143 = arith.addf %141, %142 : vector<8x128xf32>
    %144 = math.tanh %143 : vector<8x128xf32>
    %145 = arith.mulf %140, %144 : vector<8x128xf32>
    %146 = tpu.concatenate %145, %107 in 1 : vector<8x128xf32>, vector<8x128xf32> -> vector<8x256xf32>
    %147 = arith.truncf %146 : vector<8x256xf32> to vector<8x256xbf16>
    %cst_48 = arith.constant dense<0.000000e+00> : vector<8x128xf32>
    %148 = tpu.matmul %147, %4, %cst_48 {dimension_numbers = #tpu.dot_dimension_numbers<[1], [0], [0], [1], [0, 0, 1, 1], [], []>} : vector<8x256xbf16>, vector<256x128xbf16>, vector<8x128xf32> -> vector<8x128xf32>
    %149 = arith.addf %148, %11 : vector<8x128xf32>
    %150 = vector.shape_cast %149 : vector<8x128xf32> to vector<8x1x128xf32>
    %151 = vector.broadcast %150 : vector<8x1x128xf32> to vector<8x8x128xf32>
    %152 = arith.addf %0, %151 : vector<8x8x128xf32>
    %153 = math.tanh %152 : vector<8x8x128xf32>
    %154 = arith.mulf %153, %18 : vector<8x8x128xf32>
    %cst_49 = arith.constant dense<0.000000e+00> : vector<8x8xf32>
    %155 = vector.multi_reduction <add>, %154, %cst_49 [2] : vector<8x8x128xf32> to vector<8x8xf32>
    %156 = arith.addf %155, %21 : vector<8x8xf32>
    %cst_50 = arith.constant dense<0xFF800000> : vector<8xf32>
    %157 = vector.multi_reduction <maximumf>, %156, %cst_50 [1] : vector<8x8xf32> to vector<8xf32>
    %158 = vector.shape_cast %157 : vector<8xf32> to vector<8x1xf32>
    %159 = vector.broadcast %158 : vector<8x1xf32> to vector<8x8xf32>
    %160 = arith.subf %156, %159 : vector<8x8xf32>
    %161 = math.exp %160 : vector<8x8xf32>
    %cst_51 = arith.constant dense<0.000000e+00> : vector<8xf32>
    %162 = vector.multi_reduction <add>, %161, %cst_51 [1] : vector<8x8xf32> to vector<8xf32>
    %163 = vector.shape_cast %162 : vector<8xf32> to vector<8x1xf32>
    %164 = vector.broadcast %163 : vector<8x1xf32> to vector<8x8xf32>
    %165 = arith.divf %161, %164 : vector<8x8xf32>
    %166 = vector.shape_cast %165 : vector<8x8xf32> to vector<8x1x8xf32>
    %167 = arith.truncf %166 : vector<8x1x8xf32> to vector<8x1x8xbf16>
    "tpu.trace_start"() <{level = 10 : i32, message = "bqk,bkd->bqd"}> : () -> ()
    %cst_52 = arith.constant dense<0.000000e+00> : vector<8x1x128xf32>
    %168 = tpu.matmul %167, %2, %cst_52 {dimension_numbers = #tpu.dot_dimension_numbers<[2], [1], [1], [2], [0, 0, 0, 1, 1, 2], [0], [0]>} : vector<8x1x8xbf16>, vector<8x8x128xbf16>, vector<8x1x128xf32> -> vector<8x1x128xf32>
    "tpu.trace_stop"() : () -> ()
    %169 = vector.shape_cast %168 : vector<8x1x128xf32> to vector<8x128xf32>
    %170 = tpu.concatenate %169, %109, %145 in 1 : vector<8x128xf32>, vector<8x128xf32>, vector<8x128xf32> -> vector<8x384xf32>
    %171 = arith.truncf %170 : vector<8x384xf32> to vector<8x384xbf16>
    %cst_53 = arith.constant dense<0.000000e+00> : vector<8x512xf32>
    %172 = tpu.matmul %171, %5, %cst_53 {dimension_numbers = #tpu.dot_dimension_numbers<[1], [0], [0], [1], [0, 0, 1, 1], [], []>} : vector<8x384xbf16>, vector<384x512xbf16>, vector<8x512xf32> -> vector<8x512xf32>
    %173 = arith.addf %172, %14 : vector<8x512xf32>
    %174 = vector.extract_strided_slice %173 {offsets = [0, 0], sizes = [8, 128], strides = [1, 1]} : vector<8x512xf32> to vector<8x128xf32>
    %175 = arith.negf %174 : vector<8x128xf32>
    %176 = math.exp %175 : vector<8x128xf32>
    %cst_54 = arith.constant 1.000000e+00 : f32
    %177 = vector.broadcast %cst_54 : f32 to vector<8x128xf32>
    %178 = arith.addf %177, %176 : vector<8x128xf32>
    %179 = arith.divf %177, %178 : vector<8x128xf32>
    %180 = vector.extract_strided_slice %173 {offsets = [0, 128], sizes = [8, 128], strides = [1, 1]} : vector<8x512xf32> to vector<8x128xf32>
    %181 = math.tanh %180 : vector<8x128xf32>
    %182 = vector.extract_strided_slice %173 {offsets = [0, 256], sizes = [8, 128], strides = [1, 1]} : vector<8x512xf32> to vector<8x128xf32>
    %183 = arith.negf %182 : vector<8x128xf32>
    %184 = math.exp %183 : vector<8x128xf32>
    %cst_55 = arith.constant 1.000000e+00 : f32
    %185 = vector.broadcast %cst_55 : f32 to vector<8x128xf32>
    %186 = arith.addf %185, %184 : vector<8x128xf32>
    %187 = arith.divf %185, %186 : vector<8x128xf32>
    %188 = vector.extract_strided_slice %173 {offsets = [0, 384], sizes = [8, 128], strides = [1, 1]} : vector<8x512xf32> to vector<8x128xf32>
    %189 = arith.negf %188 : vector<8x128xf32>
    %190 = math.exp %189 : vector<8x128xf32>
    %cst_56 = arith.constant 1.000000e+00 : f32
    %191 = vector.broadcast %cst_56 : f32 to vector<8x128xf32>
    %192 = arith.addf %191, %190 : vector<8x128xf32>
    %193 = arith.divf %191, %192 : vector<8x128xf32>
    %194 = arith.mulf %181, %179 : vector<8x128xf32>
    %195 = arith.mulf %107, %193 : vector<8x128xf32>
    %196 = arith.addf %194, %195 : vector<8x128xf32>
    %197 = math.tanh %196 : vector<8x128xf32>
    %198 = arith.mulf %197, %187 : vector<8x128xf32>
    %199 = arith.index_cast %c1_i32 : i32 to index
    %c0_57 = arith.constant 0 : index
    %c0_58 = arith.constant 0 : index
    %200 = vector.load %arg14[%199, %c0_57, %c0_58] : memref<6x8x128xf32, #tpu.memory_space<vmem>>, vector<1x8x128xf32>
    %201 = vector.shape_cast %200 : vector<1x8x128xf32> to vector<8x128xf32>
    %202 = vector.shape_cast %198 : vector<8x128xf32> to vector<1x8x128xf32>
    tpu.vector_store %arg14[%199, %c0_57, %c0_58], %202 {strides = array<i32>} : memref<6x8x128xf32, #tpu.memory_space<vmem>>, vector<1x8x128xf32>,
    %c2_i32 = arith.constant 2 : i32
    %203 = arith.index_cast %c2_i32 : i32 to index
    %c0_59 = arith.constant 0 : index
    %c0_60 = arith.constant 0 : index
    %204 = vector.load %arg1[%203, %c0_59, %c0_60] : memref<6x8x128xf32, #tpu.memory_space<vmem>>, vector<1x8x128xf32>
    %205 = vector.shape_cast %204 : vector<1x8x128xf32> to vector<8x128xf32>
    %206 = tpu.concatenate %205, %145 in 1 : vector<8x128xf32>, vector<8x128xf32> -> vector<8x256xf32>
    %207 = arith.truncf %206 : vector<8x256xf32> to vector<8x256xbf16>
    %cst_61 = arith.constant dense<0.000000e+00> : vector<8x512xf32>
    %208 = tpu.matmul %207, %3, %cst_61 {dimension_numbers = #tpu.dot_dimension_numbers<[1], [0], [0], [1], [0, 0, 1, 1], [], []>} : vector<8x256xbf16>, vector<256x512xbf16>, vector<8x512xf32> -> vector<8x512xf32>
    %209 = arith.addf %208, %8 : vector<8x512xf32>
    %210 = vector.extract_strided_slice %209 {offsets = [0, 0], sizes = [8, 128], strides = [1, 1]} : vector<8x512xf32> to vector<8x128xf32>
    %211 = arith.negf %210 : vector<8x128xf32>
    %212 = math.exp %211 : vector<8x128xf32>
    %cst_62 = arith.constant 1.000000e+00 : f32
    %213 = vector.broadcast %cst_62 : f32 to vector<8x128xf32>
    %214 = arith.addf %213, %212 : vector<8x128xf32>
    %215 = arith.divf %213, %214 : vector<8x128xf32>
    %216 = vector.extract_strided_slice %209 {offsets = [0, 128], sizes = [8, 128], strides = [1, 1]} : vector<8x512xf32> to vector<8x128xf32>
    %217 = arith.negf %216 : vector<8x128xf32>
    %218 = math.exp %217 : vector<8x128xf32>
    %cst_63 = arith.constant 1.000000e+00 : f32
    %219 = vector.broadcast %cst_63 : f32 to vector<8x128xf32>
    %220 = arith.addf %219, %218 : vector<8x128xf32>
    %221 = arith.divf %219, %220 : vector<8x128xf32>
    %222 = vector.extract_strided_slice %209 {offsets = [0, 256], sizes = [8, 128], strides = [1, 1]} : vector<8x512xf32> to vector<8x128xf32>
    %223 = math.tanh %222 : vector<8x128xf32>
    %224 = vector.extract_strided_slice %209 {offsets = [0, 384], sizes = [8, 128], strides = [1, 1]} : vector<8x512xf32> to vector<8x128xf32>
    %225 = arith.negf %224 : vector<8x128xf32>
    %226 = math.exp %225 : vector<8x128xf32>
    %cst_64 = arith.constant 1.000000e+00 : f32
    %227 = vector.broadcast %cst_64 : f32 to vector<8x128xf32>
    %228 = arith.addf %227, %226 : vector<8x128xf32>
    %229 = arith.divf %227, %228 : vector<8x128xf32>
    %230 = arith.mulf %221, %143 : vector<8x128xf32>
    %231 = arith.mulf %215, %223 : vector<8x128xf32>
    %232 = arith.addf %230, %231 : vector<8x128xf32>
    %233 = math.tanh %232 : vector<8x128xf32>
    %234 = arith.mulf %229, %233 : vector<8x128xf32>
    %235 = tpu.concatenate %234, %196 in 1 : vector<8x128xf32>, vector<8x128xf32> -> vector<8x256xf32>
    %236 = arith.truncf %235 : vector<8x256xf32> to vector<8x256xbf16>
    %cst_65 = arith.constant dense<0.000000e+00> : vector<8x128xf32>
    %237 = tpu.matmul %236, %4, %cst_65 {dimension_numbers = #tpu.dot_dimension_numbers<[1], [0], [0], [1], [0, 0, 1, 1], [], []>} : vector<8x256xbf16>, vector<256x128xbf16>, vector<8x128xf32> -> vector<8x128xf32>
    %238 = arith.addf %237, %11 : vector<8x128xf32>
    %239 = vector.shape_cast %238 : vector<8x128xf32> to vector<8x1x128xf32>
    %240 = vector.broadcast %239 : vector<8x1x128xf32> to vector<8x8x128xf32>
    %241 = arith.addf %0, %240 : vector<8x8x128xf32>
    %242 = math.tanh %241 : vector<8x8x128xf32>
    %243 = arith.mulf %242, %18 : vector<8x8x128xf32>
    %cst_66 = arith.constant dense<0.000000e+00> : vector<8x8xf32>
    %244 = vector.multi_reduction <add>, %243, %cst_66 [2] : vector<8x8x128xf32> to vector<8x8xf32>
    %245 = arith.addf %244, %21 : vector<8x8xf32>
    %cst_67 = arith.constant dense<0xFF800000> : vector<8xf32>
    %246 = vector.multi_reduction <maximumf>, %245, %cst_67 [1] : vector<8x8xf32> to vector<8xf32>
    %247 = vector.shape_cast %246 : vector<8xf32> to vector<8x1xf32>
    %248 = vector.broadcast %247 : vector<8x1xf32> to vector<8x8xf32>
    %249 = arith.subf %245, %248 : vector<8x8xf32>
    %250 = math.exp %249 : vector<8x8xf32>
    %cst_68 = arith.constant dense<0.000000e+00> : vector<8xf32>
    %251 = vector.multi_reduction <add>, %250, %cst_68 [1] : vector<8x8xf32> to vector<8xf32>
    %252 = vector.shape_cast %251 : vector<8xf32> to vector<8x1xf32>
    %253 = vector.broadcast %252 : vector<8x1xf32> to vector<8x8xf32>
    %254 = arith.divf %250, %253 : vector<8x8xf32>
    %255 = vector.shape_cast %254 : vector<8x8xf32> to vector<8x1x8xf32>
    %256 = arith.truncf %255 : vector<8x1x8xf32> to vector<8x1x8xbf16>
    "tpu.trace_start"() <{level = 10 : i32, message = "bqk,bkd->bqd"}> : () -> ()
    %cst_69 = arith.constant dense<0.000000e+00> : vector<8x1x128xf32>
    %257 = tpu.matmul %256, %2, %cst_69 {dimension_numbers = #tpu.dot_dimension_numbers<[2], [1], [1], [2], [0, 0, 0, 1, 1, 2], [0], [0]>} : vector<8x1x8xbf16>, vector<8x8x128xbf16>, vector<8x1x128xf32> -> vector<8x1x128xf32>
    "tpu.trace_stop"() : () -> ()
    %258 = vector.shape_cast %257 : vector<8x1x128xf32> to vector<8x128xf32>
    %259 = tpu.concatenate %258, %198, %234 in 1 : vector<8x128xf32>, vector<8x128xf32>, vector<8x128xf32> -> vector<8x384xf32>
    %260 = arith.truncf %259 : vector<8x384xf32> to vector<8x384xbf16>
    %cst_70 = arith.constant dense<0.000000e+00> : vector<8x512xf32>
    %261 = tpu.matmul %260, %5, %cst_70 {dimension_numbers = #tpu.dot_dimension_numbers<[1], [0], [0], [1], [0, 0, 1, 1], [], []>} : vector<8x384xbf16>, vector<384x512xbf16>, vector<8x512xf32> -> vector<8x512xf32>
    %262 = arith.addf %261, %14 : vector<8x512xf32>
    %263 = vector.extract_strided_slice %262 {offsets = [0, 0], sizes = [8, 128], strides = [1, 1]} : vector<8x512xf32> to vector<8x128xf32>
    %264 = arith.negf %263 : vector<8x128xf32>
    %265 = math.exp %264 : vector<8x128xf32>
    %cst_71 = arith.constant 1.000000e+00 : f32
    %266 = vector.broadcast %cst_71 : f32 to vector<8x128xf32>
    %267 = arith.addf %266, %265 : vector<8x128xf32>
    %268 = arith.divf %266, %267 : vector<8x128xf32>
    %269 = vector.extract_strided_slice %262 {offsets = [0, 128], sizes = [8, 128], strides = [1, 1]} : vector<8x512xf32> to vector<8x128xf32>
    %270 = math.tanh %269 : vector<8x128xf32>
    %271 = vector.extract_strided_slice %262 {offsets = [0, 256], sizes = [8, 128], strides = [1, 1]} : vector<8x512xf32> to vector<8x128xf32>
    %272 = arith.negf %271 : vector<8x128xf32>
    %273 = math.exp %272 : vector<8x128xf32>
    %cst_72 = arith.constant 1.000000e+00 : f32
    %274 = vector.broadcast %cst_72 : f32 to vector<8x128xf32>
    %275 = arith.addf %274, %273 : vector<8x128xf32>
    %276 = arith.divf %274, %275 : vector<8x128xf32>
    %277 = vector.extract_strided_slice %262 {offsets = [0, 384], sizes = [8, 128], strides = [1, 1]} : vector<8x512xf32> to vector<8x128xf32>
    %278 = arith.negf %277 : vector<8x128xf32>
    %279 = math.exp %278 : vector<8x128xf32>
    %cst_73 = arith.constant 1.000000e+00 : f32
    %280 = vector.broadcast %cst_73 : f32 to vector<8x128xf32>
    %281 = arith.addf %280, %279 : vector<8x128xf32>
    %282 = arith.divf %280, %281 : vector<8x128xf32>
    %283 = arith.mulf %270, %268 : vector<8x128xf32>
    %284 = arith.mulf %196, %282 : vector<8x128xf32>
    %285 = arith.addf %283, %284 : vector<8x128xf32>
    %286 = math.tanh %285 : vector<8x128xf32>
    %287 = arith.mulf %286, %276 : vector<8x128xf32>
    %288 = arith.index_cast %c2_i32 : i32 to index
    %c0_74 = arith.constant 0 : index
    %c0_75 = arith.constant 0 : index
    %289 = vector.load %arg14[%288, %c0_74, %c0_75] : memref<6x8x128xf32, #tpu.memory_space<vmem>>, vector<1x8x128xf32>
    %290 = vector.shape_cast %289 : vector<1x8x128xf32> to vector<8x128xf32>
    %291 = vector.shape_cast %287 : vector<8x128xf32> to vector<1x8x128xf32>
    tpu.vector_store %arg14[%288, %c0_74, %c0_75], %291 {strides = array<i32>} : memref<6x8x128xf32, #tpu.memory_space<vmem>>, vector<1x8x128xf32>,
    %c3_i32 = arith.constant 3 : i32
    %292 = arith.index_cast %c3_i32 : i32 to index
    %c0_76 = arith.constant 0 : index
    %c0_77 = arith.constant 0 : index
    %293 = vector.load %arg1[%292, %c0_76, %c0_77] : memref<6x8x128xf32, #tpu.memory_space<vmem>>, vector<1x8x128xf32>
    %294 = vector.shape_cast %293 : vector<1x8x128xf32> to vector<8x128xf32>
    %295 = tpu.concatenate %294, %234 in 1 : vector<8x128xf32>, vector<8x128xf32> -> vector<8x256xf32>
    %296 = arith.truncf %295 : vector<8x256xf32> to vector<8x256xbf16>
    %cst_78 = arith.constant dense<0.000000e+00> : vector<8x512xf32>
    %297 = tpu.matmul %296, %3, %cst_78 {dimension_numbers = #tpu.dot_dimension_numbers<[1], [0], [0], [1], [0, 0, 1, 1], [], []>} : vector<8x256xbf16>, vector<256x512xbf16>, vector<8x512xf32> -> vector<8x512xf32>
    %298 = arith.addf %297, %8 : vector<8x512xf32>
    %299 = vector.extract_strided_slice %298 {offsets = [0, 0], sizes = [8, 128], strides = [1, 1]} : vector<8x512xf32> to vector<8x128xf32>
    %300 = arith.negf %299 : vector<8x128xf32>
    %301 = math.exp %300 : vector<8x128xf32>
    %cst_79 = arith.constant 1.000000e+00 : f32
    %302 = vector.broadcast %cst_79 : f32 to vector<8x128xf32>
    %303 = arith.addf %302, %301 : vector<8x128xf32>
    %304 = arith.divf %302, %303 : vector<8x128xf32>
    %305 = vector.extract_strided_slice %298 {offsets = [0, 128], sizes = [8, 128], strides = [1, 1]} : vector<8x512xf32> to vector<8x128xf32>
    %306 = arith.negf %305 : vector<8x128xf32>
    %307 = math.exp %306 : vector<8x128xf32>
    %cst_80 = arith.constant 1.000000e+00 : f32
    %308 = vector.broadcast %cst_80 : f32 to vector<8x128xf32>
    %309 = arith.addf %308, %307 : vector<8x128xf32>
    %310 = arith.divf %308, %309 : vector<8x128xf32>
    %311 = vector.extract_strided_slice %298 {offsets = [0, 256], sizes = [8, 128], strides = [1, 1]} : vector<8x512xf32> to vector<8x128xf32>
    %312 = math.tanh %311 : vector<8x128xf32>
    %313 = vector.extract_strided_slice %298 {offsets = [0, 384], sizes = [8, 128], strides = [1, 1]} : vector<8x512xf32> to vector<8x128xf32>
    %314 = arith.negf %313 : vector<8x128xf32>
    %315 = math.exp %314 : vector<8x128xf32>
    %cst_81 = arith.constant 1.000000e+00 : f32
    %316 = vector.broadcast %cst_81 : f32 to vector<8x128xf32>
    %317 = arith.addf %316, %315 : vector<8x128xf32>
    %318 = arith.divf %316, %317 : vector<8x128xf32>
    %319 = arith.mulf %310, %232 : vector<8x128xf32>
    %320 = arith.mulf %304, %312 : vector<8x128xf32>
    %321 = arith.addf %319, %320 : vector<8x128xf32>
    %322 = math.tanh %321 : vector<8x128xf32>
    %323 = arith.mulf %318, %322 : vector<8x128xf32>
    %324 = tpu.concatenate %323, %285 in 1 : vector<8x128xf32>, vector<8x128xf32> -> vector<8x256xf32>
    %325 = arith.truncf %324 : vector<8x256xf32> to vector<8x256xbf16>
    %cst_82 = arith.constant dense<0.000000e+00> : vector<8x128xf32>
    %326 = tpu.matmul %325, %4, %cst_82 {dimension_numbers = #tpu.dot_dimension_numbers<[1], [0], [0], [1], [0, 0, 1, 1], [], []>} : vector<8x256xbf16>, vector<256x128xbf16>, vector<8x128xf32> -> vector<8x128xf32>
    %327 = arith.addf %326, %11 : vector<8x128xf32>
    %328 = vector.shape_cast %327 : vector<8x128xf32> to vector<8x1x128xf32>
    %329 = vector.broadcast %328 : vector<8x1x128xf32> to vector<8x8x128xf32>
    %330 = arith.addf %0, %329 : vector<8x8x128xf32>
    %331 = math.tanh %330 : vector<8x8x128xf32>
    %332 = arith.mulf %331, %18 : vector<8x8x128xf32>
    %cst_83 = arith.constant dense<0.000000e+00> : vector<8x8xf32>
    %333 = vector.multi_reduction <add>, %332, %cst_83 [2] : vector<8x8x128xf32> to vector<8x8xf32>
    %334 = arith.addf %333, %21 : vector<8x8xf32>
    %cst_84 = arith.constant dense<0xFF800000> : vector<8xf32>
    %335 = vector.multi_reduction <maximumf>, %334, %cst_84 [1] : vector<8x8xf32> to vector<8xf32>
    %336 = vector.shape_cast %335 : vector<8xf32> to vector<8x1xf32>
    %337 = vector.broadcast %336 : vector<8x1xf32> to vector<8x8xf32>
    %338 = arith.subf %334, %337 : vector<8x8xf32>
    %339 = math.exp %338 : vector<8x8xf32>
    %cst_85 = arith.constant dense<0.000000e+00> : vector<8xf32>
    %340 = vector.multi_reduction <add>, %339, %cst_85 [1] : vector<8x8xf32> to vector<8xf32>
    %341 = vector.shape_cast %340 : vector<8xf32> to vector<8x1xf32>
    %342 = vector.broadcast %341 : vector<8x1xf32> to vector<8x8xf32>
    %343 = arith.divf %339, %342 : vector<8x8xf32>
    %344 = vector.shape_cast %343 : vector<8x8xf32> to vector<8x1x8xf32>
    %345 = arith.truncf %344 : vector<8x1x8xf32> to vector<8x1x8xbf16>
    "tpu.trace_start"() <{level = 10 : i32, message = "bqk,bkd->bqd"}> : () -> ()
    %cst_86 = arith.constant dense<0.000000e+00> : vector<8x1x128xf32>
    %346 = tpu.matmul %345, %2, %cst_86 {dimension_numbers = #tpu.dot_dimension_numbers<[2], [1], [1], [2], [0, 0, 0, 1, 1, 2], [0], [0]>} : vector<8x1x8xbf16>, vector<8x8x128xbf16>, vector<8x1x128xf32> -> vector<8x1x128xf32>
    "tpu.trace_stop"() : () -> ()
    %347 = vector.shape_cast %346 : vector<8x1x128xf32> to vector<8x128xf32>
    %348 = tpu.concatenate %347, %287, %323 in 1 : vector<8x128xf32>, vector<8x128xf32>, vector<8x128xf32> -> vector<8x384xf32>
    %349 = arith.truncf %348 : vector<8x384xf32> to vector<8x384xbf16>
    %cst_87 = arith.constant dense<0.000000e+00> : vector<8x512xf32>
    %350 = tpu.matmul %349, %5, %cst_87 {dimension_numbers = #tpu.dot_dimension_numbers<[1], [0], [0], [1], [0, 0, 1, 1], [], []>} : vector<8x384xbf16>, vector<384x512xbf16>, vector<8x512xf32> -> vector<8x512xf32>
    %351 = arith.addf %350, %14 : vector<8x512xf32>
    %352 = vector.extract_strided_slice %351 {offsets = [0, 0], sizes = [8, 128], strides = [1, 1]} : vector<8x512xf32> to vector<8x128xf32>
    %353 = arith.negf %352 : vector<8x128xf32>
    %354 = math.exp %353 : vector<8x128xf32>
    %cst_88 = arith.constant 1.000000e+00 : f32
    %355 = vector.broadcast %cst_88 : f32 to vector<8x128xf32>
    %356 = arith.addf %355, %354 : vector<8x128xf32>
    %357 = arith.divf %355, %356 : vector<8x128xf32>
    %358 = vector.extract_strided_slice %351 {offsets = [0, 128], sizes = [8, 128], strides = [1, 1]} : vector<8x512xf32> to vector<8x128xf32>
    %359 = math.tanh %358 : vector<8x128xf32>
    %360 = vector.extract_strided_slice %351 {offsets = [0, 256], sizes = [8, 128], strides = [1, 1]} : vector<8x512xf32> to vector<8x128xf32>
    %361 = arith.negf %360 : vector<8x128xf32>
    %362 = math.exp %361 : vector<8x128xf32>
    %cst_89 = arith.constant 1.000000e+00 : f32
    %363 = vector.broadcast %cst_89 : f32 to vector<8x128xf32>
    %364 = arith.addf %363, %362 : vector<8x128xf32>
    %365 = arith.divf %363, %364 : vector<8x128xf32>
    %366 = vector.extract_strided_slice %351 {offsets = [0, 384], sizes = [8, 128], strides = [1, 1]} : vector<8x512xf32> to vector<8x128xf32>
    %367 = arith.negf %366 : vector<8x128xf32>
    %368 = math.exp %367 : vector<8x128xf32>
    %cst_90 = arith.constant 1.000000e+00 : f32
    %369 = vector.broadcast %cst_90 : f32 to vector<8x128xf32>
    %370 = arith.addf %369, %368 : vector<8x128xf32>
    %371 = arith.divf %369, %370 : vector<8x128xf32>
    %372 = arith.mulf %359, %357 : vector<8x128xf32>
    %373 = arith.mulf %285, %371 : vector<8x128xf32>
    %374 = arith.addf %372, %373 : vector<8x128xf32>
    %375 = math.tanh %374 : vector<8x128xf32>
    %376 = arith.mulf %375, %365 : vector<8x128xf32>
    %377 = arith.index_cast %c3_i32 : i32 to index
    %c0_91 = arith.constant 0 : index
    %c0_92 = arith.constant 0 : index
    %378 = vector.load %arg14[%377, %c0_91, %c0_92] : memref<6x8x128xf32, #tpu.memory_space<vmem>>, vector<1x8x128xf32>
    %379 = vector.shape_cast %378 : vector<1x8x128xf32> to vector<8x128xf32>
    %380 = vector.shape_cast %376 : vector<8x128xf32> to vector<1x8x128xf32>
    tpu.vector_store %arg14[%377, %c0_91, %c0_92], %380 {strides = array<i32>} : memref<6x8x128xf32, #tpu.memory_space<vmem>>, vector<1x8x128xf32>,
    %c4_i32 = arith.constant 4 : i32
    %381 = arith.index_cast %c4_i32 : i32 to index
    %c0_93 = arith.constant 0 : index
    %c0_94 = arith.constant 0 : index
    %382 = vector.load %arg1[%381, %c0_93, %c0_94] : memref<6x8x128xf32, #tpu.memory_space<vmem>>, vector<1x8x128xf32>
    %383 = vector.shape_cast %382 : vector<1x8x128xf32> to vector<8x128xf32>
    %384 = tpu.concatenate %383, %323 in 1 : vector<8x128xf32>, vector<8x128xf32> -> vector<8x256xf32>
    %385 = arith.truncf %384 : vector<8x256xf32> to vector<8x256xbf16>
    %cst_95 = arith.constant dense<0.000000e+00> : vector<8x512xf32>
    %386 = tpu.matmul %385, %3, %cst_95 {dimension_numbers = #tpu.dot_dimension_numbers<[1], [0], [0], [1], [0, 0, 1, 1], [], []>} : vector<8x256xbf16>, vector<256x512xbf16>, vector<8x512xf32> -> vector<8x512xf32>
    %387 = arith.addf %386, %8 : vector<8x512xf32>
    %388 = vector.extract_strided_slice %387 {offsets = [0, 0], sizes = [8, 128], strides = [1, 1]} : vector<8x512xf32> to vector<8x128xf32>
    %389 = arith.negf %388 : vector<8x128xf32>
    %390 = math.exp %389 : vector<8x128xf32>
    %cst_96 = arith.constant 1.000000e+00 : f32
    %391 = vector.broadcast %cst_96 : f32 to vector<8x128xf32>
    %392 = arith.addf %391, %390 : vector<8x128xf32>
    %393 = arith.divf %391, %392 : vector<8x128xf32>
    %394 = vector.extract_strided_slice %387 {offsets = [0, 128], sizes = [8, 128], strides = [1, 1]} : vector<8x512xf32> to vector<8x128xf32>
    %395 = arith.negf %394 : vector<8x128xf32>
    %396 = math.exp %395 : vector<8x128xf32>
    %cst_97 = arith.constant 1.000000e+00 : f32
    %397 = vector.broadcast %cst_97 : f32 to vector<8x128xf32>
    %398 = arith.addf %397, %396 : vector<8x128xf32>
    %399 = arith.divf %397, %398 : vector<8x128xf32>
    %400 = vector.extract_strided_slice %387 {offsets = [0, 256], sizes = [8, 128], strides = [1, 1]} : vector<8x512xf32> to vector<8x128xf32>
    %401 = math.tanh %400 : vector<8x128xf32>
    %402 = vector.extract_strided_slice %387 {offsets = [0, 384], sizes = [8, 128], strides = [1, 1]} : vector<8x512xf32> to vector<8x128xf32>
    %403 = arith.negf %402 : vector<8x128xf32>
    %404 = math.exp %403 : vector<8x128xf32>
    %cst_98 = arith.constant 1.000000e+00 : f32
    %405 = vector.broadcast %cst_98 : f32 to vector<8x128xf32>
    %406 = arith.addf %405, %404 : vector<8x128xf32>
    %407 = arith.divf %405, %406 : vector<8x128xf32>
    %408 = arith.mulf %399, %321 : vector<8x128xf32>
    %409 = arith.mulf %393, %401 : vector<8x128xf32>
    %410 = arith.addf %408, %409 : vector<8x128xf32>
    %411 = math.tanh %410 : vector<8x128xf32>
    %412 = arith.mulf %407, %411 : vector<8x128xf32>
    %413 = tpu.concatenate %412, %374 in 1 : vector<8x128xf32>, vector<8x128xf32> -> vector<8x256xf32>
    %414 = arith.truncf %413 : vector<8x256xf32> to vector<8x256xbf16>
    %cst_99 = arith.constant dense<0.000000e+00> : vector<8x128xf32>
    %415 = tpu.matmul %414, %4, %cst_99 {dimension_numbers = #tpu.dot_dimension_numbers<[1], [0], [0], [1], [0, 0, 1, 1], [], []>} : vector<8x256xbf16>, vector<256x128xbf16>, vector<8x128xf32> -> vector<8x128xf32>
    %416 = arith.addf %415, %11 : vector<8x128xf32>
    %417 = vector.shape_cast %416 : vector<8x128xf32> to vector<8x1x128xf32>
    %418 = vector.broadcast %417 : vector<8x1x128xf32> to vector<8x8x128xf32>
    %419 = arith.addf %0, %418 : vector<8x8x128xf32>
    %420 = math.tanh %419 : vector<8x8x128xf32>
    %421 = arith.mulf %420, %18 : vector<8x8x128xf32>
    %cst_100 = arith.constant dense<0.000000e+00> : vector<8x8xf32>
    %422 = vector.multi_reduction <add>, %421, %cst_100 [2] : vector<8x8x128xf32> to vector<8x8xf32>
    %423 = arith.addf %422, %21 : vector<8x8xf32>
    %cst_101 = arith.constant dense<0xFF800000> : vector<8xf32>
    %424 = vector.multi_reduction <maximumf>, %423, %cst_101 [1] : vector<8x8xf32> to vector<8xf32>
    %425 = vector.shape_cast %424 : vector<8xf32> to vector<8x1xf32>
    %426 = vector.broadcast %425 : vector<8x1xf32> to vector<8x8xf32>
    %427 = arith.subf %423, %426 : vector<8x8xf32>
    %428 = math.exp %427 : vector<8x8xf32>
    %cst_102 = arith.constant dense<0.000000e+00> : vector<8xf32>
    %429 = vector.multi_reduction <add>, %428, %cst_102 [1] : vector<8x8xf32> to vector<8xf32>
    %430 = vector.shape_cast %429 : vector<8xf32> to vector<8x1xf32>
    %431 = vector.broadcast %430 : vector<8x1xf32> to vector<8x8xf32>
    %432 = arith.divf %428, %431 : vector<8x8xf32>
    %433 = vector.shape_cast %432 : vector<8x8xf32> to vector<8x1x8xf32>
    %434 = arith.truncf %433 : vector<8x1x8xf32> to vector<8x1x8xbf16>
    "tpu.trace_start"() <{level = 10 : i32, message = "bqk,bkd->bqd"}> : () -> ()
    %cst_103 = arith.constant dense<0.000000e+00> : vector<8x1x128xf32>
    %435 = tpu.matmul %434, %2, %cst_103 {dimension_numbers = #tpu.dot_dimension_numbers<[2], [1], [1], [2], [0, 0, 0, 1, 1, 2], [0], [0]>} : vector<8x1x8xbf16>, vector<8x8x128xbf16>, vector<8x1x128xf32> -> vector<8x1x128xf32>
    "tpu.trace_stop"() : () -> ()
    %436 = vector.shape_cast %435 : vector<8x1x128xf32> to vector<8x128xf32>
    %437 = tpu.concatenate %436, %376, %412 in 1 : vector<8x128xf32>, vector<8x128xf32>, vector<8x128xf32> -> vector<8x384xf32>
    %438 = arith.truncf %437 : vector<8x384xf32> to vector<8x384xbf16>
    %cst_104 = arith.constant dense<0.000000e+00> : vector<8x512xf32>
    %439 = tpu.matmul %438, %5, %cst_104 {dimension_numbers = #tpu.dot_dimension_numbers<[1], [0], [0], [1], [0, 0, 1, 1], [], []>} : vector<8x384xbf16>, vector<384x512xbf16>, vector<8x512xf32> -> vector<8x512xf32>
    %440 = arith.addf %439, %14 : vector<8x512xf32>
    %441 = vector.extract_strided_slice %440 {offsets = [0, 0], sizes = [8, 128], strides = [1, 1]} : vector<8x512xf32> to vector<8x128xf32>
    %442 = arith.negf %441 : vector<8x128xf32>
    %443 = math.exp %442 : vector<8x128xf32>
    %cst_105 = arith.constant 1.000000e+00 : f32
    %444 = vector.broadcast %cst_105 : f32 to vector<8x128xf32>
    %445 = arith.addf %444, %443 : vector<8x128xf32>
    %446 = arith.divf %444, %445 : vector<8x128xf32>
    %447 = vector.extract_strided_slice %440 {offsets = [0, 128], sizes = [8, 128], strides = [1, 1]} : vector<8x512xf32> to vector<8x128xf32>
    %448 = math.tanh %447 : vector<8x128xf32>
    %449 = vector.extract_strided_slice %440 {offsets = [0, 256], sizes = [8, 128], strides = [1, 1]} : vector<8x512xf32> to vector<8x128xf32>
    %450 = arith.negf %449 : vector<8x128xf32>
    %451 = math.exp %450 : vector<8x128xf32>
    %cst_106 = arith.constant 1.000000e+00 : f32
    %452 = vector.broadcast %cst_106 : f32 to vector<8x128xf32>
    %453 = arith.addf %452, %451 : vector<8x128xf32>
    %454 = arith.divf %452, %453 : vector<8x128xf32>
    %455 = vector.extract_strided_slice %440 {offsets = [0, 384], sizes = [8, 128], strides = [1, 1]} : vector<8x512xf32> to vector<8x128xf32>
    %456 = arith.negf %455 : vector<8x128xf32>
    %457 = math.exp %456 : vector<8x128xf32>
    %cst_107 = arith.constant 1.000000e+00 : f32
    %458 = vector.broadcast %cst_107 : f32 to vector<8x128xf32>
    %459 = arith.addf %458, %457 : vector<8x128xf32>
    %460 = arith.divf %458, %459 : vector<8x128xf32>
    %461 = arith.mulf %448, %446 : vector<8x128xf32>
    %462 = arith.mulf %374, %460 : vector<8x128xf32>
    %463 = arith.addf %461, %462 : vector<8x128xf32>
    %464 = math.tanh %463 : vector<8x128xf32>
    %465 = arith.mulf %464, %454 : vector<8x128xf32>
    %466 = arith.index_cast %c4_i32 : i32 to index
    %c0_108 = arith.constant 0 : index
    %c0_109 = arith.constant 0 : index
    %467 = vector.load %arg14[%466, %c0_108, %c0_109] : memref<6x8x128xf32, #tpu.memory_space<vmem>>, vector<1x8x128xf32>
    %468 = vector.shape_cast %467 : vector<1x8x128xf32> to vector<8x128xf32>
    %469 = vector.shape_cast %465 : vector<8x128xf32> to vector<1x8x128xf32>
    tpu.vector_store %arg14[%466, %c0_108, %c0_109], %469 {strides = array<i32>} : memref<6x8x128xf32, #tpu.memory_space<vmem>>, vector<1x8x128xf32>,
    %c5_i32 = arith.constant 5 : i32
    %470 = arith.index_cast %c5_i32 : i32 to index
    %c0_110 = arith.constant 0 : index
    %c0_111 = arith.constant 0 : index
    %471 = vector.load %arg1[%470, %c0_110, %c0_111] : memref<6x8x128xf32, #tpu.memory_space<vmem>>, vector<1x8x128xf32>
    %472 = vector.shape_cast %471 : vector<1x8x128xf32> to vector<8x128xf32>
    %473 = tpu.concatenate %472, %412 in 1 : vector<8x128xf32>, vector<8x128xf32> -> vector<8x256xf32>
    %474 = arith.truncf %473 : vector<8x256xf32> to vector<8x256xbf16>
    %cst_112 = arith.constant dense<0.000000e+00> : vector<8x512xf32>
    %475 = tpu.matmul %474, %3, %cst_112 {dimension_numbers = #tpu.dot_dimension_numbers<[1], [0], [0], [1], [0, 0, 1, 1], [], []>} : vector<8x256xbf16>, vector<256x512xbf16>, vector<8x512xf32> -> vector<8x512xf32>
    %476 = arith.addf %475, %8 : vector<8x512xf32>
    %477 = vector.extract_strided_slice %476 {offsets = [0, 0], sizes = [8, 128], strides = [1, 1]} : vector<8x512xf32> to vector<8x128xf32>
    %478 = arith.negf %477 : vector<8x128xf32>
    %479 = math.exp %478 : vector<8x128xf32>
    %cst_113 = arith.constant 1.000000e+00 : f32
    %480 = vector.broadcast %cst_113 : f32 to vector<8x128xf32>
    %481 = arith.addf %480, %479 : vector<8x128xf32>
    %482 = arith.divf %480, %481 : vector<8x128xf32>
    %483 = vector.extract_strided_slice %476 {offsets = [0, 128], sizes = [8, 128], strides = [1, 1]} : vector<8x512xf32> to vector<8x128xf32>
    %484 = arith.negf %483 : vector<8x128xf32>
    %485 = math.exp %484 : vector<8x128xf32>
    %cst_114 = arith.constant 1.000000e+00 : f32
    %486 = vector.broadcast %cst_114 : f32 to vector<8x128xf32>
    %487 = arith.addf %486, %485 : vector<8x128xf32>
    %488 = arith.divf %486, %487 : vector<8x128xf32>
    %489 = vector.extract_strided_slice %476 {offsets = [0, 256], sizes = [8, 128], strides = [1, 1]} : vector<8x512xf32> to vector<8x128xf32>
    %490 = math.tanh %489 : vector<8x128xf32>
    %491 = vector.extract_strided_slice %476 {offsets = [0, 384], sizes = [8, 128], strides = [1, 1]} : vector<8x512xf32> to vector<8x128xf32>
    %492 = arith.negf %491 : vector<8x128xf32>
    %493 = math.exp %492 : vector<8x128xf32>
    %cst_115 = arith.constant 1.000000e+00 : f32
    %494 = vector.broadcast %cst_115 : f32 to vector<8x128xf32>
    %495 = arith.addf %494, %493 : vector<8x128xf32>
    %496 = arith.divf %494, %495 : vector<8x128xf32>
    %497 = arith.mulf %488, %410 : vector<8x128xf32>
    %498 = arith.mulf %482, %490 : vector<8x128xf32>
    %499 = arith.addf %497, %498 : vector<8x128xf32>
    %500 = math.tanh %499 : vector<8x128xf32>
    %501 = arith.mulf %496, %500 : vector<8x128xf32>
    %502 = tpu.concatenate %501, %463 in 1 : vector<8x128xf32>, vector<8x128xf32> -> vector<8x256xf32>
    %503 = arith.truncf %502 : vector<8x256xf32> to vector<8x256xbf16>
    %cst_116 = arith.constant dense<0.000000e+00> : vector<8x128xf32>
    %504 = tpu.matmul %503, %4, %cst_116 {dimension_numbers = #tpu.dot_dimension_numbers<[1], [0], [0], [1], [0, 0, 1, 1], [], []>} : vector<8x256xbf16>, vector<256x128xbf16>, vector<8x128xf32> -> vector<8x128xf32>
    %505 = arith.addf %504, %11 : vector<8x128xf32>
    %506 = vector.shape_cast %505 : vector<8x128xf32> to vector<8x1x128xf32>
    %507 = vector.broadcast %506 : vector<8x1x128xf32> to vector<8x8x128xf32>
    %508 = arith.addf %0, %507 : vector<8x8x128xf32>
    %509 = math.tanh %508 : vector<8x8x128xf32>
    %510 = arith.mulf %509, %18 : vector<8x8x128xf32>
    %cst_117 = arith.constant dense<0.000000e+00> : vector<8x8xf32>
    %511 = vector.multi_reduction <add>, %510, %cst_117 [2] : vector<8x8x128xf32> to vector<8x8xf32>
    %512 = arith.addf %511, %21 : vector<8x8xf32>
    %cst_118 = arith.constant dense<0xFF800000> : vector<8xf32>
    %513 = vector.multi_reduction <maximumf>, %512, %cst_118 [1] : vector<8x8xf32> to vector<8xf32>
    %514 = vector.shape_cast %513 : vector<8xf32> to vector<8x1xf32>
    %515 = vector.broadcast %514 : vector<8x1xf32> to vector<8x8xf32>
    %516 = arith.subf %512, %515 : vector<8x8xf32>
    %517 = math.exp %516 : vector<8x8xf32>
    %cst_119 = arith.constant dense<0.000000e+00> : vector<8xf32>
    %518 = vector.multi_reduction <add>, %517, %cst_119 [1] : vector<8x8xf32> to vector<8xf32>
    %519 = vector.shape_cast %518 : vector<8xf32> to vector<8x1xf32>
    %520 = vector.broadcast %519 : vector<8x1xf32> to vector<8x8xf32>
    %521 = arith.divf %517, %520 : vector<8x8xf32>
    %522 = vector.shape_cast %521 : vector<8x8xf32> to vector<8x1x8xf32>
    %523 = arith.truncf %522 : vector<8x1x8xf32> to vector<8x1x8xbf16>
    "tpu.trace_start"() <{level = 10 : i32, message = "bqk,bkd->bqd"}> : () -> ()
    %cst_120 = arith.constant dense<0.000000e+00> : vector<8x1x128xf32>
    %524 = tpu.matmul %523, %2, %cst_120 {dimension_numbers = #tpu.dot_dimension_numbers<[2], [1], [1], [2], [0, 0, 0, 1, 1, 2], [0], [0]>} : vector<8x1x8xbf16>, vector<8x8x128xbf16>, vector<8x1x128xf32> -> vector<8x1x128xf32>
    "tpu.trace_stop"() : () -> ()
    %525 = vector.shape_cast %524 : vector<8x1x128xf32> to vector<8x128xf32>
    %526 = tpu.concatenate %525, %465, %501 in 1 : vector<8x128xf32>, vector<8x128xf32>, vector<8x128xf32> -> vector<8x384xf32>
    %527 = arith.truncf %526 : vector<8x384xf32> to vector<8x384xbf16>
    %cst_121 = arith.constant dense<0.000000e+00> : vector<8x512xf32>
    %528 = tpu.matmul %527, %5, %cst_121 {dimension_numbers = #tpu.dot_dimension_numbers<[1], [0], [0], [1], [0, 0, 1, 1], [], []>} : vector<8x384xbf16>, vector<384x512xbf16>, vector<8x512xf32> -> vector<8x512xf32>
    %529 = arith.addf %528, %14 : vector<8x512xf32>
    %530 = vector.extract_strided_slice %529 {offsets = [0, 0], sizes = [8, 128], strides = [1, 1]} : vector<8x512xf32> to vector<8x128xf32>
    %531 = arith.negf %530 : vector<8x128xf32>
    %532 = math.exp %531 : vector<8x128xf32>
    %cst_122 = arith.constant 1.000000e+00 : f32
    %533 = vector.broadcast %cst_122 : f32 to vector<8x128xf32>
    %534 = arith.addf %533, %532 : vector<8x128xf32>
    %535 = arith.divf %533, %534 : vector<8x128xf32>
    %536 = vector.extract_strided_slice %529 {offsets = [0, 128], sizes = [8, 128], strides = [1, 1]} : vector<8x512xf32> to vector<8x128xf32>
    %537 = math.tanh %536 : vector<8x128xf32>
    %538 = vector.extract_strided_slice %529 {offsets = [0, 256], sizes = [8, 128], strides = [1, 1]} : vector<8x512xf32> to vector<8x128xf32>
    %539 = arith.negf %538 : vector<8x128xf32>
    %540 = math.exp %539 : vector<8x128xf32>
    %cst_123 = arith.constant 1.000000e+00 : f32
    %541 = vector.broadcast %cst_123 : f32 to vector<8x128xf32>
    %542 = arith.addf %541, %540 : vector<8x128xf32>
    %543 = arith.divf %541, %542 : vector<8x128xf32>
    %544 = vector.extract_strided_slice %529 {offsets = [0, 384], sizes = [8, 128], strides = [1, 1]} : vector<8x512xf32> to vector<8x128xf32>
    %545 = arith.negf %544 : vector<8x128xf32>
    %546 = math.exp %545 : vector<8x128xf32>
    %cst_124 = arith.constant 1.000000e+00 : f32
    %547 = vector.broadcast %cst_124 : f32 to vector<8x128xf32>
    %548 = arith.addf %547, %546 : vector<8x128xf32>
    %549 = arith.divf %547, %548 : vector<8x128xf32>
    %550 = arith.mulf %537, %535 : vector<8x128xf32>
    %551 = arith.mulf %463, %549 : vector<8x128xf32>
    %552 = arith.addf %550, %551 : vector<8x128xf32>
    %553 = math.tanh %552 : vector<8x128xf32>
    %554 = arith.mulf %553, %543 : vector<8x128xf32>
    %555 = arith.index_cast %c5_i32 : i32 to index
    %c0_125 = arith.constant 0 : index
    %c0_126 = arith.constant 0 : index
    %556 = vector.load %arg14[%555, %c0_125, %c0_126] : memref<6x8x128xf32, #tpu.memory_space<vmem>>, vector<1x8x128xf32>
    %557 = vector.shape_cast %556 : vector<1x8x128xf32> to vector<8x128xf32>
    %558 = vector.shape_cast %554 : vector<8x128xf32> to vector<1x8x128xf32>
    tpu.vector_store %arg14[%555, %c0_125, %c0_126], %558 {strides = array<i32>} : memref<6x8x128xf32, #tpu.memory_space<vmem>>, vector<1x8x128xf32>,
    %c6_i32 = arith.constant 6 : i32
    return
  }
  func.func @transform_0(%arg0: i32) -> (i32, i32, i32) {
    %c0_i32 = arith.constant 0 : i32
    %c0_i32_0 = arith.constant 0 : i32
    %c0_i32_1 = arith.constant 0 : i32
    return %c0_i32, %arg0, %c0_i32_0 : i32, i32, i32
  }
  func.func @transform_1(%arg0: i32) -> (i32, i32, i32) {
    %c0_i32 = arith.constant 0 : i32
    %c0_i32_0 = arith.constant 0 : i32
    %c0_i32_1 = arith.constant 0 : i32
    return %arg0, %c0_i32, %c0_i32_0 : i32, i32, i32
  }
  func.func @transform_2(%arg0: i32) -> (i32, i32, i32) {
    %c0_i32 = arith.constant 0 : i32
    %c0_i32_0 = arith.constant 0 : i32
    %c0_i32_1 = arith.constant 0 : i32
    return %arg0, %c0_i32, %c0_i32_0 : i32, i32, i32
  }
  func.func @transform_3(%arg0: i32) -> (i32, i32) {
    %c0_i32 = arith.constant 0 : i32
    %c0_i32_0 = arith.constant 0 : i32
    return %arg0, %c0_i32 : i32, i32
  }
  func.func @transform_4(%arg0: i32) -> (i32, i32) {
    %c0_i32 = arith.constant 0 : i32
    %c0_i32_0 = arith.constant 0 : i32
    return %arg0, %c0_i32 : i32, i32
  }
  func.func @transform_5(%arg0: i32) -> (i32, i32) {
    %c0_i32 = arith.constant 0 : i32
    %c0_i32_0 = arith.constant 0 : i32
    %c0_i32_1 = arith.constant 0 : i32
    return %c0_i32, %c0_i32_0 : i32, i32
  }
  func.func @transform_6(%arg0: i32) -> (i32, i32) {
    %c0_i32 = arith.constant 0 : i32
    %c0_i32_0 = arith.constant 0 : i32
    %c0_i32_1 = arith.constant 0 : i32
    return %c0_i32, %c0_i32_0 : i32, i32
  }
  func.func @transform_7(%arg0: i32) -> (i32, i32) {
    %c0_i32 = arith.constant 0 : i32
    %c0_i32_0 = arith.constant 0 : i32
    %c0_i32_1 = arith.constant 0 : i32
    return %c0_i32, %c0_i32_0 : i32, i32
  }
  func.func @transform_8(%arg0: i32) -> (i32, i32) {
    %c0_i32 = arith.constant 0 : i32
    %c0_i32_0 = arith.constant 0 : i32
    %c0_i32_1 = arith.constant 0 : i32
    return %c0_i32, %c0_i32_0 : i32, i32
  }
  func.func @transform_9(%arg0: i32) -> (i32, i32) {
    %c0_i32 = arith.constant 0 : i32
    %c0_i32_0 = arith.constant 0 : i32
    %c0_i32_1 = arith.constant 0 : i32
    return %c0_i32, %c0_i32_0 : i32, i32
  }
  func.func @transform_10(%arg0: i32) -> (i32, i32) {
    %c0_i32 = arith.constant 0 : i32
    %c0_i32_0 = arith.constant 0 : i32
    %c0_i32_1 = arith.constant 0 : i32
    return %c0_i32, %c0_i32_0 : i32, i32
  }
  func.func @transform_11(%arg0: i32) -> (i32, i32) {
    %c0_i32 = arith.constant 0 : i32
    %c0_i32_0 = arith.constant 0 : i32
    %c0_i32_1 = arith.constant 0 : i32
    return %c0_i32, %c0_i32_0 : i32, i32
  }
  func.func @transform_12(%arg0: i32) -> (i32, i32) {
    %c0_i32 = arith.constant 0 : i32
    %c0_i32_0 = arith.constant 0 : i32
    %c0_i32_1 = arith.constant 0 : i32
    return %c0_i32, %c0_i32_0 : i32, i32
  }
  func.func @transform_13(%arg0: i32) -> (i32, i32, i32) {
    %c0_i32 = arith.constant 0 : i32
    %c0_i32_0 = arith.constant 0 : i32
    %c0_i32_1 = arith.constant 0 : i32
    return %c0_i32, %arg0, %c0_i32_0 : i32, i32, i32
  }
}

</mosaic_0001>

<bundles_post_ra>
// kernel: cap_decoder_forward.3
= control target key start
LH: loop header
LB: loop body
LE: loop exit
PB: predicated region body
PF: predicated region fallthrough
CT: control target
= control target key end

     0   :  { %v236_v0 = vmov 0.0   ;;  %vm237_vm0 = vmmov 0   ;;  %s324_s1 = inlined_call_operand.vmem [shape: bf16[128,128], index: 1, kind: input, shape index: {}]   ;;  %s325_s0 = inlined_call_operand.vmem [shape: f32[48,128], index: 0, kind: input, shape index: {}]   ;;  %s326_s2 = inlined_call_operand.vmem [shape: f32[1,128], index: 2, kind: input, shape index: {}]   ;;  %s327_s3 = inlined_call_operand.vmem [shape: f32[48,128], index: 3, kind: output, shape index: {}]  }
   0x1   :  { %210 = vmatprep.subr.bf16.mxu1 %v236_v0  ;;  %v228_v1 = vld [vmem:[%s324_s1 + $0x38] sm:$0xff]   ;;  %182 = vmatprep.subr.bf16.mxu0 %v236_v0  ;;  %v229_v2 = vld [vmem:[%s324_s1 + $0x30] sm:$0xff]   ;;  %v230_v3 = vld [vmem:[%s324_s1 + $0x28] sm:$0xff]  }
   0x2   :  { %202 = vmatprep.mubr.msk.bf16.mxu1 %vm237_vm0, %v236_v0  ;;  %198 = vmatprep.mubr.msk.bf16.mxu0 %vm237_vm0, %v236_v0  ;;  %v231_v4 = vld [vmem:[%s324_s1 + $0x20] sm:$0xff]   ;;  %v232_v5 = vld [vmem:[%s324_s1 + $0x18] sm:$0xff]   ;;  %v233_v6 = vld [vmem:[%s324_s1 + $0x10] sm:$0xff]  }
   0x3   :  { %218 = vmatpush3.bf16.msra.mxu1 %v228_v1  ;;  %183 = vmatpush3.bf16.msra.mxu0 %v228_v1  ;;  %v234_v7 = vld [vmem:[%s324_s1 + $0x8] sm:$0xff]   ;;  %v235_v8 = vld [vmem:[%s324_s1] sm:$0xff]   ;;  %v17_v9 = vld [vmem:[%s325_s0 + $0x10] sm:$0xff] }
   0x4   :  { %211 = vmatprep.subr.bf16.mxu1 %v236_v0  ;;  %184 = vmatprep.subr.bf16.mxu0 %v236_v0  ;;  %v18_v10 = vld [vmem:[%s325_s0 + $0x18] sm:$0xff]  ;;  %v15_v11 = vld [vmem:[%s325_s0] sm:$0xff]  ;;  %v16_v12 = vld [vmem:[%s325_s0 + $0x8] sm:$0xff] }
   0x5   :  { %v22_v13 = vpack.c.bf16 %v18_v10, %v17_v9  ;;  %v21_v14 = vpack.c.bf16 %v16_v12, %v15_v11  ;;  %v19_v15 = vld [vmem:[%s325_s0 + $0x20] sm:$0xff]  ;;  %v20_v16 = vld [vmem:[%s325_s0 + $0x28] sm:$0xff] }
   0x6   :  { %v23_v17 = vpack.c.bf16 %v20_v16, %v19_v15  ;;  %v162_v18 = vld [vmem:[%s326_s2] ss:$0 sm:$0xff] }
   0x7   :  { %219 = vmatpush3.bf16.msra.mxu1 %v229_v2  ;;  %185 = vmatpush3.bf16.msra.mxu0 %v229_v2 }
   0x8   :  { %212 = vmatprep.subr.bf16.mxu1 %v236_v0  ;;  %186 = vmatprep.subr.bf16.mxu0 %v236_v0 }
   0xb   :  { %220 = vmatpush3.bf16.msra.mxu1 %v230_v3  ;;  %187 = vmatpush3.bf16.msra.mxu0 %v230_v3 }
   0xc   :  { %213 = vmatprep.subr.bf16.mxu1 %v236_v0  ;;  %188 = vmatprep.subr.bf16.mxu0 %v236_v0 }
   0xf   :  { %221 = vmatpush3.bf16.msra.mxu1 %v231_v4  ;;  %189 = vmatpush3.bf16.msra.mxu0 %v231_v4 }
  0x10   :  { %214 = vmatprep.subr.bf16.mxu1 %v236_v0  ;;  %190 = vmatprep.subr.bf16.mxu0 %v236_v0 }
  0x13   :  { %222 = vmatpush3.bf16.msra.mxu1 %v232_v5  ;;  %191 = vmatpush3.bf16.msra.mxu0 %v232_v5 }
  0x14   :  { %215 = vmatprep.subr.bf16.mxu1 %v236_v0  ;;  %192 = vmatprep.subr.bf16.mxu0 %v236_v0 }
  0x17   :  { %223 = vmatpush3.bf16.msra.mxu1 %v233_v6  ;;  %193 = vmatpush3.bf16.msra.mxu0 %v233_v6 }
  0x18   :  { %216 = vmatprep.subr.bf16.mxu1 %v236_v0  ;;  %194 = vmatprep.subr.bf16.mxu0 %v236_v0 }
  0x1b   :  { %224 = vmatpush3.bf16.msra.mxu1 %v234_v7  ;;  %195 = vmatpush3.bf16.msra.mxu0 %v234_v7 }
  0x1c   :  { %217 = vmatprep.subr.bf16.mxu1 %v236_v0  ;;  %196 = vmatprep.subr.bf16.mxu0 %v236_v0 }
  0x1f   :  { %225 = vmatpush3.bf16.msra.mxu1 %v235_v8  ;;  %197 = vmatpush3.bf16.msra.mxu0 %v235_v8 }
  0x22   :  { %203 = vmatmul.mubr.bf16.vlgmr.msra.gmra.mxu1 %v22_v13  ;;  %199 = vmatmul.mubr.bf16.vlgmr.msra.gmra.mxu0 %v21_v14 }
  0x23   :  { %206 = vmatprep.mubr.msk.bf16.mxu1 %vm237_vm0, %v236_v0 }
  0x2a   :  { %207 = vmatmul.mubr.bf16.gmra.mxu1 %v23_v17 }
  0xe2   :  { %v137_v19 = vpop.f32.mrf.mxu1  ;;  %v129_v20 = vpop.f32.mrf.mxu0 }
  0xe3   :  { %v138_v21 = vadd.f32 %v162_v18, %v137_v19  ;;  %v130_v22 = vadd.f32 %v162_v18, %v129_v20 }
  0xe4   :  { %v204_v23 = vpop.f32.mrf.mxu1  ;;  %v200_v24 = vpop.f32.mrf.mxu0 }
  0xe5   :  { %154 = vst [vmem:[%s327_s3 + $0x10] sm:$0xff] %v138_v21  ;;  %152 = vst [vmem:[%s327_s3] sm:$0xff] %v130_v22 }
  0xe6   :  { %v140_v25 = vpop.f32.mrf.mxu1  ;;  %v132_v26 = vpop.f32.mrf.mxu0 }
  0xe7   :  { %v141_v27 = vadd.f32 %v162_v18, %v140_v25  ;;  %v133_v28 = vadd.f32 %v162_v18, %v132_v26 }
  0xe8   :  { %v205_v29 = vpop.f32.mrf.mxu1  ;;  %v201_v30 = vpop.f32.mrf.mxu0 }
  0xe9   :  { %155 = vst [vmem:[%s327_s3 + $0x18] sm:$0xff] %v141_v27  ;;  %153 = vst [vmem:[%s327_s3 + $0x8] sm:$0xff] %v133_v28 }
  0xea   :  { %v145_v31 = vpop.f32.mrf.mxu1 }
  0xeb   :  { %v146_v32 = vadd.f32 %v162_v18, %v145_v31 }
  0xec   :  { %v208_v33 = vpop.f32.mrf.mxu1 }
  0xed   :  { %156 = vst [vmem:[%s327_s3 + $0x20] sm:$0xff] %v146_v32 }
  0xee   :  { %v148_v34 = vpop.f32.mrf.mxu1 }
  0xef   :  { %v149_v35 = vadd.f32 %v162_v18, %v148_v34 }
  0xf0   :  { %v209_v36 = vpop.f32.mrf.mxu1 }
  0xf1   :  { %157 = vst [vmem:[%s327_s3 + $0x28] sm:$0xff] %v149_v35 }

// kernel: cap_decoder_forward.2
= control target key start
LH: loop header
LB: loop body
LE: loop exit
PB: predicated region body
PF: predicated region fallthrough
CT: control target
= control target key end

     0   :  { %v10834_v1 = vmov 0.0|0.0   ;;  %vm1080_vm0 = vcmask 1041409   ;;  %vm1082_vm1 = vcmask 1042434   ;;  %vm1084_vm2 = vcmask 1043459   ;;  %s15528_s5 = inlined_call_operand.vmem [shape: bf16[256,512], index: 5, kind: input, shape index: {}]   ;;  %s15529_s0 = inlined_call_operand.vmem [shape: f32[6,8,128], index: 0, kind: input, shape index: {}]   ;;  %s15530_s7 = inlined_call_operand.vmem [shape: bf16[256,128], index: 7, kind: input, shape index: {}]   ;;  %s15531_s4 = inlined_call_operand.vmem [shape: f32[8,128], index: 4, kind: input, shape index: {}]   ;;  %s15532_s6 = inlined_call_operand.vmem [shape: f32[1,512], index: 6, kind: input, shape index: {}]   ;;  %s15533_s10 = inlined_call_operand.<no memory space> [shape: f32[1,1], index: 10, kind: input, shape index: {}]   ;;  %s15534_s8 = inlined_call_operand.vmem [shape: f32[1,128], index: 8, kind: input, shape index: {}]   ;;  %s15535_s1 = inlined_call_operand.vmem [shape: f32[8,8,128], index: 1, kind: input, shape index: {}]   ;;  %s15536_s9 = inlined_call_operand.vmem [shape: f32[1,128], index: 9, kind: input, shape index: {}]   ;;  %s15537_s2 = inlined_call_operand.vmem [shape: f32[8,8,128], index: 2, kind: input, shape index: {}]   ;;  %s15538_s11 = inlined_call_operand.vmem [shape: bf16[384,512], index: 11, kind: input, shape index: {}]   ;;  %s15539_s3 = inlined_call_operand.vmem [shape: f32[8,128], index: 3, kind: input, shape index: {}]   ;;  %s15540_s12 = inlined_call_operand.vmem [shape: f32[1,512], index: 12, kind: input, shape index: {}]   ;;  %s15541_s13 = inlined_call_operand.vmem [shape: f32[6,8,128], index: 13, kind: output, shape index: {}]  }
   0x1   :  { %v9167_v0 = vld [vmem:[%s15528_s5 + $0xe4] ss:$16 sps:$4 sm:$0xff]   ;;  %688 = vmatprep.mubr.bf16.mxu0 %v10834_v1  ;;  %729 = vmatprep.mubr.bf16.mxu1 %v10834_v1  ;;  %v9169_v2 = vld [vmem:[%s15528_s5 + $0xe0] ss:$16 sps:$4 sm:$0xff]   ;;  %v9178_v6 = vld [vmem:[%s15528_s5 + $0xec] ss:$16 sps:$4 sm:$0xff]  }
   0x2   :  { %656 = vmatprep.subr.bf16.mxu0 %v9167_v0  ;;  %v9170_v3 = vld [vmem:[%s15528_s5 + $0xc4] ss:$16 sps:$4 sm:$0xff]   ;;  %v9172_v4 = vld [vmem:[%s15528_s5 + $0xc0] ss:$16 sps:$4 sm:$0xff]   ;;  %v9181_v7 = vld [vmem:[%s15528_s5 + $0xe8] ss:$16 sps:$4 sm:$0xff]   ;;  %697 = vmatprep.subr.bf16.mxu1 %v9178_v6 }
   0x3   :  { %657 = vmatpush1.bf16.msra.mxu0 %v9169_v2  ;;  %v9173_v5 = vld [vmem:[%s15528_s5 + $0xa4] ss:$16 sps:$4 sm:$0xff]   ;;  %v9175_v8 = vld [vmem:[%s15528_s5 + $0xa0] ss:$16 sps:$4 sm:$0xff]   ;;  %698 = vmatpush1.bf16.msra.mxu1 %v9181_v7  ;;  %v9184_v10 = vld [vmem:[%s15528_s5 + $0xcc] ss:$16 sps:$4 sm:$0xff]  }
   0x4   :  { %658 = vmatprep.subr.bf16.mxu0 %v9170_v3  ;;  %v9176_v9 = vld [vmem:[%s15528_s5 + $0x84] ss:$16 sps:$4 sm:$0xff]   ;;  %v9187_v11 = vld [vmem:[%s15528_s5 + $0xc8] ss:$16 sps:$4 sm:$0xff]   ;;  %699 = vmatprep.subr.bf16.mxu1 %v9184_v10  ;;  %v9180_v12 = vld [vmem:[%s15528_s5 + $0x80] ss:$16 sps:$4 sm:$0xff]  }
   0x5   :  { %v9182_v13 = vld [vmem:[%s15528_s5 + $0x64] ss:$16 sps:$4 sm:$0xff]   ;;  %v9190_v14 = vld [vmem:[%s15528_s5 + $0xac] ss:$16 sps:$4 sm:$0xff]   ;;  %v9193_v15 = vld [vmem:[%s15528_s5 + $0xa8] ss:$16 sps:$4 sm:$0xff]  }
   0x6   :  { %v9196_v16 = vld [vmem:[%s15528_s5 + $0x8c] ss:$16 sps:$4 sm:$0xff]   ;;  %v9186_v17 = vld [vmem:[%s15528_s5 + $0x60] ss:$16 sps:$4 sm:$0xff]   ;;  %v9188_v18 = vld [vmem:[%s15528_s5 + $0x44] ss:$16 sps:$4 sm:$0xff]  }
   0x7   :  { %659 = vmatpush1.bf16.msra.mxu0 %v9172_v4  ;;  %700 = vmatpush1.bf16.msra.mxu1 %v9187_v11  ;;  %v9199_v19 = vld [vmem:[%s15528_s5 + $0x88] ss:$16 sps:$4 sm:$0xff]   ;;  %v9202_v20 = vld [vmem:[%s15528_s5 + $0x6c] ss:$16 sps:$4 sm:$0xff]   ;;  %v9192_v21 = vld [vmem:[%s15528_s5 + $0x40] ss:$16 sps:$4 sm:$0xff]  }
   0x8   :  { %660 = vmatprep.subr.bf16.mxu0 %v9173_v5  ;;  %701 = vmatprep.subr.bf16.mxu1 %v9190_v14  ;;  %v9194_v22 = vld [vmem:[%s15528_s5 + $0x24] ss:$16 sps:$4 sm:$0xff]   ;;  %v9205_v23 = vld [vmem:[%s15528_s5 + $0x68] ss:$16 sps:$4 sm:$0xff]   ;;  %v9208_v24 = vld [vmem:[%s15528_s5 + $0x4c] ss:$16 sps:$4 sm:$0xff]  }
   0x9   :  { %v9198_v25 = vld [vmem:[%s15528_s5 + $0x20] ss:$16 sps:$4 sm:$0xff]   ;;  %v9200_v26 = vld [vmem:[%s15528_s5 + $0x4] ss:$16 sps:$4 sm:$0xff]   ;;  %v9211_v27 = vld [vmem:[%s15528_s5 + $0x48] ss:$16 sps:$4 sm:$0xff]  }
   0xa   :  { %v9214_v28 = vld [vmem:[%s15528_s5 + $0x2c] ss:$16 sps:$4 sm:$0xff]   ;;  %v9204_v29 = vld [vmem:[%s15528_s5] ss:$16 sps:$4 sm:$0xff]   ;;  %v9206_v30 = vld [vmem:[%s15528_s5 + $0x1e4] ss:$16 sps:$4 sm:$0xff]  }
   0xb   :  { %661 = vmatpush1.bf16.msra.mxu0 %v9175_v8  ;;  %702 = vmatpush1.bf16.msra.mxu1 %v9193_v15  ;;  %v9217_v31 = vld [vmem:[%s15528_s5 + $0x28] ss:$16 sps:$4 sm:$0xff]   ;;  %v9220_v32 = vld [vmem:[%s15528_s5 + $0xc] ss:$16 sps:$4 sm:$0xff]   ;;  %v9210_v33 = vld [vmem:[%s15528_s5 + $0x1e0] ss:$16 sps:$4 sm:$0xff]  }
   0xc   :  { %662 = vmatprep.subr.bf16.mxu0 %v9176_v9  ;;  %703 = vmatprep.subr.bf16.mxu1 %v9196_v16  ;;  %v9212_v34 = vld [vmem:[%s15528_s5 + $0x1c4] ss:$16 sps:$4 sm:$0xff]   ;;  %v9223_v35 = vld [vmem:[%s15528_s5 + $0x8] ss:$16 sps:$4 sm:$0xff]   ;;  %v9226_v36 = vld [vmem:[%s15528_s5 + $0x1ec] ss:$16 sps:$4 sm:$0xff]  }
   0xd   :  { %v9216_v37 = vld [vmem:[%s15528_s5 + $0x1c0] ss:$16 sps:$4 sm:$0xff]   ;;  %v9218_v38 = vld [vmem:[%s15528_s5 + $0x1a4] ss:$16 sps:$4 sm:$0xff]   ;;  %v9229_v39 = vld [vmem:[%s15528_s5 + $0x1e8] ss:$16 sps:$4 sm:$0xff]  }
   0xe   :  { %v9232_v40 = vld [vmem:[%s15528_s5 + $0x1cc] ss:$16 sps:$4 sm:$0xff]   ;;  %v9222_v41 = vld [vmem:[%s15528_s5 + $0x1a0] ss:$16 sps:$4 sm:$0xff]   ;;  %v9224_v42 = vld [vmem:[%s15528_s5 + $0x184] ss:$16 sps:$4 sm:$0xff]  }
   0xf   :  { %663 = vmatpush1.bf16.msra.mxu0 %v9180_v12  ;;  %704 = vmatpush1.bf16.msra.mxu1 %v9199_v19  ;;  %v9235_v43 = vld [vmem:[%s15528_s5 + $0x1c8] ss:$16 sps:$4 sm:$0xff]   ;;  %v9238_v44 = vld [vmem:[%s15528_s5 + $0x1ac] ss:$16 sps:$4 sm:$0xff]   ;;  %v9228_v45 = vld [vmem:[%s15528_s5 + $0x180] ss:$16 sps:$4 sm:$0xff]  }
  0x10   :  { %664 = vmatprep.subr.bf16.mxu0 %v9182_v13  ;;  %705 = vmatprep.subr.bf16.mxu1 %v9202_v20  ;;  %v9230_v46 = vld [vmem:[%s15528_s5 + $0x164] ss:$16 sps:$4 sm:$0xff]   ;;  %v9241_v47 = vld [vmem:[%s15528_s5 + $0x1a8] ss:$16 sps:$4 sm:$0xff]   ;;  %v9244_v48 = vld [vmem:[%s15528_s5 + $0x18c] ss:$16 sps:$4 sm:$0xff]  }
  0x11   :  { %v9234_v49 = vld [vmem:[%s15528_s5 + $0x160] ss:$16 sps:$4 sm:$0xff]   ;;  %v9236_v50 = vld [vmem:[%s15528_s5 + $0x144] ss:$16 sps:$4 sm:$0xff]   ;;  %v9247_v51 = vld [vmem:[%s15528_s5 + $0x188] ss:$16 sps:$4 sm:$0xff]  }
  0x12   :  { %v9250_v52 = vld [vmem:[%s15528_s5 + $0x16c] ss:$16 sps:$4 sm:$0xff]   ;;  %v9240_v53 = vld [vmem:[%s15528_s5 + $0x140] ss:$16 sps:$4 sm:$0xff]   ;;  %v9242_v54 = vld [vmem:[%s15528_s5 + $0x124] ss:$16 sps:$4 sm:$0xff]  }
  0x13   :  { %665 = vmatpush1.bf16.msra.mxu0 %v9186_v17  ;;  %706 = vmatpush1.bf16.msra.mxu1 %v9205_v23  ;;  %v9253_v55 = vld [vmem:[%s15528_s5 + $0x168] ss:$16 sps:$4 sm:$0xff]   ;;  %v9254_v56 = vld [vmem:[%s15528_s5 + $0x14c] ss:$16 sps:$4 sm:$0xff]   ;;  %v9246_v57 = vld [vmem:[%s15528_s5 + $0x120] ss:$16 sps:$4 sm:$0xff]  }
  0x14   :  { %666 = vmatprep.subr.bf16.mxu0 %v9188_v18  ;;  %707 = vmatprep.subr.bf16.mxu1 %v9208_v24  ;;  %v9248_v58 = vld [vmem:[%s15528_s5 + $0x104] ss:$16 sps:$4 sm:$0xff]   ;;  %v9256_v59 = vld [vmem:[%s15528_s5 + $0x148] ss:$16 sps:$4 sm:$0xff]   ;;  %v9257_v60 = vld [vmem:[%s15528_s5 + $0x12c] ss:$16 sps:$4 sm:$0xff]  }
  0x15   :  { %v9252_v61 = vld [vmem:[%s15528_s5 + $0x100] ss:$16 sps:$4 sm:$0xff]   ;;  %v9259_v63 = vld [vmem:[%s15528_s5 + $0x128] ss:$16 sps:$4 sm:$0xff]   ;;  %v9260_v0 = vld [vmem:[%s15528_s5 + $0x10c] ss:$16 sps:$4 sm:$0xff]  }
  0x16   :  { %v333_v62 = vld [vmem:[%s15529_s0] sm:$0xff]  ;;  %v9262_v2 = vld [vmem:[%s15528_s5 + $0x108] ss:$16 sps:$4 sm:$0xff]   ;;  %v9265_v5 = vld [vmem:[%s15530_s7 + $0x70] sm:$0xff]   ;;  %vm1086_vm3 = vcmask 1044484   ;;  %vm1088_vm4 = vcmask 1045509  }
  0x17   :  { %667 = vmatpush1.bf16.msra.mxu0 %v9192_v21  ;;  %708 = vmatpush1.bf16.msra.mxu1 %v9211_v27  ;;  %v334_v1 = vpack.c.bf16 %v333_v62, %v333_v62  ;;  %v9263_v3 = vld [vmem:[%s15530_s7 + $0x78] sm:$0xff]   ;;  %v9266_v6 = vld [vmem:[%s15530_s7 + $0x30] sm:$0xff]   ;;  %v9267_v7 = vld [vmem:[%s15530_s7 + $0x68] sm:$0xff]   ;;  %v265_v21 = vlaneseq  ;;  %vm1090_vm5 = vcmask 1046534   ;;  %vm1092_vm6 = vcmask 1047559  }
  0x18   :  { %668 = vmatprep.subr.bf16.mxu0 %v9194_v22  ;;  %709 = vmatprep.subr.bf16.mxu1 %v9214_v28  ;;  %v9264_v4 = vld [vmem:[%s15530_s7 + $0x38] sm:$0xff]   ;;  %v9268_v8 = vld [vmem:[%s15530_s7 + $0x28] sm:$0xff]   ;;  %v9269_v9 = vld [vmem:[%s15530_s7 + $0x60] sm:$0xff]   ;;  %vm1095_vm7 = vcmask 64512   ;;  %vm1317_vm8 = vcmask 1043456   ;;  %vm10838_vm9 = vmmov 0  }
  0x19   :  { %v9270_v10 = vld [vmem:[%s15530_s7 + $0x20] sm:$0xff]   ;;  %v9271_v11 = vld [vmem:[%s15530_s7 + $0x58] sm:$0xff]   ;;  %v9273_v13 = vld [vmem:[%s15530_s7 + $0x50] sm:$0xff]   ;;  %v11156_v22 = vshrl.u32 %v265_v21, 7 }
  0x1a   :  { %v9272_v12 = vld [vmem:[%s15530_s7 + $0x18] sm:$0xff]   ;;  %v332_v14 = vld [vmem:[%s15531_s4] sm:$0xff]  ;;  %v9274_v15 = vld [vmem:[%s15530_s7 + $0x10] sm:$0xff]  }
  0x1b   :  { %669 = vmatpush1.bf16.msra.mxu0 %v9198_v25  ;;  %710 = vmatpush1.bf16.msra.mxu1 %v9217_v31  ;;  %v763_v16 = vpack.c.bf16 %v332_v14, %v332_v14  ;;  %v9275_v17 = vld [vmem:[%s15530_s7 + $0x48] sm:$0xff]   ;;  %v9277_v19 = vld [vmem:[%s15530_s7 + $0x40] sm:$0xff]   ;;  %v11159_v23 = vsub.s32 0, %v11156_v22  ;;  %v11165_v25 = vsub.s32 1, %v11156_v22 }
  0x1c   :  { %670 = vmatprep.subr.bf16.mxu0 %v9200_v26  ;;  %711 = vmatprep.subr.bf16.mxu1 %v9220_v32  ;;  %v9276_v18 = vld [vmem:[%s15530_s7 + $0x8] sm:$0xff]   ;;  %v9278_v20 = vld [vmem:[%s15530_s7] sm:$0xff]  }
  0x1d   :  { %v263_v24 = vld [vmem:[%s15532_s6] sm:$0xf] }
  0x1e   :  { %v11168_v26 = vrot.slane %v263_v24, %v11159_v23  ;;  %v11171_v27 = vrot.slane %v263_v24, %v11165_v25 }
  0x1f   :  { %671 = vmatpush1.bf16.msra.mxu0 %v9204_v29  ;;  %712 = vmatpush1.bf16.msra.mxu1 %v9223_v35 }
  0x20   :  { %672 = vmatprep.subr.bf16.mxu0 %v9206_v30  ;;  %713 = vmatprep.subr.bf16.mxu1 %v9226_v36 }
  0x23   :  { %673 = vmatpush2.bf16.msra.mxu0 %v9210_v33  ;;  %714 = vmatpush2.bf16.msra.mxu1 %v9229_v39 }
  0x24   :  { %674 = vmatprep.subr.bf16.mxu0 %v9212_v34  ;;  %715 = vmatprep.subr.bf16.mxu1 %v9232_v40  ;;  %v11176_v34 = vsub.s32 3, %v11156_v22 }
  0x26   :  { %v11182_v40 = vrot.slane %v263_v24, %v11176_v34 }
  0x27   :  { %675 = vmatpush2.bf16.msra.mxu0 %v9216_v37  ;;  %716 = vmatpush2.bf16.msra.mxu1 %v9235_v43 }
  0x28   :  { %676 = vmatprep.subr.bf16.mxu0 %v9218_v38  ;;  %717 = vmatprep.subr.bf16.mxu1 %v9238_v44  ;;  %v11179_v38 = vsub.s32 2, %v11156_v22 }
  0x2b   :  { %677 = vmatpush2.bf16.msra.mxu0 %v9222_v41  ;;  %718 = vmatpush2.bf16.msra.mxu1 %v9241_v47 }
  0x2c   :  { %678 = vmatprep.subr.bf16.mxu0 %v9224_v42  ;;  %719 = vmatprep.subr.bf16.mxu1 %v9244_v48  ;;  %v11185_v42 = vrot.slane %v263_v24, %v11179_v38 }
  0x2f   :  { %679 = vmatpush2.bf16.msra.mxu0 %v9228_v45  ;;  %720 = vmatpush2.bf16.msra.mxu1 %v9247_v51 }
  0x30   :  { %680 = vmatprep.subr.bf16.mxu0 %v9230_v46  ;;  %721 = vmatprep.subr.bf16.mxu1 %v9250_v52 }
  0x33   :  { %681 = vmatpush2.bf16.msra.mxu0 %v9234_v49  ;;  %722 = vmatpush2.bf16.msra.mxu1 %v9253_v55 }
  0x34   :  { %682 = vmatprep.subr.bf16.mxu0 %v9236_v50  ;;  %723 = vmatprep.subr.bf16.mxu1 %v9254_v56 }
  0x37   :  { %683 = vmatpush2.bf16.msra.mxu0 %v9240_v53  ;;  %724 = vmatpush2.bf16.msra.mxu1 %v9256_v59 }
  0x38   :  { %684 = vmatprep.subr.bf16.mxu0 %v9242_v54  ;;  %725 = vmatprep.subr.bf16.mxu1 %v9257_v60 }
  0x3b   :  { %685 = vmatpush2.bf16.msra.mxu0 %v9246_v57  ;;  %726 = vmatpush2.bf16.msra.mxu1 %v9259_v63  ;;  %v10835_v63 = vmov 0  }
  0x3c   :  { %686 = vmatprep.subr.bf16.mxu0 %v9248_v58  ;;  %727 = vmatprep.subr.bf16.mxu1 %v9260_v0  ;;  %v18_v0 = vstv %s15533_s10 }
  0x3d   :  { %9165 = vset.pattern.permute.xlu0 %v10835_v63  ;;  %9166 = vset.pattern.permute.xlu1 %v10835_v63  ;;  %19 = vst [vmem:[#allocation2] sm:$0x1] %v18_v0 }
  0x3f   :  { %687 = vmatpush2.bf16.msra.mxu0 %v9252_v61  ;;  %728 = vmatpush2.bf16.msra.mxu1 %v9262_v2 }
  0x40   :  { %8644 = vmatprep.subr.bf16.mxu0 %v9263_v3 }
  0x42   :  { %689 = vmatmul.mubr.bf16.vlgmr.msra.gmra.mxu0 %v334_v1  ;;  %730 = vmatmul.mubr.bf16.vlgmr.msra.gmra.mxu1 %v334_v1  ;;  %v10836_v1 = vmov 1966171168  }
  0x43   :  { %8645 = vmatpush3.bf16.msra.mxu0 %v9264_v4  ;;  %892 = vmatprep.mubr.bf16.mxu0 %v763_v16  ;;  %v903_v2 = vunpack.c.l.s4 %v10836_v1 }
  0x44   :  { %8646 = vmatprep.subr.bf16.mxu0 %v9265_v5  ;;  %v8371_v5 = vld [vmem:[%s15534_s8] ss:$0 sm:$0xff] }
  0x45   :  { %v904_v3 = vunpack.c.0.s8 %v903_v2 }
  0x47   :  { %8647 = vmatpush3.bf16.msra.mxu0 %v9266_v6 }
  0x48   :  { %8648 = vmatprep.subr.bf16.mxu0 %v9267_v7  ;;  %v11204_v7 = vsub.s32 %v904_v3, %v11156_v22 }
  0x4b   :  { %8649 = vmatpush3.bf16.msra.mxu0 %v9268_v8 }
  0x4c   :  { %8650 = vmatprep.subr.bf16.mxu0 %v9269_v9 }
  0x4f   :  { %8651 = vmatpush3.bf16.msra.mxu0 %v9270_v10 }
  0x50   :  { %8652 = vmatprep.subr.bf16.mxu0 %v9271_v11 }
  0x53   :  { %8653 = vmatpush3.bf16.msra.mxu0 %v9272_v12 }
  0x54   :  { %8654 = vmatprep.subr.bf16.mxu0 %v9273_v13 }
  0x57   :  { %8655 = vmatpush3.bf16.msra.mxu0 %v9274_v15 }
  0x58   :  { %8656 = vmatprep.subr.bf16.mxu0 %v9275_v17  ;;  %v47_v17 = vld [vmem:[%s15535_s1] sm:$0xff] }
  0x5b   :  { %8657 = vmatpush3.bf16.msra.mxu0 %v9276_v18 }
  0x5c   :  { %8658 = vmatprep.subr.bf16.mxu0 %v9277_v19 }
  0x5f   :  { %8659 = vmatpush3.bf16.msra.mxu0 %v9278_v20 }
 0x102   :  { %v690_v28 = vpop.f32.mrf.mxu0  ;;  %v731_v36 = vpop.f32.mrf.mxu1 }
 0x103   :  { %v691_v29 = vadd.f32 %v690_v28, %v11168_v26  ;;  %v732_v45 = vadd.f32 %v731_v36, %v11185_v42 }
 0x104   :  { %v692_v30 = vpop.f32.mrf.mxu0  ;;  %v733_v39 = vpop.f32.mrf.mxu1 }
 0x105   :  { %v8438_v31 = vmul.f32 -1.442695, %v691_v29  ;;  %v693_v32 = vadd.f32 %v692_v30, %v11171_v27  ;;  %v734_v44 = vadd.f32 %v733_v39, %v11182_v40  ;;  %v48_v29 = vld [vmem:[%s15535_s1 + $0x8] sm:$0xff]  ;;  %v49_v30 = vld [vmem:[%s15535_s1 + $0x10] sm:$0xff] }
 0x106   :  { %v694_v33 = vpop.f32.mrf.mxu0  ;;  %v735_v41 = vpop.f32.mrf.mxu1 }
 0x107   :  { %9423 = vpow2.f32 %v8438_v31  ;;  %v8439_v35 = vmul.f32 -1.442695, %v693_v32  ;;  %v8440_v46 = vmul.f32 -1.442695, %v734_v44 }
 0x108   :  { %v695_v37 = vpop.f32.mrf.mxu0  ;;  %v736_v43 = vpop.f32.mrf.mxu1 }
 0x109   :  { %9425 = vpow2.f32 %v8439_v35  ;;  %v50_v35 = vld [vmem:[%s15535_s1 + $0x18] sm:$0xff]  ;;  %v51_v43 = vld [vmem:[%s15535_s1 + $0x20] sm:$0xff] }
 0x10a   :  { %9427 = vtanh.f32 %v732_v45 }
 0x10b   :  { %9429 = vpow2.f32 %v8440_v46 }
 0x114   :  { %v9424_v47 = vpop.eup %9423 }
 0x115   :  { %v741_v48 = vadd.f32 1.0, %v9424_v47 }
 0x116   :  { %v9426_v49 = vpop.eup %9425 }
 0x117   :  { %9431 = vrcp.f32 %v741_v48  ;;  %v747_v50 = vadd.f32 1.0, %v9426_v49  ;;  %v9428_v51 = vpop.eup %9427 }
 0x118   :  { %v9430_v52 = vpop.eup %9429 }
 0x119   :  { %9433 = vrcp.f32 %v747_v50  ;;  %v754_v55 = vadd.f32 1.0, %v9430_v52  ;;  %v52_v50 = vld [vmem:[%s15535_s1 + $0x28] sm:$0xff] }
 0x11b   :  { %9435 = vrcp.f32 %v754_v55 }
 0x124   :  { %v9432_v53 = vpop.eup %9431 }
 0x125   :  { %v758_v57 = vmul.f32 %v9432_v53, %v9428_v51  ;;  %v53_v53 = vld [vmem:[%s15535_s1 + $0x30] sm:$0xff] }
 0x126   :  { %v9434_v54 = vpop.eup %9433 }
 0x127   :  { %v757_v56 = vmul.f32 0.0, %v9434_v54 }
 0x128   :  { %v9436_v59 = vpop.eup %9435 }
 0x129   :  { %v11189_v58 = vadd.f32 %v758_v57, %v757_v56  ;;  %v54_v57 = vld [vmem:[%s15535_s1 + $0x38] sm:$0xff] }
 0x12b   :  { %9437 = vtanh.f32 %v11189_v58 }
 0x138   :  { %v9438_v60 = vpop.eup %9437 }
 0x139   :  { %v761_v61 = vmul.f32 %v9438_v60, %v9436_v59  ;;  %v8372_v60 = vld [vmem:[%s15536_s9] ss:$0 sm:$0xff] }
 0x13b   :  { %v11192_v62 = vpack.c.bf16 %v761_v61, %v761_v61 }
 0x13d   :  { %893 = vmatmul.mubr.bf16.vlgmr.msra.gmra.mxu0 %v11192_v62 }
 0x1fd   :  { %v8660_v4 = vpop.f32.mrf.mxu0 }
 0x1ff   :  { %v8661_v6 = vpop.f32.mrf.mxu0 }
 0x200   :  { %v8662_v8 = vadd.f32 %v8661_v6, %v8660_v4 }
 0x201   :  { %v8663_v9 = vpop.f32.mrf.mxu0 }
 0x202   :  { %v895_v10 = vadd.f32 %v8662_v8, %v8371_v5 }
 0x203   :  { %v8664_v11 = vpop.f32.mrf.mxu0 }
 0x204   :  { %v901_v12 = vcombine.high %v895_v10, %v895_v10  ;;  %v908_v13 = vrot.slane %v895_v10, %v11204_v7 }
 0x206   :  { %v915_v14 = vrot.slane %v901_v12, %v11204_v7  ;;  %v916_v15 = vcombine.high %v908_v13, %v908_v13  ;;  %v924_v16 = vrot.slane %v908_v13, %v11204_v7 }
 0x208   :  { %v917_v18 = vcombine.high %v915_v14, %v915_v14  ;;  %v931_v19 = vrot.slane %v915_v14, %v11204_v7  ;;  %v938_v20 = vrot.slane %v916_v15, %v11204_v7  ;;  %v946_v24 = vcombine.high %v924_v16, %v924_v16 }
 0x209   :  { %v953_v28 = vrot.slane %v924_v16, %v11159_v23  ;;  %v8373_v16 = vld [vmem:[#allocation2] ss:$0 sm:$0xff] }
 0x20a   :  { %v945_v31 = vrot.slane %v917_v18, %v11204_v7  ;;  %v948_v32 = vcombine.high %v938_v20, %v938_v20  ;;  %v957_v33 = vrot.slane %v938_v20, %v11159_v23  ;;  %v947_v36 = vcombine.high %v931_v19, %v931_v19 }
 0x20b   :  { %v961_v37 = vrot.slane %v946_v24, %v11159_v23  ;;  %v969_v39 = vrot.slane %v931_v19, %v11159_v23  ;;  %v990_v41 = vadd.f32 %v953_v28, %v47_v17  ;;  %v1047_v28 = vand.u32 127, %v265_v21 }
 0x20c   :  { %v965_v44 = vrot.slane %v948_v32, %v11159_v23  ;;  %v991_v45 = vadd.f32 %v957_v33, %v48_v29  ;;  %v949_v47 = vcombine.high %v945_v31, %v945_v31  ;;  %v973_v48 = vrot.slane %v945_v31, %v11159_v23 }
 0x20d   :  { %v992_v46 = vadd.f32 %v961_v37, %v49_v30  ;;  %9439 = vtanh.f32 %v990_v41  ;;  %v977_v51 = vrot.slane %v947_v36, %v11159_v23  ;;  %v994_v52 = vadd.f32 %v969_v39, %v51_v43 }
 0x20e   :  { %v993_v49 = vadd.f32 %v965_v44, %v50_v35  ;;  %9441 = vtanh.f32 %v991_v45  ;;  %v981_v54 = vrot.slane %v949_v47, %v11159_v23  ;;  %v995_v55 = vadd.f32 %v973_v48, %v52_v50 }
 0x20f   :  { %9443 = vtanh.f32 %v992_v46  ;;  %v996_v56 = vadd.f32 %v977_v51, %v53_v53  ;;  %v11249_v31 = vsub.s32 %v1047_v28, %v11156_v22 }
 0x210   :  { %9445 = vtanh.f32 %v993_v49  ;;  %v997_v59 = vadd.f32 %v981_v54, %v54_v57 }
 0x211   :  { %9447 = vtanh.f32 %v994_v52 }
 0x212   :  { %9449 = vtanh.f32 %v995_v55 }
 0x213   :  { %9451 = vtanh.f32 %v996_v56 }
 0x214   :  { %9453 = vtanh.f32 %v997_v59 }
 0x21a   :  { %v9440_v61 = vpop.eup %9439 }
 0x21b   :  { %v1006_v0 = vmul.f32 %v9440_v61, %v8372_v60  ;;  %v9442_v1 = vpop.eup %9441 }
 0x21c   :  { %v9444_v2 = vpop.eup %9443  ;;  %v1007_v5 = vmul.f32 %v9442_v1, %v8372_v60 }
 0x21d   :  { %1014 = vadd.xlane.f32.xlu0 %v1006_v0  ;;  %v1008_v3 = vmul.f32 %v9444_v2, %v8372_v60  ;;  %v9446_v4 = vpop.eup %9445  ;;  %v11278_v0 = vsub.s32 7, %v11156_v22 }
 0x21e   :  { %v9448_v6 = vpop.eup %9447  ;;  %v1009_v8 = vmul.f32 %v9446_v4, %v8372_v60 }
 0x21f   :  { %1018 = vadd.xlane.f32.xlu1 %v1008_v3  ;;  %v9450_v9 = vpop.eup %9449  ;;  %v1010_v10 = vmul.f32 %v9448_v6, %v8372_v60 }
 0x220   :  { %v9452_v11 = vpop.eup %9451  ;;  %v1011_v12 = vmul.f32 %v9450_v9, %v8372_v60 }
 0x221   :  { %1016 = vadd.xlane.f32.xlu0 %v1007_v5  ;;  %v9454_v13 = vpop.eup %9453  ;;  %v1012_v14 = vmul.f32 %v9452_v11, %v8372_v60 }
 0x222   :  { %v1013_v15 = vmul.f32 %v9454_v13, %v8372_v60 }
 0x223   :  { %1020 = vadd.xlane.f32.xlu1 %v1009_v8 }
 0x225   :  { %1022 = vadd.xlane.f32.xlu0 %v1010_v10  ;;  %v11285_v10 = vsub.s32 4, %v11156_v22 }
 0x227   :  { %1024 = vadd.xlane.f32.xlu1 %v1011_v12 }
 0x229   :  { %1026 = vadd.xlane.f32.xlu0 %v1012_v14 }
 0x22b   :  { %1028 = vadd.xlane.f32.xlu1 %v1013_v15  ;;  %v11289_v15 = vsub.s32 5, %v11156_v22 }
 0x23f   :  { %328 = vperm.xlu0 %9165, %v8373_v16  }
 0x2a6   :  { %v1015_v17 = vpop.xlane.xlu0 %1014 }
 0x2a8   :  { %v1019_v19 = vpop.xlane.xlu1 %1018 }
 0x2aa   :  { %v1017_v18 = vpop.xlane.xlu0 %1016 }
 0x2ac   :  { %v1021_v24 = vpop.xlane.xlu1 %1020 }
 0x2ae   :  { %v1023_v20 = vpop.xlane.xlu0 %1022 }
 0x2b0   :  { %v1025_v30 = vpop.xlane.xlu1 %1024 }
 0x2b2   :  { %v1027_v29 = vpop.xlane.xlu0 %1026 }
 0x2b4   :  { %v1029_v45 = vpop.xlane.xlu1 %1028 }
 0x2ba   :  { %v11251_v32 = vpop.permute.xlu0 %328 }
 0x2bb   :  { %v1030_v33 = vadd.f32 %v1015_v17, %v11251_v32  ;;  %v1031_v35 = vadd.f32 %v1017_v18, %v11251_v32  ;;  %v1032_v36 = vadd.f32 %v1019_v19, %v11251_v32  ;;  %v1033_v37 = vadd.f32 %v1021_v24, %v11251_v32 }
 0x2bc   :  { %v1034_v39 = vadd.f32 %v1023_v20, %v11251_v32  ;;  %v1035_v21 = vadd.f32 %v1025_v30, %v11251_v32  ;;  %v1036_v46 = vadd.f32 %v1027_v29, %v11251_v32  ;;  %v1037_v47 = vadd.f32 %v1029_v45, %v11251_v32 }
 0x2bd   :  { %v1051_v41 = vrot.slane %v1030_v33, %v11249_v31  ;;  %v1055_v43 = vrot.slane %v1031_v35, %v11249_v31  ;;  %v1059_v44 = vrot.slane %v1032_v36, %v11249_v31  ;;  %v1063_v48 = vrot.slane %v1033_v37, %v11249_v31 }
 0x2be   :  { %v1067_v50 = vrot.slane %v1034_v39, %v11249_v31  ;;  %v1071_v52 = vrot.slane %v1035_v21, %v11249_v31  ;;  %v1075_v54 = vrot.slane %v1036_v46, %v11249_v31  ;;  %v1079_v56 = vrot.slane %v1037_v47, %v11249_v31 }
 0x2bf   :  { %v1081_v49 = vsel %vm1080_vm0, %v1055_v43, %v1051_v41  ;;  %v11293_v20 = vsub.s32 6, %v11156_v22 }
 0x2c0   :  { %v1083_v51 = vsel %vm1082_vm1, %v1059_v44, %v1081_v49 }
 0x2c1   :  { %v1085_v53 = vsel %vm1084_vm2, %v1063_v48, %v1083_v51 }
 0x2c2   :  { %v1087_v55 = vsel %vm1086_vm3, %v1067_v50, %v1085_v53 }
 0x2c3   :  { %v1089_v57 = vsel %vm1088_vm4, %v1071_v52, %v1087_v55 }
 0x2c4   :  { %v1091_v59 = vsel %vm1090_vm5, %v1075_v54, %v1089_v57 }
 0x2c5   :  { %v1093_v60 = vsel %vm1092_vm6, %v1079_v56, %v1091_v59 }
 0x2c6   :  { %v1096_v61 = vsel %vm1095_vm7, %v1093_v60, -inf }
 0x2c7   :  { %1097 = vmax.xlane.f32.xlu1 %v1096_v61 }
 0x350   :  { %v1098_v1 = vpop.xlane.xlu1 %1097 }
 0x351   :  { %v1103_v2 = vrot.slane %v1098_v1, %v11159_v23  ;;  %v1107_v3 = vrot.slane %v1098_v1, %v11165_v25  ;;  %v1131_v4 = vrot.slane %v1098_v1, %v11278_v0  ;;  %v1111_v5 = vrot.slane %v1098_v1, %v11179_v38 }
 0x352   :  { %v1115_v12 = vrot.slane %v1098_v1, %v11176_v34  ;;  %v1119_v17 = vrot.slane %v1098_v1, %v11285_v10  ;;  %v1123_v24 = vrot.slane %v1098_v1, %v11289_v15  ;;  %v1127_v30 = vrot.slane %v1098_v1, %v11293_v20 }
 0x353   :  { %v1140_v6 = vsub.f32 %v1030_v33, %v1103_v2  ;;  %v1141_v8 = vsub.f32 %v1031_v35, %v1107_v3  ;;  %v1147_v11 = vsub.f32 %v1037_v47, %v1131_v4  ;;  %v1142_v13 = vsub.f32 %v1032_v36, %v1111_v5 }
 0x354   :  { %v1143_v18 = vsub.f32 %v1033_v37, %v1115_v12  ;;  %v1144_v28 = vsub.f32 %v1034_v39, %v1119_v17  ;;  %v1145_v33 = vsub.f32 %v1035_v21, %v1123_v24  ;;  %v1146_v37 = vsub.f32 %v1036_v46, %v1127_v30 }
 0x355   :  { %v1148_v9 = vmul.f32 1.442695, %v1140_v6  ;;  %v1150_v14 = vmul.f32 1.442695, %v1141_v8  ;;  %v1162_v16 = vmul.f32 1.442695, %v1147_v11 }
 0x356   :  { %v1152_v19 = vmul.f32 1.442695, %v1142_v13  ;;  %v1154_v29 = vmul.f32 1.442695, %v1143_v18  ;;  %v1156_v35 = vmul.f32 1.442695, %v1144_v28 }
 0x357   :  { %9455 = vpow2.f32 %v1148_v9  ;;  %v1158_v41 = vmul.f32 1.442695, %v1145_v33  ;;  %v1160_v39 = vmul.f32 1.442695, %v1146_v37 }
 0x358   :  { %9457 = vpow2.f32 %v1150_v14  ;;  %v10837_v14 = vmov 0.0  }
 0x359   :  { %9459 = vpow2.f32 %v1162_v16  ;;  %8872 = vmatprep.subr.bf16.mxu1 %v10837_v14  ;;  %v55_v16 = vld [vmem:[%s15537_s2] sm:$0xff]  ;;  %8896 = vmatprep.subr.bf16.mxu0 %v10837_v14 }
 0x35a   :  { %9461 = vpow2.f32 %v1152_v19  ;;  %v63_v17 = vpack.c.bf16 %v55_v16, %v55_v16  ;;  %8874 = vmatprep.mubr.msk.bf16.mxu1 %vm10838_vm9, %v10837_v14  ;;  %8898 = vmatprep.mubr.msk.bf16.mxu0 %vm10838_vm9, %v10837_v14 }
 0x35b   :  { %9463 = vpow2.f32 %v1154_v29 }
 0x35c   :  { %9465 = vpow2.f32 %v1156_v35  ;;  %v11343_v18 = vsel %vm1317_vm8, %v63_v17, 0 }
 0x35d   :  { %9467 = vpow2.f32 %v1158_v41  ;;  %8873 = vmatpush3.bf16.msra.mxu1 %v11343_v18 }
 0x35e   :  { %9469 = vpow2.f32 %v1160_v39  ;;  %8878 = vmatprep.subr.bf16.mxu1 %v10837_v14 }
 0x364   :  { %v11297_v36 = vpop.eup %9455 }
 0x365   :  { %1173 = vperm.xlu1 %9166, %v11297_v36   ;;  %v11300_v22 = vpop.eup %9457 }
 0x366   :  { %v11303_v43 = vpop.eup %9459 }
 0x367   :  { %v11305_v44 = vpop.eup %9461  ;;  %1194 = vperm.xlu0 %9165, %v11303_v43  }
 0x368   :  { %v11309_v21 = vpop.eup %9463 }
 0x369   :  { %1176 = vperm.xlu1 %9166, %v11300_v22   ;;  %v11312_v45 = vpop.eup %9465 }
 0x36a   :  { %v11315_v46 = vpop.eup %9467 }
 0x36b   :  { %v11318_v47 = vpop.eup %9469 }
 0x36d   :  { %1179 = vperm.xlu1 %9166, %v11305_v44  }
 0x371   :  { %1182 = vperm.xlu1 %9166, %v11309_v21  }
 0x375   :  { %1185 = vperm.xlu1 %9166, %v11312_v45  }
 0x379   :  { %1188 = vperm.xlu1 %9166, %v11315_v46  }
 0x37d   :  { %1191 = vperm.xlu1 %9166, %v11318_v47  }
 0x3e0   :  { %v1174_v48 = vpop.permute.xlu1 %1173 }
 0x3e1   :  { %v1199_v55 = vrot.slane %v1174_v48, %v11249_v31 }
 0x3e2   :  { %v1195_v1 = vpop.permute.xlu0 %1194 }
 0x3e3   :  { %v1227_v8 = vrot.slane %v1195_v1, %v11249_v31 }
 0x3e4   :  { %v1177_v49 = vpop.permute.xlu1 %1176 }
 0x3e5   :  { %v1203_v53 = vrot.slane %v1177_v49, %v11249_v31 }
 0x3e7   :  { %v1228_v60 = vsel %vm1080_vm0, %v1203_v53, %v1199_v55 }
 0x3e8   :  { %v1180_v50 = vpop.permute.xlu1 %1179 }
 0x3e9   :  { %v1207_v54 = vrot.slane %v1180_v50, %v11249_v31 }
 0x3eb   :  { %v1229_v2 = vsel %vm1082_vm1, %v1207_v54, %v1228_v60 }
 0x3ec   :  { %v1183_v51 = vpop.permute.xlu1 %1182 }
 0x3ed   :  { %v1211_v56 = vrot.slane %v1183_v51, %v11249_v31 }
 0x3ef   :  { %v1230_v3 = vsel %vm1084_vm2, %v1211_v56, %v1229_v2 }
 0x3f0   :  { %v1186_v52 = vpop.permute.xlu1 %1185 }
 0x3f1   :  { %v1215_v59 = vrot.slane %v1186_v52, %v11249_v31 }
 0x3f3   :  { %v1231_v5 = vsel %vm1086_vm3, %v1215_v59, %v1230_v3 }
 0x3f4   :  { %v1189_v57 = vpop.permute.xlu1 %1188 }
 0x3f5   :  { %v1219_v61 = vrot.slane %v1189_v57, %v11249_v31 }
 0x3f7   :  { %v1232_v9 = vsel %vm1088_vm4, %v1219_v61, %v1231_v5 }
 0x3f8   :  { %v1192_v4 = vpop.permute.xlu1 %1191 }
 0x3f9   :  { %v1223_v6 = vrot.slane %v1192_v4, %v11249_v31 }
 0x3fb   :  { %v1233_v11 = vsel %vm1090_vm5, %v1223_v6, %v1232_v9 }
 0x3fc   :  { %v1234_v12 = vsel %vm1092_vm6, %v1227_v8, %v1233_v11 }
 0x3fd   :  { %v1236_v13 = vsel %vm1095_vm7, %v1234_v12, 0.0 }
 0x3fe   :  { %1237 = vadd.xlane.f32.xlu1 %v1236_v13 }
 0x487   :  { %v1238_v19 = vpop.xlane.xlu1 %1237 }
 0x488   :  { %v1243_v24 = vrot.slane %v1238_v19, %v11159_v23  ;;  %v1247_v28 = vrot.slane %v1238_v19, %v11165_v25  ;;  %v1251_v29 = vrot.slane %v1238_v19, %v11179_v38  ;;  %v1255_v30 = vrot.slane %v1238_v19, %v11176_v34 }
 0x489   :  { %v1259_v33 = vrot.slane %v1238_v19, %v11285_v10  ;;  %v1263_v35 = vrot.slane %v1238_v19, %v11289_v15  ;;  %v1267_v41 = vrot.slane %v1238_v19, %v11293_v20  ;;  %v1271_v52 = vrot.slane %v1238_v19, %v11278_v0 }
 0x48a   :  { %9471 = vrcp.f32 %v1243_v24  ;;  %v56_v24 = vld [vmem:[%s15537_s2 + $0x8] sm:$0xff] }
 0x48b   :  { %9473 = vrcp.f32 %v1247_v28  ;;  %v64_v28 = vpack.c.bf16 %v56_v24, %v56_v24 }
 0x48c   :  { %9475 = vrcp.f32 %v1251_v29 }
 0x48d   :  { %9477 = vrcp.f32 %v1255_v30 }
 0x48e   :  { %9479 = vrcp.f32 %v1259_v33 }
 0x48f   :  { %9481 = vrcp.f32 %v1263_v35 }
 0x490   :  { %9483 = vrcp.f32 %v1267_v41 }
 0x491   :  { %9485 = vrcp.f32 %v1271_v52  ;;  %v58_v52 = vld [vmem:[%s15537_s2 + $0x18] sm:$0xff] }
 0x497   :  { %v9472_v37 = vpop.eup %9471 }
 0x498   :  { %v9474_v39 = vpop.eup %9473  ;;  %v1281_v48 = vmul.f32 %v9472_v37, %v11297_v36  ;;  %v57_v37 = vld [vmem:[%s15537_s2 + $0x10] sm:$0xff] }
 0x499   :  { %v9476_v49 = vpop.eup %9475  ;;  %v1283_v50 = vmul.f32 %v9474_v39, %v11300_v22  ;;  %v65_v39 = vpack.c.bf16 %v57_v37, %v57_v37  ;;  %v9323_v37 = vld [vmem:[%s15538_s11 + $0x80] ss:$16 sps:$4 sm:$0xff]  }
 0x49a   :  { %v1296_v51 = vpack.c.bf16 %v1281_v48, %v1281_v48  ;;  %v1285_v55 = vmul.f32 %v9476_v49, %v11305_v44  ;;  %v9478_v56 = vpop.eup %9477 }
 0x49b   :  { %v1297_v54 = vpack.c.bf16 %v1283_v50, %v1283_v50  ;;  %v1287_v22 = vmul.f32 %v9478_v56, %v11309_v21  ;;  %v9480_v59 = vpop.eup %9479  ;;  %v59_v21 = vld [vmem:[%s15537_s2 + $0x20] sm:$0xff]  ;;  %v11392_v50 = vsel %vm1317_vm8, %v65_v39, 0 }
 0x49c   :  { %v1305_v53 = vunpack.c.l.b16 %v1296_v51  ;;  %v1298_v57 = vpack.c.bf16 %v1285_v55, %v1285_v55  ;;  %v1289_v44 = vmul.f32 %v9480_v59, %v11312_v45  ;;  %v9482_v1 = vpop.eup %9481  ;;  %v67_v12 = vpack.c.bf16 %v59_v21, %v59_v21  ;;  %v9281_v39 = vld [vmem:[%s15538_s11 + $0x2e0] ss:$16 sps:$4 sm:$0xff]  }
 0x49d   :  { %v1362_v36 = vunpack.c.l.b16 %v1297_v54  ;;  %v1299_v61 = vpack.c.bf16 %v1287_v22, %v1287_v22  ;;  %v9484_v2 = vpop.eup %9483  ;;  %v1291_v5 = vmul.f32 %v9482_v1, %v11315_v46  ;;  %v66_v55 = vpack.c.bf16 %v58_v52, %v58_v52  ;;  %v60_v1 = vld [vmem:[%s15537_s2 + $0x28] sm:$0xff]  ;;  %v9284_v52 = vld [vmem:[%s15538_s11 + $0x2c0] ss:$16 sps:$4 sm:$0xff]  }
 0x49e   :  { %1307 = vperm.xlu0 %9165, %v1305_v53   ;;  %v1418_v60 = vunpack.c.l.b16 %v1298_v57  ;;  %v1300_v4 = vpack.c.bf16 %v1289_v44, %v1289_v44  ;;  %v1293_v9 = vmul.f32 %v9484_v2, %v11318_v47  ;;  %v9486_v11 = vpop.eup %9485  ;;  %v11370_v45 = vsel %vm1317_vm8, %v67_v12, 0  ;;  %v61_v53 = vld [vmem:[%s15537_s2 + $0x30] sm:$0xff]  ;;  %v62_v12 = vld [vmem:[%s15537_s2 + $0x38] sm:$0xff] }
 0x49f   :  { %v1474_v3 = vunpack.c.l.b16 %v1299_v61  ;;  %v1301_v8 = vpack.c.bf16 %v1291_v5, %v1291_v5  ;;  %v1295_v17 = vmul.f32 %v9486_v11, %v11303_v43  ;;  %8897 = vmatpush3.bf16.msra.mxu0 %v11370_v45  ;;  %v11380_v43 = vsel %vm1317_vm8, %v64_v28, 0  ;;  %v9303_v2 = vld [vmem:[%s15538_s11 + $0xe4] ss:$16 sps:$4 sm:$0xff]   ;;  %v9305_v11 = vld [vmem:[%s15538_s11 + $0xe0] ss:$16 sps:$4 sm:$0xff]  }
 0x4a0   :  { %v1530_v6 = vunpack.c.l.b16 %v1300_v4  ;;  %v1302_v16 = vpack.c.bf16 %v1293_v9, %v1293_v9  ;;  %8908 = vmatprep.subr.bf16.mxu0 %v10837_v14  ;;  %v69_v56 = vpack.c.bf16 %v61_v53, %v61_v53  ;;  %v68_v4 = vpack.c.bf16 %v60_v1, %v60_v1  ;;  %v9279_v28 = vld [vmem:[%s15538_s11 + $0x2e4] ss:$16 sps:$4 sm:$0xff]   ;;  %v9299_v1 = vld [vmem:[%s15538_s11 + $0x220] ss:$16 sps:$4 sm:$0xff]  }
 0x4a1   :  { %v1586_v13 = vunpack.c.l.b16 %v1301_v8  ;;  %v1303_v47 = vpack.c.bf16 %v1295_v17, %v1295_v17  ;;  %v70_v17 = vpack.c.bf16 %v62_v12, %v62_v12  ;;  %v9285_v53 = vld [vmem:[%s15538_s11 + $0x2a4] ss:$16 sps:$4 sm:$0xff]   ;;  %v9341_v12 = vld [vmem:[%s15538_s11 + $0x20] ss:$16 sps:$4 sm:$0xff]  }
 0x4a2   :  { %1364 = vperm.xlu0 %9165, %v1362_v36   ;;  %v1642_v46 = vunpack.c.l.b16 %v1302_v16  ;;  %v11411_v61 = vsel %vm1317_vm8, %v69_v56, 0  ;;  %v11431_v21 = vsel %vm1317_vm8, %v68_v4, 0  ;;  %v9290_v56 = vld [vmem:[%s15538_s11 + $0x280] ss:$16 sps:$4 sm:$0xff]  }
 0x4a3   :  { %v1698_v19 = vunpack.c.l.b16 %v1303_v47  ;;  %v9315_v47 = vld [vmem:[%s15538_s11 + $0xa4] ss:$16 sps:$4 sm:$0xff]   ;;  %v11456_v24 = vsel %vm1317_vm8, %v70_v17, 0  ;;  %v9302_v4 = vld [vmem:[%s15538_s11 + $0x200] ss:$16 sps:$4 sm:$0xff]  }
 0x4a4   :  { %v9345_v17 = vld [vmem:[%s15538_s11 + $0x4] ss:$16 sps:$4 sm:$0xff]  }
 0x4a6   :  { %1420 = vperm.xlu0 %9165, %v1418_v60   ;;  %v11408_v60 = vsel %vm1317_vm8, %v66_v55, 0  ;;  %v9288_v55 = vld [vmem:[%s15538_s11 + $0x284] ss:$16 sps:$4 sm:$0xff]  }
 0x4aa   :  { %1476 = vperm.xlu0 %9165, %v1474_v3  }
 0x4ae   :  { %1532 = vperm.xlu0 %9165, %v1530_v6  }
 0x4b2   :  { %1588 = vperm.xlu0 %9165, %v1586_v13   ;;  %v9309_v13 = vld [vmem:[%s15538_s11 + $0xc4] ss:$16 sps:$4 sm:$0xff]  }
 0x4b6   :  { %1644 = vperm.xlu0 %9165, %v1642_v46   ;;  %v9311_v46 = vld [vmem:[%s15538_s11 + $0xc0] ss:$16 sps:$4 sm:$0xff]  }
 0x4ba   :  { %1700 = vperm.xlu0 %9165, %v1698_v19  }
 0x519   :  { %v1308_v29 = vpop.permute.xlu0 %1307 }
 0x51a   :  { %v1312_v30 = vrot.slane %v1308_v29, %v11249_v31  ;;  %v9317_v29 = vld [vmem:[%s15538_s11 + $0xa0] ss:$16 sps:$4 sm:$0xff]  }
 0x51c   :  { %v1313_v33 = vpack.c.b16 %v1312_v30, %v1312_v30 }
 0x51d   :  { %v1365_v35 = vpop.permute.xlu0 %1364 }
 0x51e   :  { %8875 = vmatmul.mubr.msk.bf16.vlgmr.msra.gmra.mxu1 %vm1095_vm7, %v1313_v33  ;;  %v1369_v41 = vrot.slane %v1365_v35, %v11249_v31  ;;  %v9321_v33 = vld [vmem:[%s15538_s11 + $0x84] ss:$16 sps:$4 sm:$0xff]  }
 0x51f   :  { %8879 = vmatpush3.bf16.msra.mxu1 %v11380_v43  ;;  %8880 = vmatprep.mubr.msk.bf16.mxu1 %vm10838_vm9, %v10837_v14 }
 0x520   :  { %8884 = vmatprep.subr.bf16.mxu1 %v10837_v14  ;;  %v1370_v49 = vpack.c.b16 %v1369_v41, %v1369_v41  ;;  %v9327_v41 = vld [vmem:[%s15538_s11 + $0x64] ss:$16 sps:$4 sm:$0xff]  }
 0x521   :  { %v1421_v48 = vpop.permute.xlu0 %1420 }
 0x522   :  { %v1425_v54 = vrot.slane %v1421_v48, %v11249_v31 }
 0x524   :  { %v1426_v22 = vpack.c.b16 %v1425_v54, %v1425_v54  ;;  %v9287_v54 = vld [vmem:[%s15538_s11 + $0x2a0] ss:$16 sps:$4 sm:$0xff]  }
 0x525   :  { %v1477_v51 = vpop.permute.xlu0 %1476 }
 0x526   :  { %8881 = vmatmul.mubr.msk.bf16.vlgmr.msra.gmra.mxu1 %vm1095_vm7, %v1370_v49  ;;  %v1481_v3 = vrot.slane %v1477_v51, %v11249_v31  ;;  %v9282_v49 = vld [vmem:[%s15538_s11 + $0x2c4] ss:$16 sps:$4 sm:$0xff]   ;;  %v9329_v51 = vld [vmem:[%s15538_s11 + $0x60] ss:$16 sps:$4 sm:$0xff]  }
 0x527   :  { %8885 = vmatpush3.bf16.msra.mxu1 %v11392_v50  ;;  %8886 = vmatprep.mubr.msk.bf16.mxu1 %vm10838_vm9, %v10837_v14 }
 0x528   :  { %8890 = vmatprep.subr.bf16.mxu1 %v10837_v14  ;;  %v1482_v8 = vpack.c.b16 %v1481_v3, %v1481_v3  ;;  %v9333_v3 = vld [vmem:[%s15538_s11 + $0x44] ss:$16 sps:$4 sm:$0xff]  }
 0x529   :  { %v1533_v36 = vpop.permute.xlu0 %1532 }
 0x52a   :  { %v1537_v57 = vrot.slane %v1533_v36, %v11249_v31  ;;  %v9291_v36 = vld [vmem:[%s15538_s11 + $0x264] ss:$16 sps:$4 sm:$0xff]  }
 0x52c   :  { %v1538_v59 = vpack.c.b16 %v1537_v57, %v1537_v57  ;;  %v9293_v57 = vld [vmem:[%s15538_s11 + $0x260] ss:$16 sps:$4 sm:$0xff]  }
 0x52d   :  { %v1589_v44 = vpop.permute.xlu0 %1588 }
 0x52e   :  { %8887 = vmatmul.mubr.msk.bf16.vlgmr.msra.gmra.mxu1 %vm1095_vm7, %v1426_v22  ;;  %8899 = vmatmul.mubr.msk.bf16.vlgmr.msra.gmra.mxu0 %vm1095_vm7, %v1538_v59  ;;  %v1593_v16 = vrot.slane %v1589_v44, %v11249_v31  ;;  %v9294_v22 = vld [vmem:[%s15538_s11 + $0x244] ss:$16 sps:$4 sm:$0xff]   ;;  %v9296_v59 = vld [vmem:[%s15538_s11 + $0x240] ss:$16 sps:$4 sm:$0xff]  }
 0x52f   :  { %8891 = vmatpush3.bf16.msra.mxu1 %v11408_v60  ;;  %8909 = vmatpush3.bf16.msra.mxu0 %v11411_v61  ;;  %v9297_v44 = vld [vmem:[%s15538_s11 + $0x224] ss:$16 sps:$4 sm:$0xff]  }
 0x530   :  { %8892 = vmatprep.mubr.msk.bf16.mxu1 %vm10838_vm9, %v10837_v14  ;;  %8902 = vmatprep.subr.bf16.mxu1 %v10837_v14  ;;  %v1594_v19 = vpack.c.b16 %v1593_v16, %v1593_v16  ;;  %v9318_v16 = vld [vmem:[%s15538_s11 + $0xac] ss:$16 sps:$4 sm:$0xff]  }
 0x531   :  { %v1645_v5 = vpop.permute.xlu0 %1644  ;;  %8910 = vmatprep.mubr.msk.bf16.mxu0 %vm10838_vm9, %v10837_v14  ;;  %2258 = vmatprep.subr.bf16.mxu0 %v9303_v2  ;;  %v9300_v2 = vld [vmem:[%s15538_s11 + $0x204] ss:$16 sps:$4 sm:$0xff]  }
 0x532   :  { %v1649_v6 = vrot.slane %v1645_v5, %v11249_v31  ;;  %v9306_v5 = vld [vmem:[%s15538_s11 + $0xec] ss:$16 sps:$4 sm:$0xff]  }
 0x534   :  { %v1650_v9 = vpack.c.b16 %v1649_v6, %v1649_v6  ;;  %v9335_v6 = vld [vmem:[%s15538_s11 + $0x40] ss:$16 sps:$4 sm:$0xff]  }
 0x535   :  { %v1701_v30 = vpop.permute.xlu0 %1700 }
 0x536   :  { %8893 = vmatmul.mubr.msk.bf16.vlgmr.msra.gmra.mxu1 %vm1095_vm7, %v1482_v8  ;;  %8911 = vmatmul.mubr.msk.bf16.vlgmr.msra.gmra.mxu0 %vm1095_vm7, %v1650_v9  ;;  %v1705_v35 = vrot.slane %v1701_v30, %v11249_v31  ;;  %v9339_v8 = vld [vmem:[%s15538_s11 + $0x24] ss:$16 sps:$4 sm:$0xff]   ;;  %v9308_v9 = vld [vmem:[%s15538_s11 + $0xe8] ss:$16 sps:$4 sm:$0xff]  }
 0x537   :  { %8903 = vmatpush3.bf16.msra.mxu1 %v11431_v21  ;;  %8904 = vmatprep.mubr.msk.bf16.mxu1 %vm10838_vm9, %v10837_v14  ;;  %v9326_v30 = vld [vmem:[%s15538_s11 + $0x88] ss:$16 sps:$4 sm:$0xff]  }
 0x538   :  { %8914 = vmatprep.subr.bf16.mxu1 %v10837_v14  ;;  %2259 = vmatpush1.bf16.msra.mxu0 %v9305_v11  ;;  %v1706_v48 = vpack.c.b16 %v1705_v35, %v1705_v35  ;;  %v9312_v11 = vld [vmem:[%s15538_s11 + $0xcc] ss:$16 sps:$4 sm:$0xff]   ;;  %v9357_v35 = vld [vmem:[%s15538_s11 + $0x1c4] ss:$16 sps:$4 sm:$0xff]  }
 0x539   :  { %2260 = vmatprep.subr.bf16.mxu0 %v9309_v13  ;;  %v9314_v13 = vld [vmem:[%s15538_s11 + $0xc8] ss:$16 sps:$4 sm:$0xff]  }
 0x53c   :  { %2261 = vmatpush1.bf16.msra.mxu0 %v9311_v46  ;;  %v9347_v46 = vld [vmem:[%s15538_s11] ss:$16 sps:$4 sm:$0xff]  }
 0x53d   :  { %2262 = vmatprep.subr.bf16.mxu0 %v9315_v47  ;;  %v9351_v47 = vld [vmem:[%s15538_s11 + $0x1e4] ss:$16 sps:$4 sm:$0xff]  }
 0x53e   :  { %8905 = vmatmul.mubr.msk.bf16.vlgmr.msra.gmra.mxu1 %vm1095_vm7, %v1594_v19  ;;  %v9320_v19 = vld [vmem:[%s15538_s11 + $0xa8] ss:$16 sps:$4 sm:$0xff]  }
 0x53f   :  { %8915 = vmatpush3.bf16.msra.mxu1 %v11456_v24  ;;  %8916 = vmatprep.mubr.msk.bf16.mxu1 %vm10838_vm9, %v10837_v14 }
 0x540   :  { %2299 = vmatprep.subr.bf16.mxu1 %v9279_v28  ;;  %2263 = vmatpush1.bf16.msra.mxu0 %v9317_v29  ;;  %v9324_v28 = vld [vmem:[%s15538_s11 + $0x8c] ss:$16 sps:$4 sm:$0xff]   ;;  %v9353_v29 = vld [vmem:[%s15538_s11 + $0x1e0] ss:$16 sps:$4 sm:$0xff]  }
 0x541   :  { %2264 = vmatprep.subr.bf16.mxu0 %v9321_v33  ;;  %v9330_v33 = vld [vmem:[%s15538_s11 + $0x6c] ss:$16 sps:$4 sm:$0xff]  }
 0x544   :  { %2265 = vmatpush1.bf16.msra.mxu0 %v9323_v37  ;;  %v9359_v37 = vld [vmem:[%s15538_s11 + $0x1c0] ss:$16 sps:$4 sm:$0xff]  }
 0x545   :  { %2266 = vmatprep.subr.bf16.mxu0 %v9327_v41  ;;  %v9363_v41 = vld [vmem:[%s15538_s11 + $0x1a4] ss:$16 sps:$4 sm:$0xff]  }
 0x546   :  { %8917 = vmatmul.mubr.msk.bf16.vlgmr.msra.gmra.mxu1 %vm1095_vm7, %v1706_v48  ;;  %v9336_v48 = vld [vmem:[%s15538_s11 + $0x4c] ss:$16 sps:$4 sm:$0xff]  }
 0x547   :  { %2300 = vmatpush1.bf16.msra.mxu1 %v9281_v39  ;;  %2331 = vmatprep.mubr.bf16.mxu1 %v10835_v63  ;;  %v9332_v39 = vld [vmem:[%s15538_s11 + $0x68] ss:$16 sps:$4 sm:$0xff]  }
 0x548   :  { %2301 = vmatprep.subr.bf16.mxu1 %v9282_v49  ;;  %2267 = vmatpush1.bf16.msra.mxu0 %v9329_v51  ;;  %v9365_v49 = vld [vmem:[%s15538_s11 + $0x1a0] ss:$16 sps:$4 sm:$0xff]   ;;  %v9338_v51 = vld [vmem:[%s15538_s11 + $0x48] ss:$16 sps:$4 sm:$0xff]  }
 0x549   :  { %2268 = vmatprep.subr.bf16.mxu0 %v9333_v3  ;;  %v9356_v3 = vld [vmem:[%s15538_s11 + $0x1e8] ss:$16 sps:$4 sm:$0xff]  }
 0x54b   :  { %2302 = vmatpush1.bf16.msra.mxu1 %v9284_v52  ;;  %v9342_v52 = vld [vmem:[%s15538_s11 + $0x2c] ss:$16 sps:$4 sm:$0xff]  }
 0x54c   :  { %2303 = vmatprep.subr.bf16.mxu1 %v9285_v53  ;;  %2269 = vmatpush1.bf16.msra.mxu0 %v9335_v6  ;;  %v9369_v53 = vld [vmem:[%s15538_s11 + $0x184] ss:$16 sps:$4 sm:$0xff]   ;;  %v9362_v6 = vld [vmem:[%s15538_s11 + $0x1c8] ss:$16 sps:$4 sm:$0xff]  }
 0x54d   :  { %2270 = vmatprep.subr.bf16.mxu0 %v9339_v8  ;;  %v9366_v8 = vld [vmem:[%s15538_s11 + $0x1ac] ss:$16 sps:$4 sm:$0xff]  }
 0x54f   :  { %2304 = vmatpush1.bf16.msra.mxu1 %v9287_v54  ;;  %v9371_v54 = vld [vmem:[%s15538_s11 + $0x180] ss:$16 sps:$4 sm:$0xff]  }
 0x550   :  { %2305 = vmatprep.subr.bf16.mxu1 %v9288_v55  ;;  %2271 = vmatpush1.bf16.msra.mxu0 %v9341_v12  ;;  %v9375_v55 = vld [vmem:[%s15538_s11 + $0x164] ss:$16 sps:$4 sm:$0xff]   ;;  %v9368_v12 = vld [vmem:[%s15538_s11 + $0x1a8] ss:$16 sps:$4 sm:$0xff]  }
 0x551   :  { %2272 = vmatprep.subr.bf16.mxu0 %v9345_v17  ;;  %v9372_v17 = vld [vmem:[%s15538_s11 + $0x18c] ss:$16 sps:$4 sm:$0xff]  }
 0x553   :  { %2306 = vmatpush1.bf16.msra.mxu1 %v9290_v56  ;;  %v9344_v56 = vld [vmem:[%s15538_s11 + $0x28] ss:$16 sps:$4 sm:$0xff]  }
 0x554   :  { %2307 = vmatprep.subr.bf16.mxu1 %v9291_v36  ;;  %2273 = vmatpush1.bf16.msra.mxu0 %v9347_v46  ;;  %v9348_v36 = vld [vmem:[%s15538_s11 + $0xc] ss:$16 sps:$4 sm:$0xff]  }
 0x555   :  { %2274 = vmatprep.subr.bf16.mxu0 %v9351_v47  ;;  %v9374_v47 = vld [vmem:[%s15538_s11 + $0x188] ss:$16 sps:$4 sm:$0xff]  }
 0x557   :  { %2308 = vmatpush1.bf16.msra.mxu1 %v9293_v57  ;;  %v9377_v57 = vld [vmem:[%s15538_s11 + $0x160] ss:$16 sps:$4 sm:$0xff]  }
 0x558   :  { %2309 = vmatprep.subr.bf16.mxu1 %v9294_v22  ;;  %2275 = vmatpush2.bf16.msra.mxu0 %v9353_v29  ;;  %v9350_v22 = vld [vmem:[%s15538_s11 + $0x8] ss:$16 sps:$4 sm:$0xff]   ;;  %v9384_v29 = vld [vmem:[%s15538_s11 + $0x14c] ss:$16 sps:$4 sm:$0xff]  }
 0x559   :  { %2276 = vmatprep.subr.bf16.mxu0 %v9357_v35  ;;  %v9392_v35 = vld [vmem:[%s15538_s11 + $0x128] ss:$16 sps:$4 sm:$0xff]  }
 0x55b   :  { %2310 = vmatpush1.bf16.msra.mxu1 %v9296_v59  ;;  %v9354_v59 = vld [vmem:[%s15538_s11 + $0x1ec] ss:$16 sps:$4 sm:$0xff]  }
 0x55c   :  { %2311 = vmatprep.subr.bf16.mxu1 %v9297_v44  ;;  %2277 = vmatpush2.bf16.msra.mxu0 %v9359_v37  ;;  %v9381_v44 = vld [vmem:[%s15538_s11 + $0x144] ss:$16 sps:$4 sm:$0xff]   ;;  %v9396_v37 = vld [vmem:[%s15538_s11 + $0x10c] ss:$16 sps:$4 sm:$0xff]  }
 0x55d   :  { %2278 = vmatprep.subr.bf16.mxu0 %v9363_v41  ;;  %v9398_v41 = vld [vmem:[%s15538_s11 + $0x108] ss:$16 sps:$4 sm:$0xff]  }
 0x55f   :  { %2312 = vmatpush1.bf16.msra.mxu1 %v9299_v1  ;;  %v9383_v1 = vld [vmem:[%s15538_s11 + $0x140] ss:$16 sps:$4 sm:$0xff]  }
 0x560   :  { %2313 = vmatprep.subr.bf16.mxu1 %v9300_v2  ;;  %2279 = vmatpush2.bf16.msra.mxu0 %v9365_v49  ;;  %v9387_v2 = vld [vmem:[%s15538_s11 + $0x124] ss:$16 sps:$4 sm:$0xff]  }
 0x561   :  { %2280 = vmatprep.subr.bf16.mxu0 %v9369_v53 }
 0x563   :  { %2314 = vmatpush1.bf16.msra.mxu1 %v9302_v4  ;;  %v9360_v4 = vld [vmem:[%s15538_s11 + $0x1cc] ss:$16 sps:$4 sm:$0xff]  }
 0x564   :  { %2340 = vmatprep.subr.bf16.mxu1 %v9306_v5  ;;  %2281 = vmatpush2.bf16.msra.mxu0 %v9371_v54  ;;  %v9389_v5 = vld [vmem:[%s15538_s11 + $0x120] ss:$16 sps:$4 sm:$0xff]  }
 0x565   :  { %2282 = vmatprep.subr.bf16.mxu0 %v9375_v55 }
 0x566   :  { %2332 = vmatmul.mubr.bf16.vlgmr.msra.gmra.mxu1 %v11192_v62 }
 0x567   :  { %2341 = vmatpush1.bf16.msra.mxu1 %v9308_v9  ;;  %v9393_v9 = vld [vmem:[%s15538_s11 + $0x104] ss:$16 sps:$4 sm:$0xff]  }
 0x568   :  { %2342 = vmatprep.subr.bf16.mxu1 %v9312_v11  ;;  %2283 = vmatpush2.bf16.msra.mxu0 %v9377_v57  ;;  %v9395_v11 = vld [vmem:[%s15538_s11 + $0x100] ss:$16 sps:$4 sm:$0xff]  }
 0x569   :  { %2284 = vmatprep.subr.bf16.mxu0 %v9381_v44 }
 0x56b   :  { %2343 = vmatpush1.bf16.msra.mxu1 %v9314_v13  ;;  %v331_v13 = vld [vmem:[%s15539_s3] sm:$0xff] }
 0x56c   :  { %2344 = vmatprep.subr.bf16.mxu1 %v9318_v16  ;;  %2285 = vmatpush2.bf16.msra.mxu0 %v9383_v1  ;;  %v9399_v16 = vld [vmem:[%s15538_s11 + $0x2ec] ss:$16 sps:$4 sm:$0xff]   ;;  %v1777_v46 = vpack.c.bf16 %v331_v13, %v331_v13 }
 0x56d   :  { %2286 = vmatprep.subr.bf16.mxu0 %v9387_v2 }
 0x56e   :  { %2290 = vmatprep.mubr.bf16.mxu0 %v1777_v46  ;;  %2372 = vmatprep.mubr.bf16.mxu1 %v1777_v46 }
 0x56f   :  { %2345 = vmatpush1.bf16.msra.mxu1 %v9320_v19  ;;  %v9378_v19 = vld [vmem:[%s15538_s11 + $0x16c] ss:$16 sps:$4 sm:$0xff]  }
 0x570   :  { %2346 = vmatprep.subr.bf16.mxu1 %v9324_v28  ;;  %2287 = vmatpush2.bf16.msra.mxu0 %v9389_v5  ;;  %v9380_v28 = vld [vmem:[%s15538_s11 + $0x168] ss:$16 sps:$4 sm:$0xff]  }
 0x571   :  { %2288 = vmatprep.subr.bf16.mxu0 %v9393_v9 }
 0x573   :  { %2347 = vmatpush1.bf16.msra.mxu1 %v9326_v30  ;;  %v9386_v30 = vld [vmem:[%s15538_s11 + $0x148] ss:$16 sps:$4 sm:$0xff]  }
 0x574   :  { %2348 = vmatprep.subr.bf16.mxu1 %v9330_v33  ;;  %2289 = vmatpush2.bf16.msra.mxu0 %v9395_v11  ;;  %v9390_v33 = vld [vmem:[%s15538_s11 + $0x12c] ss:$16 sps:$4 sm:$0xff]  }
 0x575   :  { %2381 = vmatprep.subr.bf16.mxu0 %v9399_v16 }
 0x577   :  { %2349 = vmatpush1.bf16.msra.mxu1 %v9332_v39  ;;  %v9903_v39 = vld [vmem:[%s15528_s5 + $0xec] ss:$16 sps:$4 sm:$0xff]  }
 0x578   :  { %2350 = vmatprep.subr.bf16.mxu1 %v9336_v48 }
 0x57b   :  { %2351 = vmatpush1.bf16.msra.mxu1 %v9338_v51 }
 0x57c   :  { %2352 = vmatprep.subr.bf16.mxu1 %v9342_v52 }
 0x57f   :  { %2353 = vmatpush1.bf16.msra.mxu1 %v9344_v56 }
 0x580   :  { %2354 = vmatprep.subr.bf16.mxu1 %v9348_v36 }
 0x583   :  { %2355 = vmatpush1.bf16.msra.mxu1 %v9350_v22 }
 0x584   :  { %2356 = vmatprep.subr.bf16.mxu1 %v9354_v59 }
 0x587   :  { %2357 = vmatpush2.bf16.msra.mxu1 %v9356_v3 }
 0x588   :  { %2358 = vmatprep.subr.bf16.mxu1 %v9360_v4 }
 0x58b   :  { %2359 = vmatpush2.bf16.msra.mxu1 %v9362_v6 }
 0x58c   :  { %2360 = vmatprep.subr.bf16.mxu1 %v9366_v8 }
 0x58f   :  { %2361 = vmatpush2.bf16.msra.mxu1 %v9368_v12 }
 0x590   :  { %2362 = vmatprep.subr.bf16.mxu1 %v9372_v17 }
 0x593   :  { %2363 = vmatpush2.bf16.msra.mxu1 %v9374_v47 }
 0x594   :  { %2364 = vmatprep.subr.bf16.mxu1 %v9378_v19 }
 0x597   :  { %2365 = vmatpush2.bf16.msra.mxu1 %v9380_v28 }
 0x598   :  { %2366 = vmatprep.subr.bf16.mxu1 %v9384_v29 }
 0x59b   :  { %2367 = vmatpush2.bf16.msra.mxu1 %v9386_v30 }
 0x59c   :  { %2368 = vmatprep.subr.bf16.mxu1 %v9390_v33 }
 0x59f   :  { %2369 = vmatpush2.bf16.msra.mxu1 %v9392_v35 }
 0x5a0   :  { %2370 = vmatprep.subr.bf16.mxu1 %v9396_v37 }
 0x5a3   :  { %2371 = vmatpush2.bf16.msra.mxu1 %v9398_v41 }
 0x5a4   :  { %2491 = vmatprep.subr.bf16.mxu1 %v9903_v39 }
 0x5de   :  { %v1355_v48 = vpop.f32.mrf.mxu1 }
 0x5e0   :  { %v8876_v49 = vpop.f32.mrf.mxu1 }
 0x5e2   :  { %v1358_v51 = vpop.f32.mrf.mxu1 }
 0x5e4   :  { %v8877_v52 = vpop.f32.mrf.mxu1 }
 0x5e6   :  { %v1411_v53 = vpop.f32.mrf.mxu1 }
 0x5e7   :  { %v1761_v12 = vrot.slane %v1411_v53, 7 }
 0x5e8   :  { %v8882_v54 = vpop.f32.mrf.mxu1 }
 0x5e9   :  { %v1762_v19 = vsel %vm1080_vm0, %v1761_v12, %v1355_v48  ;;  %v9908_v12 = vld [vmem:[%s15528_s5 + $0xa8] ss:$16 sps:$4 sm:$0xff]  }
 0x5ea   :  { %v1414_v55 = vpop.f32.mrf.mxu1 }
 0x5ec   :  { %v8883_v56 = vpop.f32.mrf.mxu1 }
 0x5ed   :  { %v9401_v56 = vld [vmem:[%s15538_s11 + $0x2e8] ss:$16 sps:$4 sm:$0xff]  }
 0x5ee   :  { %v1467_v36 = vpop.f32.mrf.mxu1  ;;  %v1579_v57 = vpop.f32.mrf.mxu0 }
 0x5ef   :  { %v1763_v13 = vrot.slane %v1467_v36, 6  ;;  %v1767_v35 = vrot.slane %v1579_v57, 4 }
 0x5f0   :  { %v8888_v22 = vpop.f32.mrf.mxu1  ;;  %v8900_v59 = vpop.f32.mrf.mxu0 }
 0x5f1   :  { %v1764_v28 = vsel %vm1082_vm1, %v1763_v13, %v1762_v19  ;;  %v9402_v22 = vld [vmem:[%s15538_s11 + $0x2cc] ss:$16 sps:$4 sm:$0xff]   ;;  %v9416_v19 = vld [vmem:[%s15538_s11 + $0x248] ss:$16 sps:$4 sm:$0xff]  }
 0x5f2   :  { %v1470_v44 = vpop.f32.mrf.mxu1  ;;  %v1582_v1 = vpop.f32.mrf.mxu0  ;;  %v9909_v13 = vld [vmem:[%s15528_s5 + $0x8c] ss:$16 sps:$4 sm:$0xff]  }
 0x5f3   :  { %v9404_v44 = vld [vmem:[%s15538_s11 + $0x2c8] ss:$16 sps:$4 sm:$0xff]   ;;  %v9405_v1 = vld [vmem:[%s15538_s11 + $0x2ac] ss:$16 sps:$4 sm:$0xff]  }
 0x5f4   :  { %v8889_v2 = vpop.f32.mrf.mxu1  ;;  %v8901_v3 = vpop.f32.mrf.mxu0 }
 0x5f5   :  { %v9904_v2 = vld [vmem:[%s15528_s5 + $0xe8] ss:$16 sps:$4 sm:$0xff]   ;;  %v9905_v3 = vld [vmem:[%s15528_s5 + $0xcc] ss:$16 sps:$4 sm:$0xff]  }
 0x5f6   :  { %v1523_v4 = vpop.f32.mrf.mxu1  ;;  %v1691_v5 = vpop.f32.mrf.mxu0 }
 0x5f7   :  { %v1765_v46 = vrot.slane %v1523_v4, 5  ;;  %v1771_v51 = vrot.slane %v1691_v5, 2  ;;  %v9407_v4 = vld [vmem:[%s15538_s11 + $0x2a8] ss:$16 sps:$4 sm:$0xff]   ;;  %v9408_v5 = vld [vmem:[%s15538_s11 + $0x28c] ss:$16 sps:$4 sm:$0xff]  }
 0x5f8   :  { %v8894_v6 = vpop.f32.mrf.mxu1  ;;  %v8912_v8 = vpop.f32.mrf.mxu0 }
 0x5f9   :  { %v1766_v30 = vsel %vm1084_vm2, %v1765_v46, %v1764_v28  ;;  %v9906_v6 = vld [vmem:[%s15528_s5 + $0xc8] ss:$16 sps:$4 sm:$0xff]   ;;  %v9907_v8 = vld [vmem:[%s15528_s5 + $0xac] ss:$16 sps:$4 sm:$0xff]  }
 0x5fa   :  { %v1526_v9 = vpop.f32.mrf.mxu1  ;;  %v1694_v11 = vpop.f32.mrf.mxu0  ;;  %v1768_v41 = vsel %vm1086_vm3, %v1767_v35, %v1766_v30  ;;  %v9910_v46 = vld [vmem:[%s15528_s5 + $0x88] ss:$16 sps:$4 sm:$0xff]   ;;  %v9417_v28 = vld [vmem:[%s15538_s11 + $0x22c] ss:$16 sps:$4 sm:$0xff]  }
 0x5fb   :  { %v9410_v9 = vld [vmem:[%s15538_s11 + $0x288] ss:$16 sps:$4 sm:$0xff]   ;;  %v9411_v11 = vld [vmem:[%s15538_s11 + $0x26c] ss:$16 sps:$4 sm:$0xff]  }
 0x5fc   :  { %v8895_v16 = vpop.f32.mrf.mxu1  ;;  %v8913_v17 = vpop.f32.mrf.mxu0  ;;  %v9913_v30 = vld [vmem:[%s15528_s5 + $0x4c] ss:$16 sps:$4 sm:$0xff]  }
 0x5fd   :  { %v9413_v16 = vld [vmem:[%s15538_s11 + $0x268] ss:$16 sps:$4 sm:$0xff]   ;;  %v9414_v17 = vld [vmem:[%s15538_s11 + $0x24c] ss:$16 sps:$4 sm:$0xff]  }
 0x5fe   :  { %v1635_v47 = vpop.f32.mrf.mxu1  ;;  %v9420_v35 = vld [vmem:[%s15538_s11 + $0x20c] ss:$16 sps:$4 sm:$0xff]  }
 0x5ff   :  { %v1769_v33 = vrot.slane %v1635_v47, 3  ;;  %v9911_v47 = vld [vmem:[%s15528_s5 + $0x6c] ss:$16 sps:$4 sm:$0xff]  }
 0x600   :  { %v8906_v29 = vpop.f32.mrf.mxu1 }
 0x601   :  { %v1770_v49 = vsel %vm1088_vm4, %v1769_v33, %v1768_v41  ;;  %v9912_v29 = vld [vmem:[%s15528_s5 + $0x68] ss:$16 sps:$4 sm:$0xff]   ;;  %v9915_v41 = vld [vmem:[%s15528_s5 + $0x2c] ss:$16 sps:$4 sm:$0xff]  }
 0x602   :  { %v1638_v37 = vpop.f32.mrf.mxu1  ;;  %v1772_v54 = vsel %vm1090_vm5, %v1771_v51, %v1770_v49  ;;  %v9419_v33 = vld [vmem:[%s15538_s11 + $0x228] ss:$16 sps:$4 sm:$0xff]  }
 0x603   :  { %v9914_v37 = vld [vmem:[%s15528_s5 + $0x48] ss:$16 sps:$4 sm:$0xff]  }
 0x604   :  { %v8907_v39 = vpop.f32.mrf.mxu1  ;;  %v9916_v51 = vld [vmem:[%s15528_s5 + $0x28] ss:$16 sps:$4 sm:$0xff]  }
 0x605   :  { %v9422_v39 = vld [vmem:[%s15538_s11 + $0x208] ss:$16 sps:$4 sm:$0xff]  }
 0x606   :  { %v1747_v52 = vpop.f32.mrf.mxu1 }
 0x607   :  { %v1773_v53 = vrot.slane %v1747_v52, 1 }
 0x608   :  { %v8918_v55 = vpop.f32.mrf.mxu1 }
 0x609   :  { %v1774_v48 = vsel %vm1092_vm6, %v1773_v53, %v1772_v54  ;;  %v9917_v53 = vld [vmem:[%s15528_s5 + $0xc] ss:$16 sps:$4 sm:$0xff]   ;;  %v9918_v55 = vld [vmem:[%s15528_s5 + $0xe4] ss:$16 sps:$4 sm:$0xff]  }
 0x60a   :  { %v1776_v36 = vpack.c.bf16 %v1774_v48, %v1774_v48  ;;  %v1750_v57 = vpop.f32.mrf.mxu1  ;;  %v9919_v48 = vld [vmem:[%s15528_s5 + $0x8] ss:$16 sps:$4 sm:$0xff]  }
 0x60b   :  { %v9921_v57 = vld [vmem:[%s15528_s5 + $0xe0] ss:$16 sps:$4 sm:$0xff]  }
 0x60c   :  { %v8919_v59 = vpop.f32.mrf.mxu1  ;;  %2291 = vmatmul.mubr.bf16.vlgmr.msra.gmra.mxu0 %v1776_v36  ;;  %2373 = vmatmul.mubr.bf16.vlgmr.msra.gmra.mxu1 %v1776_v36  ;;  %v9920_v36 = vld [vmem:[%s15528_s5 + $0x1ec] ss:$16 sps:$4 sm:$0xff]  }
 0x60d   :  { %2382 = vmatpush1.bf16.msra.mxu0 %v9401_v56  ;;  %2523 = vmatprep.mubr.bf16.mxu1 %v11192_v62  ;;  %v9923_v59 = vld [vmem:[%s15528_s5 + $0x1e8] ss:$16 sps:$4 sm:$0xff]  }
 0x60e   :  { %2383 = vmatprep.subr.bf16.mxu0 %v9402_v22  ;;  %2413 = vmatprep.mubr.bf16.mxu0 %v10835_v63  ;;  %v9922_v22 = vld [vmem:[%s15528_s5 + $0xc4] ss:$16 sps:$4 sm:$0xff]  }
 0x60f   :  { %2492 = vmatpush1.bf16.msra.mxu1 %v9904_v2  ;;  %v9927_v2 = vld [vmem:[%s15528_s5 + $0x1c8] ss:$16 sps:$4 sm:$0xff]  }
 0x610   :  { %2493 = vmatprep.subr.bf16.mxu1 %v9905_v3  ;;  %v9928_v3 = vld [vmem:[%s15528_s5 + $0x1ac] ss:$16 sps:$4 sm:$0xff]  }
 0x611   :  { %2384 = vmatpush1.bf16.msra.mxu0 %v9404_v44  ;;  %v9924_v44 = vld [vmem:[%s15528_s5 + $0x1cc] ss:$16 sps:$4 sm:$0xff]  }
 0x612   :  { %2385 = vmatprep.subr.bf16.mxu0 %v9405_v1  ;;  %v9925_v1 = vld [vmem:[%s15528_s5 + $0xc0] ss:$16 sps:$4 sm:$0xff]  }
 0x613   :  { %2494 = vmatpush1.bf16.msra.mxu1 %v9906_v6  ;;  %v9931_v6 = vld [vmem:[%s15528_s5 + $0x1a8] ss:$16 sps:$4 sm:$0xff]  }
 0x614   :  { %2495 = vmatprep.subr.bf16.mxu1 %v9907_v8  ;;  %v9932_v8 = vld [vmem:[%s15528_s5 + $0x18c] ss:$16 sps:$4 sm:$0xff]  }
 0x615   :  { %2386 = vmatpush1.bf16.msra.mxu0 %v9407_v4  ;;  %v9929_v4 = vld [vmem:[%s15528_s5 + $0xa0] ss:$16 sps:$4 sm:$0xff]  }
 0x616   :  { %2387 = vmatprep.subr.bf16.mxu0 %v9408_v5  ;;  %v9930_v5 = vld [vmem:[%s15528_s5 + $0x84] ss:$16 sps:$4 sm:$0xff]  }
 0x617   :  { %2496 = vmatpush1.bf16.msra.mxu1 %v9908_v12  ;;  %v9935_v12 = vld [vmem:[%s15528_s5 + $0x188] ss:$16 sps:$4 sm:$0xff]  }
 0x618   :  { %2497 = vmatprep.subr.bf16.mxu1 %v9909_v13  ;;  %v9936_v13 = vld [vmem:[%s15528_s5 + $0x16c] ss:$16 sps:$4 sm:$0xff]  }
 0x619   :  { %2388 = vmatpush1.bf16.msra.mxu0 %v9410_v9  ;;  %v9933_v9 = vld [vmem:[%s15528_s5 + $0x80] ss:$16 sps:$4 sm:$0xff]  }
 0x61a   :  { %2389 = vmatprep.subr.bf16.mxu0 %v9411_v11  ;;  %v9934_v11 = vld [vmem:[%s15528_s5 + $0x64] ss:$16 sps:$4 sm:$0xff]  }
 0x61b   :  { %2498 = vmatpush1.bf16.msra.mxu1 %v9910_v46  ;;  %v9939_v46 = vld [vmem:[%s15528_s5 + $0x168] ss:$16 sps:$4 sm:$0xff]  }
 0x61c   :  { %2499 = vmatprep.subr.bf16.mxu1 %v9911_v47  ;;  %v9940_v47 = vld [vmem:[%s15528_s5 + $0x14c] ss:$16 sps:$4 sm:$0xff]  }
 0x61d   :  { %2390 = vmatpush1.bf16.msra.mxu0 %v9413_v16  ;;  %v9937_v16 = vld [vmem:[%s15528_s5 + $0x60] ss:$16 sps:$4 sm:$0xff]  }
 0x61e   :  { %2391 = vmatprep.subr.bf16.mxu0 %v9414_v17  ;;  %v9938_v17 = vld [vmem:[%s15528_s5 + $0x44] ss:$16 sps:$4 sm:$0xff]  }
 0x61f   :  { %2500 = vmatpush1.bf16.msra.mxu1 %v9912_v29  ;;  %v9943_v29 = vld [vmem:[%s15528_s5 + $0x148] ss:$16 sps:$4 sm:$0xff]  }
 0x620   :  { %2501 = vmatprep.subr.bf16.mxu1 %v9913_v30  ;;  %v9944_v30 = vld [vmem:[%s15528_s5 + $0x12c] ss:$16 sps:$4 sm:$0xff]  }
 0x621   :  { %2392 = vmatpush1.bf16.msra.mxu0 %v9416_v19  ;;  %v9941_v19 = vld [vmem:[%s15528_s5 + $0x40] ss:$16 sps:$4 sm:$0xff]  }
 0x622   :  { %2393 = vmatprep.subr.bf16.mxu0 %v9417_v28  ;;  %v9942_v28 = vld [vmem:[%s15528_s5 + $0x24] ss:$16 sps:$4 sm:$0xff]  }
 0x623   :  { %2502 = vmatpush1.bf16.msra.mxu1 %v9914_v37  ;;  %v9947_v37 = vld [vmem:[%s15528_s5 + $0x128] ss:$16 sps:$4 sm:$0xff]  }
 0x624   :  { %2503 = vmatprep.subr.bf16.mxu1 %v9915_v41  ;;  %v9948_v41 = vld [vmem:[%s15528_s5 + $0x10c] ss:$16 sps:$4 sm:$0xff]  }
 0x625   :  { %2394 = vmatpush1.bf16.msra.mxu0 %v9419_v33  ;;  %v9945_v33 = vld [vmem:[%s15528_s5 + $0x20] ss:$16 sps:$4 sm:$0xff]  }
 0x626   :  { %v11790_v49 = vpop.f32.mrf.mxu1  ;;  %2395 = vmatprep.subr.bf16.mxu0 %v9420_v35  ;;  %v9946_v35 = vld [vmem:[%s15528_s5 + $0x4] ss:$16 sps:$4 sm:$0xff]  }
 0x627   :  { %2504 = vmatpush1.bf16.msra.mxu1 %v9916_v51  ;;  %v8564_v51 = vld [vmem:[%s15529_s0 + $0x8] sm:$0xff] }
 0x628   :  { %v11795_v52 = vpop.f32.mrf.mxu1  ;;  %2505 = vmatprep.subr.bf16.mxu1 %v9917_v53  ;;  %v9950_v53 = vld [vmem:[%s15528_s5 + $0x1e4] ss:$16 sps:$4 sm:$0xff]  }
 0x629   :  { %2396 = vmatpush1.bf16.msra.mxu0 %v9422_v39  ;;  %v9949_v39 = vld [vmem:[%s15528_s5] ss:$16 sps:$4 sm:$0xff]  }
 0x62a   :  { %v2337_v54 = vpop.f32.mrf.mxu1  ;;  %2450 = vmatprep.subr.bf16.mxu0 %v9918_v55  ;;  %v2449_v55 = vpack.c.bf16 %v8564_v51, %v8564_v51 }
 0x62b   :  { %2506 = vmatpush1.bf16.msra.mxu1 %v9919_v48  ;;  %v9951_v54 = vld [vmem:[%s15528_s5 + $0x108] ss:$16 sps:$4 sm:$0xff]   ;;  %v9952_v48 = vld [vmem:[%s15528_s5 + $0x1e0] ss:$16 sps:$4 sm:$0xff]  }
 0x62c   :  { %v2338_v56 = vpop.f32.mrf.mxu1  ;;  %2414 = vmatmul.mubr.bf16.vlgmr.msra.gmra.mxu0 %v11192_v62  ;;  %2507 = vmatprep.subr.bf16.mxu1 %v9920_v36  ;;  %v9954_v36 = vld [vmem:[%s15528_s5 + $0x1c0] ss:$16 sps:$4 sm:$0xff]  }
 0x62d   :  { %2451 = vmatpush1.bf16.msra.mxu0 %v9921_v57  ;;  %2482 = vmatprep.mubr.bf16.mxu0 %v11192_v62  ;;  %v9926_v62 = vld [vmem:[%s15528_s5 + $0xa4] ss:$16 sps:$4 sm:$0xff]  }
 0x62e   :  { %2452 = vmatprep.subr.bf16.mxu0 %v9922_v22  ;;  %v9953_v56 = vld [vmem:[%s15528_s5 + $0x1c4] ss:$16 sps:$4 sm:$0xff]   ;;  %v9956_v22 = vld [vmem:[%s15528_s5 + $0x1a0] ss:$16 sps:$4 sm:$0xff]  }
 0x62f   :  { %2508 = vmatpush2.bf16.msra.mxu1 %v9923_v59  ;;  %v9955_v57 = vld [vmem:[%s15528_s5 + $0x1a4] ss:$16 sps:$4 sm:$0xff]  }
 0x630   :  { %2509 = vmatprep.subr.bf16.mxu1 %v9924_v44  ;;  %v9957_v59 = vld [vmem:[%s15528_s5 + $0x184] ss:$16 sps:$4 sm:$0xff]   ;;  %v9958_v44 = vld [vmem:[%s15528_s5 + $0x180] ss:$16 sps:$4 sm:$0xff]  }
 0x631   :  { %2453 = vmatpush1.bf16.msra.mxu0 %v9925_v1  ;;  %v9959_v1 = vld [vmem:[%s15528_s5 + $0x164] ss:$16 sps:$4 sm:$0xff]  }
 0x632   :  { %2454 = vmatprep.subr.bf16.mxu0 %v9926_v62  ;;  %v9960_v62 = vld [vmem:[%s15528_s5 + $0x160] ss:$16 sps:$4 sm:$0xff]  }
 0x633   :  { %2510 = vmatpush2.bf16.msra.mxu1 %v9927_v2  ;;  %v9961_v2 = vld [vmem:[%s15528_s5 + $0x144] ss:$16 sps:$4 sm:$0xff]  }
 0x634   :  { %2511 = vmatprep.subr.bf16.mxu1 %v9928_v3  ;;  %v9962_v3 = vld [vmem:[%s15528_s5 + $0x140] ss:$16 sps:$4 sm:$0xff]  }
 0x635   :  { %2455 = vmatpush1.bf16.msra.mxu0 %v9929_v4  ;;  %v9963_v4 = vld [vmem:[%s15528_s5 + $0x124] ss:$16 sps:$4 sm:$0xff]  }
 0x636   :  { %2456 = vmatprep.subr.bf16.mxu0 %v9930_v5  ;;  %v9964_v5 = vld [vmem:[%s15528_s5 + $0x120] ss:$16 sps:$4 sm:$0xff]  }
 0x637   :  { %2512 = vmatpush2.bf16.msra.mxu1 %v9931_v6  ;;  %v9965_v6 = vld [vmem:[%s15528_s5 + $0x104] ss:$16 sps:$4 sm:$0xff]  }
 0x638   :  { %2513 = vmatprep.subr.bf16.mxu1 %v9932_v8  ;;  %v9966_v8 = vld [vmem:[%s15528_s5 + $0x100] ss:$16 sps:$4 sm:$0xff]  }
 0x639   :  { %2457 = vmatpush1.bf16.msra.mxu0 %v9933_v9  ;;  %v9967_v9 = vld [vmem:[%s15530_s7 + $0x78] sm:$0xff]  }
 0x63a   :  { %2458 = vmatprep.subr.bf16.mxu0 %v9934_v11  ;;  %v9968_v11 = vld [vmem:[%s15530_s7 + $0x38] sm:$0xff]  }
 0x63b   :  { %2514 = vmatpush2.bf16.msra.mxu1 %v9935_v12  ;;  %v9969_v12 = vld [vmem:[%s15530_s7 + $0x70] sm:$0xff]  }
 0x63c   :  { %2515 = vmatprep.subr.bf16.mxu1 %v9936_v13  ;;  %v9970_v13 = vld [vmem:[%s15530_s7 + $0x30] sm:$0xff]  }
 0x63d   :  { %2459 = vmatpush1.bf16.msra.mxu0 %v9937_v16  ;;  %v9971_v16 = vld [vmem:[%s15530_s7 + $0x68] sm:$0xff]  }
 0x63e   :  { %2460 = vmatprep.subr.bf16.mxu0 %v9938_v17  ;;  %v9972_v17 = vld [vmem:[%s15530_s7 + $0x28] sm:$0xff]  }
 0x63f   :  { %2516 = vmatpush2.bf16.msra.mxu1 %v9939_v46  ;;  %v9973_v46 = vld [vmem:[%s15530_s7 + $0x60] sm:$0xff]  }
 0x640   :  { %2517 = vmatprep.subr.bf16.mxu1 %v9940_v47  ;;  %v9974_v47 = vld [vmem:[%s15530_s7 + $0x20] sm:$0xff]  }
 0x641   :  { %2461 = vmatpush1.bf16.msra.mxu0 %v9941_v19  ;;  %v9975_v19 = vld [vmem:[%s15530_s7 + $0x58] sm:$0xff]  }
 0x642   :  { %2462 = vmatprep.subr.bf16.mxu0 %v9942_v28  ;;  %v9976_v28 = vld [vmem:[%s15530_s7 + $0x18] sm:$0xff]  }
 0x643   :  { %2518 = vmatpush2.bf16.msra.mxu1 %v9943_v29  ;;  %v9977_v29 = vld [vmem:[%s15530_s7 + $0x50] sm:$0xff]  }
 0x644   :  { %2519 = vmatprep.subr.bf16.mxu1 %v9944_v30  ;;  %v9978_v30 = vld [vmem:[%s15530_s7 + $0x10] sm:$0xff]  }
 0x645   :  { %2463 = vmatpush1.bf16.msra.mxu0 %v9945_v33  ;;  %v9979_v33 = vld [vmem:[%s15530_s7 + $0x48] sm:$0xff]  }
 0x646   :  { %2464 = vmatprep.subr.bf16.mxu0 %v9946_v35  ;;  %v9980_v35 = vld [vmem:[%s15530_s7 + $0x8] sm:$0xff]  }
 0x647   :  { %2520 = vmatpush2.bf16.msra.mxu1 %v9947_v37  ;;  %v9981_v37 = vld [vmem:[%s15530_s7 + $0x40] sm:$0xff]  }
 0x648   :  { %2521 = vmatprep.subr.bf16.mxu1 %v9948_v41  ;;  %v9982_v41 = vld [vmem:[%s15530_s7] sm:$0xff]  }
 0x649   :  { %2465 = vmatpush1.bf16.msra.mxu0 %v9949_v39 }
 0x64a   :  { %2466 = vmatprep.subr.bf16.mxu0 %v9950_v53 }
 0x64b   :  { %2522 = vmatpush2.bf16.msra.mxu1 %v9951_v54 }
 0x64c   :  { %8920 = vmatprep.subr.bf16.mxu1 %v10837_v14 }
 0x64d   :  { %2467 = vmatpush2.bf16.msra.mxu0 %v9952_v48 }
 0x64e   :  { %2468 = vmatprep.subr.bf16.mxu0 %v9953_v56  ;;  %2524 = vmatmul.mubr.bf16.vlgmr.msra.gmra.mxu1 %v2449_v55 }
 0x64f   :  { %8921 = vmatpush3.bf16.msra.mxu1 %v11343_v18  ;;  %8922 = vmatprep.mubr.msk.bf16.mxu1 %vm10838_vm9, %v10837_v14 }
 0x650   :  { %8926 = vmatprep.subr.bf16.mxu1 %v10837_v14 }
 0x651   :  { %2469 = vmatpush2.bf16.msra.mxu0 %v9954_v36 }
 0x652   :  { %2470 = vmatprep.subr.bf16.mxu0 %v9955_v57  ;;  %v292_v57 = vld [vmem:[%s15540_s12] sm:$0xf] }
 0x655   :  { %2471 = vmatpush2.bf16.msra.mxu0 %v9956_v22  ;;  %v12010_v22 = vrot.slane %v292_v57, %v11159_v23 }
 0x656   :  { %2472 = vmatprep.subr.bf16.mxu0 %v9957_v59 }
 0x659   :  { %2473 = vmatpush2.bf16.msra.mxu0 %v9958_v44 }
 0x65a   :  { %2474 = vmatprep.subr.bf16.mxu0 %v9959_v1 }
 0x65d   :  { %2475 = vmatpush2.bf16.msra.mxu0 %v9960_v62  ;;  %v12015_v62 = vrot.slane %v292_v57, %v11176_v34 }
 0x65e   :  { %2476 = vmatprep.subr.bf16.mxu0 %v9961_v2 }
 0x661   :  { %2477 = vmatpush2.bf16.msra.mxu0 %v9962_v3 }
 0x662   :  { %2478 = vmatprep.subr.bf16.mxu0 %v9963_v4 }
 0x665   :  { %2479 = vmatpush2.bf16.msra.mxu0 %v9964_v5 }
 0x666   :  { %2480 = vmatprep.subr.bf16.mxu0 %v9965_v6 }
 0x669   :  { %2481 = vmatpush2.bf16.msra.mxu0 %v9966_v8 }
 0x66a   :  { %8682 = vmatprep.subr.bf16.mxu0 %v9967_v9  ;;  %v12019_v9 = vrot.slane %v292_v57, %v11179_v38 }
 0x66c   :  { %2483 = vmatmul.mubr.bf16.vlgmr.msra.gmra.mxu0 %v2449_v55 }
 0x66d   :  { %8683 = vmatpush3.bf16.msra.mxu0 %v9968_v11 }
 0x66e   :  { %8684 = vmatprep.subr.bf16.mxu0 %v9969_v12 }
 0x671   :  { %8685 = vmatpush3.bf16.msra.mxu0 %v9970_v13 }
 0x672   :  { %8686 = vmatprep.subr.bf16.mxu0 %v9971_v16 }
 0x675   :  { %8687 = vmatpush3.bf16.msra.mxu0 %v9972_v17 }
 0x676   :  { %8688 = vmatprep.subr.bf16.mxu0 %v9973_v46 }
 0x679   :  { %8689 = vmatpush3.bf16.msra.mxu0 %v9974_v47 }
 0x67a   :  { %8690 = vmatprep.subr.bf16.mxu0 %v9975_v19 }
 0x67d   :  { %8691 = vmatpush3.bf16.msra.mxu0 %v9976_v28 }
 0x67e   :  { %8692 = vmatprep.subr.bf16.mxu0 %v9977_v29 }
 0x681   :  { %8693 = vmatpush3.bf16.msra.mxu0 %v9978_v30 }
 0x682   :  { %8694 = vmatprep.subr.bf16.mxu0 %v9979_v33 }
 0x685   :  { %8695 = vmatpush3.bf16.msra.mxu0 %v9980_v35 }
 0x686   :  { %8696 = vmatprep.subr.bf16.mxu0 %v9981_v37 }
 0x689   :  { %8697 = vmatpush3.bf16.msra.mxu0 %v9982_v41 }
 0x68a   :  { %8944 = vmatprep.subr.bf16.mxu0 %v10837_v14 }
 0x6cc   :  { %v2292_v39 = vpop.f32.mrf.mxu0  ;;  %v2374_v51 = vpop.f32.mrf.mxu1 }
 0x6cd   :  { %v2293_v59 = vadd.f32 %v2292_v39, %v12010_v22  ;;  %v2375_v12 = vadd.f32 %v2374_v51, %v12019_v9 }
 0x6ce   :  { %v2294_v53 = vpop.f32.mrf.mxu0  ;;  %v2376_v54 = vpop.f32.mrf.mxu1 }
 0x6cf   :  { %v2334_v44 = vadd.f32 %v11790_v49, %v2293_v59  ;;  %v2377_v3 = vadd.f32 %v2376_v54, %v12015_v62  ;;  %v12023_v49 = vrot.slane %v292_v57, %v11165_v25 }
 0x6d0   :  { %v2296_v55 = vpop.f32.mrf.mxu0  ;;  %v2378_v48 = vpop.f32.mrf.mxu1 }
 0x6d1   :  { %v8561_v1 = vmul.f32 -1.442695, %v2334_v44  ;;  %v2295_v17 = vadd.f32 %v2294_v53, %v12023_v49  ;;  %v9983_v53 = vld [vmem:[%s15531_s4] sm:$0xff] }
 0x6d2   :  { %v2297_v56 = vpop.f32.mrf.mxu0  ;;  %v2379_v36 = vpop.f32.mrf.mxu1 }
 0x6d3   :  { %9487 = vpow2.f32 %v8561_v1  ;;  %v2336_v19 = vadd.f32 %v11795_v52, %v2295_v17 }
 0x6e0   :  { %v9488_v16 = vpop.eup %9487 }
 0x6e1   :  { %v2425_v47 = vadd.f32 1.0, %v9488_v16 }
 0x6ec   :  { %v2415_v2 = vpop.f32.mrf.mxu0 }
 0x6ed   :  { %v2416_v13 = vadd.f32 %v2415_v2, %v2375_v12 }
 0x6ee   :  { %v2417_v4 = vpop.f32.mrf.mxu0 }
 0x6ef   :  { %v2418_v5 = vadd.f32 %v2417_v4, %v2377_v3  ;;  %v8562_v46 = vmul.f32 -1.442695, %v2416_v13 }
 0x6f0   :  { %v2419_v6 = vpop.f32.mrf.mxu0 }
 0x6f1   :  { %v8563_v8 = vmul.f32 -1.442695, %v2418_v5 }
 0x6f2   :  { %v2420_v11 = vpop.f32.mrf.mxu0 }
 0x6f3   :  { %9489 = vpow2.f32 %v8563_v8 }
 0x6f4   :  { %9491 = vpow2.f32 %v8562_v46 }
 0x6f5   :  { %9493 = vrcp.f32 %v2425_v47 }
 0x6f6   :  { %9495 = vtanh.f32 %v2336_v19 }
 0x700   :  { %v9490_v28 = vpop.eup %9489 }
 0x701   :  { %v2438_v29 = vadd.f32 1.0, %v9490_v28  ;;  %v9492_v30 = vpop.eup %9491 }
 0x702   :  { %v9494_v33 = vpop.eup %9493  ;;  %v2432_v39 = vadd.f32 1.0, %v9492_v30 }
 0x703   :  { %9497 = vrcp.f32 %v2438_v29  ;;  %v9496_v37 = vpop.eup %9495 }
 0x704   :  { %v2441_v54 = vmul.f32 %v9496_v37, %v9494_v33  ;;  %9499 = vrcp.f32 %v2432_v39 }
 0x70e   :  { %v2525_v35 = vpop.f32.mrf.mxu1 }
 0x70f   :  { %v2526_v13 = vadd.f32 %v2525_v35, %v11185_v42 }
 0x710   :  { %v9498_v41 = vpop.eup %9497  ;;  %v2527_v51 = vpop.f32.mrf.mxu1 }
 0x711   :  { %v2442_v55 = vmul.f32 %v9983_v53, %v9498_v41  ;;  %v9500_v57 = vpop.eup %9499  ;;  %v2528_v12 = vadd.f32 %v2527_v51, %v11182_v40 }
 0x712   :  { %v2529_v52 = vpop.f32.mrf.mxu1 }
 0x713   :  { %v12030_v48 = vadd.f32 %v2442_v55, %v2441_v54  ;;  %v8567_v16 = vmul.f32 -1.442695, %v2528_v12 }
 0x714   :  { %v2530_v56 = vpop.f32.mrf.mxu1 }
 0x715   :  { %9501 = vtanh.f32 %v12030_v48  ;;  %v2557_v36 = vpack.c.bf16 %v12030_v48, %v12030_v48 }
 0x717   :  { %2590 = vmatprep.mubr.bf16.mxu0 %v2557_v36 }
 0x722   :  { %v9502_v59 = vpop.eup %9501 }
 0x723   :  { %v12035_v44 = vmul.f32 %v9502_v59, %v9500_v57  ;;  %v9984_v57 = vld [vmem:[%s15534_s8] ss:$0 sm:$0xff] }
 0x725   :  { %2446 = vst [vmem:[%s15541_s13] sm:$0xff] %v12035_v44 }
 0x72c   :  { %v2484_v1 = vpop.f32.mrf.mxu0 }
 0x72d   :  { %v2485_v2 = vadd.f32 %v2484_v1, %v11168_v26 }
 0x72e   :  { %v2486_v3 = vpop.f32.mrf.mxu0 }
 0x72f   :  { %v8565_v4 = vmul.f32 -1.442695, %v2485_v2  ;;  %v2487_v5 = vadd.f32 %v2486_v3, %v11171_v27 }
 0x730   :  { %v2488_v6 = vpop.f32.mrf.mxu0 }
 0x731   :  { %9503 = vpow2.f32 %v8565_v4  ;;  %v8566_v8 = vmul.f32 -1.442695, %v2487_v5 }
 0x732   :  { %v2489_v11 = vpop.f32.mrf.mxu0 }
 0x733   :  { %9505 = vpow2.f32 %v8566_v8 }
 0x734   :  { %9507 = vtanh.f32 %v2526_v13 }
 0x735   :  { %9509 = vpow2.f32 %v8567_v16 }
 0x73e   :  { %v9504_v17 = vpop.eup %9503 }
 0x73f   :  { %v2535_v46 = vadd.f32 1.0, %v9504_v17 }
 0x740   :  { %v9506_v47 = vpop.eup %9505 }
 0x741   :  { %9511 = vrcp.f32 %v2535_v46  ;;  %v2541_v19 = vadd.f32 1.0, %v9506_v47  ;;  %v9508_v28 = vpop.eup %9507  ;;  %v9985_v46 = vld [vmem:[%s15535_s1] sm:$0xff] }
 0x742   :  { %v9510_v29 = vpop.eup %9509 }
 0x743   :  { %9513 = vrcp.f32 %v2541_v19  ;;  %v2548_v37 = vadd.f32 1.0, %v9510_v29 }
 0x745   :  { %9515 = vrcp.f32 %v2548_v37  ;;  %v9987_v37 = vld [vmem:[%s15535_s1 + $0x10] sm:$0xff] }
 0x74e   :  { %v9512_v30 = vpop.eup %9511 }
 0x74f   :  { %v2552_v39 = vmul.f32 %v9512_v30, %v9508_v28  ;;  %v9986_v30 = vld [vmem:[%s15535_s1 + $0x8] sm:$0xff] }
 0x750   :  { %v9514_v33 = vpop.eup %9513 }
 0x751   :  { %v2551_v41 = vmul.f32 %v9514_v33, %v11189_v58 }
 0x752   :  { %v9516_v35 = vpop.eup %9515 }
 0x753   :  { %v12046_v51 = vadd.f32 %v2552_v39, %v2551_v41 }
 0x755   :  { %9517 = vtanh.f32 %v12046_v51 }
 0x762   :  { %v9518_v54 = vpop.eup %9517 }
 0x763   :  { %v2555_v53 = vmul.f32 %v9518_v54, %v9516_v35  ;;  %v9988_v54 = vld [vmem:[%s15535_s1 + $0x20] sm:$0xff] }
 0x765   :  { %v12049_v55 = vpack.c.bf16 %v2555_v53, %v2555_v53 }
 0x767   :  { %2591 = vmatmul.mubr.bf16.vlgmr.msra.gmra.mxu0 %v12049_v55 }
 0x768   :  { %8945 = vmatpush3.bf16.msra.mxu0 %v11370_v45  ;;  %8946 = vmatprep.mubr.msk.bf16.mxu0 %vm10838_vm9, %v10837_v14 }
 0x769   :  { %8956 = vmatprep.subr.bf16.mxu0 %v10837_v14 }
 0x827   :  { %v8698_v58 = vpop.f32.mrf.mxu0 }
 0x829   :  { %v8699_v52 = vpop.f32.mrf.mxu0 }
 0x82a   :  { %v8700_v56 = vadd.f32 %v8699_v52, %v8698_v58 }
 0x82b   :  { %v8701_v36 = vpop.f32.mrf.mxu0 }
 0x82c   :  { %v2593_v59 = vadd.f32 %v9984_v57, %v8700_v56  ;;  %v9989_v56 = vld [vmem:[%s15535_s1 + $0x18] sm:$0xff] }
 0x82d   :  { %v8702_v1 = vpop.f32.mrf.mxu0 }
 0x82e   :  { %v2599_v2 = vcombine.high %v2593_v59, %v2593_v59  ;;  %v2606_v3 = vrot.slane %v2593_v59, %v11204_v7  ;;  %v9990_v1 = vld [vmem:[%s15535_s1 + $0x28] sm:$0xff] }
 0x830   :  { %v2613_v4 = vrot.slane %v2599_v2, %v11204_v7  ;;  %v2614_v5 = vcombine.high %v2606_v3, %v2606_v3  ;;  %v2622_v6 = vrot.slane %v2606_v3, %v11204_v7 }
 0x832   :  { %v2636_v8 = vrot.slane %v2614_v5, %v11204_v7  ;;  %v2644_v11 = vcombine.high %v2622_v6, %v2622_v6  ;;  %v2629_v12 = vrot.slane %v2613_v4, %v11204_v7  ;;  %v2651_v13 = vrot.slane %v2622_v6, %v11159_v23 }
 0x833   :  { %v2615_v19 = vcombine.high %v2613_v4, %v2613_v4  ;;  %v9991_v4 = vld [vmem:[%s15536_s9] ss:$0 sm:$0xff] }
 0x834   :  { %v2655_v16 = vrot.slane %v2636_v8, %v11159_v23  ;;  %v2659_v17 = vrot.slane %v2644_v11, %v11159_v23  ;;  %v2688_v47 = vadd.f32 %v9985_v46, %v2651_v13  ;;  %v2646_v28 = vcombine.high %v2636_v8, %v2636_v8  ;;  %v9992_v11 = vld [vmem:[%s15535_s1 + $0x30] sm:$0xff]  ;;  %v9993_v46 = vld [vmem:[%s15535_s1 + $0x38] sm:$0xff] }
 0x835   :  { %v2667_v29 = vrot.slane %v2629_v12, %v11159_v23  ;;  %v2643_v39 = vrot.slane %v2615_v19, %v11204_v7  ;;  %v2645_v58 = vcombine.high %v2629_v12, %v2629_v12 }
 0x836   :  { %v2689_v33 = vadd.f32 %v9986_v30, %v2655_v16  ;;  %v2690_v41 = vadd.f32 %v9987_v37, %v2659_v17  ;;  %9519 = vtanh.f32 %v2688_v47  ;;  %v2663_v35 = vrot.slane %v2646_v28, %v11159_v23 }
 0x837   :  { %v2692_v53 = vadd.f32 %v9988_v54, %v2667_v29  ;;  %v2671_v52 = vrot.slane %v2643_v39, %v11159_v23  ;;  %v2647_v57 = vcombine.high %v2643_v39, %v2643_v39  ;;  %v2675_v59 = vrot.slane %v2645_v58, %v11159_v23 }
 0x838   :  { %9521 = vtanh.f32 %v2689_v33  ;;  %v2691_v36 = vadd.f32 %v9989_v56, %v2663_v35 }
 0x839   :  { %9523 = vtanh.f32 %v2690_v41  ;;  %v2693_v2 = vadd.f32 %v9990_v1, %v2671_v52  ;;  %v2679_v8 = vrot.slane %v2647_v57, %v11159_v23  ;;  %v2694_v12 = vadd.f32 %v9992_v11, %v2675_v59 }
 0x83a   :  { %9525 = vtanh.f32 %v2692_v53 }
 0x83b   :  { %9527 = vtanh.f32 %v2691_v36  ;;  %v2695_v47 = vadd.f32 %v9993_v46, %v2679_v8 }
 0x83c   :  { %9529 = vtanh.f32 %v2693_v2 }
 0x83d   :  { %9531 = vtanh.f32 %v2694_v12 }
 0x83e   :  { %9533 = vtanh.f32 %v2695_v47 }
 0x843   :  { %v9520_v3 = vpop.eup %9519 }
 0x844   :  { %v2704_v5 = vmul.f32 %v9991_v4, %v9520_v3 }
 0x845   :  { %v9522_v6 = vpop.eup %9521 }
 0x846   :  { %2712 = vadd.xlane.f32.xlu0 %v2704_v5  ;;  %v2705_v13 = vmul.f32 %v9991_v4, %v9522_v6  ;;  %v9524_v16 = vpop.eup %9523 }
 0x847   :  { %v2706_v17 = vmul.f32 %v9991_v4, %v9524_v16  ;;  %v9526_v19 = vpop.eup %9525 }
 0x848   :  { %2714 = vadd.xlane.f32.xlu1 %v2705_v13  ;;  %v2708_v28 = vmul.f32 %v9991_v4, %v9526_v19  ;;  %v9528_v29 = vpop.eup %9527 }
 0x849   :  { %v2707_v30 = vmul.f32 %v9991_v4, %v9528_v29  ;;  %v9530_v33 = vpop.eup %9529 }
 0x84a   :  { %v2709_v37 = vmul.f32 %v9991_v4, %v9530_v33  ;;  %v9532_v41 = vpop.eup %9531 }
 0x84b   :  { %v2710_v39 = vmul.f32 %v9991_v4, %v9532_v41  ;;  %v9534_v35 = vpop.eup %9533 }
 0x84c   :  { %2716 = vadd.xlane.f32.xlu1 %v2706_v17  ;;  %v2711_v54 = vmul.f32 %v9991_v4, %v9534_v35 }
 0x850   :  { %2720 = vadd.xlane.f32.xlu1 %v2708_v28 }
 0x854   :  { %2718 = vadd.xlane.f32.xlu1 %v2707_v30 }
 0x858   :  { %2722 = vadd.xlane.f32.xlu1 %v2709_v37 }
 0x85c   :  { %2724 = vadd.xlane.f32.xlu1 %v2710_v39 }
 0x860   :  { %2726 = vadd.xlane.f32.xlu1 %v2711_v54 }
 0x8cf   :  { %v2713_v56 = vpop.xlane.xlu0 %2712 }
 0x8d0   :  { %v2728_v1 = vadd.f32 %v2713_v56, %v11251_v32 }
 0x8d1   :  { %v2715_v53 = vpop.xlane.xlu1 %2714 }
 0x8d2   :  { %v2729_v57 = vadd.f32 %v2715_v53, %v11251_v32  ;;  %v2747_v4 = vrot.slane %v2728_v1, %v11249_v31 }
 0x8d4   :  { %v2751_v5 = vrot.slane %v2729_v57, %v11249_v31 }
 0x8d5   :  { %v2717_v58 = vpop.xlane.xlu1 %2716 }
 0x8d6   :  { %v2730_v59 = vadd.f32 %v2717_v58, %v11251_v32  ;;  %v2776_v16 = vsel %vm1080_vm0, %v2751_v5, %v2747_v4 }
 0x8d8   :  { %v2755_v6 = vrot.slane %v2730_v59, %v11249_v31 }
 0x8d9   :  { %v2721_v52 = vpop.xlane.xlu1 %2720 }
 0x8da   :  { %v2732_v12 = vadd.f32 %v2721_v52, %v11251_v32  ;;  %v2777_v46 = vsel %vm1082_vm1, %v2755_v6, %v2776_v16 }
 0x8dc   :  { %v2763_v28 = vrot.slane %v2732_v12, %v11249_v31 }
 0x8dd   :  { %v2719_v36 = vpop.xlane.xlu1 %2718 }
 0x8de   :  { %v2731_v2 = vadd.f32 %v2719_v36, %v11251_v32 }
 0x8e0   :  { %v2759_v8 = vrot.slane %v2731_v2, %v11249_v31 }
 0x8e1   :  { %v2723_v3 = vpop.xlane.xlu1 %2722 }
 0x8e2   :  { %v2733_v11 = vadd.f32 %v2723_v3, %v11251_v32  ;;  %v2778_v47 = vsel %vm1084_vm2, %v2759_v8, %v2777_v46 }
 0x8e3   :  { %v2779_v37 = vsel %vm1086_vm3, %v2763_v28, %v2778_v47 }
 0x8e4   :  { %v2767_v19 = vrot.slane %v2733_v11, %v11249_v31 }
 0x8e5   :  { %v2725_v13 = vpop.xlane.xlu1 %2724 }
 0x8e6   :  { %v2734_v17 = vadd.f32 %v2725_v13, %v11251_v32  ;;  %v2780_v39 = vsel %vm1088_vm4, %v2767_v19, %v2779_v37 }
 0x8e8   :  { %v2771_v29 = vrot.slane %v2734_v17, %v11249_v31 }
 0x8e9   :  { %v2727_v30 = vpop.xlane.xlu1 %2726 }
 0x8ea   :  { %v2735_v33 = vadd.f32 %v2727_v30, %v11251_v32  ;;  %v2781_v35 = vsel %vm1090_vm5, %v2771_v29, %v2780_v39 }
 0x8ec   :  { %v2775_v41 = vrot.slane %v2735_v33, %v11249_v31 }
 0x8ee   :  { %v2782_v54 = vsel %vm1092_vm6, %v2775_v41, %v2781_v35 }
 0x8ef   :  { %v2784_v53 = vsel %vm1095_vm7, %v2782_v54, -inf }
 0x8f0   :  { %2785 = vmax.xlane.f32.xlu1 %v2784_v53 }
 0x979   :  { %v2786_v58 = vpop.xlane.xlu1 %2785 }
 0x97a   :  { %v2791_v52 = vrot.slane %v2786_v58, %v11159_v23  ;;  %v2795_v56 = vrot.slane %v2786_v58, %v11165_v25  ;;  %v2799_v36 = vrot.slane %v2786_v58, %v11179_v38  ;;  %v2803_v3 = vrot.slane %v2786_v58, %v11176_v34 }
 0x97b   :  { %v2811_v5 = vrot.slane %v2786_v58, %v11289_v15  ;;  %v2807_v13 = vrot.slane %v2786_v58, %v11285_v10  ;;  %v2819_v19 = vrot.slane %v2786_v58, %v11278_v0  ;;  %v2815_v30 = vrot.slane %v2786_v58, %v11293_v20 }
 0x97c   :  { %v2828_v6 = vsub.f32 %v2728_v1, %v2791_v52  ;;  %v2829_v4 = vsub.f32 %v2729_v57, %v2795_v56  ;;  %v2831_v8 = vsub.f32 %v2731_v2, %v2803_v3  ;;  %v2830_v16 = vsub.f32 %v2730_v59, %v2799_v36 }
 0x97d   :  { %v2833_v28 = vsub.f32 %v2733_v11, %v2811_v5  ;;  %v2832_v37 = vsub.f32 %v2732_v12, %v2807_v13  ;;  %v2835_v39 = vsub.f32 %v2735_v33, %v2819_v19  ;;  %v2834_v57 = vsub.f32 %v2734_v17, %v2815_v30 }
 0x97e   :  { %v2836_v46 = vmul.f32 1.442695, %v2828_v6  ;;  %v2838_v47 = vmul.f32 1.442695, %v2829_v4  ;;  %v2842_v29 = vmul.f32 1.442695, %v2831_v8 }
 0x97f   :  { %v2840_v41 = vmul.f32 1.442695, %v2830_v16  ;;  %v2846_v1 = vmul.f32 1.442695, %v2833_v28  ;;  %v2844_v2 = vmul.f32 1.442695, %v2832_v37 }
 0x980   :  { %9535 = vpow2.f32 %v2836_v46  ;;  %v2850_v59 = vmul.f32 1.442695, %v2835_v39  ;;  %v2848_v35 = vmul.f32 1.442695, %v2834_v57 }
 0x981   :  { %9537 = vpow2.f32 %v2838_v47 }
 0x982   :  { %9539 = vpow2.f32 %v2842_v29 }
 0x983   :  { %9541 = vpow2.f32 %v2840_v41 }
 0x984   :  { %9543 = vpow2.f32 %v2846_v1 }
 0x985   :  { %9545 = vpow2.f32 %v2844_v2 }
 0x986   :  { %9547 = vpow2.f32 %v2850_v59 }
 0x987   :  { %9549 = vpow2.f32 %v2848_v35 }
 0x98d   :  { %v9536_v54 = vpop.eup %9535 }
 0x98e   :  { %v9538_v11 = vpop.eup %9537  ;;  %2861 = vperm.xlu0 %9165, %v9536_v54  }
 0x98f   :  { %2864 = vperm.xlu1 %9166, %v9538_v11   ;;  %v12132_v53 = vpop.eup %9539 }
 0x990   :  { %v9542_v12 = vpop.eup %9541 }
 0x991   :  { %v12135_v33 = vpop.eup %9543 }
 0x992   :  { %2870 = vperm.xlu0 %9165, %v12132_v53   ;;  %v12137_v17 = vpop.eup %9545 }
 0x993   :  { %2867 = vperm.xlu1 %9166, %v9542_v12   ;;  %v12141_v58 = vpop.eup %9547 }
 0x994   :  { %v12143_v52 = vpop.eup %9549 }
 0x996   :  { %2876 = vperm.xlu0 %9165, %v12135_v33  }
 0x997   :  { %2873 = vperm.xlu1 %9166, %v12137_v17  }
 0x99a   :  { %2882 = vperm.xlu0 %9165, %v12141_v58  }
 0x99b   :  { %2879 = vperm.xlu1 %9166, %v12143_v52  }
 0xa09   :  { %v2862_v56 = vpop.permute.xlu0 %2861 }
 0xa0a   :  { %v2865_v36 = vpop.permute.xlu1 %2864  ;;  %v2887_v5 = vrot.slane %v2862_v56, %v11249_v31 }
 0xa0b   :  { %v2891_v3 = vrot.slane %v2865_v36, %v11249_v31 }
 0xa0d   :  { %v2871_v6 = vpop.permute.xlu0 %2870  ;;  %v2916_v13 = vsel %vm1080_vm0, %v2891_v3, %v2887_v5 }
 0xa0e   :  { %v2868_v4 = vpop.permute.xlu1 %2867  ;;  %v2899_v16 = vrot.slane %v2871_v6, %v11249_v31 }
 0xa0f   :  { %v2895_v8 = vrot.slane %v2868_v4, %v11249_v31 }
 0xa11   :  { %v2917_v46 = vsel %vm1082_vm1, %v2895_v8, %v2916_v13  ;;  %v2877_v47 = vpop.permute.xlu0 %2876 }
 0xa12   :  { %v2874_v19 = vpop.permute.xlu1 %2873  ;;  %v2918_v29 = vsel %vm1084_vm2, %v2899_v16, %v2917_v46  ;;  %v2907_v30 = vrot.slane %v2877_v47, %v11249_v31 }
 0xa13   :  { %v2903_v28 = vrot.slane %v2874_v19, %v11249_v31 }
 0xa15   :  { %v2919_v37 = vsel %vm1086_vm3, %v2903_v28, %v2918_v29  ;;  %v2883_v41 = vpop.permute.xlu0 %2882 }
 0xa16   :  { %v2880_v39 = vpop.permute.xlu1 %2879  ;;  %v2915_v1 = vrot.slane %v2883_v41, %v11249_v31  ;;  %v2920_v2 = vsel %vm1088_vm4, %v2907_v30, %v2919_v37 }
 0xa17   :  { %v2911_v57 = vrot.slane %v2880_v39, %v11249_v31 }
 0xa19   :  { %v2921_v59 = vsel %vm1090_vm5, %v2911_v57, %v2920_v2 }
 0xa1a   :  { %v2922_v35 = vsel %vm1092_vm6, %v2915_v1, %v2921_v59 }
 0xa1b   :  { %v2924_v56 = vsel %vm1095_vm7, %v2922_v35, 0.0 }
 0xa1c   :  { %2925 = vadd.xlane.f32.xlu1 %v2924_v56 }
 0xaa5   :  { %v2926_v36 = vpop.xlane.xlu1 %2925 }
 0xaa6   :  { %v2931_v3 = vrot.slane %v2926_v36, %v11159_v23  ;;  %v2935_v5 = vrot.slane %v2926_v36, %v11165_v25  ;;  %v2939_v6 = vrot.slane %v2926_v36, %v11179_v38  ;;  %v2943_v4 = vrot.slane %v2926_v36, %v11176_v34 }
 0xaa7   :  { %v2947_v8 = vrot.slane %v2926_v36, %v11285_v10  ;;  %v2951_v13 = vrot.slane %v2926_v36, %v11289_v15  ;;  %v2955_v19 = vrot.slane %v2926_v36, %v11293_v20  ;;  %v2959_v37 = vrot.slane %v2926_v36, %v11278_v0 }
 0xaa8   :  { %9551 = vrcp.f32 %v2931_v3 }
 0xaa9   :  { %9553 = vrcp.f32 %v2935_v5 }
 0xaaa   :  { %9555 = vrcp.f32 %v2939_v6 }
 0xaab   :  { %9557 = vrcp.f32 %v2943_v4 }
 0xaac   :  { %9559 = vrcp.f32 %v2947_v8 }
 0xaad   :  { %9561 = vrcp.f32 %v2951_v13 }
 0xaae   :  { %9563 = vrcp.f32 %v2955_v19 }
 0xaaf   :  { %9565 = vrcp.f32 %v2959_v37 }
 0xab5   :  { %v9552_v16 = vpop.eup %9551 }
 0xab6   :  { %v9554_v46 = vpop.eup %9553  ;;  %v2969_v47 = vmul.f32 %v9552_v16, %v9536_v54 }
 0xab7   :  { %v9556_v28 = vpop.eup %9555  ;;  %v2971_v29 = vmul.f32 %v9554_v46, %v9538_v11 }
 0xab8   :  { %v2984_v30 = vpack.c.bf16 %v2969_v47, %v2969_v47  ;;  %v2973_v1 = vmul.f32 %v9556_v28, %v9542_v12  ;;  %v9558_v57 = vpop.eup %9557 }
 0xab9   :  { %v2985_v39 = vpack.c.bf16 %v2971_v29, %v2971_v29  ;;  %v2975_v35 = vmul.f32 %v9558_v57, %v12132_v53  ;;  %v9560_v54 = vpop.eup %9559 }
 0xaba   :  { %v2993_v41 = vunpack.c.l.b16 %v2984_v30  ;;  %v2986_v59 = vpack.c.bf16 %v2973_v1, %v2973_v1  ;;  %v2977_v11 = vmul.f32 %v9560_v54, %v12137_v17  ;;  %v9562_v5 = vpop.eup %9561 }
 0xabb   :  { %v3046_v2 = vunpack.c.l.b16 %v2985_v39  ;;  %v2987_v3 = vpack.c.bf16 %v2975_v35, %v2975_v35  ;;  %v2979_v12 = vmul.f32 %v9562_v5, %v12135_v33  ;;  %v9564_v4 = vpop.eup %9563  ;;  %v9994_v5 = vld [vmem:[%s15538_s11 + $0xe4] ss:$16 sps:$4 sm:$0xff]  }
 0xabc   :  { %2995 = vperm.xlu0 %9165, %v2993_v41   ;;  %v3099_v56 = vunpack.c.l.b16 %v2986_v59  ;;  %v2988_v6 = vpack.c.bf16 %v2977_v11, %v2977_v11  ;;  %v2981_v16 = vmul.f32 %v9564_v4, %v12143_v52  ;;  %v9566_v53 = vpop.eup %9565  ;;  %v12206_v4 = vpack.c.bf16 %v12035_v44, %v12035_v44  ;;  %v9995_v44 = vld [vmem:[%s15538_s11 + $0xe0] ss:$16 sps:$4 sm:$0xff]  }
 0xabd   :  { %v3152_v36 = vunpack.c.l.b16 %v2987_v3  ;;  %v2989_v13 = vpack.c.bf16 %v2979_v12, %v2979_v12  ;;  %v2983_v19 = vmul.f32 %v9566_v53, %v12141_v58 }
 0xabe   :  { %v3205_v8 = vunpack.c.l.b16 %v2988_v6  ;;  %v2990_v47 = vpack.c.bf16 %v2981_v16, %v2981_v16 }
 0xabf   :  { %v3258_v46 = vunpack.c.l.b16 %v2989_v13  ;;  %v2991_v28 = vpack.c.bf16 %v2983_v19, %v2983_v19  ;;  %v9996_v13 = vld [vmem:[%s15538_s11 + $0xc4] ss:$16 sps:$4 sm:$0xff]  }
 0xac0   :  { %3048 = vperm.xlu0 %9165, %v3046_v2   ;;  %v3311_v17 = vunpack.c.l.b16 %v2990_v47  ;;  %v9998_v47 = vld [vmem:[%s15538_s11 + $0xa4] ss:$16 sps:$4 sm:$0xff]  }
 0xac1   :  { %v3364_v29 = vunpack.c.l.b16 %v2991_v28  ;;  %v10000_v28 = vld [vmem:[%s15538_s11 + $0xa0] ss:$16 sps:$4 sm:$0xff]  }
 0xac4   :  { %3101 = vperm.xlu0 %9165, %v3099_v56  }
 0xac8   :  { %3154 = vperm.xlu0 %9165, %v3152_v36  }
 0xacc   :  { %3207 = vperm.xlu0 %9165, %v3205_v8  }
 0xad0   :  { %3260 = vperm.xlu0 %9165, %v3258_v46   ;;  %v9997_v46 = vld [vmem:[%s15538_s11 + $0xc0] ss:$16 sps:$4 sm:$0xff]  }
 0xad4   :  { %3313 = vperm.xlu0 %9165, %v3311_v17   ;;  %v9999_v17 = vld [vmem:[%s15538_s11 + $0x2e4] ss:$16 sps:$4 sm:$0xff]  }
 0xad8   :  { %3366 = vperm.xlu0 %9165, %v3364_v29   ;;  %v10001_v29 = vld [vmem:[%s15538_s11 + $0x84] ss:$16 sps:$4 sm:$0xff]  }
 0xb37   :  { %v2996_v30 = vpop.permute.xlu0 %2995 }
 0xb38   :  { %v3000_v33 = vrot.slane %v2996_v30, %v11249_v31 }
 0xb3a   :  { %v3001_v37 = vpack.c.b16 %v3000_v33, %v3000_v33  ;;  %v10002_v33 = vld [vmem:[%s15538_s11 + $0x80] ss:$16 sps:$4 sm:$0xff]  }
 0xb3b   :  { %v3049_v41 = vpop.permute.xlu0 %3048 }
 0xb3c   :  { %8923 = vmatmul.mubr.msk.bf16.vlgmr.msra.gmra.mxu1 %vm1095_vm7, %v3001_v37  ;;  %v3053_v58 = vrot.slane %v3049_v41, %v11249_v31  ;;  %v10003_v37 = vld [vmem:[%s15538_s11 + $0x64] ss:$16 sps:$4 sm:$0xff]   ;;  %v10004_v41 = vld [vmem:[%s15538_s11 + $0x2e0] ss:$16 sps:$4 sm:$0xff]  }
 0xb3d   :  { %8927 = vmatpush3.bf16.msra.mxu1 %v11380_v43  ;;  %8928 = vmatprep.mubr.msk.bf16.mxu1 %vm10838_vm9, %v10837_v14 }
 0xb3e   :  { %8932 = vmatprep.subr.bf16.mxu1 %v10837_v14  ;;  %v3054_v39 = vpack.c.b16 %v3053_v58, %v3053_v58  ;;  %v10005_v58 = vld [vmem:[%s15538_s11 + $0x2c4] ss:$16 sps:$4 sm:$0xff]  }
 0xb3f   :  { %v3102_v52 = vpop.permute.xlu0 %3101 }
 0xb40   :  { %v3106_v57 = vrot.slane %v3102_v52, %v11249_v31  ;;  %v10006_v52 = vld [vmem:[%s15538_s11 + $0x60] ss:$16 sps:$4 sm:$0xff]  }
 0xb42   :  { %v3107_v35 = vpack.c.b16 %v3106_v57, %v3106_v57  ;;  %v10009_v57 = vld [vmem:[%s15538_s11 + $0x2a4] ss:$16 sps:$4 sm:$0xff]  }
 0xb43   :  { %v3155_v1 = vpop.permute.xlu0 %3154 }
 0xb44   :  { %8929 = vmatmul.mubr.msk.bf16.vlgmr.msra.gmra.mxu1 %vm1095_vm7, %v3054_v39  ;;  %v3159_v3 = vrot.slane %v3155_v1, %v11249_v31  ;;  %v10007_v39 = vld [vmem:[%s15538_s11 + $0x44] ss:$16 sps:$4 sm:$0xff]   ;;  %v10008_v1 = vld [vmem:[%s15538_s11 + $0x2c0] ss:$16 sps:$4 sm:$0xff]  }
 0xb45   :  { %8933 = vmatpush3.bf16.msra.mxu1 %v11392_v50  ;;  %8934 = vmatprep.mubr.msk.bf16.mxu1 %vm10838_vm9, %v10837_v14 }
 0xb46   :  { %8938 = vmatprep.subr.bf16.mxu1 %v10837_v14  ;;  %v3160_v6 = vpack.c.b16 %v3159_v3, %v3159_v3  ;;  %v10015_v3 = vld [vmem:[%s15538_s11 + $0x4] ss:$16 sps:$4 sm:$0xff]  }
 0xb47   :  { %v3208_v2 = vpop.permute.xlu0 %3207 }
 0xb48   :  { %v3212_v59 = vrot.slane %v3208_v2, %v11249_v31  ;;  %v10010_v2 = vld [vmem:[%s15538_s11 + $0x40] ss:$16 sps:$4 sm:$0xff]  }
 0xb4a   :  { %v3213_v54 = vpack.c.b16 %v3212_v59, %v3212_v59  ;;  %v10011_v59 = vld [vmem:[%s15538_s11 + $0x24] ss:$16 sps:$4 sm:$0xff]  }
 0xb4b   :  { %v3261_v56 = vpop.permute.xlu0 %3260 }
 0xb4c   :  { %8935 = vmatmul.mubr.msk.bf16.vlgmr.msra.gmra.mxu1 %vm1095_vm7, %v3107_v35  ;;  %8947 = vmatmul.mubr.msk.bf16.vlgmr.msra.gmra.mxu0 %vm1095_vm7, %v3213_v54  ;;  %v3265_v8 = vrot.slane %v3261_v56, %v11249_v31  ;;  %v10012_v35 = vld [vmem:[%s15538_s11 + $0x2a0] ss:$16 sps:$4 sm:$0xff]   ;;  %v10013_v54 = vld [vmem:[%s15538_s11 + $0x284] ss:$16 sps:$4 sm:$0xff]  }
 0xb4d   :  { %8939 = vmatpush3.bf16.msra.mxu1 %v11408_v60  ;;  %8957 = vmatpush3.bf16.msra.mxu0 %v11411_v61  ;;  %v10014_v56 = vld [vmem:[%s15538_s11 + $0x20] ss:$16 sps:$4 sm:$0xff]  }
 0xb4e   :  { %8940 = vmatprep.mubr.msk.bf16.mxu1 %vm10838_vm9, %v10837_v14  ;;  %8950 = vmatprep.subr.bf16.mxu1 %v10837_v14  ;;  %v3266_v16 = vpack.c.b16 %v3265_v8, %v3265_v8  ;;  %v10021_v8 = vld [vmem:[%s15538_s11 + $0x244] ss:$16 sps:$4 sm:$0xff]  }
 0xb4f   :  { %v3314_v11 = vpop.permute.xlu0 %3313  ;;  %8958 = vmatprep.mubr.msk.bf16.mxu0 %vm10838_vm9, %v10837_v14  ;;  %3441 = vmatprep.subr.bf16.mxu0 %v9994_v5  ;;  %v10017_v5 = vld [vmem:[%s15538_s11 + $0x264] ss:$16 sps:$4 sm:$0xff]  }
 0xb50   :  { %v3318_v36 = vrot.slane %v3314_v11, %v11249_v31  ;;  %v10016_v11 = vld [vmem:[%s15538_s11 + $0x280] ss:$16 sps:$4 sm:$0xff]  }
 0xb52   :  { %v3319_v12 = vpack.c.b16 %v3318_v36, %v3318_v36  ;;  %v10018_v36 = vld [vmem:[%s15538_s11] ss:$16 sps:$4 sm:$0xff]  }
 0xb53   :  { %v3367_v53 = vpop.permute.xlu0 %3366 }
 0xb54   :  { %8941 = vmatmul.mubr.msk.bf16.vlgmr.msra.gmra.mxu1 %vm1095_vm7, %v3160_v6  ;;  %8959 = vmatmul.mubr.msk.bf16.vlgmr.msra.gmra.mxu0 %vm1095_vm7, %v3319_v12  ;;  %v3371_v19 = vrot.slane %v3367_v53, %v11249_v31  ;;  %v10019_v6 = vld [vmem:[%s15538_s11 + $0x1e4] ss:$16 sps:$4 sm:$0xff]   ;;  %v10020_v12 = vld [vmem:[%s15538_s11 + $0x260] ss:$16 sps:$4 sm:$0xff]  }
 0xb55   :  { %8951 = vmatpush3.bf16.msra.mxu1 %v11431_v21  ;;  %3473 = vmatprep.mubr.bf16.mxu0 %v12206_v4  ;;  %v10025_v53 = vld [vmem:[%s15538_s11 + $0x224] ss:$16 sps:$4 sm:$0xff]  }
 0xb56   :  { %8952 = vmatprep.mubr.msk.bf16.mxu1 %vm10838_vm9, %v10837_v14  ;;  %8962 = vmatprep.subr.bf16.mxu1 %v10837_v14  ;;  %v3372_v30 = vpack.c.b16 %v3371_v19, %v3371_v19  ;;  %v10028_v19 = vld [vmem:[%s15538_s11 + $0x220] ss:$16 sps:$4 sm:$0xff]  }
 0xb57   :  { %3442 = vmatpush1.bf16.msra.mxu0 %v9995_v44  ;;  %v10022_v44 = vld [vmem:[%s15538_s11 + $0x1e0] ss:$16 sps:$4 sm:$0xff]  }
 0xb58   :  { %3443 = vmatprep.subr.bf16.mxu0 %v9996_v13  ;;  %v10023_v13 = vld [vmem:[%s15538_s11 + $0x1c4] ss:$16 sps:$4 sm:$0xff]  }
 0xb5b   :  { %3444 = vmatpush1.bf16.msra.mxu0 %v9997_v46  ;;  %v10026_v46 = vld [vmem:[%s15538_s11 + $0x1c0] ss:$16 sps:$4 sm:$0xff]  }
 0xb5c   :  { %8953 = vmatmul.mubr.msk.bf16.vlgmr.msra.gmra.mxu1 %vm1095_vm7, %v3266_v16  ;;  %3445 = vmatprep.subr.bf16.mxu0 %v9998_v47  ;;  %v10024_v16 = vld [vmem:[%s15538_s11 + $0x240] ss:$16 sps:$4 sm:$0xff]   ;;  %v10027_v47 = vld [vmem:[%s15538_s11 + $0x1a4] ss:$16 sps:$4 sm:$0xff]  }
 0xb5d   :  { %8963 = vmatpush3.bf16.msra.mxu1 %v11456_v24  ;;  %8964 = vmatprep.mubr.msk.bf16.mxu1 %vm10838_vm9, %v10837_v14 }
 0xb5e   :  { %3482 = vmatprep.subr.bf16.mxu1 %v9999_v17  ;;  %v10029_v17 = vld [vmem:[%s15538_s11 + $0x204] ss:$16 sps:$4 sm:$0xff]  }
 0xb5f   :  { %3446 = vmatpush1.bf16.msra.mxu0 %v10000_v28  ;;  %v10030_v28 = vld [vmem:[%s15538_s11 + $0x1a0] ss:$16 sps:$4 sm:$0xff]  }
 0xb60   :  { %3447 = vmatprep.subr.bf16.mxu0 %v10001_v29  ;;  %v10031_v29 = vld [vmem:[%s15538_s11 + $0x184] ss:$16 sps:$4 sm:$0xff]  }
 0xb63   :  { %3448 = vmatpush1.bf16.msra.mxu0 %v10002_v33  ;;  %v10033_v33 = vld [vmem:[%s15538_s11 + $0xec] ss:$16 sps:$4 sm:$0xff]  }
 0xb64   :  { %8965 = vmatmul.mubr.msk.bf16.vlgmr.msra.gmra.mxu1 %vm1095_vm7, %v3372_v30  ;;  %3449 = vmatprep.subr.bf16.mxu0 %v10003_v37  ;;  %v10032_v30 = vld [vmem:[%s15538_s11 + $0x200] ss:$16 sps:$4 sm:$0xff]  }
 0xb65   :  { %3483 = vmatpush1.bf16.msra.mxu1 %v10004_v41  ;;  %3514 = vmatprep.mubr.bf16.mxu1 %v10835_v63  ;;  %v10034_v37 = vld [vmem:[%s15538_s11 + $0x180] ss:$16 sps:$4 sm:$0xff]   ;;  %v10035_v41 = vld [vmem:[%s15538_s11 + $0x164] ss:$16 sps:$4 sm:$0xff]  }
 0xb66   :  { %3484 = vmatprep.subr.bf16.mxu1 %v10005_v58  ;;  %v10036_v58 = vld [vmem:[%s15538_s11 + $0xe8] ss:$16 sps:$4 sm:$0xff]  }
 0xb67   :  { %3450 = vmatpush1.bf16.msra.mxu0 %v10006_v52  ;;  %v10037_v52 = vld [vmem:[%s15538_s11 + $0xcc] ss:$16 sps:$4 sm:$0xff]  }
 0xb68   :  { %3451 = vmatprep.subr.bf16.mxu0 %v10007_v39  ;;  %v10038_v39 = vld [vmem:[%s15538_s11 + $0x160] ss:$16 sps:$4 sm:$0xff]  }
 0xb69   :  { %3485 = vmatpush1.bf16.msra.mxu1 %v10008_v1  ;;  %v10039_v1 = vld [vmem:[%s15538_s11 + $0x144] ss:$16 sps:$4 sm:$0xff]  }
 0xb6a   :  { %3486 = vmatprep.subr.bf16.mxu1 %v10009_v57  ;;  %v10041_v57 = vld [vmem:[%s15538_s11 + $0xac] ss:$16 sps:$4 sm:$0xff]  }
 0xb6b   :  { %3452 = vmatpush1.bf16.msra.mxu0 %v10010_v2  ;;  %v10042_v2 = vld [vmem:[%s15538_s11 + $0x140] ss:$16 sps:$4 sm:$0xff]  }
 0xb6c   :  { %3453 = vmatprep.subr.bf16.mxu0 %v10011_v59  ;;  %v10043_v59 = vld [vmem:[%s15538_s11 + $0x124] ss:$16 sps:$4 sm:$0xff]  }
 0xb6d   :  { %3487 = vmatpush1.bf16.msra.mxu1 %v10012_v35  ;;  %v10044_v35 = vld [vmem:[%s15538_s11 + $0xa8] ss:$16 sps:$4 sm:$0xff]  }
 0xb6e   :  { %3488 = vmatprep.subr.bf16.mxu1 %v10013_v54  ;;  %v10045_v54 = vld [vmem:[%s15538_s11 + $0x8c] ss:$16 sps:$4 sm:$0xff]  }
 0xb6f   :  { %3454 = vmatpush1.bf16.msra.mxu0 %v10014_v56  ;;  %v10046_v56 = vld [vmem:[%s15538_s11 + $0x120] ss:$16 sps:$4 sm:$0xff]  }
 0xb70   :  { %3455 = vmatprep.subr.bf16.mxu0 %v10015_v3  ;;  %v10047_v3 = vld [vmem:[%s15538_s11 + $0x104] ss:$16 sps:$4 sm:$0xff]  }
 0xb71   :  { %3489 = vmatpush1.bf16.msra.mxu1 %v10016_v11  ;;  %v10048_v11 = vld [vmem:[%s15538_s11 + $0x88] ss:$16 sps:$4 sm:$0xff]  }
 0xb72   :  { %3490 = vmatprep.subr.bf16.mxu1 %v10017_v5  ;;  %v10049_v5 = vld [vmem:[%s15538_s11 + $0x6c] ss:$16 sps:$4 sm:$0xff]  }
 0xb73   :  { %3456 = vmatpush1.bf16.msra.mxu0 %v10018_v36  ;;  %v10050_v36 = vld [vmem:[%s15538_s11 + $0x100] ss:$16 sps:$4 sm:$0xff]  }
 0xb74   :  { %3457 = vmatprep.subr.bf16.mxu0 %v10019_v6  ;;  %v10051_v6 = vld [vmem:[%s15538_s11 + $0x2ec] ss:$16 sps:$4 sm:$0xff]  }
 0xb75   :  { %3491 = vmatpush1.bf16.msra.mxu1 %v10020_v12  ;;  %v10052_v12 = vld [vmem:[%s15538_s11 + $0x68] ss:$16 sps:$4 sm:$0xff]  }
 0xb76   :  { %3492 = vmatprep.subr.bf16.mxu1 %v10021_v8  ;;  %v10053_v8 = vld [vmem:[%s15538_s11 + $0x4c] ss:$16 sps:$4 sm:$0xff]  }
 0xb77   :  { %3458 = vmatpush2.bf16.msra.mxu0 %v10022_v44  ;;  %v10054_v44 = vld [vmem:[%s15538_s11 + $0x48] ss:$16 sps:$4 sm:$0xff]  }
 0xb78   :  { %3459 = vmatprep.subr.bf16.mxu0 %v10023_v13  ;;  %v10055_v13 = vld [vmem:[%s15538_s11 + $0x2c] ss:$16 sps:$4 sm:$0xff]  }
 0xb79   :  { %3493 = vmatpush1.bf16.msra.mxu1 %v10024_v16  ;;  %v10056_v16 = vld [vmem:[%s15538_s11 + $0x28] ss:$16 sps:$4 sm:$0xff]  }
 0xb7a   :  { %3494 = vmatprep.subr.bf16.mxu1 %v10025_v53  ;;  %v10057_v53 = vld [vmem:[%s15538_s11 + $0xc] ss:$16 sps:$4 sm:$0xff]  }
 0xb7b   :  { %3460 = vmatpush2.bf16.msra.mxu0 %v10026_v46  ;;  %v10058_v46 = vld [vmem:[%s15538_s11 + $0x8] ss:$16 sps:$4 sm:$0xff]  }
 0xb7c   :  { %3461 = vmatprep.subr.bf16.mxu0 %v10027_v47  ;;  %v10059_v47 = vld [vmem:[%s15538_s11 + $0x1ec] ss:$16 sps:$4 sm:$0xff]  }
 0xb7d   :  { %3495 = vmatpush1.bf16.msra.mxu1 %v10028_v19  ;;  %v10060_v19 = vld [vmem:[%s15538_s11 + $0x1e8] ss:$16 sps:$4 sm:$0xff]  }
 0xb7e   :  { %3496 = vmatprep.subr.bf16.mxu1 %v10029_v17  ;;  %v10061_v17 = vld [vmem:[%s15538_s11 + $0x1cc] ss:$16 sps:$4 sm:$0xff]  }
 0xb7f   :  { %3462 = vmatpush2.bf16.msra.mxu0 %v10030_v28  ;;  %v10062_v28 = vld [vmem:[%s15538_s11 + $0x1c8] ss:$16 sps:$4 sm:$0xff]  }
 0xb80   :  { %3463 = vmatprep.subr.bf16.mxu0 %v10031_v29  ;;  %v10063_v29 = vld [vmem:[%s15538_s11 + $0x1ac] ss:$16 sps:$4 sm:$0xff]  }
 0xb81   :  { %3497 = vmatpush1.bf16.msra.mxu1 %v10032_v30  ;;  %v10064_v30 = vld [vmem:[%s15538_s11 + $0x1a8] ss:$16 sps:$4 sm:$0xff]  }
 0xb82   :  { %3523 = vmatprep.subr.bf16.mxu1 %v10033_v33  ;;  %v10065_v33 = vld [vmem:[%s15538_s11 + $0x18c] ss:$16 sps:$4 sm:$0xff]  }
 0xb83   :  { %3464 = vmatpush2.bf16.msra.mxu0 %v10034_v37  ;;  %v10066_v37 = vld [vmem:[%s15538_s11 + $0x188] ss:$16 sps:$4 sm:$0xff]  }
 0xb84   :  { %3515 = vmatmul.mubr.bf16.vlgmr.msra.gmra.mxu1 %v12049_v55  ;;  %3465 = vmatprep.subr.bf16.mxu0 %v10035_v41  ;;  %v10067_v41 = vld [vmem:[%s15538_s11 + $0x16c] ss:$16 sps:$4 sm:$0xff]  }
 0xb85   :  { %3555 = vmatprep.mubr.bf16.mxu1 %v12206_v4  ;;  %3524 = vmatpush1.bf16.msra.mxu1 %v10036_v58  ;;  %v10040_v4 = vld [vmem:[%s15538_s11 + $0xc8] ss:$16 sps:$4 sm:$0xff]  }
 0xb86   :  { %3525 = vmatprep.subr.bf16.mxu1 %v10037_v52  ;;  %v10068_v58 = vld [vmem:[%s15538_s11 + $0x168] ss:$16 sps:$4 sm:$0xff]   ;;  %v10069_v52 = vld [vmem:[%s15538_s11 + $0x14c] ss:$16 sps:$4 sm:$0xff]  }
 0xb87   :  { %3466 = vmatpush2.bf16.msra.mxu0 %v10038_v39  ;;  %v10070_v39 = vld [vmem:[%s15538_s11 + $0x148] ss:$16 sps:$4 sm:$0xff]  }
 0xb88   :  { %3467 = vmatprep.subr.bf16.mxu0 %v10039_v1  ;;  %v10071_v1 = vld [vmem:[%s15538_s11 + $0x12c] ss:$16 sps:$4 sm:$0xff]  }
 0xb89   :  { %3526 = vmatpush1.bf16.msra.mxu1 %v10040_v4  ;;  %v10072_v4 = vld [vmem:[%s15538_s11 + $0x128] ss:$16 sps:$4 sm:$0xff]  }
 0xb8a   :  { %3527 = vmatprep.subr.bf16.mxu1 %v10041_v57  ;;  %v10073_v57 = vld [vmem:[%s15538_s11 + $0x10c] ss:$16 sps:$4 sm:$0xff]  }
 0xb8b   :  { %3468 = vmatpush2.bf16.msra.mxu0 %v10042_v2  ;;  %v10074_v2 = vld [vmem:[%s15538_s11 + $0x108] ss:$16 sps:$4 sm:$0xff]  }
 0xb8c   :  { %3469 = vmatprep.subr.bf16.mxu0 %v10043_v59  ;;  %v10075_v59 = vld [vmem:[%s15528_s5 + $0xec] ss:$16 sps:$4 sm:$0xff]  }
 0xb8d   :  { %3528 = vmatpush1.bf16.msra.mxu1 %v10044_v35 }
 0xb8e   :  { %3529 = vmatprep.subr.bf16.mxu1 %v10045_v54 }
 0xb8f   :  { %3470 = vmatpush2.bf16.msra.mxu0 %v10046_v56 }
 0xb90   :  { %3471 = vmatprep.subr.bf16.mxu0 %v10047_v3 }
 0xb91   :  { %3530 = vmatpush1.bf16.msra.mxu1 %v10048_v11 }
 0xb92   :  { %3531 = vmatprep.subr.bf16.mxu1 %v10049_v5 }
 0xb93   :  { %3472 = vmatpush2.bf16.msra.mxu0 %v10050_v36 }
 0xb94   :  { %3564 = vmatprep.subr.bf16.mxu0 %v10051_v6 }
 0xb95   :  { %3532 = vmatpush1.bf16.msra.mxu1 %v10052_v12 }
 0xb96   :  { %3533 = vmatprep.subr.bf16.mxu1 %v10053_v8 }
 0xb99   :  { %3534 = vmatpush1.bf16.msra.mxu1 %v10054_v44 }
 0xb9a   :  { %3535 = vmatprep.subr.bf16.mxu1 %v10055_v13 }
 0xb9d   :  { %3536 = vmatpush1.bf16.msra.mxu1 %v10056_v16 }
 0xb9e   :  { %3537 = vmatprep.subr.bf16.mxu1 %v10057_v53 }
 0xba1   :  { %3538 = vmatpush1.bf16.msra.mxu1 %v10058_v46 }
 0xba2   :  { %3539 = vmatprep.subr.bf16.mxu1 %v10059_v47 }
 0xba5   :  { %3540 = vmatpush2.bf16.msra.mxu1 %v10060_v19 }
 0xba6   :  { %3541 = vmatprep.subr.bf16.mxu1 %v10061_v17 }
 0xba9   :  { %3542 = vmatpush2.bf16.msra.mxu1 %v10062_v28 }
 0xbaa   :  { %3543 = vmatprep.subr.bf16.mxu1 %v10063_v29 }
 0xbad   :  { %3544 = vmatpush2.bf16.msra.mxu1 %v10064_v30 }
 0xbae   :  { %3545 = vmatprep.subr.bf16.mxu1 %v10065_v33 }
 0xbb1   :  { %3546 = vmatpush2.bf16.msra.mxu1 %v10066_v37 }
 0xbb2   :  { %3547 = vmatprep.subr.bf16.mxu1 %v10067_v41 }
 0xbb5   :  { %3548 = vmatpush2.bf16.msra.mxu1 %v10068_v58 }
 0xbb6   :  { %3549 = vmatprep.subr.bf16.mxu1 %v10069_v52 }
 0xbb9   :  { %3550 = vmatpush2.bf16.msra.mxu1 %v10070_v39 }
 0xbba   :  { %3551 = vmatprep.subr.bf16.mxu1 %v10071_v1 }
 0xbbd   :  { %3552 = vmatpush2.bf16.msra.mxu1 %v10072_v4 }
 0xbbe   :  { %3553 = vmatprep.subr.bf16.mxu1 %v10073_v57 }
 0xbc1   :  { %3554 = vmatpush2.bf16.msra.mxu1 %v10074_v2 }
 0xbc2   :  { %3675 = vmatprep.subr.bf16.mxu1 %v10075_v59 }
 0xbfc   :  { %v3039_v35 = vpop.f32.mrf.mxu1 }
 0xbfe   :  { %v8924_v54 = vpop.f32.mrf.mxu1 }
 0xc00   :  { %v3042_v56 = vpop.f32.mrf.mxu1 }
 0xc02   :  { %v8925_v3 = vpop.f32.mrf.mxu1 }
 0xc04   :  { %v3092_v11 = vpop.f32.mrf.mxu1 }
 0xc05   :  { %v3424_v37 = vrot.slane %v3092_v11, 7 }
 0xc06   :  { %v8930_v5 = vpop.f32.mrf.mxu1 }
 0xc07   :  { %v3425_v4 = vsel %vm1080_vm0, %v3424_v37, %v3039_v35  ;;  %v10083_v37 = vld [vmem:[%s15528_s5 + $0xac] ss:$16 sps:$4 sm:$0xff]  }
 0xc08   :  { %v3095_v36 = vpop.f32.mrf.mxu1 }
 0xc0a   :  { %v8931_v6 = vpop.f32.mrf.mxu1 }
 0xc0c   :  { %v3145_v12 = vpop.f32.mrf.mxu1  ;;  %v3251_v8 = vpop.f32.mrf.mxu0 }
 0xc0d   :  { %v3426_v41 = vrot.slane %v3145_v12, 6  ;;  %v3430_v56 = vrot.slane %v3251_v8, 4  ;;  %v10076_v8 = vld [vmem:[%s15538_s11 + $0x2e8] ss:$16 sps:$4 sm:$0xff]  }
 0xc0e   :  { %v8936_v44 = vpop.f32.mrf.mxu1  ;;  %v8948_v13 = vpop.f32.mrf.mxu0 }
 0xc0f   :  { %v3427_v57 = vsel %vm1082_vm1, %v3426_v41, %v3425_v4  ;;  %v10084_v41 = vld [vmem:[%s15538_s11 + $0x2a8] ss:$16 sps:$4 sm:$0xff]   ;;  %v10089_v4 = vld [vmem:[%s15538_s11 + $0x26c] ss:$16 sps:$4 sm:$0xff]  }
 0xc10   :  { %v3148_v16 = vpop.f32.mrf.mxu1  ;;  %v3254_v53 = vpop.f32.mrf.mxu0 }
 0xc12   :  { %v8937_v46 = vpop.f32.mrf.mxu1  ;;  %v8949_v47 = vpop.f32.mrf.mxu0 }
 0xc14   :  { %v3198_v19 = vpop.f32.mrf.mxu1  ;;  %v3357_v17 = vpop.f32.mrf.mxu0 }
 0xc15   :  { %v3428_v39 = vrot.slane %v3198_v19, 5  ;;  %v3434_v6 = vrot.slane %v3357_v17, 2  ;;  %v10077_v19 = vld [vmem:[%s15538_s11 + $0x2cc] ss:$16 sps:$4 sm:$0xff]   ;;  %v10078_v17 = vld [vmem:[%s15528_s5 + $0xe8] ss:$16 sps:$4 sm:$0xff]  }
 0xc16   :  { %v8942_v28 = vpop.f32.mrf.mxu1  ;;  %v8960_v29 = vpop.f32.mrf.mxu0 }
 0xc17   :  { %v3429_v59 = vsel %vm1084_vm2, %v3428_v39, %v3427_v57  ;;  %v10079_v28 = vld [vmem:[%s15528_s5 + $0xcc] ss:$16 sps:$4 sm:$0xff]   ;;  %v10080_v29 = vld [vmem:[%s15538_s11 + $0x2c8] ss:$16 sps:$4 sm:$0xff]  }
 0xc18   :  { %v3201_v30 = vpop.f32.mrf.mxu1  ;;  %v3360_v33 = vpop.f32.mrf.mxu0  ;;  %v3431_v5 = vsel %vm1086_vm3, %v3430_v56, %v3429_v59  ;;  %v10087_v39 = vld [vmem:[%s15528_s5 + $0x8c] ss:$16 sps:$4 sm:$0xff]   ;;  %v10090_v57 = vld [vmem:[%s15528_s5 + $0x88] ss:$16 sps:$4 sm:$0xff]  }
 0xc19   :  { %v10081_v30 = vld [vmem:[%s15538_s11 + $0x2ac] ss:$16 sps:$4 sm:$0xff]   ;;  %v10082_v33 = vld [vmem:[%s15528_s5 + $0xc8] ss:$16 sps:$4 sm:$0xff]  }
 0xc1a   :  { %v8943_v58 = vpop.f32.mrf.mxu1  ;;  %v8961_v52 = vpop.f32.mrf.mxu0  ;;  %v10092_v59 = vld [vmem:[%s15538_s11 + $0x268] ss:$16 sps:$4 sm:$0xff]  }
 0xc1b   :  { %v10085_v58 = vld [vmem:[%s15538_s11 + $0x28c] ss:$16 sps:$4 sm:$0xff]   ;;  %v10086_v52 = vld [vmem:[%s15528_s5 + $0xa8] ss:$16 sps:$4 sm:$0xff]  }
 0xc1c   :  { %v3304_v1 = vpop.f32.mrf.mxu1  ;;  %v10094_v56 = vld [vmem:[%s15528_s5 + $0x68] ss:$16 sps:$4 sm:$0xff]  }
 0xc1d   :  { %v3432_v54 = vrot.slane %v3304_v1, 3  ;;  %v10088_v1 = vld [vmem:[%s15538_s11 + $0x288] ss:$16 sps:$4 sm:$0xff]  }
 0xc1e   :  { %v8954_v2 = vpop.f32.mrf.mxu1 }
 0xc1f   :  { %v3433_v11 = vsel %vm1088_vm4, %v3432_v54, %v3431_v5  ;;  %v10091_v2 = vld [vmem:[%s15528_s5 + $0x6c] ss:$16 sps:$4 sm:$0xff]   ;;  %v10096_v5 = vld [vmem:[%s15538_s11 + $0x248] ss:$16 sps:$4 sm:$0xff]  }
 0xc20   :  { %v3307_v3 = vpop.f32.mrf.mxu1  ;;  %v3435_v13 = vsel %vm1090_vm5, %v3434_v6, %v3433_v11  ;;  %v10093_v54 = vld [vmem:[%s15538_s11 + $0x24c] ss:$16 sps:$4 sm:$0xff]   ;;  %v10098_v11 = vld [vmem:[%s15528_s5 + $0x48] ss:$16 sps:$4 sm:$0xff]  }
 0xc21   :  { %v10095_v3 = vld [vmem:[%s15528_s5 + $0x4c] ss:$16 sps:$4 sm:$0xff]  }
 0xc22   :  { %v8955_v36 = vpop.f32.mrf.mxu1  ;;  %v10099_v6 = vld [vmem:[%s15528_s5 + $0x2c] ss:$16 sps:$4 sm:$0xff]  }
 0xc23   :  { %v10097_v36 = vld [vmem:[%s15538_s11 + $0x22c] ss:$16 sps:$4 sm:$0xff]  }
 0xc24   :  { %v3410_v12 = vpop.f32.mrf.mxu1 }
 0xc25   :  { %v3436_v44 = vrot.slane %v3410_v12, 1  ;;  %v10100_v12 = vld [vmem:[%s15538_s11 + $0x228] ss:$16 sps:$4 sm:$0xff]  }
 0xc26   :  { %v8966_v16 = vpop.f32.mrf.mxu1 }
 0xc27   :  { %v3437_v35 = vsel %vm1092_vm6, %v3436_v44, %v3435_v13  ;;  %v10101_v13 = vld [vmem:[%s15538_s11 + $0x20c] ss:$16 sps:$4 sm:$0xff]   ;;  %v10102_v16 = vld [vmem:[%s15528_s5 + $0x28] ss:$16 sps:$4 sm:$0xff]  }
 0xc28   :  { %v3439_v53 = vpack.c.bf16 %v3437_v35, %v3437_v35  ;;  %v3413_v46 = vpop.f32.mrf.mxu1 }
 0xc29   :  { %v10104_v46 = vld [vmem:[%s15538_s11 + $0x208] ss:$16 sps:$4 sm:$0xff]  }
 0xc2a   :  { %v8967_v47 = vpop.f32.mrf.mxu1  ;;  %3474 = vmatmul.mubr.bf16.vlgmr.msra.gmra.mxu0 %v3439_v53  ;;  %3556 = vmatmul.mubr.bf16.vlgmr.msra.gmra.mxu1 %v3439_v53  ;;  %v10103_v53 = vld [vmem:[%s15528_s5 + $0xc] ss:$16 sps:$4 sm:$0xff]  }
 0xc2b   :  { %3565 = vmatpush1.bf16.msra.mxu0 %v10076_v8  ;;  %3707 = vmatprep.mubr.bf16.mxu1 %v12049_v55  ;;  %v10105_v8 = vld [vmem:[%s15528_s5 + $0xe4] ss:$16 sps:$4 sm:$0xff]  }
 0xc2c   :  { %3566 = vmatprep.subr.bf16.mxu0 %v10077_v19  ;;  %3596 = vmatprep.mubr.bf16.mxu0 %v10835_v63  ;;  %v10106_v19 = vld [vmem:[%s15528_s5 + $0x8] ss:$16 sps:$4 sm:$0xff]  }
 0xc2d   :  { %3676 = vmatpush1.bf16.msra.mxu1 %v10078_v17 }
 0xc2e   :  { %3677 = vmatprep.subr.bf16.mxu1 %v10079_v28  ;;  %v10107_v28 = vld [vmem:[%s15528_s5 + $0x1ec] ss:$16 sps:$4 sm:$0xff]  }
 0xc2f   :  { %3567 = vmatpush1.bf16.msra.mxu0 %v10080_v29  ;;  %v10108_v29 = vld [vmem:[%s15528_s5 + $0xe0] ss:$16 sps:$4 sm:$0xff]  }
 0xc30   :  { %3568 = vmatprep.subr.bf16.mxu0 %v10081_v30  ;;  %v10109_v30 = vld [vmem:[%s15528_s5 + $0xc4] ss:$16 sps:$4 sm:$0xff]  }
 0xc31   :  { %3678 = vmatpush1.bf16.msra.mxu1 %v10082_v33  ;;  %v10110_v33 = vld [vmem:[%s15528_s5 + $0x1e8] ss:$16 sps:$4 sm:$0xff]  }
 0xc32   :  { %3679 = vmatprep.subr.bf16.mxu1 %v10083_v37  ;;  %v10111_v37 = vld [vmem:[%s15528_s5 + $0x1cc] ss:$16 sps:$4 sm:$0xff]  }
 0xc33   :  { %3569 = vmatpush1.bf16.msra.mxu0 %v10084_v41  ;;  %v10112_v41 = vld [vmem:[%s15528_s5 + $0xc0] ss:$16 sps:$4 sm:$0xff]  }
 0xc34   :  { %3570 = vmatprep.subr.bf16.mxu0 %v10085_v58  ;;  %v10114_v58 = vld [vmem:[%s15528_s5 + $0x1c8] ss:$16 sps:$4 sm:$0xff]  }
 0xc35   :  { %3680 = vmatpush1.bf16.msra.mxu1 %v10086_v52  ;;  %v10115_v52 = vld [vmem:[%s15528_s5 + $0x1ac] ss:$16 sps:$4 sm:$0xff]  }
 0xc36   :  { %3681 = vmatprep.subr.bf16.mxu1 %v10087_v39  ;;  %v10116_v39 = vld [vmem:[%s15528_s5 + $0xa0] ss:$16 sps:$4 sm:$0xff]  }
 0xc37   :  { %3571 = vmatpush1.bf16.msra.mxu0 %v10088_v1  ;;  %v10117_v1 = vld [vmem:[%s15528_s5 + $0x84] ss:$16 sps:$4 sm:$0xff]  }
 0xc38   :  { %3572 = vmatprep.subr.bf16.mxu0 %v10089_v4  ;;  %v10118_v4 = vld [vmem:[%s15528_s5 + $0x1a8] ss:$16 sps:$4 sm:$0xff]  }
 0xc39   :  { %3682 = vmatpush1.bf16.msra.mxu1 %v10090_v57  ;;  %v10119_v57 = vld [vmem:[%s15528_s5 + $0x18c] ss:$16 sps:$4 sm:$0xff]  }
 0xc3a   :  { %3683 = vmatprep.subr.bf16.mxu1 %v10091_v2  ;;  %v10120_v2 = vld [vmem:[%s15528_s5 + $0x80] ss:$16 sps:$4 sm:$0xff]  }
 0xc3b   :  { %3573 = vmatpush1.bf16.msra.mxu0 %v10092_v59  ;;  %v10121_v59 = vld [vmem:[%s15528_s5 + $0x64] ss:$16 sps:$4 sm:$0xff]  }
 0xc3c   :  { %3574 = vmatprep.subr.bf16.mxu0 %v10093_v54  ;;  %v10122_v54 = vld [vmem:[%s15528_s5 + $0x188] ss:$16 sps:$4 sm:$0xff]  }
 0xc3d   :  { %3684 = vmatpush1.bf16.msra.mxu1 %v10094_v56  ;;  %v10123_v56 = vld [vmem:[%s15528_s5 + $0x16c] ss:$16 sps:$4 sm:$0xff]  }
 0xc3e   :  { %3685 = vmatprep.subr.bf16.mxu1 %v10095_v3  ;;  %v10124_v3 = vld [vmem:[%s15528_s5 + $0x60] ss:$16 sps:$4 sm:$0xff]  }
 0xc3f   :  { %3575 = vmatpush1.bf16.msra.mxu0 %v10096_v5  ;;  %v10125_v5 = vld [vmem:[%s15528_s5 + $0x44] ss:$16 sps:$4 sm:$0xff]  }
 0xc40   :  { %3576 = vmatprep.subr.bf16.mxu0 %v10097_v36  ;;  %v10126_v36 = vld [vmem:[%s15528_s5 + $0x168] ss:$16 sps:$4 sm:$0xff]  }
 0xc41   :  { %3686 = vmatpush1.bf16.msra.mxu1 %v10098_v11  ;;  %v10127_v11 = vld [vmem:[%s15528_s5 + $0x14c] ss:$16 sps:$4 sm:$0xff]  }
 0xc42   :  { %3687 = vmatprep.subr.bf16.mxu1 %v10099_v6  ;;  %v10128_v6 = vld [vmem:[%s15528_s5 + $0x40] ss:$16 sps:$4 sm:$0xff]  }
 0xc43   :  { %3577 = vmatpush1.bf16.msra.mxu0 %v10100_v12  ;;  %v10129_v12 = vld [vmem:[%s15528_s5 + $0x24] ss:$16 sps:$4 sm:$0xff]  }
 0xc44   :  { %v12552_v44 = vpop.f32.mrf.mxu1  ;;  %3578 = vmatprep.subr.bf16.mxu0 %v10101_v13  ;;  %v10130_v13 = vld [vmem:[%s15528_s5 + $0x148] ss:$16 sps:$4 sm:$0xff]  }
 0xc45   :  { %3688 = vmatpush1.bf16.msra.mxu1 %v10102_v16  ;;  %v10131_v16 = vld [vmem:[%s15528_s5 + $0x12c] ss:$16 sps:$4 sm:$0xff]  }
 0xc46   :  { %v12560_v35 = vpop.f32.mrf.mxu1  ;;  %3689 = vmatprep.subr.bf16.mxu1 %v10103_v53  ;;  %v10132_v53 = vld [vmem:[%s15528_s5 + $0x20] ss:$16 sps:$4 sm:$0xff]  }
 0xc47   :  { %3579 = vmatpush1.bf16.msra.mxu0 %v10104_v46  ;;  %v10133_v46 = vld [vmem:[%s15528_s5 + $0x4] ss:$16 sps:$4 sm:$0xff]  }
 0xc48   :  { %v3520_v47 = vpop.f32.mrf.mxu1  ;;  %3634 = vmatprep.subr.bf16.mxu0 %v10105_v8  ;;  %v10135_v8 = vld [vmem:[%s15528_s5 + $0x10c] ss:$16 sps:$4 sm:$0xff]  }
 0xc49   :  { %3690 = vmatpush1.bf16.msra.mxu1 %v10106_v19  ;;  %v10134_v47 = vld [vmem:[%s15528_s5 + $0x128] ss:$16 sps:$4 sm:$0xff]   ;;  %v10136_v19 = vld [vmem:[%s15528_s5] ss:$16 sps:$4 sm:$0xff]  }
 0xc4a   :  { %v3521_v17 = vpop.f32.mrf.mxu1  ;;  %3597 = vmatmul.mubr.bf16.vlgmr.msra.gmra.mxu0 %v12049_v55  ;;  %3691 = vmatprep.subr.bf16.mxu1 %v10107_v28  ;;  %v10137_v28 = vld [vmem:[%s15528_s5 + $0x1e4] ss:$16 sps:$4 sm:$0xff]  }
 0xc4b   :  { %3635 = vmatpush1.bf16.msra.mxu0 %v10108_v29  ;;  %3666 = vmatprep.mubr.bf16.mxu0 %v12049_v55  ;;  %v10113_v55 = vld [vmem:[%s15528_s5 + $0xa4] ss:$16 sps:$4 sm:$0xff]   ;;  %v10138_v29 = vld [vmem:[%s15528_s5 + $0x108] ss:$16 sps:$4 sm:$0xff]  }
 0xc4c   :  { %3636 = vmatprep.subr.bf16.mxu0 %v10109_v30  ;;  %v8580_v17 = vld [vmem:[%s15529_s0 + $0x10] sm:$0xff] }
 0xc4d   :  { %3692 = vmatpush2.bf16.msra.mxu1 %v10110_v33  ;;  %v3633_v30 = vpack.c.bf16 %v8580_v17, %v8580_v17  ;;  %v10139_v33 = vld [vmem:[%s15528_s5 + $0x1e0] ss:$16 sps:$4 sm:$0xff]   ;;  %v10166_v17 = vld [vmem:[%s15530_s7 + $0x48] sm:$0xff]  }
 0xc4e   :  { %3693 = vmatprep.subr.bf16.mxu1 %v10111_v37  ;;  %v10140_v37 = vld [vmem:[%s15528_s5 + $0x1c4] ss:$16 sps:$4 sm:$0xff]  }
 0xc4f   :  { %3637 = vmatpush1.bf16.msra.mxu0 %v10112_v41  ;;  %v10141_v41 = vld [vmem:[%s15528_s5 + $0x1c0] ss:$16 sps:$4 sm:$0xff]  }
 0xc50   :  { %3638 = vmatprep.subr.bf16.mxu0 %v10113_v55  ;;  %v10142_v55 = vld [vmem:[%s15528_s5 + $0x1a4] ss:$16 sps:$4 sm:$0xff]  }
 0xc51   :  { %3694 = vmatpush2.bf16.msra.mxu1 %v10114_v58  ;;  %v10143_v58 = vld [vmem:[%s15528_s5 + $0x1a0] ss:$16 sps:$4 sm:$0xff]  }
 0xc52   :  { %3695 = vmatprep.subr.bf16.mxu1 %v10115_v52  ;;  %v10144_v52 = vld [vmem:[%s15528_s5 + $0x184] ss:$16 sps:$4 sm:$0xff]  }
 0xc53   :  { %3639 = vmatpush1.bf16.msra.mxu0 %v10116_v39  ;;  %v10145_v39 = vld [vmem:[%s15528_s5 + $0x180] ss:$16 sps:$4 sm:$0xff]  }
 0xc54   :  { %3640 = vmatprep.subr.bf16.mxu0 %v10117_v1  ;;  %v10146_v1 = vld [vmem:[%s15528_s5 + $0x164] ss:$16 sps:$4 sm:$0xff]  }
 0xc55   :  { %3696 = vmatpush2.bf16.msra.mxu1 %v10118_v4  ;;  %v10147_v4 = vld [vmem:[%s15528_s5 + $0x160] ss:$16 sps:$4 sm:$0xff]  }
 0xc56   :  { %3697 = vmatprep.subr.bf16.mxu1 %v10119_v57  ;;  %v10148_v57 = vld [vmem:[%s15528_s5 + $0x144] ss:$16 sps:$4 sm:$0xff]  }
 0xc57   :  { %3641 = vmatpush1.bf16.msra.mxu0 %v10120_v2  ;;  %v10149_v2 = vld [vmem:[%s15528_s5 + $0x140] ss:$16 sps:$4 sm:$0xff]  }
 0xc58   :  { %3642 = vmatprep.subr.bf16.mxu0 %v10121_v59  ;;  %v10150_v59 = vld [vmem:[%s15528_s5 + $0x124] ss:$16 sps:$4 sm:$0xff]  }
 0xc59   :  { %3698 = vmatpush2.bf16.msra.mxu1 %v10122_v54  ;;  %v10151_v54 = vld [vmem:[%s15528_s5 + $0x120] ss:$16 sps:$4 sm:$0xff]  }
 0xc5a   :  { %3699 = vmatprep.subr.bf16.mxu1 %v10123_v56  ;;  %v10152_v56 = vld [vmem:[%s15528_s5 + $0x104] ss:$16 sps:$4 sm:$0xff]  }
 0xc5b   :  { %3643 = vmatpush1.bf16.msra.mxu0 %v10124_v3  ;;  %v10153_v3 = vld [vmem:[%s15528_s5 + $0x100] ss:$16 sps:$4 sm:$0xff]  }
 0xc5c   :  { %3644 = vmatprep.subr.bf16.mxu0 %v10125_v5  ;;  %v10154_v5 = vld [vmem:[%s15530_s7 + $0x78] sm:$0xff]  }
 0xc5d   :  { %3700 = vmatpush2.bf16.msra.mxu1 %v10126_v36  ;;  %v10155_v36 = vld [vmem:[%s15530_s7 + $0x38] sm:$0xff]  }
 0xc5e   :  { %3701 = vmatprep.subr.bf16.mxu1 %v10127_v11  ;;  %v10156_v11 = vld [vmem:[%s15530_s7 + $0x70] sm:$0xff]  }
 0xc5f   :  { %3645 = vmatpush1.bf16.msra.mxu0 %v10128_v6  ;;  %v10157_v6 = vld [vmem:[%s15530_s7 + $0x30] sm:$0xff]  }
 0xc60   :  { %3646 = vmatprep.subr.bf16.mxu0 %v10129_v12  ;;  %v10158_v12 = vld [vmem:[%s15530_s7 + $0x68] sm:$0xff]  }
 0xc61   :  { %3702 = vmatpush2.bf16.msra.mxu1 %v10130_v13  ;;  %v10159_v13 = vld [vmem:[%s15530_s7 + $0x28] sm:$0xff]  }
 0xc62   :  { %3703 = vmatprep.subr.bf16.mxu1 %v10131_v16  ;;  %v10160_v16 = vld [vmem:[%s15530_s7 + $0x60] sm:$0xff]  }
 0xc63   :  { %3647 = vmatpush1.bf16.msra.mxu0 %v10132_v53  ;;  %v10161_v53 = vld [vmem:[%s15530_s7 + $0x20] sm:$0xff]  }
 0xc64   :  { %3648 = vmatprep.subr.bf16.mxu0 %v10133_v46  ;;  %v10162_v46 = vld [vmem:[%s15530_s7 + $0x58] sm:$0xff]  }
 0xc65   :  { %3704 = vmatpush2.bf16.msra.mxu1 %v10134_v47  ;;  %v10163_v47 = vld [vmem:[%s15530_s7 + $0x18] sm:$0xff]  }
 0xc66   :  { %3705 = vmatprep.subr.bf16.mxu1 %v10135_v8  ;;  %v10164_v8 = vld [vmem:[%s15530_s7 + $0x50] sm:$0xff]  }
 0xc67   :  { %3649 = vmatpush1.bf16.msra.mxu0 %v10136_v19  ;;  %v10165_v19 = vld [vmem:[%s15530_s7 + $0x10] sm:$0xff]  }
 0xc68   :  { %3650 = vmatprep.subr.bf16.mxu0 %v10137_v28  ;;  %v10167_v28 = vld [vmem:[%s15530_s7 + $0x8] sm:$0xff]  }
 0xc69   :  { %3706 = vmatpush2.bf16.msra.mxu1 %v10138_v29  ;;  %v10168_v29 = vld [vmem:[%s15530_s7 + $0x40] sm:$0xff]  }
 0xc6a   :  { %8968 = vmatprep.subr.bf16.mxu1 %v10837_v14 }
 0xc6b   :  { %3651 = vmatpush2.bf16.msra.mxu0 %v10139_v33 }
 0xc6c   :  { %3652 = vmatprep.subr.bf16.mxu0 %v10140_v37  ;;  %3708 = vmatmul.mubr.bf16.vlgmr.msra.gmra.mxu1 %v3633_v30 }
 0xc6d   :  { %8969 = vmatpush3.bf16.msra.mxu1 %v11343_v18  ;;  %8970 = vmatprep.mubr.msk.bf16.mxu1 %vm10838_vm9, %v10837_v14 }
 0xc6e   :  { %8974 = vmatprep.subr.bf16.mxu1 %v10837_v14 }
 0xc6f   :  { %3653 = vmatpush2.bf16.msra.mxu0 %v10141_v41 }
 0xc70   :  { %3654 = vmatprep.subr.bf16.mxu0 %v10142_v55 }
 0xc73   :  { %3655 = vmatpush2.bf16.msra.mxu0 %v10143_v58 }
 0xc74   :  { %3656 = vmatprep.subr.bf16.mxu0 %v10144_v52 }
 0xc77   :  { %3657 = vmatpush2.bf16.msra.mxu0 %v10145_v39 }
 0xc78   :  { %3658 = vmatprep.subr.bf16.mxu0 %v10146_v1 }
 0xc7b   :  { %3659 = vmatpush2.bf16.msra.mxu0 %v10147_v4 }
 0xc7c   :  { %3660 = vmatprep.subr.bf16.mxu0 %v10148_v57 }
 0xc7f   :  { %3661 = vmatpush2.bf16.msra.mxu0 %v10149_v2 }
 0xc80   :  { %3662 = vmatprep.subr.bf16.mxu0 %v10150_v59 }
 0xc83   :  { %3663 = vmatpush2.bf16.msra.mxu0 %v10151_v54 }
 0xc84   :  { %3664 = vmatprep.subr.bf16.mxu0 %v10152_v56 }
 0xc87   :  { %3665 = vmatpush2.bf16.msra.mxu0 %v10153_v3 }
 0xc88   :  { %8720 = vmatprep.subr.bf16.mxu0 %v10154_v5 }
 0xc8a   :  { %3667 = vmatmul.mubr.bf16.vlgmr.msra.gmra.mxu0 %v3633_v30  ;;  %v10169_v30 = vld [vmem:[%s15530_s7] sm:$0xff]  }
 0xc8b   :  { %8721 = vmatpush3.bf16.msra.mxu0 %v10155_v36 }
 0xc8c   :  { %8722 = vmatprep.subr.bf16.mxu0 %v10156_v11 }
 0xc8f   :  { %8723 = vmatpush3.bf16.msra.mxu0 %v10157_v6 }
 0xc90   :  { %8724 = vmatprep.subr.bf16.mxu0 %v10158_v12 }
 0xc93   :  { %8725 = vmatpush3.bf16.msra.mxu0 %v10159_v13 }
 0xc94   :  { %8726 = vmatprep.subr.bf16.mxu0 %v10160_v16 }
 0xc97   :  { %8727 = vmatpush3.bf16.msra.mxu0 %v10161_v53 }
 0xc98   :  { %8728 = vmatprep.subr.bf16.mxu0 %v10162_v46 }
 0xc9b   :  { %8729 = vmatpush3.bf16.msra.mxu0 %v10163_v47 }
 0xc9c   :  { %8730 = vmatprep.subr.bf16.mxu0 %v10164_v8 }
 0xc9f   :  { %8731 = vmatpush3.bf16.msra.mxu0 %v10165_v19 }
 0xca0   :  { %8732 = vmatprep.subr.bf16.mxu0 %v10166_v17 }
 0xca3   :  { %8733 = vmatpush3.bf16.msra.mxu0 %v10167_v28 }
 0xca4   :  { %8734 = vmatprep.subr.bf16.mxu0 %v10168_v29 }
 0xca7   :  { %8735 = vmatpush3.bf16.msra.mxu0 %v10169_v30 }
 0xca8   :  { %8992 = vmatprep.subr.bf16.mxu0 %v10837_v14 }
 0xcea   :  { %v3475_v33 = vpop.f32.mrf.mxu0  ;;  %v3557_v37 = vpop.f32.mrf.mxu1 }
 0xceb   :  { %v3476_v4 = vadd.f32 %v3475_v33, %v12010_v22  ;;  %v3558_v6 = vadd.f32 %v3557_v37, %v12019_v9 }
 0xcec   :  { %v3477_v41 = vpop.f32.mrf.mxu0  ;;  %v3559_v55 = vpop.f32.mrf.mxu1 }
 0xced   :  { %v3517_v57 = vadd.f32 %v12552_v44, %v3476_v4  ;;  %v3560_v54 = vadd.f32 %v3559_v55, %v12015_v62  ;;  %v3478_v16 = vadd.f32 %v3477_v41, %v12023_v49 }
 0xcee   :  { %v3479_v58 = vpop.f32.mrf.mxu0  ;;  %v3561_v52 = vpop.f32.mrf.mxu1 }
 0xcef   :  { %v8576_v2 = vmul.f32 -1.442695, %v3517_v57  ;;  %v3519_v44 = vadd.f32 %v12560_v35, %v3478_v16 }
 0xcf0   :  { %v3480_v39 = vpop.f32.mrf.mxu0  ;;  %v3562_v1 = vpop.f32.mrf.mxu1 }
 0xcf1   :  { %9567 = vpow2.f32 %v8576_v2 }
 0xcfe   :  { %v9568_v13 = vpop.eup %9567 }
 0xcff   :  { %v3608_v46 = vadd.f32 1.0, %v9568_v13 }
 0xd0a   :  { %v3598_v59 = vpop.f32.mrf.mxu0 }
 0xd0b   :  { %v3599_v12 = vadd.f32 %v3598_v59, %v3558_v6 }
 0xd0c   :  { %v3600_v56 = vpop.f32.mrf.mxu0 }
 0xd0d   :  { %v3601_v3 = vadd.f32 %v3600_v56, %v3560_v54  ;;  %v8577_v53 = vmul.f32 -1.442695, %v3599_v12 }
 0xd0e   :  { %v3602_v5 = vpop.f32.mrf.mxu0 }
 0xd0f   :  { %v8578_v36 = vmul.f32 -1.442695, %v3601_v3 }
 0xd10   :  { %v3603_v11 = vpop.f32.mrf.mxu0 }
 0xd11   :  { %9569 = vpow2.f32 %v8578_v36 }
 0xd12   :  { %9571 = vpow2.f32 %v8577_v53 }
 0xd13   :  { %9573 = vrcp.f32 %v3608_v46 }
 0xd14   :  { %9575 = vtanh.f32 %v3519_v44 }
 0xd1e   :  { %v9570_v47 = vpop.eup %9569 }
 0xd1f   :  { %v3621_v8 = vadd.f32 1.0, %v9570_v47  ;;  %v9572_v19 = vpop.eup %9571 }
 0xd20   :  { %v9574_v17 = vpop.eup %9573  ;;  %v3615_v33 = vadd.f32 1.0, %v9572_v19 }
 0xd21   :  { %9577 = vrcp.f32 %v3621_v8  ;;  %v9576_v29 = vpop.eup %9575 }
 0xd22   :  { %v3624_v55 = vmul.f32 %v9576_v29, %v9574_v17  ;;  %9579 = vrcp.f32 %v3615_v33 }
 0xd2c   :  { %v3709_v28 = vpop.f32.mrf.mxu1 }
 0xd2d   :  { %v3710_v6 = vadd.f32 %v3709_v28, %v11185_v42 }
 0xd2e   :  { %v9578_v30 = vpop.eup %9577  ;;  %v3711_v37 = vpop.f32.mrf.mxu1 }
 0xd2f   :  { %v3625_v41 = vmul.f32 %v9578_v30, %v12030_v48  ;;  %v9580_v1 = vpop.eup %9579  ;;  %v3712_v11 = vadd.f32 %v3711_v37, %v11182_v40 }
 0xd30   :  { %v3713_v58 = vpop.f32.mrf.mxu1 }
 0xd31   :  { %v12781_v52 = vadd.f32 %v3625_v41, %v3624_v55  ;;  %v8583_v12 = vmul.f32 -1.442695, %v3712_v11 }
 0xd32   :  { %v3714_v35 = vpop.f32.mrf.mxu1 }
 0xd33   :  { %9581 = vtanh.f32 %v12781_v52  ;;  %v3741_v39 = vpack.c.bf16 %v12781_v52, %v12781_v52 }
 0xd35   :  { %3774 = vmatprep.mubr.bf16.mxu0 %v3741_v39 }
 0xd40   :  { %v9582_v4 = vpop.eup %9581 }
 0xd41   :  { %v12786_v57 = vmul.f32 %v9582_v4, %v9580_v1  ;;  %v10170_v1 = vld [vmem:[%s15534_s8] ss:$0 sm:$0xff] }
 0xd43   :  { %8579 = vst [vmem:[%s15541_s13 + $0x8] sm:$0xff] %v12786_v57 }
 0xd4a   :  { %v3668_v48 = vpop.f32.mrf.mxu0 }
 0xd4b   :  { %v3669_v2 = vadd.f32 %v3668_v48, %v11168_v26 }
 0xd4c   :  { %v3670_v59 = vpop.f32.mrf.mxu0 }
 0xd4d   :  { %v8581_v54 = vmul.f32 -1.442695, %v3669_v2  ;;  %v3671_v56 = vadd.f32 %v3670_v59, %v11171_v27 }
 0xd4e   :  { %v3672_v3 = vpop.f32.mrf.mxu0 }
 0xd4f   :  { %9583 = vpow2.f32 %v8581_v54  ;;  %v8582_v5 = vmul.f32 -1.442695, %v3671_v56 }
 0xd50   :  { %v3673_v36 = vpop.f32.mrf.mxu0 }
 0xd51   :  { %9585 = vpow2.f32 %v8582_v5 }
 0xd52   :  { %9587 = vtanh.f32 %v3710_v6 }
 0xd53   :  { %9589 = vpow2.f32 %v8583_v12 }
 0xd5c   :  { %v9584_v13 = vpop.eup %9583 }
 0xd5d   :  { %v3719_v16 = vadd.f32 1.0, %v9584_v13 }
 0xd5e   :  { %v9586_v53 = vpop.eup %9585 }
 0xd5f   :  { %9591 = vrcp.f32 %v3719_v16  ;;  %v3725_v46 = vadd.f32 1.0, %v9586_v53  ;;  %v9588_v44 = vpop.eup %9587  ;;  %v10171_v16 = vld [vmem:[%s15535_s1] sm:$0xff] }
 0xd60   :  { %v9590_v47 = vpop.eup %9589 }
 0xd61   :  { %9593 = vrcp.f32 %v3725_v46  ;;  %v3732_v17 = vadd.f32 1.0, %v9590_v47 }
 0xd63   :  { %9595 = vrcp.f32 %v3732_v17  ;;  %v10173_v17 = vld [vmem:[%s15535_s1 + $0x10] sm:$0xff] }
 0xd6c   :  { %v9592_v8 = vpop.eup %9591 }
 0xd6d   :  { %v3736_v30 = vmul.f32 %v9592_v8, %v9588_v44  ;;  %v10172_v8 = vld [vmem:[%s15535_s1 + $0x8] sm:$0xff] }
 0xd6e   :  { %v9594_v19 = vpop.eup %9593 }
 0xd6f   :  { %v3735_v29 = vmul.f32 %v9594_v19, %v12046_v51 }
 0xd70   :  { %v9596_v28 = vpop.eup %9595 }
 0xd71   :  { %v12797_v33 = vadd.f32 %v3736_v30, %v3735_v29 }
 0xd73   :  { %9597 = vtanh.f32 %v12797_v33 }
 0xd80   :  { %v9598_v37 = vpop.eup %9597 }
 0xd81   :  { %v3739_v55 = vmul.f32 %v9598_v37, %v9596_v28  ;;  %v10174_v37 = vld [vmem:[%s15535_s1 + $0x20] sm:$0xff] }
 0xd83   :  { %v12800_v41 = vpack.c.bf16 %v3739_v55, %v3739_v55 }
 0xd85   :  { %3775 = vmatmul.mubr.bf16.vlgmr.msra.gmra.mxu0 %v12800_v41 }
 0xd86   :  { %8993 = vmatpush3.bf16.msra.mxu0 %v11370_v45  ;;  %8994 = vmatprep.mubr.msk.bf16.mxu0 %vm10838_vm9, %v10837_v14 }
 0xd87   :  { %9004 = vmatprep.subr.bf16.mxu0 %v10837_v14 }
 0xe45   :  { %v8736_v51 = vpop.f32.mrf.mxu0 }
 0xe47   :  { %v8737_v58 = vpop.f32.mrf.mxu0 }
 0xe48   :  { %v8738_v35 = vadd.f32 %v8737_v58, %v8736_v51 }
 0xe49   :  { %v8739_v39 = vpop.f32.mrf.mxu0 }
 0xe4a   :  { %v3777_v4 = vadd.f32 %v10170_v1, %v8738_v35  ;;  %v10175_v35 = vld [vmem:[%s15535_s1 + $0x18] sm:$0xff] }
 0xe4b   :  { %v8740_v48 = vpop.f32.mrf.mxu0 }
 0xe4c   :  { %v3783_v2 = vcombine.high %v3777_v4, %v3777_v4  ;;  %v3790_v59 = vrot.slane %v3777_v4, %v11204_v7  ;;  %v10176_v48 = vld [vmem:[%s15535_s1 + $0x28] sm:$0xff] }
 0xe4e   :  { %v3797_v54 = vrot.slane %v3783_v2, %v11204_v7  ;;  %v3798_v56 = vcombine.high %v3790_v59, %v3790_v59  ;;  %v3806_v3 = vrot.slane %v3790_v59, %v11204_v7 }
 0xe50   :  { %v3820_v5 = vrot.slane %v3798_v56, %v11204_v7  ;;  %v3828_v36 = vcombine.high %v3806_v3, %v3806_v3  ;;  %v3813_v11 = vrot.slane %v3797_v54, %v11204_v7  ;;  %v3835_v6 = vrot.slane %v3806_v3, %v11159_v23 }
 0xe51   :  { %v3799_v46 = vcombine.high %v3797_v54, %v3797_v54  ;;  %v10177_v54 = vld [vmem:[%s15536_s9] ss:$0 sm:$0xff] }
 0xe52   :  { %v3839_v12 = vrot.slane %v3820_v5, %v11159_v23  ;;  %v3843_v13 = vrot.slane %v3828_v36, %v11159_v23  ;;  %v3872_v53 = vadd.f32 %v10171_v16, %v3835_v6  ;;  %v3830_v44 = vcombine.high %v3820_v5, %v3820_v5  ;;  %v10178_v36 = vld [vmem:[%s15535_s1 + $0x30] sm:$0xff]  ;;  %v10179_v16 = vld [vmem:[%s15535_s1 + $0x38] sm:$0xff] }
 0xe53   :  { %v3851_v47 = vrot.slane %v3813_v11, %v11159_v23  ;;  %v3827_v30 = vrot.slane %v3799_v46, %v11204_v7  ;;  %v3829_v51 = vcombine.high %v3813_v11, %v3813_v11 }
 0xe54   :  { %v3873_v19 = vadd.f32 %v10172_v8, %v3839_v12  ;;  %v3874_v29 = vadd.f32 %v10173_v17, %v3843_v13  ;;  %9599 = vtanh.f32 %v3872_v53  ;;  %v3847_v28 = vrot.slane %v3830_v44, %v11159_v23 }
 0xe55   :  { %v3876_v55 = vadd.f32 %v10174_v37, %v3851_v47  ;;  %v3855_v58 = vrot.slane %v3827_v30, %v11159_v23  ;;  %v3831_v1 = vcombine.high %v3827_v30, %v3827_v30  ;;  %v3859_v4 = vrot.slane %v3829_v51, %v11159_v23 }
 0xe56   :  { %9601 = vtanh.f32 %v3873_v19  ;;  %v3875_v39 = vadd.f32 %v10175_v35, %v3847_v28 }
 0xe57   :  { %9603 = vtanh.f32 %v3874_v29  ;;  %v3877_v2 = vadd.f32 %v10176_v48, %v3855_v58  ;;  %v3863_v5 = vrot.slane %v3831_v1, %v11159_v23  ;;  %v3878_v11 = vadd.f32 %v10178_v36, %v3859_v4 }
 0xe58   :  { %9605 = vtanh.f32 %v3876_v55 }
 0xe59   :  { %9607 = vtanh.f32 %v3875_v39  ;;  %v3879_v53 = vadd.f32 %v10179_v16, %v3863_v5 }
 0xe5a   :  { %9609 = vtanh.f32 %v3877_v2 }
 0xe5b   :  { %9611 = vtanh.f32 %v3878_v11 }
 0xe5c   :  { %9613 = vtanh.f32 %v3879_v53 }
 0xe61   :  { %v9600_v59 = vpop.eup %9599 }
 0xe62   :  { %v3888_v56 = vmul.f32 %v10177_v54, %v9600_v59 }
 0xe63   :  { %v9602_v3 = vpop.eup %9601 }
 0xe64   :  { %3896 = vadd.xlane.f32.xlu0 %v3888_v56  ;;  %v3889_v6 = vmul.f32 %v10177_v54, %v9602_v3  ;;  %v9604_v12 = vpop.eup %9603 }
 0xe65   :  { %v3890_v13 = vmul.f32 %v10177_v54, %v9604_v12  ;;  %v9606_v46 = vpop.eup %9605 }
 0xe66   :  { %3898 = vadd.xlane.f32.xlu1 %v3889_v6  ;;  %v3892_v44 = vmul.f32 %v10177_v54, %v9606_v46  ;;  %v9608_v47 = vpop.eup %9607 }
 0xe67   :  { %v3891_v8 = vmul.f32 %v10177_v54, %v9608_v47  ;;  %v9610_v19 = vpop.eup %9609 }
 0xe68   :  { %v3893_v17 = vmul.f32 %v10177_v54, %v9610_v19  ;;  %v9612_v29 = vpop.eup %9611 }
 0xe69   :  { %v3894_v30 = vmul.f32 %v10177_v54, %v9612_v29  ;;  %v9614_v28 = vpop.eup %9613 }
 0xe6a   :  { %3900 = vadd.xlane.f32.xlu1 %v3890_v13  ;;  %v3895_v37 = vmul.f32 %v10177_v54, %v9614_v28 }
 0xe6e   :  { %3904 = vadd.xlane.f32.xlu1 %v3892_v44 }
 0xe72   :  { %3902 = vadd.xlane.f32.xlu1 %v3891_v8 }
 0xe76   :  { %3906 = vadd.xlane.f32.xlu1 %v3893_v17 }
 0xe7a   :  { %3908 = vadd.xlane.f32.xlu1 %v3894_v30 }
 0xe7e   :  { %3910 = vadd.xlane.f32.xlu1 %v3895_v37 }
 0xeed   :  { %v3897_v35 = vpop.xlane.xlu0 %3896 }
 0xeee   :  { %v3912_v48 = vadd.f32 %v3897_v35, %v11251_v32 }
 0xeef   :  { %v3899_v55 = vpop.xlane.xlu1 %3898 }
 0xef0   :  { %v3913_v1 = vadd.f32 %v3899_v55, %v11251_v32  ;;  %v3931_v54 = vrot.slane %v3912_v48, %v11249_v31 }
 0xef2   :  { %v3935_v56 = vrot.slane %v3913_v1, %v11249_v31 }
 0xef3   :  { %v3901_v51 = vpop.xlane.xlu1 %3900 }
 0xef4   :  { %v3914_v4 = vadd.f32 %v3901_v51, %v11251_v32  ;;  %v3960_v12 = vsel %vm1080_vm0, %v3935_v56, %v3931_v54 }
 0xef6   :  { %v3939_v3 = vrot.slane %v3914_v4, %v11249_v31 }
 0xef7   :  { %v3905_v58 = vpop.xlane.xlu1 %3904 }
 0xef8   :  { %v3916_v11 = vadd.f32 %v3905_v58, %v11251_v32  ;;  %v3961_v16 = vsel %vm1082_vm1, %v3939_v3, %v3960_v12 }
 0xefa   :  { %v3947_v44 = vrot.slane %v3916_v11, %v11249_v31 }
 0xefb   :  { %v3903_v39 = vpop.xlane.xlu1 %3902 }
 0xefc   :  { %v3915_v2 = vadd.f32 %v3903_v39, %v11251_v32 }
 0xefe   :  { %v3943_v5 = vrot.slane %v3915_v2, %v11249_v31 }
 0xeff   :  { %v3907_v59 = vpop.xlane.xlu1 %3906 }
 0xf00   :  { %v3917_v36 = vadd.f32 %v3907_v59, %v11251_v32  ;;  %v3962_v53 = vsel %vm1084_vm2, %v3943_v5, %v3961_v16 }
 0xf01   :  { %v3963_v17 = vsel %vm1086_vm3, %v3947_v44, %v3962_v53 }
 0xf02   :  { %v3951_v46 = vrot.slane %v3917_v36, %v11249_v31 }
 0xf03   :  { %v3909_v6 = vpop.xlane.xlu1 %3908 }
 0xf04   :  { %v3918_v13 = vadd.f32 %v3909_v6, %v11251_v32  ;;  %v3964_v30 = vsel %vm1088_vm4, %v3951_v46, %v3963_v17 }
 0xf06   :  { %v3955_v47 = vrot.slane %v3918_v13, %v11249_v31 }
 0xf07   :  { %v3911_v8 = vpop.xlane.xlu1 %3910 }
 0xf08   :  { %v3919_v19 = vadd.f32 %v3911_v8, %v11251_v32  ;;  %v3965_v28 = vsel %vm1090_vm5, %v3955_v47, %v3964_v30 }
 0xf0a   :  { %v3959_v29 = vrot.slane %v3919_v19, %v11249_v31 }
 0xf0c   :  { %v3966_v37 = vsel %vm1092_vm6, %v3959_v29, %v3965_v28 }
 0xf0d   :  { %v3968_v55 = vsel %vm1095_vm7, %v3966_v37, -inf }
 0xf0e   :  { %3969 = vmax.xlane.f32.xlu1 %v3968_v55 }
 0xf97   :  { %v3970_v51 = vpop.xlane.xlu1 %3969 }
 0xf98   :  { %v3975_v58 = vrot.slane %v3970_v51, %v11159_v23  ;;  %v3979_v35 = vrot.slane %v3970_v51, %v11165_v25  ;;  %v3983_v39 = vrot.slane %v3970_v51, %v11179_v38  ;;  %v3987_v59 = vrot.slane %v3970_v51, %v11176_v34 }
 0xf99   :  { %v3995_v56 = vrot.slane %v3970_v51, %v11289_v15  ;;  %v3991_v6 = vrot.slane %v3970_v51, %v11285_v10  ;;  %v4003_v46 = vrot.slane %v3970_v51, %v11278_v0  ;;  %v3999_v8 = vrot.slane %v3970_v51, %v11293_v20 }
 0xf9a   :  { %v4012_v3 = vsub.f32 %v3912_v48, %v3975_v58  ;;  %v4013_v54 = vsub.f32 %v3913_v1, %v3979_v35  ;;  %v4015_v5 = vsub.f32 %v3915_v2, %v3987_v59  ;;  %v4014_v12 = vsub.f32 %v3914_v4, %v3983_v39 }
 0xf9b   :  { %v4017_v44 = vsub.f32 %v3917_v36, %v3995_v56  ;;  %v4016_v17 = vsub.f32 %v3916_v11, %v3991_v6  ;;  %v4019_v30 = vsub.f32 %v3919_v19, %v4003_v46  ;;  %v4018_v1 = vsub.f32 %v3918_v13, %v3999_v8 }
 0xf9c   :  { %v4020_v16 = vmul.f32 1.442695, %v4012_v3  ;;  %v4022_v53 = vmul.f32 1.442695, %v4013_v54  ;;  %v4026_v47 = vmul.f32 1.442695, %v4015_v5 }
 0xf9d   :  { %v4024_v29 = vmul.f32 1.442695, %v4014_v12  ;;  %v4030_v48 = vmul.f32 1.442695, %v4017_v44  ;;  %v4028_v2 = vmul.f32 1.442695, %v4016_v17 }
 0xf9e   :  { %9615 = vpow2.f32 %v4020_v16  ;;  %v4034_v4 = vmul.f32 1.442695, %v4019_v30  ;;  %v4032_v28 = vmul.f32 1.442695, %v4018_v1 }
 0xf9f   :  { %9617 = vpow2.f32 %v4022_v53 }
 0xfa0   :  { %9619 = vpow2.f32 %v4026_v47 }
 0xfa1   :  { %9621 = vpow2.f32 %v4024_v29 }
 0xfa2   :  { %9623 = vpow2.f32 %v4030_v48 }
 0xfa3   :  { %9625 = vpow2.f32 %v4028_v2 }
 0xfa4   :  { %9627 = vpow2.f32 %v4034_v4 }
 0xfa5   :  { %9629 = vpow2.f32 %v4032_v28 }
 0xfab   :  { %v9616_v37 = vpop.eup %9615 }
 0xfac   :  { %v9618_v36 = vpop.eup %9617  ;;  %4045 = vperm.xlu0 %9165, %v9616_v37  }
 0xfad   :  { %4048 = vperm.xlu1 %9166, %v9618_v36   ;;  %v12883_v55 = vpop.eup %9619 }
 0xfae   :  { %v9622_v11 = vpop.eup %9621 }
 0xfaf   :  { %v12886_v19 = vpop.eup %9623 }
 0xfb0   :  { %4054 = vperm.xlu0 %9165, %v12883_v55   ;;  %v12888_v13 = vpop.eup %9625 }
 0xfb1   :  { %4051 = vperm.xlu1 %9166, %v9622_v11   ;;  %v12892_v51 = vpop.eup %9627 }
 0xfb2   :  { %v12894_v58 = vpop.eup %9629 }
 0xfb4   :  { %4060 = vperm.xlu0 %9165, %v12886_v19  }
 0xfb5   :  { %4057 = vperm.xlu1 %9166, %v12888_v13  }
 0xfb8   :  { %4066 = vperm.xlu0 %9165, %v12892_v51  }
 0xfb9   :  { %4063 = vperm.xlu1 %9166, %v12894_v58  }
0x1027   :  { %v4046_v35 = vpop.permute.xlu0 %4045 }
0x1028   :  { %v4049_v39 = vpop.permute.xlu1 %4048  ;;  %v4071_v56 = vrot.slane %v4046_v35, %v11249_v31 }
0x1029   :  { %v4075_v59 = vrot.slane %v4049_v39, %v11249_v31 }
0x102b   :  { %v4055_v3 = vpop.permute.xlu0 %4054  ;;  %v4100_v6 = vsel %vm1080_vm0, %v4075_v59, %v4071_v56 }
0x102c   :  { %v4052_v54 = vpop.permute.xlu1 %4051  ;;  %v4083_v12 = vrot.slane %v4055_v3, %v11249_v31 }
0x102d   :  { %v4079_v5 = vrot.slane %v4052_v54, %v11249_v31 }
0x102f   :  { %v4101_v16 = vsel %vm1082_vm1, %v4079_v5, %v4100_v6  ;;  %v4061_v53 = vpop.permute.xlu0 %4060 }
0x1030   :  { %v4058_v46 = vpop.permute.xlu1 %4057  ;;  %v4102_v47 = vsel %vm1084_vm2, %v4083_v12, %v4101_v16  ;;  %v4091_v8 = vrot.slane %v4061_v53, %v11249_v31 }
0x1031   :  { %v4087_v44 = vrot.slane %v4058_v46, %v11249_v31 }
0x1033   :  { %v4103_v17 = vsel %vm1086_vm3, %v4087_v44, %v4102_v47  ;;  %v4067_v29 = vpop.permute.xlu0 %4066 }
0x1034   :  { %v4064_v30 = vpop.permute.xlu1 %4063  ;;  %v4099_v48 = vrot.slane %v4067_v29, %v11249_v31  ;;  %v4104_v2 = vsel %vm1088_vm4, %v4091_v8, %v4103_v17 }
0x1035   :  { %v4095_v1 = vrot.slane %v4064_v30, %v11249_v31 }
0x1037   :  { %v4105_v4 = vsel %vm1090_vm5, %v4095_v1, %v4104_v2 }
0x1038   :  { %v4106_v28 = vsel %vm1092_vm6, %v4099_v48, %v4105_v4 }
0x1039   :  { %v4108_v35 = vsel %vm1095_vm7, %v4106_v28, 0.0 }
0x103a   :  { %4109 = vadd.xlane.f32.xlu1 %v4108_v35 }
0x10c3   :  { %v4110_v39 = vpop.xlane.xlu1 %4109 }
0x10c4   :  { %v4115_v59 = vrot.slane %v4110_v39, %v11159_v23  ;;  %v4119_v56 = vrot.slane %v4110_v39, %v11165_v25  ;;  %v4123_v3 = vrot.slane %v4110_v39, %v11179_v38  ;;  %v4127_v54 = vrot.slane %v4110_v39, %v11176_v34 }
0x10c5   :  { %v4131_v5 = vrot.slane %v4110_v39, %v11285_v10  ;;  %v4135_v6 = vrot.slane %v4110_v39, %v11289_v15  ;;  %v4139_v46 = vrot.slane %v4110_v39, %v11293_v20  ;;  %v4143_v17 = vrot.slane %v4110_v39, %v11278_v0 }
0x10c6   :  { %9631 = vrcp.f32 %v4115_v59 }
0x10c7   :  { %9633 = vrcp.f32 %v4119_v56 }
0x10c8   :  { %9635 = vrcp.f32 %v4123_v3 }
0x10c9   :  { %9637 = vrcp.f32 %v4127_v54 }
0x10ca   :  { %9639 = vrcp.f32 %v4131_v5 }
0x10cb   :  { %9641 = vrcp.f32 %v4135_v6 }
0x10cc   :  { %9643 = vrcp.f32 %v4139_v46 }
0x10cd   :  { %9645 = vrcp.f32 %v4143_v17 }
0x10d3   :  { %v9632_v12 = vpop.eup %9631 }
0x10d4   :  { %v9634_v16 = vpop.eup %9633  ;;  %v4153_v53 = vmul.f32 %v9632_v12, %v9616_v37 }
0x10d5   :  { %v9636_v44 = vpop.eup %9635  ;;  %v4155_v47 = vmul.f32 %v9634_v16, %v9618_v36 }
0x10d6   :  { %v4168_v8 = vpack.c.bf16 %v4153_v53, %v4153_v53  ;;  %v4157_v48 = vmul.f32 %v9636_v44, %v9622_v11  ;;  %v9638_v1 = vpop.eup %9637 }
0x10d7   :  { %v4169_v30 = vpack.c.bf16 %v4155_v47, %v4155_v47  ;;  %v4159_v28 = vmul.f32 %v9638_v1, %v12883_v55  ;;  %v9640_v37 = vpop.eup %9639 }
0x10d8   :  { %v4177_v29 = vunpack.c.l.b16 %v4168_v8  ;;  %v4170_v4 = vpack.c.bf16 %v4157_v48, %v4157_v48  ;;  %v4161_v36 = vmul.f32 %v9640_v37, %v12888_v13  ;;  %v9642_v56 = vpop.eup %9641 }
0x10d9   :  { %v4230_v2 = vunpack.c.l.b16 %v4169_v30  ;;  %v4171_v59 = vpack.c.bf16 %v4159_v28, %v4159_v28  ;;  %v4163_v11 = vmul.f32 %v9642_v56, %v12886_v19  ;;  %v9644_v54 = vpop.eup %9643  ;;  %v10180_v56 = vld [vmem:[%s15538_s11 + $0xe4] ss:$16 sps:$4 sm:$0xff]  }
0x10da   :  { %4179 = vperm.xlu0 %9165, %v4177_v29   ;;  %v4283_v35 = vunpack.c.l.b16 %v4170_v4  ;;  %v4172_v3 = vpack.c.bf16 %v4161_v36, %v4161_v36  ;;  %v4165_v12 = vmul.f32 %v9644_v54, %v12894_v58  ;;  %v9646_v55 = vpop.eup %9645  ;;  %v12957_v54 = vpack.c.bf16 %v12786_v57, %v12786_v57  ;;  %v10181_v57 = vld [vmem:[%s15538_s11 + $0xe0] ss:$16 sps:$4 sm:$0xff]  }
0x10db   :  { %v4336_v39 = vunpack.c.l.b16 %v4171_v59  ;;  %v4173_v6 = vpack.c.bf16 %v4163_v11, %v4163_v11  ;;  %v4167_v46 = vmul.f32 %v9646_v55, %v12892_v51 }
0x10dc   :  { %v4389_v5 = vunpack.c.l.b16 %v4172_v3  ;;  %v4174_v53 = vpack.c.bf16 %v4165_v12, %v4165_v12 }
0x10dd   :  { %v4442_v16 = vunpack.c.l.b16 %v4173_v6  ;;  %v4175_v44 = vpack.c.bf16 %v4167_v46, %v4167_v46  ;;  %v10182_v6 = vld [vmem:[%s15538_s11 + $0xc4] ss:$16 sps:$4 sm:$0xff]  }
0x10de   :  { %4232 = vperm.xlu0 %9165, %v4230_v2   ;;  %v4495_v13 = vunpack.c.l.b16 %v4174_v53  ;;  %v10184_v53 = vld [vmem:[%s15538_s11 + $0xa4] ss:$16 sps:$4 sm:$0xff]  }
0x10df   :  { %v4548_v47 = vunpack.c.l.b16 %v4175_v44  ;;  %v10186_v44 = vld [vmem:[%s15538_s11 + $0xa0] ss:$16 sps:$4 sm:$0xff]  }
0x10e2   :  { %4285 = vperm.xlu0 %9165, %v4283_v35  }
0x10e6   :  { %4338 = vperm.xlu0 %9165, %v4336_v39  }
0x10ea   :  { %4391 = vperm.xlu0 %9165, %v4389_v5  }
0x10ee   :  { %4444 = vperm.xlu0 %9165, %v4442_v16   ;;  %v10183_v16 = vld [vmem:[%s15538_s11 + $0xc0] ss:$16 sps:$4 sm:$0xff]  }
0x10f2   :  { %4497 = vperm.xlu0 %9165, %v4495_v13   ;;  %v10185_v13 = vld [vmem:[%s15538_s11 + $0x2e4] ss:$16 sps:$4 sm:$0xff]  }
0x10f6   :  { %4550 = vperm.xlu0 %9165, %v4548_v47   ;;  %v10187_v47 = vld [vmem:[%s15538_s11 + $0x84] ss:$16 sps:$4 sm:$0xff]  }
0x1155   :  { %v4180_v8 = vpop.permute.xlu0 %4179 }
0x1156   :  { %v4184_v19 = vrot.slane %v4180_v8, %v11249_v31 }
0x1158   :  { %v4185_v17 = vpack.c.b16 %v4184_v19, %v4184_v19  ;;  %v10188_v19 = vld [vmem:[%s15538_s11 + $0x80] ss:$16 sps:$4 sm:$0xff]  }
0x1159   :  { %v4233_v29 = vpop.permute.xlu0 %4232 }
0x115a   :  { %8971 = vmatmul.mubr.msk.bf16.vlgmr.msra.gmra.mxu1 %vm1095_vm7, %v4185_v17  ;;  %v4237_v51 = vrot.slane %v4233_v29, %v11249_v31  ;;  %v10189_v17 = vld [vmem:[%s15538_s11 + $0x64] ss:$16 sps:$4 sm:$0xff]   ;;  %v10190_v29 = vld [vmem:[%s15538_s11 + $0x2e0] ss:$16 sps:$4 sm:$0xff]  }
0x115b   :  { %8975 = vmatpush3.bf16.msra.mxu1 %v11380_v43  ;;  %8976 = vmatprep.mubr.msk.bf16.mxu1 %vm10838_vm9, %v10837_v14 }
0x115c   :  { %8980 = vmatprep.subr.bf16.mxu1 %v10837_v14  ;;  %v4238_v30 = vpack.c.b16 %v4237_v51, %v4237_v51  ;;  %v10191_v51 = vld [vmem:[%s15538_s11 + $0x2c4] ss:$16 sps:$4 sm:$0xff]  }
0x115d   :  { %v4286_v58 = vpop.permute.xlu0 %4285 }
0x115e   :  { %v4290_v1 = vrot.slane %v4286_v58, %v11249_v31  ;;  %v10192_v58 = vld [vmem:[%s15538_s11 + $0x60] ss:$16 sps:$4 sm:$0xff]  }
0x1160   :  { %v4291_v28 = vpack.c.b16 %v4290_v1, %v4290_v1  ;;  %v10195_v1 = vld [vmem:[%s15538_s11 + $0x2a4] ss:$16 sps:$4 sm:$0xff]  }
0x1161   :  { %v4339_v48 = vpop.permute.xlu0 %4338 }
0x1162   :  { %8977 = vmatmul.mubr.msk.bf16.vlgmr.msra.gmra.mxu1 %vm1095_vm7, %v4238_v30  ;;  %v4343_v59 = vrot.slane %v4339_v48, %v11249_v31  ;;  %v10193_v30 = vld [vmem:[%s15538_s11 + $0x44] ss:$16 sps:$4 sm:$0xff]   ;;  %v10194_v48 = vld [vmem:[%s15538_s11 + $0x2c0] ss:$16 sps:$4 sm:$0xff]  }
0x1163   :  { %8981 = vmatpush3.bf16.msra.mxu1 %v11392_v50  ;;  %8982 = vmatprep.mubr.msk.bf16.mxu1 %vm10838_vm9, %v10837_v14 }
0x1164   :  { %8986 = vmatprep.subr.bf16.mxu1 %v10837_v14  ;;  %v4344_v3 = vpack.c.b16 %v4343_v59, %v4343_v59  ;;  %v10201_v59 = vld [vmem:[%s15538_s11 + $0x4] ss:$16 sps:$4 sm:$0xff]  }
0x1165   :  { %v4392_v2 = vpop.permute.xlu0 %4391 }
0x1166   :  { %v4396_v4 = vrot.slane %v4392_v2, %v11249_v31  ;;  %v10196_v2 = vld [vmem:[%s15538_s11 + $0x40] ss:$16 sps:$4 sm:$0xff]  }
0x1168   :  { %v4397_v37 = vpack.c.b16 %v4396_v4, %v4396_v4  ;;  %v10197_v4 = vld [vmem:[%s15538_s11 + $0x24] ss:$16 sps:$4 sm:$0xff]  }
0x1169   :  { %v4445_v35 = vpop.permute.xlu0 %4444 }
0x116a   :  { %8983 = vmatmul.mubr.msk.bf16.vlgmr.msra.gmra.mxu1 %vm1095_vm7, %v4291_v28  ;;  %8995 = vmatmul.mubr.msk.bf16.vlgmr.msra.gmra.mxu0 %vm1095_vm7, %v4397_v37  ;;  %v4449_v5 = vrot.slane %v4445_v35, %v11249_v31  ;;  %v10198_v28 = vld [vmem:[%s15538_s11 + $0x2a0] ss:$16 sps:$4 sm:$0xff]   ;;  %v10199_v37 = vld [vmem:[%s15538_s11 + $0x284] ss:$16 sps:$4 sm:$0xff]  }
0x116b   :  { %8987 = vmatpush3.bf16.msra.mxu1 %v11408_v60  ;;  %9005 = vmatpush3.bf16.msra.mxu0 %v11411_v61  ;;  %v10200_v35 = vld [vmem:[%s15538_s11 + $0x20] ss:$16 sps:$4 sm:$0xff]  }
0x116c   :  { %8988 = vmatprep.mubr.msk.bf16.mxu1 %vm10838_vm9, %v10837_v14  ;;  %8998 = vmatprep.subr.bf16.mxu1 %v10837_v14  ;;  %v4450_v12 = vpack.c.b16 %v4449_v5, %v4449_v5  ;;  %v10207_v5 = vld [vmem:[%s15538_s11 + $0x244] ss:$16 sps:$4 sm:$0xff]  }
0x116d   :  { %v4498_v36 = vpop.permute.xlu0 %4497  ;;  %9006 = vmatprep.mubr.msk.bf16.mxu0 %vm10838_vm9, %v10837_v14  ;;  %4625 = vmatprep.subr.bf16.mxu0 %v10180_v56  ;;  %v10203_v56 = vld [vmem:[%s15538_s11 + $0x264] ss:$16 sps:$4 sm:$0xff]  }
0x116e   :  { %v4502_v39 = vrot.slane %v4498_v36, %v11249_v31  ;;  %v10202_v36 = vld [vmem:[%s15538_s11 + $0x280] ss:$16 sps:$4 sm:$0xff]  }
0x1170   :  { %v4503_v11 = vpack.c.b16 %v4502_v39, %v4502_v39  ;;  %v10204_v39 = vld [vmem:[%s15538_s11] ss:$16 sps:$4 sm:$0xff]  }
0x1171   :  { %v4551_v55 = vpop.permute.xlu0 %4550 }
0x1172   :  { %8989 = vmatmul.mubr.msk.bf16.vlgmr.msra.gmra.mxu1 %vm1095_vm7, %v4344_v3  ;;  %9007 = vmatmul.mubr.msk.bf16.vlgmr.msra.gmra.mxu0 %vm1095_vm7, %v4503_v11  ;;  %v4555_v46 = vrot.slane %v4551_v55, %v11249_v31  ;;  %v10205_v3 = vld [vmem:[%s15538_s11 + $0x1e4] ss:$16 sps:$4 sm:$0xff]   ;;  %v10206_v11 = vld [vmem:[%s15538_s11 + $0x260] ss:$16 sps:$4 sm:$0xff]  }
0x1173   :  { %8999 = vmatpush3.bf16.msra.mxu1 %v11431_v21  ;;  %4657 = vmatprep.mubr.bf16.mxu0 %v12957_v54  ;;  %v10211_v55 = vld [vmem:[%s15538_s11 + $0x224] ss:$16 sps:$4 sm:$0xff]  }
0x1174   :  { %9000 = vmatprep.mubr.msk.bf16.mxu1 %vm10838_vm9, %v10837_v14  ;;  %9010 = vmatprep.subr.bf16.mxu1 %v10837_v14  ;;  %v4556_v8 = vpack.c.b16 %v4555_v46, %v4555_v46  ;;  %v10214_v46 = vld [vmem:[%s15538_s11 + $0x220] ss:$16 sps:$4 sm:$0xff]  }
0x1175   :  { %4626 = vmatpush1.bf16.msra.mxu0 %v10181_v57  ;;  %v10208_v57 = vld [vmem:[%s15538_s11 + $0x1e0] ss:$16 sps:$4 sm:$0xff]  }
0x1176   :  { %4627 = vmatprep.subr.bf16.mxu0 %v10182_v6  ;;  %v10209_v6 = vld [vmem:[%s15538_s11 + $0x1c4] ss:$16 sps:$4 sm:$0xff]  }
0x1179   :  { %4628 = vmatpush1.bf16.msra.mxu0 %v10183_v16  ;;  %v10212_v16 = vld [vmem:[%s15538_s11 + $0x1c0] ss:$16 sps:$4 sm:$0xff]  }
0x117a   :  { %9001 = vmatmul.mubr.msk.bf16.vlgmr.msra.gmra.mxu1 %vm1095_vm7, %v4450_v12  ;;  %4629 = vmatprep.subr.bf16.mxu0 %v10184_v53  ;;  %v10210_v12 = vld [vmem:[%s15538_s11 + $0x240] ss:$16 sps:$4 sm:$0xff]   ;;  %v10213_v53 = vld [vmem:[%s15538_s11 + $0x1a4] ss:$16 sps:$4 sm:$0xff]  }
0x117b   :  { %9011 = vmatpush3.bf16.msra.mxu1 %v11456_v24  ;;  %9012 = vmatprep.mubr.msk.bf16.mxu1 %vm10838_vm9, %v10837_v14 }
0x117c   :  { %4666 = vmatprep.subr.bf16.mxu1 %v10185_v13  ;;  %v10215_v13 = vld [vmem:[%s15538_s11 + $0x204] ss:$16 sps:$4 sm:$0xff]  }
0x117d   :  { %4630 = vmatpush1.bf16.msra.mxu0 %v10186_v44  ;;  %v10216_v44 = vld [vmem:[%s15538_s11 + $0x1a0] ss:$16 sps:$4 sm:$0xff]  }
0x117e   :  { %4631 = vmatprep.subr.bf16.mxu0 %v10187_v47  ;;  %v10217_v47 = vld [vmem:[%s15538_s11 + $0x184] ss:$16 sps:$4 sm:$0xff]  }
0x1181   :  { %4632 = vmatpush1.bf16.msra.mxu0 %v10188_v19  ;;  %v10219_v19 = vld [vmem:[%s15538_s11 + $0xec] ss:$16 sps:$4 sm:$0xff]  }
0x1182   :  { %9013 = vmatmul.mubr.msk.bf16.vlgmr.msra.gmra.mxu1 %vm1095_vm7, %v4556_v8  ;;  %4633 = vmatprep.subr.bf16.mxu0 %v10189_v17  ;;  %v10218_v8 = vld [vmem:[%s15538_s11 + $0x200] ss:$16 sps:$4 sm:$0xff]  }
0x1183   :  { %4667 = vmatpush1.bf16.msra.mxu1 %v10190_v29  ;;  %4698 = vmatprep.mubr.bf16.mxu1 %v10835_v63  ;;  %v10220_v17 = vld [vmem:[%s15538_s11 + $0x180] ss:$16 sps:$4 sm:$0xff]   ;;  %v10221_v29 = vld [vmem:[%s15538_s11 + $0x164] ss:$16 sps:$4 sm:$0xff]  }
0x1184   :  { %4668 = vmatprep.subr.bf16.mxu1 %v10191_v51  ;;  %v10222_v51 = vld [vmem:[%s15538_s11 + $0xe8] ss:$16 sps:$4 sm:$0xff]  }
0x1185   :  { %4634 = vmatpush1.bf16.msra.mxu0 %v10192_v58  ;;  %v10223_v58 = vld [vmem:[%s15538_s11 + $0xcc] ss:$16 sps:$4 sm:$0xff]  }
0x1186   :  { %4635 = vmatprep.subr.bf16.mxu0 %v10193_v30  ;;  %v10224_v30 = vld [vmem:[%s15538_s11 + $0x160] ss:$16 sps:$4 sm:$0xff]  }
0x1187   :  { %4669 = vmatpush1.bf16.msra.mxu1 %v10194_v48  ;;  %v10225_v48 = vld [vmem:[%s15538_s11 + $0x144] ss:$16 sps:$4 sm:$0xff]  }
0x1188   :  { %4670 = vmatprep.subr.bf16.mxu1 %v10195_v1  ;;  %v10227_v1 = vld [vmem:[%s15538_s11 + $0xac] ss:$16 sps:$4 sm:$0xff]  }
0x1189   :  { %4636 = vmatpush1.bf16.msra.mxu0 %v10196_v2  ;;  %v10228_v2 = vld [vmem:[%s15538_s11 + $0x140] ss:$16 sps:$4 sm:$0xff]  }
0x118a   :  { %4637 = vmatprep.subr.bf16.mxu0 %v10197_v4  ;;  %v10229_v4 = vld [vmem:[%s15538_s11 + $0x124] ss:$16 sps:$4 sm:$0xff]  }
0x118b   :  { %4671 = vmatpush1.bf16.msra.mxu1 %v10198_v28  ;;  %v10230_v28 = vld [vmem:[%s15538_s11 + $0xa8] ss:$16 sps:$4 sm:$0xff]  }
0x118c   :  { %4672 = vmatprep.subr.bf16.mxu1 %v10199_v37  ;;  %v10231_v37 = vld [vmem:[%s15538_s11 + $0x8c] ss:$16 sps:$4 sm:$0xff]  }
0x118d   :  { %4638 = vmatpush1.bf16.msra.mxu0 %v10200_v35  ;;  %v10232_v35 = vld [vmem:[%s15538_s11 + $0x120] ss:$16 sps:$4 sm:$0xff]  }
0x118e   :  { %4639 = vmatprep.subr.bf16.mxu0 %v10201_v59  ;;  %v10233_v59 = vld [vmem:[%s15538_s11 + $0x104] ss:$16 sps:$4 sm:$0xff]  }
0x118f   :  { %4673 = vmatpush1.bf16.msra.mxu1 %v10202_v36  ;;  %v10234_v36 = vld [vmem:[%s15538_s11 + $0x88] ss:$16 sps:$4 sm:$0xff]  }
0x1190   :  { %4674 = vmatprep.subr.bf16.mxu1 %v10203_v56  ;;  %v10235_v56 = vld [vmem:[%s15538_s11 + $0x6c] ss:$16 sps:$4 sm:$0xff]  }
0x1191   :  { %4640 = vmatpush1.bf16.msra.mxu0 %v10204_v39  ;;  %v10236_v39 = vld [vmem:[%s15538_s11 + $0x100] ss:$16 sps:$4 sm:$0xff]  }
0x1192   :  { %4641 = vmatprep.subr.bf16.mxu0 %v10205_v3  ;;  %v10237_v3 = vld [vmem:[%s15538_s11 + $0x2ec] ss:$16 sps:$4 sm:$0xff]  }
0x1193   :  { %4675 = vmatpush1.bf16.msra.mxu1 %v10206_v11  ;;  %v10238_v11 = vld [vmem:[%s15538_s11 + $0x68] ss:$16 sps:$4 sm:$0xff]  }
0x1194   :  { %4676 = vmatprep.subr.bf16.mxu1 %v10207_v5  ;;  %v10239_v5 = vld [vmem:[%s15538_s11 + $0x4c] ss:$16 sps:$4 sm:$0xff]  }
0x1195   :  { %4642 = vmatpush2.bf16.msra.mxu0 %v10208_v57  ;;  %v10240_v57 = vld [vmem:[%s15538_s11 + $0x48] ss:$16 sps:$4 sm:$0xff]  }
0x1196   :  { %4643 = vmatprep.subr.bf16.mxu0 %v10209_v6  ;;  %v10241_v6 = vld [vmem:[%s15538_s11 + $0x2c] ss:$16 sps:$4 sm:$0xff]  }
0x1197   :  { %4677 = vmatpush1.bf16.msra.mxu1 %v10210_v12  ;;  %v10242_v12 = vld [vmem:[%s15538_s11 + $0x28] ss:$16 sps:$4 sm:$0xff]  }
0x1198   :  { %4678 = vmatprep.subr.bf16.mxu1 %v10211_v55  ;;  %v10243_v55 = vld [vmem:[%s15538_s11 + $0xc] ss:$16 sps:$4 sm:$0xff]  }
0x1199   :  { %4644 = vmatpush2.bf16.msra.mxu0 %v10212_v16  ;;  %v10244_v16 = vld [vmem:[%s15538_s11 + $0x8] ss:$16 sps:$4 sm:$0xff]  }
0x119a   :  { %4645 = vmatprep.subr.bf16.mxu0 %v10213_v53  ;;  %v10245_v53 = vld [vmem:[%s15538_s11 + $0x1ec] ss:$16 sps:$4 sm:$0xff]  }
0x119b   :  { %4679 = vmatpush1.bf16.msra.mxu1 %v10214_v46  ;;  %v10246_v46 = vld [vmem:[%s15538_s11 + $0x1e8] ss:$16 sps:$4 sm:$0xff]  }
0x119c   :  { %4680 = vmatprep.subr.bf16.mxu1 %v10215_v13  ;;  %v10247_v13 = vld [vmem:[%s15538_s11 + $0x1cc] ss:$16 sps:$4 sm:$0xff]  }
0x119d   :  { %4646 = vmatpush2.bf16.msra.mxu0 %v10216_v44  ;;  %v10248_v44 = vld [vmem:[%s15538_s11 + $0x1c8] ss:$16 sps:$4 sm:$0xff]  }
0x119e   :  { %4647 = vmatprep.subr.bf16.mxu0 %v10217_v47  ;;  %v10249_v47 = vld [vmem:[%s15538_s11 + $0x1ac] ss:$16 sps:$4 sm:$0xff]  }
0x119f   :  { %4681 = vmatpush1.bf16.msra.mxu1 %v10218_v8  ;;  %v10250_v8 = vld [vmem:[%s15538_s11 + $0x1a8] ss:$16 sps:$4 sm:$0xff]  }
0x11a0   :  { %4707 = vmatprep.subr.bf16.mxu1 %v10219_v19  ;;  %v10251_v19 = vld [vmem:[%s15538_s11 + $0x18c] ss:$16 sps:$4 sm:$0xff]  }
0x11a1   :  { %4648 = vmatpush2.bf16.msra.mxu0 %v10220_v17  ;;  %v10252_v17 = vld [vmem:[%s15538_s11 + $0x188] ss:$16 sps:$4 sm:$0xff]  }
0x11a2   :  { %4699 = vmatmul.mubr.bf16.vlgmr.msra.gmra.mxu1 %v12800_v41  ;;  %4649 = vmatprep.subr.bf16.mxu0 %v10221_v29  ;;  %v10253_v29 = vld [vmem:[%s15538_s11 + $0x16c] ss:$16 sps:$4 sm:$0xff]  }
0x11a3   :  { %4739 = vmatprep.mubr.bf16.mxu1 %v12957_v54  ;;  %4708 = vmatpush1.bf16.msra.mxu1 %v10222_v51  ;;  %v10226_v54 = vld [vmem:[%s15538_s11 + $0xc8] ss:$16 sps:$4 sm:$0xff]  }
0x11a4   :  { %4709 = vmatprep.subr.bf16.mxu1 %v10223_v58  ;;  %v10254_v51 = vld [vmem:[%s15538_s11 + $0x168] ss:$16 sps:$4 sm:$0xff]   ;;  %v10255_v58 = vld [vmem:[%s15538_s11 + $0x14c] ss:$16 sps:$4 sm:$0xff]  }
0x11a5   :  { %4650 = vmatpush2.bf16.msra.mxu0 %v10224_v30  ;;  %v10256_v30 = vld [vmem:[%s15538_s11 + $0x148] ss:$16 sps:$4 sm:$0xff]  }
0x11a6   :  { %4651 = vmatprep.subr.bf16.mxu0 %v10225_v48  ;;  %v10257_v48 = vld [vmem:[%s15538_s11 + $0x12c] ss:$16 sps:$4 sm:$0xff]  }
0x11a7   :  { %4710 = vmatpush1.bf16.msra.mxu1 %v10226_v54  ;;  %v10258_v54 = vld [vmem:[%s15538_s11 + $0x128] ss:$16 sps:$4 sm:$0xff]  }
0x11a8   :  { %4711 = vmatprep.subr.bf16.mxu1 %v10227_v1  ;;  %v10259_v1 = vld [vmem:[%s15538_s11 + $0x10c] ss:$16 sps:$4 sm:$0xff]  }
0x11a9   :  { %4652 = vmatpush2.bf16.msra.mxu0 %v10228_v2  ;;  %v10260_v2 = vld [vmem:[%s15538_s11 + $0x108] ss:$16 sps:$4 sm:$0xff]  }
0x11aa   :  { %4653 = vmatprep.subr.bf16.mxu0 %v10229_v4  ;;  %v10261_v4 = vld [vmem:[%s15528_s5 + $0xec] ss:$16 sps:$4 sm:$0xff]  }
0x11ab   :  { %4712 = vmatpush1.bf16.msra.mxu1 %v10230_v28 }
0x11ac   :  { %4713 = vmatprep.subr.bf16.mxu1 %v10231_v37 }
0x11ad   :  { %4654 = vmatpush2.bf16.msra.mxu0 %v10232_v35 }
0x11ae   :  { %4655 = vmatprep.subr.bf16.mxu0 %v10233_v59 }
0x11af   :  { %4714 = vmatpush1.bf16.msra.mxu1 %v10234_v36 }
0x11b0   :  { %4715 = vmatprep.subr.bf16.mxu1 %v10235_v56 }
0x11b1   :  { %4656 = vmatpush2.bf16.msra.mxu0 %v10236_v39 }
0x11b2   :  { %4748 = vmatprep.subr.bf16.mxu0 %v10237_v3 }
0x11b3   :  { %4716 = vmatpush1.bf16.msra.mxu1 %v10238_v11 }
0x11b4   :  { %4717 = vmatprep.subr.bf16.mxu1 %v10239_v5 }
0x11b7   :  { %4718 = vmatpush1.bf16.msra.mxu1 %v10240_v57 }
0x11b8   :  { %4719 = vmatprep.subr.bf16.mxu1 %v10241_v6 }
0x11bb   :  { %4720 = vmatpush1.bf16.msra.mxu1 %v10242_v12 }
0x11bc   :  { %4721 = vmatprep.subr.bf16.mxu1 %v10243_v55 }
0x11bf   :  { %4722 = vmatpush1.bf16.msra.mxu1 %v10244_v16 }
0x11c0   :  { %4723 = vmatprep.subr.bf16.mxu1 %v10245_v53 }
0x11c3   :  { %4724 = vmatpush2.bf16.msra.mxu1 %v10246_v46 }
0x11c4   :  { %4725 = vmatprep.subr.bf16.mxu1 %v10247_v13 }
0x11c7   :  { %4726 = vmatpush2.bf16.msra.mxu1 %v10248_v44 }
0x11c8   :  { %4727 = vmatprep.subr.bf16.mxu1 %v10249_v47 }
0x11cb   :  { %4728 = vmatpush2.bf16.msra.mxu1 %v10250_v8 }
0x11cc   :  { %4729 = vmatprep.subr.bf16.mxu1 %v10251_v19 }
0x11cf   :  { %4730 = vmatpush2.bf16.msra.mxu1 %v10252_v17 }
0x11d0   :  { %4731 = vmatprep.subr.bf16.mxu1 %v10253_v29 }
0x11d3   :  { %4732 = vmatpush2.bf16.msra.mxu1 %v10254_v51 }
0x11d4   :  { %4733 = vmatprep.subr.bf16.mxu1 %v10255_v58 }
0x11d7   :  { %4734 = vmatpush2.bf16.msra.mxu1 %v10256_v30 }
0x11d8   :  { %4735 = vmatprep.subr.bf16.mxu1 %v10257_v48 }
0x11db   :  { %4736 = vmatpush2.bf16.msra.mxu1 %v10258_v54 }
0x11dc   :  { %4737 = vmatprep.subr.bf16.mxu1 %v10259_v1 }
0x11df   :  { %4738 = vmatpush2.bf16.msra.mxu1 %v10260_v2 }
0x11e0   :  { %4859 = vmatprep.subr.bf16.mxu1 %v10261_v4 }
0x121a   :  { %v4223_v28 = vpop.f32.mrf.mxu1 }
0x121c   :  { %v8972_v37 = vpop.f32.mrf.mxu1 }
0x121e   :  { %v4226_v35 = vpop.f32.mrf.mxu1 }
0x1220   :  { %v8973_v59 = vpop.f32.mrf.mxu1 }
0x1222   :  { %v4276_v36 = vpop.f32.mrf.mxu1 }
0x1223   :  { %v4608_v17 = vrot.slane %v4276_v36, 7 }
0x1224   :  { %v8978_v56 = vpop.f32.mrf.mxu1 }
0x1225   :  { %v4609_v54 = vsel %vm1080_vm0, %v4608_v17, %v4223_v28  ;;  %v10269_v17 = vld [vmem:[%s15528_s5 + $0xac] ss:$16 sps:$4 sm:$0xff]  }
0x1226   :  { %v4279_v39 = vpop.f32.mrf.mxu1 }
0x1228   :  { %v8979_v3 = vpop.f32.mrf.mxu1 }
0x122a   :  { %v4329_v11 = vpop.f32.mrf.mxu1  ;;  %v4435_v5 = vpop.f32.mrf.mxu0 }
0x122b   :  { %v4610_v29 = vrot.slane %v4329_v11, 6  ;;  %v4614_v35 = vrot.slane %v4435_v5, 4  ;;  %v10262_v5 = vld [vmem:[%s15538_s11 + $0x2e8] ss:$16 sps:$4 sm:$0xff]  }
0x122c   :  { %v8984_v57 = vpop.f32.mrf.mxu1  ;;  %v8996_v6 = vpop.f32.mrf.mxu0 }
0x122d   :  { %v4611_v1 = vsel %vm1082_vm1, %v4610_v29, %v4609_v54  ;;  %v10270_v29 = vld [vmem:[%s15538_s11 + $0x2a8] ss:$16 sps:$4 sm:$0xff]   ;;  %v10275_v54 = vld [vmem:[%s15538_s11 + $0x26c] ss:$16 sps:$4 sm:$0xff]  }
0x122e   :  { %v4332_v12 = vpop.f32.mrf.mxu1  ;;  %v4438_v55 = vpop.f32.mrf.mxu0 }
0x1230   :  { %v8985_v16 = vpop.f32.mrf.mxu1  ;;  %v8997_v53 = vpop.f32.mrf.mxu0 }
0x1232   :  { %v4382_v46 = vpop.f32.mrf.mxu1  ;;  %v4541_v13 = vpop.f32.mrf.mxu0 }
0x1233   :  { %v4612_v30 = vrot.slane %v4382_v46, 5  ;;  %v4618_v3 = vrot.slane %v4541_v13, 2  ;;  %v10263_v46 = vld [vmem:[%s15538_s11 + $0x2cc] ss:$16 sps:$4 sm:$0xff]   ;;  %v10264_v13 = vld [vmem:[%s15528_s5 + $0xe8] ss:$16 sps:$4 sm:$0xff]  }
0x1234   :  { %v8990_v44 = vpop.f32.mrf.mxu1  ;;  %v9008_v47 = vpop.f32.mrf.mxu0 }
0x1235   :  { %v4613_v4 = vsel %vm1084_vm2, %v4612_v30, %v4611_v1  ;;  %v10265_v44 = vld [vmem:[%s15528_s5 + $0xcc] ss:$16 sps:$4 sm:$0xff]   ;;  %v10266_v47 = vld [vmem:[%s15538_s11 + $0x2c8] ss:$16 sps:$4 sm:$0xff]  }
0x1236   :  { %v4385_v8 = vpop.f32.mrf.mxu1  ;;  %v4544_v19 = vpop.f32.mrf.mxu0  ;;  %v4615_v56 = vsel %vm1086_vm3, %v4614_v35, %v4613_v4  ;;  %v10273_v30 = vld [vmem:[%s15528_s5 + $0x8c] ss:$16 sps:$4 sm:$0xff]   ;;  %v10276_v1 = vld [vmem:[%s15528_s5 + $0x88] ss:$16 sps:$4 sm:$0xff]  }
0x1237   :  { %v10267_v8 = vld [vmem:[%s15538_s11 + $0x2ac] ss:$16 sps:$4 sm:$0xff]   ;;  %v10268_v19 = vld [vmem:[%s15528_s5 + $0xc8] ss:$16 sps:$4 sm:$0xff]  }
0x1238   :  { %v8991_v51 = vpop.f32.mrf.mxu1  ;;  %v9009_v58 = vpop.f32.mrf.mxu0  ;;  %v10278_v4 = vld [vmem:[%s15538_s11 + $0x268] ss:$16 sps:$4 sm:$0xff]  }
0x1239   :  { %v10271_v51 = vld [vmem:[%s15538_s11 + $0x28c] ss:$16 sps:$4 sm:$0xff]   ;;  %v10272_v58 = vld [vmem:[%s15528_s5 + $0xa8] ss:$16 sps:$4 sm:$0xff]  }
0x123a   :  { %v4488_v48 = vpop.f32.mrf.mxu1  ;;  %v10280_v35 = vld [vmem:[%s15528_s5 + $0x68] ss:$16 sps:$4 sm:$0xff]  }
0x123b   :  { %v4616_v37 = vrot.slane %v4488_v48, 3  ;;  %v10274_v48 = vld [vmem:[%s15538_s11 + $0x288] ss:$16 sps:$4 sm:$0xff]  }
0x123c   :  { %v9002_v2 = vpop.f32.mrf.mxu1 }
0x123d   :  { %v4617_v36 = vsel %vm1088_vm4, %v4616_v37, %v4615_v56  ;;  %v10277_v2 = vld [vmem:[%s15528_s5 + $0x6c] ss:$16 sps:$4 sm:$0xff]   ;;  %v10282_v56 = vld [vmem:[%s15538_s11 + $0x248] ss:$16 sps:$4 sm:$0xff]  }
0x123e   :  { %v4491_v59 = vpop.f32.mrf.mxu1  ;;  %v4619_v6 = vsel %vm1090_vm5, %v4618_v3, %v4617_v36  ;;  %v10279_v37 = vld [vmem:[%s15538_s11 + $0x24c] ss:$16 sps:$4 sm:$0xff]   ;;  %v10284_v36 = vld [vmem:[%s15528_s5 + $0x48] ss:$16 sps:$4 sm:$0xff]  }
0x123f   :  { %v10281_v59 = vld [vmem:[%s15528_s5 + $0x4c] ss:$16 sps:$4 sm:$0xff]  }
0x1240   :  { %v9003_v39 = vpop.f32.mrf.mxu1  ;;  %v10285_v3 = vld [vmem:[%s15528_s5 + $0x2c] ss:$16 sps:$4 sm:$0xff]  }
0x1241   :  { %v10283_v39 = vld [vmem:[%s15538_s11 + $0x22c] ss:$16 sps:$4 sm:$0xff]  }
0x1242   :  { %v4594_v11 = vpop.f32.mrf.mxu1 }
0x1243   :  { %v4620_v57 = vrot.slane %v4594_v11, 1  ;;  %v10286_v11 = vld [vmem:[%s15538_s11 + $0x228] ss:$16 sps:$4 sm:$0xff]  }
0x1244   :  { %v9014_v12 = vpop.f32.mrf.mxu1 }
0x1245   :  { %v4621_v28 = vsel %vm1092_vm6, %v4620_v57, %v4619_v6  ;;  %v10287_v6 = vld [vmem:[%s15538_s11 + $0x20c] ss:$16 sps:$4 sm:$0xff]   ;;  %v10288_v12 = vld [vmem:[%s15528_s5 + $0x28] ss:$16 sps:$4 sm:$0xff]  }
0x1246   :  { %v4623_v55 = vpack.c.bf16 %v4621_v28, %v4621_v28  ;;  %v4597_v16 = vpop.f32.mrf.mxu1 }
0x1247   :  { %v10290_v16 = vld [vmem:[%s15538_s11 + $0x208] ss:$16 sps:$4 sm:$0xff]  }
0x1248   :  { %v9015_v53 = vpop.f32.mrf.mxu1  ;;  %4658 = vmatmul.mubr.bf16.vlgmr.msra.gmra.mxu0 %v4623_v55  ;;  %4740 = vmatmul.mubr.bf16.vlgmr.msra.gmra.mxu1 %v4623_v55  ;;  %v10289_v55 = vld [vmem:[%s15528_s5 + $0xc] ss:$16 sps:$4 sm:$0xff]  }
0x1249   :  { %4749 = vmatpush1.bf16.msra.mxu0 %v10262_v5  ;;  %4891 = vmatprep.mubr.bf16.mxu1 %v12800_v41  ;;  %v10291_v5 = vld [vmem:[%s15528_s5 + $0xe4] ss:$16 sps:$4 sm:$0xff]  }
0x124a   :  { %4750 = vmatprep.subr.bf16.mxu0 %v10263_v46  ;;  %4780 = vmatprep.mubr.bf16.mxu0 %v10835_v63  ;;  %v10292_v46 = vld [vmem:[%s15528_s5 + $0x8] ss:$16 sps:$4 sm:$0xff]  }
0x124b   :  { %4860 = vmatpush1.bf16.msra.mxu1 %v10264_v13 }
0x124c   :  { %4861 = vmatprep.subr.bf16.mxu1 %v10265_v44  ;;  %v10293_v44 = vld [vmem:[%s15528_s5 + $0x1ec] ss:$16 sps:$4 sm:$0xff]  }
0x124d   :  { %4751 = vmatpush1.bf16.msra.mxu0 %v10266_v47  ;;  %v10294_v47 = vld [vmem:[%s15528_s5 + $0xe0] ss:$16 sps:$4 sm:$0xff]  }
0x124e   :  { %4752 = vmatprep.subr.bf16.mxu0 %v10267_v8  ;;  %v10295_v8 = vld [vmem:[%s15528_s5 + $0xc4] ss:$16 sps:$4 sm:$0xff]  }
0x124f   :  { %4862 = vmatpush1.bf16.msra.mxu1 %v10268_v19  ;;  %v10296_v19 = vld [vmem:[%s15528_s5 + $0x1e8] ss:$16 sps:$4 sm:$0xff]  }
0x1250   :  { %4863 = vmatprep.subr.bf16.mxu1 %v10269_v17  ;;  %v10297_v17 = vld [vmem:[%s15528_s5 + $0x1cc] ss:$16 sps:$4 sm:$0xff]  }
0x1251   :  { %4753 = vmatpush1.bf16.msra.mxu0 %v10270_v29  ;;  %v10298_v29 = vld [vmem:[%s15528_s5 + $0xc0] ss:$16 sps:$4 sm:$0xff]  }
0x1252   :  { %4754 = vmatprep.subr.bf16.mxu0 %v10271_v51  ;;  %v10300_v51 = vld [vmem:[%s15528_s5 + $0x1c8] ss:$16 sps:$4 sm:$0xff]  }
0x1253   :  { %4864 = vmatpush1.bf16.msra.mxu1 %v10272_v58  ;;  %v10301_v58 = vld [vmem:[%s15528_s5 + $0x1ac] ss:$16 sps:$4 sm:$0xff]  }
0x1254   :  { %4865 = vmatprep.subr.bf16.mxu1 %v10273_v30  ;;  %v10302_v30 = vld [vmem:[%s15528_s5 + $0xa0] ss:$16 sps:$4 sm:$0xff]  }
0x1255   :  { %4755 = vmatpush1.bf16.msra.mxu0 %v10274_v48  ;;  %v10303_v48 = vld [vmem:[%s15528_s5 + $0x84] ss:$16 sps:$4 sm:$0xff]  }
0x1256   :  { %4756 = vmatprep.subr.bf16.mxu0 %v10275_v54  ;;  %v10304_v54 = vld [vmem:[%s15528_s5 + $0x1a8] ss:$16 sps:$4 sm:$0xff]  }
0x1257   :  { %4866 = vmatpush1.bf16.msra.mxu1 %v10276_v1  ;;  %v10305_v1 = vld [vmem:[%s15528_s5 + $0x18c] ss:$16 sps:$4 sm:$0xff]  }
0x1258   :  { %4867 = vmatprep.subr.bf16.mxu1 %v10277_v2  ;;  %v10306_v2 = vld [vmem:[%s15528_s5 + $0x80] ss:$16 sps:$4 sm:$0xff]  }
0x1259   :  { %4757 = vmatpush1.bf16.msra.mxu0 %v10278_v4  ;;  %v10307_v4 = vld [vmem:[%s15528_s5 + $0x64] ss:$16 sps:$4 sm:$0xff]  }
0x125a   :  { %4758 = vmatprep.subr.bf16.mxu0 %v10279_v37  ;;  %v10308_v37 = vld [vmem:[%s15528_s5 + $0x188] ss:$16 sps:$4 sm:$0xff]  }
0x125b   :  { %4868 = vmatpush1.bf16.msra.mxu1 %v10280_v35  ;;  %v10309_v35 = vld [vmem:[%s15528_s5 + $0x16c] ss:$16 sps:$4 sm:$0xff]  }
0x125c   :  { %4869 = vmatprep.subr.bf16.mxu1 %v10281_v59  ;;  %v10310_v59 = vld [vmem:[%s15528_s5 + $0x60] ss:$16 sps:$4 sm:$0xff]  }
0x125d   :  { %4759 = vmatpush1.bf16.msra.mxu0 %v10282_v56  ;;  %v10311_v56 = vld [vmem:[%s15528_s5 + $0x44] ss:$16 sps:$4 sm:$0xff]  }
0x125e   :  { %4760 = vmatprep.subr.bf16.mxu0 %v10283_v39  ;;  %v10312_v39 = vld [vmem:[%s15528_s5 + $0x168] ss:$16 sps:$4 sm:$0xff]  }
0x125f   :  { %4870 = vmatpush1.bf16.msra.mxu1 %v10284_v36  ;;  %v10313_v36 = vld [vmem:[%s15528_s5 + $0x14c] ss:$16 sps:$4 sm:$0xff]  }
0x1260   :  { %4871 = vmatprep.subr.bf16.mxu1 %v10285_v3  ;;  %v10314_v3 = vld [vmem:[%s15528_s5 + $0x40] ss:$16 sps:$4 sm:$0xff]  }
0x1261   :  { %4761 = vmatpush1.bf16.msra.mxu0 %v10286_v11  ;;  %v10315_v11 = vld [vmem:[%s15528_s5 + $0x24] ss:$16 sps:$4 sm:$0xff]  }
0x1262   :  { %v13303_v57 = vpop.f32.mrf.mxu1  ;;  %4762 = vmatprep.subr.bf16.mxu0 %v10287_v6  ;;  %v10316_v6 = vld [vmem:[%s15528_s5 + $0x148] ss:$16 sps:$4 sm:$0xff]  }
0x1263   :  { %4872 = vmatpush1.bf16.msra.mxu1 %v10288_v12  ;;  %v10317_v12 = vld [vmem:[%s15528_s5 + $0x12c] ss:$16 sps:$4 sm:$0xff]  }
0x1264   :  { %v13311_v28 = vpop.f32.mrf.mxu1  ;;  %4873 = vmatprep.subr.bf16.mxu1 %v10289_v55  ;;  %v10318_v55 = vld [vmem:[%s15528_s5 + $0x20] ss:$16 sps:$4 sm:$0xff]  }
0x1265   :  { %4763 = vmatpush1.bf16.msra.mxu0 %v10290_v16  ;;  %v10319_v16 = vld [vmem:[%s15528_s5 + $0x4] ss:$16 sps:$4 sm:$0xff]  }
0x1266   :  { %v4704_v53 = vpop.f32.mrf.mxu1  ;;  %4818 = vmatprep.subr.bf16.mxu0 %v10291_v5  ;;  %v10321_v5 = vld [vmem:[%s15528_s5 + $0x10c] ss:$16 sps:$4 sm:$0xff]  }
0x1267   :  { %4874 = vmatpush1.bf16.msra.mxu1 %v10292_v46  ;;  %v10320_v53 = vld [vmem:[%s15528_s5 + $0x128] ss:$16 sps:$4 sm:$0xff]   ;;  %v10322_v46 = vld [vmem:[%s15528_s5] ss:$16 sps:$4 sm:$0xff]  }
0x1268   :  { %v4705_v13 = vpop.f32.mrf.mxu1  ;;  %4781 = vmatmul.mubr.bf16.vlgmr.msra.gmra.mxu0 %v12800_v41  ;;  %4875 = vmatprep.subr.bf16.mxu1 %v10293_v44  ;;  %v10323_v44 = vld [vmem:[%s15528_s5 + $0x1e4] ss:$16 sps:$4 sm:$0xff]  }
0x1269   :  { %4819 = vmatpush1.bf16.msra.mxu0 %v10294_v47  ;;  %4850 = vmatprep.mubr.bf16.mxu0 %v12800_v41  ;;  %v10299_v41 = vld [vmem:[%s15528_s5 + $0xa4] ss:$16 sps:$4 sm:$0xff]   ;;  %v8596_v13 = vld [vmem:[%s15529_s0 + $0x18] sm:$0xff] }
0x126a   :  { %4820 = vmatprep.subr.bf16.mxu0 %v10295_v8  ;;  %v10324_v47 = vld [vmem:[%s15528_s5 + $0x108] ss:$16 sps:$4 sm:$0xff]   ;;  %v4817_v8 = vpack.c.bf16 %v8596_v13, %v8596_v13 }
0x126b   :  { %4876 = vmatpush2.bf16.msra.mxu1 %v10296_v19  ;;  %v10325_v19 = vld [vmem:[%s15528_s5 + $0x1e0] ss:$16 sps:$4 sm:$0xff]   ;;  %v10352_v13 = vld [vmem:[%s15530_s7 + $0x48] sm:$0xff]  }
0x126c   :  { %4877 = vmatprep.subr.bf16.mxu1 %v10297_v17  ;;  %v10326_v17 = vld [vmem:[%s15528_s5 + $0x1c4] ss:$16 sps:$4 sm:$0xff]  }
0x126d   :  { %4821 = vmatpush1.bf16.msra.mxu0 %v10298_v29  ;;  %v10327_v29 = vld [vmem:[%s15528_s5 + $0x1c0] ss:$16 sps:$4 sm:$0xff]  }
0x126e   :  { %4822 = vmatprep.subr.bf16.mxu0 %v10299_v41  ;;  %v10328_v41 = vld [vmem:[%s15528_s5 + $0x1a4] ss:$16 sps:$4 sm:$0xff]  }
0x126f   :  { %4878 = vmatpush2.bf16.msra.mxu1 %v10300_v51  ;;  %v10329_v51 = vld [vmem:[%s15528_s5 + $0x1a0] ss:$16 sps:$4 sm:$0xff]  }
0x1270   :  { %4879 = vmatprep.subr.bf16.mxu1 %v10301_v58  ;;  %v10330_v58 = vld [vmem:[%s15528_s5 + $0x184] ss:$16 sps:$4 sm:$0xff]  }
0x1271   :  { %4823 = vmatpush1.bf16.msra.mxu0 %v10302_v30  ;;  %v10331_v30 = vld [vmem:[%s15528_s5 + $0x180] ss:$16 sps:$4 sm:$0xff]  }
0x1272   :  { %4824 = vmatprep.subr.bf16.mxu0 %v10303_v48  ;;  %v10332_v48 = vld [vmem:[%s15528_s5 + $0x164] ss:$16 sps:$4 sm:$0xff]  }
0x1273   :  { %4880 = vmatpush2.bf16.msra.mxu1 %v10304_v54  ;;  %v10333_v54 = vld [vmem:[%s15528_s5 + $0x160] ss:$16 sps:$4 sm:$0xff]  }
0x1274   :  { %4881 = vmatprep.subr.bf16.mxu1 %v10305_v1  ;;  %v10334_v1 = vld [vmem:[%s15528_s5 + $0x144] ss:$16 sps:$4 sm:$0xff]  }
0x1275   :  { %4825 = vmatpush1.bf16.msra.mxu0 %v10306_v2  ;;  %v10335_v2 = vld [vmem:[%s15528_s5 + $0x140] ss:$16 sps:$4 sm:$0xff]  }
0x1276   :  { %4826 = vmatprep.subr.bf16.mxu0 %v10307_v4  ;;  %v10336_v4 = vld [vmem:[%s15528_s5 + $0x124] ss:$16 sps:$4 sm:$0xff]  }
0x1277   :  { %4882 = vmatpush2.bf16.msra.mxu1 %v10308_v37  ;;  %v10337_v37 = vld [vmem:[%s15528_s5 + $0x120] ss:$16 sps:$4 sm:$0xff]  }
0x1278   :  { %4883 = vmatprep.subr.bf16.mxu1 %v10309_v35  ;;  %v10338_v35 = vld [vmem:[%s15528_s5 + $0x104] ss:$16 sps:$4 sm:$0xff]  }
0x1279   :  { %4827 = vmatpush1.bf16.msra.mxu0 %v10310_v59  ;;  %v10339_v59 = vld [vmem:[%s15528_s5 + $0x100] ss:$16 sps:$4 sm:$0xff]  }
0x127a   :  { %4828 = vmatprep.subr.bf16.mxu0 %v10311_v56  ;;  %v10340_v56 = vld [vmem:[%s15530_s7 + $0x78] sm:$0xff]  }
0x127b   :  { %4884 = vmatpush2.bf16.msra.mxu1 %v10312_v39  ;;  %v10341_v39 = vld [vmem:[%s15530_s7 + $0x38] sm:$0xff]  }
0x127c   :  { %4885 = vmatprep.subr.bf16.mxu1 %v10313_v36  ;;  %v10342_v36 = vld [vmem:[%s15530_s7 + $0x70] sm:$0xff]  }
0x127d   :  { %4829 = vmatpush1.bf16.msra.mxu0 %v10314_v3  ;;  %v10343_v3 = vld [vmem:[%s15530_s7 + $0x30] sm:$0xff]  }
0x127e   :  { %4830 = vmatprep.subr.bf16.mxu0 %v10315_v11  ;;  %v10344_v11 = vld [vmem:[%s15530_s7 + $0x68] sm:$0xff]  }
0x127f   :  { %4886 = vmatpush2.bf16.msra.mxu1 %v10316_v6  ;;  %v10345_v6 = vld [vmem:[%s15530_s7 + $0x28] sm:$0xff]  }
0x1280   :  { %4887 = vmatprep.subr.bf16.mxu1 %v10317_v12  ;;  %v10346_v12 = vld [vmem:[%s15530_s7 + $0x60] sm:$0xff]  }
0x1281   :  { %4831 = vmatpush1.bf16.msra.mxu0 %v10318_v55  ;;  %v10347_v55 = vld [vmem:[%s15530_s7 + $0x20] sm:$0xff]  }
0x1282   :  { %4832 = vmatprep.subr.bf16.mxu0 %v10319_v16  ;;  %v10348_v16 = vld [vmem:[%s15530_s7 + $0x58] sm:$0xff]  }
0x1283   :  { %4888 = vmatpush2.bf16.msra.mxu1 %v10320_v53  ;;  %v10349_v53 = vld [vmem:[%s15530_s7 + $0x18] sm:$0xff]  }
0x1284   :  { %4889 = vmatprep.subr.bf16.mxu1 %v10321_v5  ;;  %v10350_v5 = vld [vmem:[%s15530_s7 + $0x50] sm:$0xff]  }
0x1285   :  { %4833 = vmatpush1.bf16.msra.mxu0 %v10322_v46  ;;  %v10351_v46 = vld [vmem:[%s15530_s7 + $0x10] sm:$0xff]  }
0x1286   :  { %4834 = vmatprep.subr.bf16.mxu0 %v10323_v44  ;;  %v10353_v44 = vld [vmem:[%s15530_s7 + $0x8] sm:$0xff]  }
0x1287   :  { %4890 = vmatpush2.bf16.msra.mxu1 %v10324_v47  ;;  %v10354_v47 = vld [vmem:[%s15530_s7 + $0x40] sm:$0xff]  }
0x1288   :  { %9016 = vmatprep.subr.bf16.mxu1 %v10837_v14 }
0x1289   :  { %4835 = vmatpush2.bf16.msra.mxu0 %v10325_v19 }
0x128a   :  { %4836 = vmatprep.subr.bf16.mxu0 %v10326_v17  ;;  %4892 = vmatmul.mubr.bf16.vlgmr.msra.gmra.mxu1 %v4817_v8 }
0x128b   :  { %9017 = vmatpush3.bf16.msra.mxu1 %v11343_v18  ;;  %9018 = vmatprep.mubr.msk.bf16.mxu1 %vm10838_vm9, %v10837_v14 }
0x128c   :  { %9022 = vmatprep.subr.bf16.mxu1 %v10837_v14 }
0x128d   :  { %4837 = vmatpush2.bf16.msra.mxu0 %v10327_v29 }
0x128e   :  { %4838 = vmatprep.subr.bf16.mxu0 %v10328_v41 }
0x1291   :  { %4839 = vmatpush2.bf16.msra.mxu0 %v10329_v51 }
0x1292   :  { %4840 = vmatprep.subr.bf16.mxu0 %v10330_v58 }
0x1295   :  { %4841 = vmatpush2.bf16.msra.mxu0 %v10331_v30 }
0x1296   :  { %4842 = vmatprep.subr.bf16.mxu0 %v10332_v48 }
0x1299   :  { %4843 = vmatpush2.bf16.msra.mxu0 %v10333_v54 }
0x129a   :  { %4844 = vmatprep.subr.bf16.mxu0 %v10334_v1 }
0x129d   :  { %4845 = vmatpush2.bf16.msra.mxu0 %v10335_v2 }
0x129e   :  { %4846 = vmatprep.subr.bf16.mxu0 %v10336_v4 }
0x12a1   :  { %4847 = vmatpush2.bf16.msra.mxu0 %v10337_v37 }
0x12a2   :  { %4848 = vmatprep.subr.bf16.mxu0 %v10338_v35 }
0x12a5   :  { %4849 = vmatpush2.bf16.msra.mxu0 %v10339_v59 }
0x12a6   :  { %8758 = vmatprep.subr.bf16.mxu0 %v10340_v56 }
0x12a8   :  { %4851 = vmatmul.mubr.bf16.vlgmr.msra.gmra.mxu0 %v4817_v8  ;;  %v10355_v8 = vld [vmem:[%s15530_s7] sm:$0xff]  }
0x12a9   :  { %8759 = vmatpush3.bf16.msra.mxu0 %v10341_v39 }
0x12aa   :  { %8760 = vmatprep.subr.bf16.mxu0 %v10342_v36 }
0x12ad   :  { %8761 = vmatpush3.bf16.msra.mxu0 %v10343_v3 }
0x12ae   :  { %8762 = vmatprep.subr.bf16.mxu0 %v10344_v11 }
0x12b1   :  { %8763 = vmatpush3.bf16.msra.mxu0 %v10345_v6 }
0x12b2   :  { %8764 = vmatprep.subr.bf16.mxu0 %v10346_v12 }
0x12b5   :  { %8765 = vmatpush3.bf16.msra.mxu0 %v10347_v55 }
0x12b6   :  { %8766 = vmatprep.subr.bf16.mxu0 %v10348_v16 }
0x12b9   :  { %8767 = vmatpush3.bf16.msra.mxu0 %v10349_v53 }
0x12ba   :  { %8768 = vmatprep.subr.bf16.mxu0 %v10350_v5 }
0x12bd   :  { %8769 = vmatpush3.bf16.msra.mxu0 %v10351_v46 }
0x12be   :  { %8770 = vmatprep.subr.bf16.mxu0 %v10352_v13 }
0x12c1   :  { %8771 = vmatpush3.bf16.msra.mxu0 %v10353_v44 }
0x12c2   :  { %8772 = vmatprep.subr.bf16.mxu0 %v10354_v47 }
0x12c5   :  { %8773 = vmatpush3.bf16.msra.mxu0 %v10355_v8 }
0x12c6   :  { %9040 = vmatprep.subr.bf16.mxu0 %v10837_v14 }
0x1308   :  { %v4659_v19 = vpop.f32.mrf.mxu0  ;;  %v4741_v17 = vpop.f32.mrf.mxu1 }
0x1309   :  { %v4660_v54 = vadd.f32 %v4659_v19, %v12010_v22  ;;  %v4742_v3 = vadd.f32 %v4741_v17, %v12019_v9 }
0x130a   :  { %v4661_v29 = vpop.f32.mrf.mxu0  ;;  %v4743_v41 = vpop.f32.mrf.mxu1 }
0x130b   :  { %v4701_v1 = vadd.f32 %v13303_v57, %v4660_v54  ;;  %v4744_v37 = vadd.f32 %v4743_v41, %v12015_v62  ;;  %v4662_v12 = vadd.f32 %v4661_v29, %v12023_v49 }
0x130c   :  { %v4663_v51 = vpop.f32.mrf.mxu0  ;;  %v4745_v58 = vpop.f32.mrf.mxu1 }
0x130d   :  { %v8592_v2 = vmul.f32 -1.442695, %v4701_v1  ;;  %v4703_v57 = vadd.f32 %v13311_v28, %v4662_v12 }
0x130e   :  { %v4664_v30 = vpop.f32.mrf.mxu0  ;;  %v4746_v48 = vpop.f32.mrf.mxu1 }
0x130f   :  { %9647 = vpow2.f32 %v8592_v2 }
0x131c   :  { %v9648_v6 = vpop.eup %9647 }
0x131d   :  { %v4792_v16 = vadd.f32 1.0, %v9648_v6 }
0x1328   :  { %v4782_v4 = vpop.f32.mrf.mxu0 }
0x1329   :  { %v4783_v11 = vadd.f32 %v4782_v4, %v4742_v3 }
0x132a   :  { %v4784_v35 = vpop.f32.mrf.mxu0 }
0x132b   :  { %v4785_v59 = vadd.f32 %v4784_v35, %v4744_v37  ;;  %v8593_v55 = vmul.f32 -1.442695, %v4783_v11 }
0x132c   :  { %v4786_v56 = vpop.f32.mrf.mxu0 }
0x132d   :  { %v8594_v39 = vmul.f32 -1.442695, %v4785_v59 }
0x132e   :  { %v4787_v36 = vpop.f32.mrf.mxu0 }
0x132f   :  { %9649 = vpow2.f32 %v8594_v39 }
0x1330   :  { %9651 = vpow2.f32 %v8593_v55 }
0x1331   :  { %9653 = vrcp.f32 %v4792_v16 }
0x1332   :  { %9655 = vtanh.f32 %v4703_v57 }
0x133c   :  { %v9650_v53 = vpop.eup %9649 }
0x133d   :  { %v4805_v5 = vadd.f32 1.0, %v9650_v53  ;;  %v9652_v46 = vpop.eup %9651 }
0x133e   :  { %v9654_v13 = vpop.eup %9653  ;;  %v4799_v19 = vadd.f32 1.0, %v9652_v46 }
0x133f   :  { %9657 = vrcp.f32 %v4805_v5  ;;  %v9656_v47 = vpop.eup %9655 }
0x1340   :  { %v4808_v41 = vmul.f32 %v9656_v47, %v9654_v13  ;;  %9659 = vrcp.f32 %v4799_v19 }
0x134a   :  { %v4893_v44 = vpop.f32.mrf.mxu1 }
0x134b   :  { %v4894_v3 = vadd.f32 %v4893_v44, %v11185_v42 }
0x134c   :  { %v9658_v8 = vpop.eup %9657  ;;  %v4895_v17 = vpop.f32.mrf.mxu1 }
0x134d   :  { %v4809_v29 = vmul.f32 %v9658_v8, %v12781_v52  ;;  %v9660_v48 = vpop.eup %9659  ;;  %v4896_v36 = vadd.f32 %v4895_v17, %v11182_v40 }
0x134e   :  { %v4897_v51 = vpop.f32.mrf.mxu1 }
0x134f   :  { %v13532_v58 = vadd.f32 %v4809_v29, %v4808_v41  ;;  %v8599_v11 = vmul.f32 -1.442695, %v4896_v36 }
0x1350   :  { %v4898_v28 = vpop.f32.mrf.mxu1 }
0x1351   :  { %9661 = vtanh.f32 %v13532_v58  ;;  %v4925_v30 = vpack.c.bf16 %v13532_v58, %v13532_v58 }
0x1353   :  { %4958 = vmatprep.mubr.bf16.mxu0 %v4925_v30 }
0x135e   :  { %v9662_v54 = vpop.eup %9661 }
0x135f   :  { %v13537_v1 = vmul.f32 %v9662_v54, %v9660_v48  ;;  %v10356_v48 = vld [vmem:[%s15534_s8] ss:$0 sm:$0xff] }
0x1361   :  { %8595 = vst [vmem:[%s15541_s13 + $0x10] sm:$0xff] %v13537_v1 }
0x1368   :  { %v4852_v52 = vpop.f32.mrf.mxu0 }
0x1369   :  { %v4853_v2 = vadd.f32 %v4852_v52, %v11168_v26 }
0x136a   :  { %v4854_v4 = vpop.f32.mrf.mxu0 }
0x136b   :  { %v8597_v37 = vmul.f32 -1.442695, %v4853_v2  ;;  %v4855_v35 = vadd.f32 %v4854_v4, %v11171_v27 }
0x136c   :  { %v4856_v59 = vpop.f32.mrf.mxu0 }
0x136d   :  { %9663 = vpow2.f32 %v8597_v37  ;;  %v8598_v56 = vmul.f32 -1.442695, %v4855_v35 }
0x136e   :  { %v4857_v39 = vpop.f32.mrf.mxu0 }
0x136f   :  { %9665 = vpow2.f32 %v8598_v56 }
0x1370   :  { %9667 = vtanh.f32 %v4894_v3 }
0x1371   :  { %9669 = vpow2.f32 %v8599_v11 }
0x137a   :  { %v9664_v6 = vpop.eup %9663 }
0x137b   :  { %v4903_v12 = vadd.f32 1.0, %v9664_v6 }
0x137c   :  { %v9666_v55 = vpop.eup %9665 }
0x137d   :  { %9671 = vrcp.f32 %v4903_v12  ;;  %v4909_v16 = vadd.f32 1.0, %v9666_v55  ;;  %v9668_v57 = vpop.eup %9667  ;;  %v10357_v12 = vld [vmem:[%s15535_s1] sm:$0xff] }
0x137e   :  { %v9670_v53 = vpop.eup %9669 }
0x137f   :  { %9673 = vrcp.f32 %v4909_v16  ;;  %v4916_v13 = vadd.f32 1.0, %v9670_v53 }
0x1381   :  { %9675 = vrcp.f32 %v4916_v13  ;;  %v10359_v13 = vld [vmem:[%s15535_s1 + $0x10] sm:$0xff] }
0x138a   :  { %v9672_v5 = vpop.eup %9671 }
0x138b   :  { %v4920_v8 = vmul.f32 %v9672_v5, %v9668_v57  ;;  %v10358_v5 = vld [vmem:[%s15535_s1 + $0x8] sm:$0xff] }
0x138c   :  { %v9674_v46 = vpop.eup %9673 }
0x138d   :  { %v4919_v47 = vmul.f32 %v9674_v46, %v12797_v33 }
0x138e   :  { %v9676_v44 = vpop.eup %9675 }
0x138f   :  { %v13548_v19 = vadd.f32 %v4920_v8, %v4919_v47 }
0x1391   :  { %9677 = vtanh.f32 %v13548_v19 }
0x139e   :  { %v9678_v17 = vpop.eup %9677 }
0x139f   :  { %v4923_v41 = vmul.f32 %v9678_v17, %v9676_v44  ;;  %v10360_v17 = vld [vmem:[%s15535_s1 + $0x20] sm:$0xff] }
0x13a1   :  { %v13551_v29 = vpack.c.bf16 %v4923_v41, %v4923_v41 }
0x13a3   :  { %4959 = vmatmul.mubr.bf16.vlgmr.msra.gmra.mxu0 %v13551_v29 }
0x13a4   :  { %9041 = vmatpush3.bf16.msra.mxu0 %v11370_v45  ;;  %9042 = vmatprep.mubr.msk.bf16.mxu0 %vm10838_vm9, %v10837_v14 }
0x13a5   :  { %9052 = vmatprep.subr.bf16.mxu0 %v10837_v14 }
0x1463   :  { %v8774_v33 = vpop.f32.mrf.mxu0 }
0x1465   :  { %v8775_v51 = vpop.f32.mrf.mxu0 }
0x1466   :  { %v8776_v28 = vadd.f32 %v8775_v51, %v8774_v33 }
0x1467   :  { %v8777_v30 = vpop.f32.mrf.mxu0 }
0x1468   :  { %v4961_v54 = vadd.f32 %v10356_v48, %v8776_v28  ;;  %v10361_v28 = vld [vmem:[%s15535_s1 + $0x18] sm:$0xff] }
0x1469   :  { %v8778_v52 = vpop.f32.mrf.mxu0 }
0x146a   :  { %v4967_v2 = vcombine.high %v4961_v54, %v4961_v54  ;;  %v4974_v4 = vrot.slane %v4961_v54, %v11204_v7  ;;  %v10362_v52 = vld [vmem:[%s15535_s1 + $0x28] sm:$0xff] }
0x146c   :  { %v4981_v37 = vrot.slane %v4967_v2, %v11204_v7  ;;  %v4982_v35 = vcombine.high %v4974_v4, %v4974_v4  ;;  %v4990_v59 = vrot.slane %v4974_v4, %v11204_v7 }
0x146e   :  { %v5004_v56 = vrot.slane %v4982_v35, %v11204_v7  ;;  %v5012_v39 = vcombine.high %v4990_v59, %v4990_v59  ;;  %v4997_v36 = vrot.slane %v4981_v37, %v11204_v7  ;;  %v5019_v3 = vrot.slane %v4990_v59, %v11159_v23 }
0x146f   :  { %v4983_v16 = vcombine.high %v4981_v37, %v4981_v37  ;;  %v10363_v37 = vld [vmem:[%s15536_s9] ss:$0 sm:$0xff] }
0x1470   :  { %v5023_v11 = vrot.slane %v5004_v56, %v11159_v23  ;;  %v5027_v6 = vrot.slane %v5012_v39, %v11159_v23  ;;  %v5056_v55 = vadd.f32 %v10357_v12, %v5019_v3  ;;  %v5014_v57 = vcombine.high %v5004_v56, %v5004_v56  ;;  %v10364_v39 = vld [vmem:[%s15535_s1 + $0x30] sm:$0xff]  ;;  %v10365_v12 = vld [vmem:[%s15535_s1 + $0x38] sm:$0xff] }
0x1471   :  { %v5035_v53 = vrot.slane %v4997_v36, %v11159_v23  ;;  %v5011_v8 = vrot.slane %v4983_v16, %v11204_v7  ;;  %v5013_v33 = vcombine.high %v4997_v36, %v4997_v36 }
0x1472   :  { %v5057_v46 = vadd.f32 %v10358_v5, %v5023_v11  ;;  %v5058_v47 = vadd.f32 %v10359_v13, %v5027_v6  ;;  %9679 = vtanh.f32 %v5056_v55  ;;  %v5031_v44 = vrot.slane %v5014_v57, %v11159_v23 }
0x1473   :  { %v5060_v41 = vadd.f32 %v10360_v17, %v5035_v53  ;;  %v5039_v51 = vrot.slane %v5011_v8, %v11159_v23  ;;  %v5015_v48 = vcombine.high %v5011_v8, %v5011_v8  ;;  %v5043_v54 = vrot.slane %v5013_v33, %v11159_v23 }
0x1474   :  { %9681 = vtanh.f32 %v5057_v46  ;;  %v5059_v30 = vadd.f32 %v10361_v28, %v5031_v44 }
0x1475   :  { %9683 = vtanh.f32 %v5058_v47  ;;  %v5061_v2 = vadd.f32 %v10362_v52, %v5039_v51  ;;  %v5047_v56 = vrot.slane %v5015_v48, %v11159_v23  ;;  %v5062_v36 = vadd.f32 %v10364_v39, %v5043_v54 }
0x1476   :  { %9685 = vtanh.f32 %v5060_v41 }
0x1477   :  { %9687 = vtanh.f32 %v5059_v30  ;;  %v5063_v55 = vadd.f32 %v10365_v12, %v5047_v56 }
0x1478   :  { %9689 = vtanh.f32 %v5061_v2 }
0x1479   :  { %9691 = vtanh.f32 %v5062_v36 }
0x147a   :  { %9693 = vtanh.f32 %v5063_v55 }
0x147f   :  { %v9680_v4 = vpop.eup %9679 }
0x1480   :  { %v5072_v35 = vmul.f32 %v10363_v37, %v9680_v4 }
0x1481   :  { %v9682_v59 = vpop.eup %9681 }
0x1482   :  { %5080 = vadd.xlane.f32.xlu0 %v5072_v35  ;;  %v5073_v3 = vmul.f32 %v10363_v37, %v9682_v59  ;;  %v9684_v11 = vpop.eup %9683 }
0x1483   :  { %v5074_v6 = vmul.f32 %v10363_v37, %v9684_v11  ;;  %v9686_v16 = vpop.eup %9685 }
0x1484   :  { %5082 = vadd.xlane.f32.xlu1 %v5073_v3  ;;  %v5076_v57 = vmul.f32 %v10363_v37, %v9686_v16  ;;  %v9688_v53 = vpop.eup %9687 }
0x1485   :  { %v5075_v5 = vmul.f32 %v10363_v37, %v9688_v53  ;;  %v9690_v46 = vpop.eup %9689 }
0x1486   :  { %v5077_v13 = vmul.f32 %v10363_v37, %v9690_v46  ;;  %v9692_v47 = vpop.eup %9691 }
0x1487   :  { %v5078_v8 = vmul.f32 %v10363_v37, %v9692_v47  ;;  %v9694_v44 = vpop.eup %9693 }
0x1488   :  { %5084 = vadd.xlane.f32.xlu1 %v5074_v6  ;;  %v5079_v17 = vmul.f32 %v10363_v37, %v9694_v44 }
0x148c   :  { %5088 = vadd.xlane.f32.xlu1 %v5076_v57 }
0x1490   :  { %5086 = vadd.xlane.f32.xlu1 %v5075_v5 }
0x1494   :  { %5090 = vadd.xlane.f32.xlu1 %v5077_v13 }
0x1498   :  { %5092 = vadd.xlane.f32.xlu1 %v5078_v8 }
0x149c   :  { %5094 = vadd.xlane.f32.xlu1 %v5079_v17 }
0x150b   :  { %v5081_v28 = vpop.xlane.xlu0 %5080 }
0x150c   :  { %v5096_v52 = vadd.f32 %v5081_v28, %v11251_v32 }
0x150d   :  { %v5083_v41 = vpop.xlane.xlu1 %5082 }
0x150e   :  { %v5097_v48 = vadd.f32 %v5083_v41, %v11251_v32  ;;  %v5115_v37 = vrot.slane %v5096_v52, %v11249_v31 }
0x1510   :  { %v5119_v35 = vrot.slane %v5097_v48, %v11249_v31 }
0x1511   :  { %v5085_v33 = vpop.xlane.xlu1 %5084 }
0x1512   :  { %v5098_v54 = vadd.f32 %v5085_v33, %v11251_v32  ;;  %v5144_v11 = vsel %vm1080_vm0, %v5119_v35, %v5115_v37 }
0x1514   :  { %v5123_v59 = vrot.slane %v5098_v54, %v11249_v31 }
0x1515   :  { %v5089_v51 = vpop.xlane.xlu1 %5088 }
0x1516   :  { %v5100_v36 = vadd.f32 %v5089_v51, %v11251_v32  ;;  %v5145_v12 = vsel %vm1082_vm1, %v5123_v59, %v5144_v11 }
0x1518   :  { %v5131_v57 = vrot.slane %v5100_v36, %v11249_v31 }
0x1519   :  { %v5087_v30 = vpop.xlane.xlu1 %5086 }
0x151a   :  { %v5099_v2 = vadd.f32 %v5087_v30, %v11251_v32 }
0x151c   :  { %v5127_v56 = vrot.slane %v5099_v2, %v11249_v31 }
0x151d   :  { %v5091_v4 = vpop.xlane.xlu1 %5090 }
0x151e   :  { %v5101_v39 = vadd.f32 %v5091_v4, %v11251_v32  ;;  %v5146_v55 = vsel %vm1084_vm2, %v5127_v56, %v5145_v12 }
0x151f   :  { %v5147_v13 = vsel %vm1086_vm3, %v5131_v57, %v5146_v55 }
0x1520   :  { %v5135_v16 = vrot.slane %v5101_v39, %v11249_v31 }
0x1521   :  { %v5093_v3 = vpop.xlane.xlu1 %5092 }
0x1522   :  { %v5102_v6 = vadd.f32 %v5093_v3, %v11251_v32  ;;  %v5148_v8 = vsel %vm1088_vm4, %v5135_v16, %v5147_v13 }
0x1524   :  { %v5139_v53 = vrot.slane %v5102_v6, %v11249_v31 }
0x1525   :  { %v5095_v5 = vpop.xlane.xlu1 %5094 }
0x1526   :  { %v5103_v46 = vadd.f32 %v5095_v5, %v11251_v32  ;;  %v5149_v44 = vsel %vm1090_vm5, %v5139_v53, %v5148_v8 }
0x1528   :  { %v5143_v47 = vrot.slane %v5103_v46, %v11249_v31 }
0x152a   :  { %v5150_v17 = vsel %vm1092_vm6, %v5143_v47, %v5149_v44 }
0x152b   :  { %v5152_v41 = vsel %vm1095_vm7, %v5150_v17, -inf }
0x152c   :  { %5153 = vmax.xlane.f32.xlu1 %v5152_v41 }
0x15b5   :  { %v5154_v33 = vpop.xlane.xlu1 %5153 }
0x15b6   :  { %v5159_v51 = vrot.slane %v5154_v33, %v11159_v23  ;;  %v5163_v28 = vrot.slane %v5154_v33, %v11165_v25  ;;  %v5167_v30 = vrot.slane %v5154_v33, %v11179_v38  ;;  %v5171_v4 = vrot.slane %v5154_v33, %v11176_v34 }
0x15b7   :  { %v5179_v35 = vrot.slane %v5154_v33, %v11289_v15  ;;  %v5175_v3 = vrot.slane %v5154_v33, %v11285_v10  ;;  %v5187_v16 = vrot.slane %v5154_v33, %v11278_v0  ;;  %v5183_v5 = vrot.slane %v5154_v33, %v11293_v20 }
0x15b8   :  { %v5196_v59 = vsub.f32 %v5096_v52, %v5159_v51  ;;  %v5197_v37 = vsub.f32 %v5097_v48, %v5163_v28  ;;  %v5199_v56 = vsub.f32 %v5099_v2, %v5171_v4  ;;  %v5198_v11 = vsub.f32 %v5098_v54, %v5167_v30 }
0x15b9   :  { %v5201_v57 = vsub.f32 %v5101_v39, %v5179_v35  ;;  %v5200_v13 = vsub.f32 %v5100_v36, %v5175_v3  ;;  %v5203_v8 = vsub.f32 %v5103_v46, %v5187_v16  ;;  %v5202_v48 = vsub.f32 %v5102_v6, %v5183_v5 }
0x15ba   :  { %v5204_v12 = vmul.f32 1.442695, %v5196_v59  ;;  %v5206_v55 = vmul.f32 1.442695, %v5197_v37  ;;  %v5210_v53 = vmul.f32 1.442695, %v5199_v56 }
0x15bb   :  { %v5208_v47 = vmul.f32 1.442695, %v5198_v11  ;;  %v5214_v52 = vmul.f32 1.442695, %v5201_v57  ;;  %v5212_v2 = vmul.f32 1.442695, %v5200_v13 }
0x15bc   :  { %9695 = vpow2.f32 %v5204_v12  ;;  %v5218_v54 = vmul.f32 1.442695, %v5203_v8  ;;  %v5216_v44 = vmul.f32 1.442695, %v5202_v48 }
0x15bd   :  { %9697 = vpow2.f32 %v5206_v55 }
0x15be   :  { %9699 = vpow2.f32 %v5210_v53 }
0x15bf   :  { %9701 = vpow2.f32 %v5208_v47 }
0x15c0   :  { %9703 = vpow2.f32 %v5214_v52 }
0x15c1   :  { %9705 = vpow2.f32 %v5212_v2 }
0x15c2   :  { %9707 = vpow2.f32 %v5218_v54 }
0x15c3   :  { %9709 = vpow2.f32 %v5216_v44 }
0x15c9   :  { %v9696_v17 = vpop.eup %9695 }
0x15ca   :  { %v9698_v39 = vpop.eup %9697  ;;  %5229 = vperm.xlu0 %9165, %v9696_v17  }
0x15cb   :  { %5232 = vperm.xlu1 %9166, %v9698_v39   ;;  %v13634_v41 = vpop.eup %9699 }
0x15cc   :  { %v9702_v36 = vpop.eup %9701 }
0x15cd   :  { %v13637_v46 = vpop.eup %9703 }
0x15ce   :  { %5238 = vperm.xlu0 %9165, %v13634_v41   ;;  %v13639_v6 = vpop.eup %9705 }
0x15cf   :  { %5235 = vperm.xlu1 %9166, %v9702_v36   ;;  %v13643_v33 = vpop.eup %9707 }
0x15d0   :  { %v13645_v51 = vpop.eup %9709 }
0x15d2   :  { %5244 = vperm.xlu0 %9165, %v13637_v46  }
0x15d3   :  { %5241 = vperm.xlu1 %9166, %v13639_v6  }
0x15d6   :  { %5250 = vperm.xlu0 %9165, %v13643_v33  }
0x15d7   :  { %5247 = vperm.xlu1 %9166, %v13645_v51  }
0x1645   :  { %v5230_v28 = vpop.permute.xlu0 %5229 }
0x1646   :  { %v5233_v30 = vpop.permute.xlu1 %5232  ;;  %v5255_v35 = vrot.slane %v5230_v28, %v11249_v31 }
0x1647   :  { %v5259_v4 = vrot.slane %v5233_v30, %v11249_v31 }
0x1649   :  { %v5239_v59 = vpop.permute.xlu0 %5238  ;;  %v5284_v3 = vsel %vm1080_vm0, %v5259_v4, %v5255_v35 }
0x164a   :  { %v5236_v37 = vpop.permute.xlu1 %5235  ;;  %v5267_v11 = vrot.slane %v5239_v59, %v11249_v31 }
0x164b   :  { %v5263_v56 = vrot.slane %v5236_v37, %v11249_v31 }
0x164d   :  { %v5285_v12 = vsel %vm1082_vm1, %v5263_v56, %v5284_v3  ;;  %v5245_v55 = vpop.permute.xlu0 %5244 }
0x164e   :  { %v5242_v16 = vpop.permute.xlu1 %5241  ;;  %v5286_v53 = vsel %vm1084_vm2, %v5267_v11, %v5285_v12  ;;  %v5275_v5 = vrot.slane %v5245_v55, %v11249_v31 }
0x164f   :  { %v5271_v57 = vrot.slane %v5242_v16, %v11249_v31 }
0x1651   :  { %v5287_v13 = vsel %vm1086_vm3, %v5271_v57, %v5286_v53  ;;  %v5251_v47 = vpop.permute.xlu0 %5250 }
0x1652   :  { %v5248_v8 = vpop.permute.xlu1 %5247  ;;  %v5283_v52 = vrot.slane %v5251_v47, %v11249_v31  ;;  %v5288_v2 = vsel %vm1088_vm4, %v5275_v5, %v5287_v13 }
0x1653   :  { %v5279_v48 = vrot.slane %v5248_v8, %v11249_v31 }
0x1655   :  { %v5289_v54 = vsel %vm1090_vm5, %v5279_v48, %v5288_v2 }
0x1656   :  { %v5290_v44 = vsel %vm1092_vm6, %v5283_v52, %v5289_v54 }
0x1657   :  { %v5292_v28 = vsel %vm1095_vm7, %v5290_v44, 0.0 }
0x1658   :  { %5293 = vadd.xlane.f32.xlu1 %v5292_v28 }
0x16e1   :  { %v5294_v30 = vpop.xlane.xlu1 %5293 }
0x16e2   :  { %v5299_v4 = vrot.slane %v5294_v30, %v11159_v23  ;;  %v5303_v35 = vrot.slane %v5294_v30, %v11165_v25  ;;  %v5307_v59 = vrot.slane %v5294_v30, %v11179_v38  ;;  %v5311_v37 = vrot.slane %v5294_v30, %v11176_v34 }
0x16e3   :  { %v5315_v56 = vrot.slane %v5294_v30, %v11285_v10  ;;  %v5319_v3 = vrot.slane %v5294_v30, %v11289_v15  ;;  %v5323_v55 = vrot.slane %v5294_v30, %v11293_v20  ;;  %v5327_v13 = vrot.slane %v5294_v30, %v11278_v0 }
0x16e4   :  { %9711 = vrcp.f32 %v5299_v4 }
0x16e5   :  { %9713 = vrcp.f32 %v5303_v35 }
0x16e6   :  { %9715 = vrcp.f32 %v5307_v59 }
0x16e7   :  { %9717 = vrcp.f32 %v5311_v37 }
0x16e8   :  { %9719 = vrcp.f32 %v5315_v56 }
0x16e9   :  { %9721 = vrcp.f32 %v5319_v3 }
0x16ea   :  { %9723 = vrcp.f32 %v5323_v55 }
0x16eb   :  { %9725 = vrcp.f32 %v5327_v13 }
0x16f1   :  { %v9712_v11 = vpop.eup %9711 }
0x16f2   :  { %v9714_v12 = vpop.eup %9713  ;;  %v5337_v16 = vmul.f32 %v9712_v11, %v9696_v17 }
0x16f3   :  { %v9716_v57 = vpop.eup %9715  ;;  %v5339_v53 = vmul.f32 %v9714_v12, %v9698_v39 }
0x16f4   :  { %v5352_v5 = vpack.c.bf16 %v5337_v16, %v5337_v16  ;;  %v5341_v52 = vmul.f32 %v9716_v57, %v9702_v36  ;;  %v9718_v48 = vpop.eup %9717 }
0x16f5   :  { %v5353_v8 = vpack.c.bf16 %v5339_v53, %v5339_v53  ;;  %v5343_v44 = vmul.f32 %v9718_v48, %v13634_v41  ;;  %v9720_v28 = vpop.eup %9719 }
0x16f6   :  { %v5361_v47 = vunpack.c.l.b16 %v5352_v5  ;;  %v5354_v54 = vpack.c.bf16 %v5341_v52, %v5341_v52  ;;  %v5345_v39 = vmul.f32 %v9720_v28, %v13639_v6  ;;  %v9722_v35 = vpop.eup %9721 }
0x16f7   :  { %v5414_v2 = vunpack.c.l.b16 %v5353_v8  ;;  %v5355_v17 = vpack.c.bf16 %v5343_v44, %v5343_v44  ;;  %v5347_v37 = vmul.f32 %v9722_v35, %v13637_v46  ;;  %v9724_v36 = vpop.eup %9723  ;;  %v10366_v35 = vld [vmem:[%s15538_s11 + $0xe4] ss:$16 sps:$4 sm:$0xff]  }
0x16f8   :  { %5363 = vperm.xlu0 %9165, %v5361_v47   ;;  %v5467_v4 = vunpack.c.l.b16 %v5354_v54  ;;  %v5356_v59 = vpack.c.bf16 %v5345_v39, %v5345_v39  ;;  %v5349_v11 = vmul.f32 %v9724_v36, %v13645_v51  ;;  %v9726_v12 = vpop.eup %9725  ;;  %v13708_v36 = vpack.c.bf16 %v13537_v1, %v13537_v1  ;;  %v10367_v1 = vld [vmem:[%s15538_s11 + $0xe0] ss:$16 sps:$4 sm:$0xff]  }
0x16f9   :  { %v5520_v30 = vunpack.c.l.b16 %v5355_v17  ;;  %v5357_v3 = vpack.c.bf16 %v5347_v37, %v5347_v37  ;;  %v5351_v16 = vmul.f32 %v9726_v12, %v13643_v33 }
0x16fa   :  { %v5573_v56 = vunpack.c.l.b16 %v5356_v59  ;;  %v5358_v55 = vpack.c.bf16 %v5349_v11, %v5349_v11 }
0x16fb   :  { %v5626_v41 = vunpack.c.l.b16 %v5357_v3  ;;  %v5359_v57 = vpack.c.bf16 %v5351_v16, %v5351_v16  ;;  %v10368_v3 = vld [vmem:[%s15538_s11 + $0xc4] ss:$16 sps:$4 sm:$0xff]  }
0x16fc   :  { %5416 = vperm.xlu0 %9165, %v5414_v2   ;;  %v5679_v6 = vunpack.c.l.b16 %v5358_v55  ;;  %v10370_v55 = vld [vmem:[%s15538_s11 + $0xa4] ss:$16 sps:$4 sm:$0xff]  }
0x16fd   :  { %v5732_v53 = vunpack.c.l.b16 %v5359_v57  ;;  %v10372_v57 = vld [vmem:[%s15538_s11 + $0xa0] ss:$16 sps:$4 sm:$0xff]  }
0x1700   :  { %5469 = vperm.xlu0 %9165, %v5467_v4  }
0x1704   :  { %5522 = vperm.xlu0 %9165, %v5520_v30  }
0x1708   :  { %5575 = vperm.xlu0 %9165, %v5573_v56  }
0x170c   :  { %5628 = vperm.xlu0 %9165, %v5626_v41   ;;  %v10369_v41 = vld [vmem:[%s15538_s11 + $0xc0] ss:$16 sps:$4 sm:$0xff]  }
0x1710   :  { %5681 = vperm.xlu0 %9165, %v5679_v6   ;;  %v10371_v6 = vld [vmem:[%s15538_s11 + $0x2e4] ss:$16 sps:$4 sm:$0xff]  }
0x1714   :  { %5734 = vperm.xlu0 %9165, %v5732_v53   ;;  %v10373_v53 = vld [vmem:[%s15538_s11 + $0x84] ss:$16 sps:$4 sm:$0xff]  }
0x1773   :  { %v5364_v5 = vpop.permute.xlu0 %5363 }
0x1774   :  { %v5368_v46 = vrot.slane %v5364_v5, %v11249_v31 }
0x1776   :  { %v5369_v13 = vpack.c.b16 %v5368_v46, %v5368_v46  ;;  %v10374_v46 = vld [vmem:[%s15538_s11 + $0x80] ss:$16 sps:$4 sm:$0xff]  }
0x1777   :  { %v5417_v47 = vpop.permute.xlu0 %5416 }
0x1778   :  { %9019 = vmatmul.mubr.msk.bf16.vlgmr.msra.gmra.mxu1 %vm1095_vm7, %v5369_v13  ;;  %v5421_v33 = vrot.slane %v5417_v47, %v11249_v31  ;;  %v10375_v13 = vld [vmem:[%s15538_s11 + $0x64] ss:$16 sps:$4 sm:$0xff]   ;;  %v10376_v47 = vld [vmem:[%s15538_s11 + $0x2e0] ss:$16 sps:$4 sm:$0xff]  }
0x1779   :  { %9023 = vmatpush3.bf16.msra.mxu1 %v11380_v43  ;;  %9024 = vmatprep.mubr.msk.bf16.mxu1 %vm10838_vm9, %v10837_v14 }
0x177a   :  { %9028 = vmatprep.subr.bf16.mxu1 %v10837_v14  ;;  %v5422_v8 = vpack.c.b16 %v5421_v33, %v5421_v33  ;;  %v10377_v33 = vld [vmem:[%s15538_s11 + $0x2c4] ss:$16 sps:$4 sm:$0xff]  }
0x177b   :  { %v5470_v51 = vpop.permute.xlu0 %5469 }
0x177c   :  { %v5474_v48 = vrot.slane %v5470_v51, %v11249_v31  ;;  %v10378_v51 = vld [vmem:[%s15538_s11 + $0x60] ss:$16 sps:$4 sm:$0xff]  }
0x177e   :  { %v5475_v44 = vpack.c.b16 %v5474_v48, %v5474_v48  ;;  %v10381_v48 = vld [vmem:[%s15538_s11 + $0x2a4] ss:$16 sps:$4 sm:$0xff]  }
0x177f   :  { %v5523_v52 = vpop.permute.xlu0 %5522 }
0x1780   :  { %9025 = vmatmul.mubr.msk.bf16.vlgmr.msra.gmra.mxu1 %vm1095_vm7, %v5422_v8  ;;  %v5527_v17 = vrot.slane %v5523_v52, %v11249_v31  ;;  %v10379_v8 = vld [vmem:[%s15538_s11 + $0x44] ss:$16 sps:$4 sm:$0xff]   ;;  %v10380_v52 = vld [vmem:[%s15538_s11 + $0x2c0] ss:$16 sps:$4 sm:$0xff]  }
0x1781   :  { %9029 = vmatpush3.bf16.msra.mxu1 %v11392_v50  ;;  %9030 = vmatprep.mubr.msk.bf16.mxu1 %vm10838_vm9, %v10837_v14 }
0x1782   :  { %9034 = vmatprep.subr.bf16.mxu1 %v10837_v14  ;;  %v5528_v59 = vpack.c.b16 %v5527_v17, %v5527_v17  ;;  %v10387_v17 = vld [vmem:[%s15538_s11 + $0x4] ss:$16 sps:$4 sm:$0xff]  }
0x1783   :  { %v5576_v2 = vpop.permute.xlu0 %5575 }
0x1784   :  { %v5580_v54 = vrot.slane %v5576_v2, %v11249_v31  ;;  %v10382_v2 = vld [vmem:[%s15538_s11 + $0x40] ss:$16 sps:$4 sm:$0xff]  }
0x1786   :  { %v5581_v28 = vpack.c.b16 %v5580_v54, %v5580_v54  ;;  %v10383_v54 = vld [vmem:[%s15538_s11 + $0x24] ss:$16 sps:$4 sm:$0xff]  }
0x1787   :  { %v5629_v4 = vpop.permute.xlu0 %5628 }
0x1788   :  { %9031 = vmatmul.mubr.msk.bf16.vlgmr.msra.gmra.mxu1 %vm1095_vm7, %v5475_v44  ;;  %9043 = vmatmul.mubr.msk.bf16.vlgmr.msra.gmra.mxu0 %vm1095_vm7, %v5581_v28  ;;  %v5633_v56 = vrot.slane %v5629_v4, %v11249_v31  ;;  %v10384_v44 = vld [vmem:[%s15538_s11 + $0x2a0] ss:$16 sps:$4 sm:$0xff]   ;;  %v10385_v28 = vld [vmem:[%s15538_s11 + $0x284] ss:$16 sps:$4 sm:$0xff]  }
0x1789   :  { %9035 = vmatpush3.bf16.msra.mxu1 %v11408_v60  ;;  %9053 = vmatpush3.bf16.msra.mxu0 %v11411_v61  ;;  %v10386_v4 = vld [vmem:[%s15538_s11 + $0x20] ss:$16 sps:$4 sm:$0xff]  }
0x178a   :  { %9036 = vmatprep.mubr.msk.bf16.mxu1 %vm10838_vm9, %v10837_v14  ;;  %9046 = vmatprep.subr.bf16.mxu1 %v10837_v14  ;;  %v5634_v11 = vpack.c.b16 %v5633_v56, %v5633_v56  ;;  %v10393_v56 = vld [vmem:[%s15538_s11 + $0x244] ss:$16 sps:$4 sm:$0xff]  }
0x178b   :  { %v5682_v39 = vpop.permute.xlu0 %5681  ;;  %9054 = vmatprep.mubr.msk.bf16.mxu0 %vm10838_vm9, %v10837_v14  ;;  %5809 = vmatprep.subr.bf16.mxu0 %v10366_v35  ;;  %v10389_v35 = vld [vmem:[%s15538_s11 + $0x264] ss:$16 sps:$4 sm:$0xff]  }
0x178c   :  { %v5686_v30 = vrot.slane %v5682_v39, %v11249_v31  ;;  %v10388_v39 = vld [vmem:[%s15538_s11 + $0x280] ss:$16 sps:$4 sm:$0xff]  }
0x178e   :  { %v5687_v37 = vpack.c.b16 %v5686_v30, %v5686_v30  ;;  %v10390_v30 = vld [vmem:[%s15538_s11] ss:$16 sps:$4 sm:$0xff]  }
0x178f   :  { %v5735_v12 = vpop.permute.xlu0 %5734 }
0x1790   :  { %9037 = vmatmul.mubr.msk.bf16.vlgmr.msra.gmra.mxu1 %vm1095_vm7, %v5528_v59  ;;  %9055 = vmatmul.mubr.msk.bf16.vlgmr.msra.gmra.mxu0 %vm1095_vm7, %v5687_v37  ;;  %v5739_v16 = vrot.slane %v5735_v12, %v11249_v31  ;;  %v10391_v59 = vld [vmem:[%s15538_s11 + $0x1e4] ss:$16 sps:$4 sm:$0xff]   ;;  %v10392_v37 = vld [vmem:[%s15538_s11 + $0x260] ss:$16 sps:$4 sm:$0xff]  }
0x1791   :  { %9047 = vmatpush3.bf16.msra.mxu1 %v11431_v21  ;;  %5841 = vmatprep.mubr.bf16.mxu0 %v13708_v36  ;;  %v10397_v12 = vld [vmem:[%s15538_s11 + $0x224] ss:$16 sps:$4 sm:$0xff]  }
0x1792   :  { %9048 = vmatprep.mubr.msk.bf16.mxu1 %vm10838_vm9, %v10837_v14  ;;  %9058 = vmatprep.subr.bf16.mxu1 %v10837_v14  ;;  %v5740_v5 = vpack.c.b16 %v5739_v16, %v5739_v16  ;;  %v10400_v16 = vld [vmem:[%s15538_s11 + $0x220] ss:$16 sps:$4 sm:$0xff]  }
0x1793   :  { %5810 = vmatpush1.bf16.msra.mxu0 %v10367_v1  ;;  %v10394_v1 = vld [vmem:[%s15538_s11 + $0x1e0] ss:$16 sps:$4 sm:$0xff]  }
0x1794   :  { %5811 = vmatprep.subr.bf16.mxu0 %v10368_v3  ;;  %v10395_v3 = vld [vmem:[%s15538_s11 + $0x1c4] ss:$16 sps:$4 sm:$0xff]  }
0x1797   :  { %5812 = vmatpush1.bf16.msra.mxu0 %v10369_v41  ;;  %v10398_v41 = vld [vmem:[%s15538_s11 + $0x1c0] ss:$16 sps:$4 sm:$0xff]  }
0x1798   :  { %9049 = vmatmul.mubr.msk.bf16.vlgmr.msra.gmra.mxu1 %vm1095_vm7, %v5634_v11  ;;  %5813 = vmatprep.subr.bf16.mxu0 %v10370_v55  ;;  %v10396_v11 = vld [vmem:[%s15538_s11 + $0x240] ss:$16 sps:$4 sm:$0xff]   ;;  %v10399_v55 = vld [vmem:[%s15538_s11 + $0x1a4] ss:$16 sps:$4 sm:$0xff]  }
0x1799   :  { %9059 = vmatpush3.bf16.msra.mxu1 %v11456_v24  ;;  %9060 = vmatprep.mubr.msk.bf16.mxu1 %vm10838_vm9, %v10837_v14 }
0x179a   :  { %5850 = vmatprep.subr.bf16.mxu1 %v10371_v6  ;;  %v10401_v6 = vld [vmem:[%s15538_s11 + $0x204] ss:$16 sps:$4 sm:$0xff]  }
0x179b   :  { %5814 = vmatpush1.bf16.msra.mxu0 %v10372_v57  ;;  %v10402_v57 = vld [vmem:[%s15538_s11 + $0x1a0] ss:$16 sps:$4 sm:$0xff]  }
0x179c   :  { %5815 = vmatprep.subr.bf16.mxu0 %v10373_v53  ;;  %v10403_v53 = vld [vmem:[%s15538_s11 + $0x184] ss:$16 sps:$4 sm:$0xff]  }
0x179f   :  { %5816 = vmatpush1.bf16.msra.mxu0 %v10374_v46  ;;  %v10405_v46 = vld [vmem:[%s15538_s11 + $0xec] ss:$16 sps:$4 sm:$0xff]  }
0x17a0   :  { %9061 = vmatmul.mubr.msk.bf16.vlgmr.msra.gmra.mxu1 %vm1095_vm7, %v5740_v5  ;;  %5817 = vmatprep.subr.bf16.mxu0 %v10375_v13  ;;  %v10404_v5 = vld [vmem:[%s15538_s11 + $0x200] ss:$16 sps:$4 sm:$0xff]  }
0x17a1   :  { %5851 = vmatpush1.bf16.msra.mxu1 %v10376_v47  ;;  %5882 = vmatprep.mubr.bf16.mxu1 %v10835_v63  ;;  %v10406_v13 = vld [vmem:[%s15538_s11 + $0x180] ss:$16 sps:$4 sm:$0xff]   ;;  %v10407_v47 = vld [vmem:[%s15538_s11 + $0x164] ss:$16 sps:$4 sm:$0xff]  }
0x17a2   :  { %5852 = vmatprep.subr.bf16.mxu1 %v10377_v33  ;;  %v10408_v33 = vld [vmem:[%s15538_s11 + $0xe8] ss:$16 sps:$4 sm:$0xff]  }
0x17a3   :  { %5818 = vmatpush1.bf16.msra.mxu0 %v10378_v51  ;;  %v10409_v51 = vld [vmem:[%s15538_s11 + $0xcc] ss:$16 sps:$4 sm:$0xff]  }
0x17a4   :  { %5819 = vmatprep.subr.bf16.mxu0 %v10379_v8  ;;  %v10410_v8 = vld [vmem:[%s15538_s11 + $0x160] ss:$16 sps:$4 sm:$0xff]  }
0x17a5   :  { %5853 = vmatpush1.bf16.msra.mxu1 %v10380_v52  ;;  %v10411_v52 = vld [vmem:[%s15538_s11 + $0x144] ss:$16 sps:$4 sm:$0xff]  }
0x17a6   :  { %5854 = vmatprep.subr.bf16.mxu1 %v10381_v48  ;;  %v10413_v48 = vld [vmem:[%s15538_s11 + $0xac] ss:$16 sps:$4 sm:$0xff]  }
0x17a7   :  { %5820 = vmatpush1.bf16.msra.mxu0 %v10382_v2  ;;  %v10414_v2 = vld [vmem:[%s15538_s11 + $0x140] ss:$16 sps:$4 sm:$0xff]  }
0x17a8   :  { %5821 = vmatprep.subr.bf16.mxu0 %v10383_v54  ;;  %v10415_v54 = vld [vmem:[%s15538_s11 + $0x124] ss:$16 sps:$4 sm:$0xff]  }
0x17a9   :  { %5855 = vmatpush1.bf16.msra.mxu1 %v10384_v44  ;;  %v10416_v44 = vld [vmem:[%s15538_s11 + $0xa8] ss:$16 sps:$4 sm:$0xff]  }
0x17aa   :  { %5856 = vmatprep.subr.bf16.mxu1 %v10385_v28  ;;  %v10417_v28 = vld [vmem:[%s15538_s11 + $0x8c] ss:$16 sps:$4 sm:$0xff]  }
0x17ab   :  { %5822 = vmatpush1.bf16.msra.mxu0 %v10386_v4  ;;  %v10418_v4 = vld [vmem:[%s15538_s11 + $0x120] ss:$16 sps:$4 sm:$0xff]  }
0x17ac   :  { %5823 = vmatprep.subr.bf16.mxu0 %v10387_v17  ;;  %v10419_v17 = vld [vmem:[%s15538_s11 + $0x104] ss:$16 sps:$4 sm:$0xff]  }
0x17ad   :  { %5857 = vmatpush1.bf16.msra.mxu1 %v10388_v39  ;;  %v10420_v39 = vld [vmem:[%s15538_s11 + $0x88] ss:$16 sps:$4 sm:$0xff]  }
0x17ae   :  { %5858 = vmatprep.subr.bf16.mxu1 %v10389_v35  ;;  %v10421_v35 = vld [vmem:[%s15538_s11 + $0x6c] ss:$16 sps:$4 sm:$0xff]  }
0x17af   :  { %5824 = vmatpush1.bf16.msra.mxu0 %v10390_v30  ;;  %v10422_v30 = vld [vmem:[%s15538_s11 + $0x100] ss:$16 sps:$4 sm:$0xff]  }
0x17b0   :  { %5825 = vmatprep.subr.bf16.mxu0 %v10391_v59  ;;  %v10423_v59 = vld [vmem:[%s15538_s11 + $0x2ec] ss:$16 sps:$4 sm:$0xff]  }
0x17b1   :  { %5859 = vmatpush1.bf16.msra.mxu1 %v10392_v37  ;;  %v10424_v37 = vld [vmem:[%s15538_s11 + $0x68] ss:$16 sps:$4 sm:$0xff]  }
0x17b2   :  { %5860 = vmatprep.subr.bf16.mxu1 %v10393_v56  ;;  %v10425_v56 = vld [vmem:[%s15538_s11 + $0x4c] ss:$16 sps:$4 sm:$0xff]  }
0x17b3   :  { %5826 = vmatpush2.bf16.msra.mxu0 %v10394_v1  ;;  %v10426_v1 = vld [vmem:[%s15538_s11 + $0x48] ss:$16 sps:$4 sm:$0xff]  }
0x17b4   :  { %5827 = vmatprep.subr.bf16.mxu0 %v10395_v3  ;;  %v10427_v3 = vld [vmem:[%s15538_s11 + $0x2c] ss:$16 sps:$4 sm:$0xff]  }
0x17b5   :  { %5861 = vmatpush1.bf16.msra.mxu1 %v10396_v11  ;;  %v10428_v11 = vld [vmem:[%s15538_s11 + $0x28] ss:$16 sps:$4 sm:$0xff]  }
0x17b6   :  { %5862 = vmatprep.subr.bf16.mxu1 %v10397_v12  ;;  %v10429_v12 = vld [vmem:[%s15538_s11 + $0xc] ss:$16 sps:$4 sm:$0xff]  }
0x17b7   :  { %5828 = vmatpush2.bf16.msra.mxu0 %v10398_v41  ;;  %v10430_v41 = vld [vmem:[%s15538_s11 + $0x8] ss:$16 sps:$4 sm:$0xff]  }
0x17b8   :  { %5829 = vmatprep.subr.bf16.mxu0 %v10399_v55  ;;  %v10431_v55 = vld [vmem:[%s15538_s11 + $0x1ec] ss:$16 sps:$4 sm:$0xff]  }
0x17b9   :  { %5863 = vmatpush1.bf16.msra.mxu1 %v10400_v16  ;;  %v10432_v16 = vld [vmem:[%s15538_s11 + $0x1e8] ss:$16 sps:$4 sm:$0xff]  }
0x17ba   :  { %5864 = vmatprep.subr.bf16.mxu1 %v10401_v6  ;;  %v10433_v6 = vld [vmem:[%s15538_s11 + $0x1cc] ss:$16 sps:$4 sm:$0xff]  }
0x17bb   :  { %5830 = vmatpush2.bf16.msra.mxu0 %v10402_v57  ;;  %v10434_v57 = vld [vmem:[%s15538_s11 + $0x1c8] ss:$16 sps:$4 sm:$0xff]  }
0x17bc   :  { %5831 = vmatprep.subr.bf16.mxu0 %v10403_v53  ;;  %v10435_v53 = vld [vmem:[%s15538_s11 + $0x1ac] ss:$16 sps:$4 sm:$0xff]  }
0x17bd   :  { %5865 = vmatpush1.bf16.msra.mxu1 %v10404_v5  ;;  %v10436_v5 = vld [vmem:[%s15538_s11 + $0x1a8] ss:$16 sps:$4 sm:$0xff]  }
0x17be   :  { %5891 = vmatprep.subr.bf16.mxu1 %v10405_v46  ;;  %v10437_v46 = vld [vmem:[%s15538_s11 + $0x18c] ss:$16 sps:$4 sm:$0xff]  }
0x17bf   :  { %5832 = vmatpush2.bf16.msra.mxu0 %v10406_v13  ;;  %v10438_v13 = vld [vmem:[%s15538_s11 + $0x188] ss:$16 sps:$4 sm:$0xff]  }
0x17c0   :  { %5883 = vmatmul.mubr.bf16.vlgmr.msra.gmra.mxu1 %v13551_v29  ;;  %5833 = vmatprep.subr.bf16.mxu0 %v10407_v47  ;;  %v10439_v47 = vld [vmem:[%s15538_s11 + $0x16c] ss:$16 sps:$4 sm:$0xff]  }
0x17c1   :  { %5923 = vmatprep.mubr.bf16.mxu1 %v13708_v36  ;;  %5892 = vmatpush1.bf16.msra.mxu1 %v10408_v33  ;;  %v10412_v36 = vld [vmem:[%s15538_s11 + $0xc8] ss:$16 sps:$4 sm:$0xff]  }
0x17c2   :  { %5893 = vmatprep.subr.bf16.mxu1 %v10409_v51  ;;  %v10440_v33 = vld [vmem:[%s15538_s11 + $0x168] ss:$16 sps:$4 sm:$0xff]   ;;  %v10441_v51 = vld [vmem:[%s15538_s11 + $0x14c] ss:$16 sps:$4 sm:$0xff]  }
0x17c3   :  { %5834 = vmatpush2.bf16.msra.mxu0 %v10410_v8  ;;  %v10442_v8 = vld [vmem:[%s15538_s11 + $0x148] ss:$16 sps:$4 sm:$0xff]  }
0x17c4   :  { %5835 = vmatprep.subr.bf16.mxu0 %v10411_v52  ;;  %v10443_v52 = vld [vmem:[%s15538_s11 + $0x12c] ss:$16 sps:$4 sm:$0xff]  }
0x17c5   :  { %5894 = vmatpush1.bf16.msra.mxu1 %v10412_v36  ;;  %v10444_v36 = vld [vmem:[%s15538_s11 + $0x128] ss:$16 sps:$4 sm:$0xff]  }
0x17c6   :  { %5895 = vmatprep.subr.bf16.mxu1 %v10413_v48  ;;  %v10445_v48 = vld [vmem:[%s15538_s11 + $0x10c] ss:$16 sps:$4 sm:$0xff]  }
0x17c7   :  { %5836 = vmatpush2.bf16.msra.mxu0 %v10414_v2  ;;  %v10446_v2 = vld [vmem:[%s15538_s11 + $0x108] ss:$16 sps:$4 sm:$0xff]  }
0x17c8   :  { %5837 = vmatprep.subr.bf16.mxu0 %v10415_v54  ;;  %v10447_v54 = vld [vmem:[%s15528_s5 + $0xec] ss:$16 sps:$4 sm:$0xff]  }
0x17c9   :  { %5896 = vmatpush1.bf16.msra.mxu1 %v10416_v44 }
0x17ca   :  { %5897 = vmatprep.subr.bf16.mxu1 %v10417_v28 }
0x17cb   :  { %5838 = vmatpush2.bf16.msra.mxu0 %v10418_v4 }
0x17cc   :  { %5839 = vmatprep.subr.bf16.mxu0 %v10419_v17 }
0x17cd   :  { %5898 = vmatpush1.bf16.msra.mxu1 %v10420_v39 }
0x17ce   :  { %5899 = vmatprep.subr.bf16.mxu1 %v10421_v35 }
0x17cf   :  { %5840 = vmatpush2.bf16.msra.mxu0 %v10422_v30 }
0x17d0   :  { %5932 = vmatprep.subr.bf16.mxu0 %v10423_v59 }
0x17d1   :  { %5900 = vmatpush1.bf16.msra.mxu1 %v10424_v37 }
0x17d2   :  { %5901 = vmatprep.subr.bf16.mxu1 %v10425_v56 }
0x17d5   :  { %5902 = vmatpush1.bf16.msra.mxu1 %v10426_v1 }
0x17d6   :  { %5903 = vmatprep.subr.bf16.mxu1 %v10427_v3 }
0x17d9   :  { %5904 = vmatpush1.bf16.msra.mxu1 %v10428_v11 }
0x17da   :  { %5905 = vmatprep.subr.bf16.mxu1 %v10429_v12 }
0x17dd   :  { %5906 = vmatpush1.bf16.msra.mxu1 %v10430_v41 }
0x17de   :  { %5907 = vmatprep.subr.bf16.mxu1 %v10431_v55 }
0x17e1   :  { %5908 = vmatpush2.bf16.msra.mxu1 %v10432_v16 }
0x17e2   :  { %5909 = vmatprep.subr.bf16.mxu1 %v10433_v6 }
0x17e5   :  { %5910 = vmatpush2.bf16.msra.mxu1 %v10434_v57 }
0x17e6   :  { %5911 = vmatprep.subr.bf16.mxu1 %v10435_v53 }
0x17e9   :  { %5912 = vmatpush2.bf16.msra.mxu1 %v10436_v5 }
0x17ea   :  { %5913 = vmatprep.subr.bf16.mxu1 %v10437_v46 }
0x17ed   :  { %5914 = vmatpush2.bf16.msra.mxu1 %v10438_v13 }
0x17ee   :  { %5915 = vmatprep.subr.bf16.mxu1 %v10439_v47 }
0x17f1   :  { %5916 = vmatpush2.bf16.msra.mxu1 %v10440_v33 }
0x17f2   :  { %5917 = vmatprep.subr.bf16.mxu1 %v10441_v51 }
0x17f5   :  { %5918 = vmatpush2.bf16.msra.mxu1 %v10442_v8 }
0x17f6   :  { %5919 = vmatprep.subr.bf16.mxu1 %v10443_v52 }
0x17f9   :  { %5920 = vmatpush2.bf16.msra.mxu1 %v10444_v36 }
0x17fa   :  { %5921 = vmatprep.subr.bf16.mxu1 %v10445_v48 }
0x17fd   :  { %5922 = vmatpush2.bf16.msra.mxu1 %v10446_v2 }
0x17fe   :  { %6043 = vmatprep.subr.bf16.mxu1 %v10447_v54 }
0x1838   :  { %v5407_v44 = vpop.f32.mrf.mxu1 }
0x183a   :  { %v9020_v28 = vpop.f32.mrf.mxu1 }
0x183c   :  { %v5410_v4 = vpop.f32.mrf.mxu1 }
0x183e   :  { %v9021_v17 = vpop.f32.mrf.mxu1 }
0x1840   :  { %v5460_v39 = vpop.f32.mrf.mxu1 }
0x1841   :  { %v5792_v13 = vrot.slane %v5460_v39, 7 }
0x1842   :  { %v9026_v35 = vpop.f32.mrf.mxu1 }
0x1843   :  { %v5793_v36 = vsel %vm1080_vm0, %v5792_v13, %v5407_v44  ;;  %v10455_v13 = vld [vmem:[%s15528_s5 + $0xac] ss:$16 sps:$4 sm:$0xff]  }
0x1844   :  { %v5463_v30 = vpop.f32.mrf.mxu1 }
0x1846   :  { %v9027_v59 = vpop.f32.mrf.mxu1 }
0x1848   :  { %v5513_v37 = vpop.f32.mrf.mxu1  ;;  %v5619_v56 = vpop.f32.mrf.mxu0 }
0x1849   :  { %v5794_v47 = vrot.slane %v5513_v37, 6  ;;  %v5798_v4 = vrot.slane %v5619_v56, 4  ;;  %v10448_v56 = vld [vmem:[%s15538_s11 + $0x2e8] ss:$16 sps:$4 sm:$0xff]  }
0x184a   :  { %v9032_v1 = vpop.f32.mrf.mxu1  ;;  %v9044_v3 = vpop.f32.mrf.mxu0 }
0x184b   :  { %v5795_v48 = vsel %vm1082_vm1, %v5794_v47, %v5793_v36  ;;  %v10456_v47 = vld [vmem:[%s15538_s11 + $0x2a8] ss:$16 sps:$4 sm:$0xff]   ;;  %v10461_v36 = vld [vmem:[%s15538_s11 + $0x26c] ss:$16 sps:$4 sm:$0xff]  }
0x184c   :  { %v5516_v11 = vpop.f32.mrf.mxu1  ;;  %v5622_v12 = vpop.f32.mrf.mxu0 }
0x184e   :  { %v9033_v41 = vpop.f32.mrf.mxu1  ;;  %v9045_v55 = vpop.f32.mrf.mxu0 }
0x1850   :  { %v5566_v16 = vpop.f32.mrf.mxu1  ;;  %v5725_v6 = vpop.f32.mrf.mxu0 }
0x1851   :  { %v5796_v8 = vrot.slane %v5566_v16, 5  ;;  %v5802_v59 = vrot.slane %v5725_v6, 2  ;;  %v10449_v16 = vld [vmem:[%s15538_s11 + $0x2cc] ss:$16 sps:$4 sm:$0xff]   ;;  %v10450_v6 = vld [vmem:[%s15528_s5 + $0xe8] ss:$16 sps:$4 sm:$0xff]  }
0x1852   :  { %v9038_v57 = vpop.f32.mrf.mxu1  ;;  %v9056_v53 = vpop.f32.mrf.mxu0 }
0x1853   :  { %v5797_v54 = vsel %vm1084_vm2, %v5796_v8, %v5795_v48  ;;  %v10451_v57 = vld [vmem:[%s15528_s5 + $0xcc] ss:$16 sps:$4 sm:$0xff]   ;;  %v10452_v53 = vld [vmem:[%s15538_s11 + $0x2c8] ss:$16 sps:$4 sm:$0xff]  }
0x1854   :  { %v5569_v5 = vpop.f32.mrf.mxu1  ;;  %v5728_v46 = vpop.f32.mrf.mxu0  ;;  %v5799_v35 = vsel %vm1086_vm3, %v5798_v4, %v5797_v54  ;;  %v10459_v8 = vld [vmem:[%s15528_s5 + $0x8c] ss:$16 sps:$4 sm:$0xff]   ;;  %v10462_v48 = vld [vmem:[%s15528_s5 + $0x88] ss:$16 sps:$4 sm:$0xff]  }
0x1855   :  { %v10453_v5 = vld [vmem:[%s15538_s11 + $0x2ac] ss:$16 sps:$4 sm:$0xff]   ;;  %v10454_v46 = vld [vmem:[%s15528_s5 + $0xc8] ss:$16 sps:$4 sm:$0xff]  }
0x1856   :  { %v9039_v33 = vpop.f32.mrf.mxu1  ;;  %v9057_v51 = vpop.f32.mrf.mxu0  ;;  %v10464_v54 = vld [vmem:[%s15538_s11 + $0x268] ss:$16 sps:$4 sm:$0xff]  }
0x1857   :  { %v10457_v33 = vld [vmem:[%s15538_s11 + $0x28c] ss:$16 sps:$4 sm:$0xff]   ;;  %v10458_v51 = vld [vmem:[%s15528_s5 + $0xa8] ss:$16 sps:$4 sm:$0xff]  }
0x1858   :  { %v5672_v52 = vpop.f32.mrf.mxu1  ;;  %v10466_v4 = vld [vmem:[%s15528_s5 + $0x68] ss:$16 sps:$4 sm:$0xff]  }
0x1859   :  { %v5800_v28 = vrot.slane %v5672_v52, 3  ;;  %v10460_v52 = vld [vmem:[%s15538_s11 + $0x288] ss:$16 sps:$4 sm:$0xff]  }
0x185a   :  { %v9050_v2 = vpop.f32.mrf.mxu1 }
0x185b   :  { %v5801_v39 = vsel %vm1088_vm4, %v5800_v28, %v5799_v35  ;;  %v10463_v2 = vld [vmem:[%s15528_s5 + $0x6c] ss:$16 sps:$4 sm:$0xff]   ;;  %v10468_v35 = vld [vmem:[%s15538_s11 + $0x248] ss:$16 sps:$4 sm:$0xff]  }
0x185c   :  { %v5675_v17 = vpop.f32.mrf.mxu1  ;;  %v5803_v3 = vsel %vm1090_vm5, %v5802_v59, %v5801_v39  ;;  %v10465_v28 = vld [vmem:[%s15538_s11 + $0x24c] ss:$16 sps:$4 sm:$0xff]   ;;  %v10470_v39 = vld [vmem:[%s15528_s5 + $0x48] ss:$16 sps:$4 sm:$0xff]  }
0x185d   :  { %v10467_v17 = vld [vmem:[%s15528_s5 + $0x4c] ss:$16 sps:$4 sm:$0xff]  }
0x185e   :  { %v9051_v30 = vpop.f32.mrf.mxu1  ;;  %v10471_v59 = vld [vmem:[%s15528_s5 + $0x2c] ss:$16 sps:$4 sm:$0xff]  }
0x185f   :  { %v10469_v30 = vld [vmem:[%s15538_s11 + $0x22c] ss:$16 sps:$4 sm:$0xff]  }
0x1860   :  { %v5778_v37 = vpop.f32.mrf.mxu1 }
0x1861   :  { %v5804_v1 = vrot.slane %v5778_v37, 1  ;;  %v10472_v37 = vld [vmem:[%s15538_s11 + $0x228] ss:$16 sps:$4 sm:$0xff]  }
0x1862   :  { %v9062_v11 = vpop.f32.mrf.mxu1 }
0x1863   :  { %v5805_v44 = vsel %vm1092_vm6, %v5804_v1, %v5803_v3  ;;  %v10473_v3 = vld [vmem:[%s15538_s11 + $0x20c] ss:$16 sps:$4 sm:$0xff]   ;;  %v10474_v11 = vld [vmem:[%s15528_s5 + $0x28] ss:$16 sps:$4 sm:$0xff]  }
0x1864   :  { %v5807_v12 = vpack.c.bf16 %v5805_v44, %v5805_v44  ;;  %v5781_v41 = vpop.f32.mrf.mxu1 }
0x1865   :  { %v10476_v41 = vld [vmem:[%s15538_s11 + $0x208] ss:$16 sps:$4 sm:$0xff]  }
0x1866   :  { %v9063_v55 = vpop.f32.mrf.mxu1  ;;  %5842 = vmatmul.mubr.bf16.vlgmr.msra.gmra.mxu0 %v5807_v12  ;;  %5924 = vmatmul.mubr.bf16.vlgmr.msra.gmra.mxu1 %v5807_v12  ;;  %v10475_v12 = vld [vmem:[%s15528_s5 + $0xc] ss:$16 sps:$4 sm:$0xff]  }
0x1867   :  { %5933 = vmatpush1.bf16.msra.mxu0 %v10448_v56  ;;  %6075 = vmatprep.mubr.bf16.mxu1 %v13551_v29  ;;  %v10477_v56 = vld [vmem:[%s15528_s5 + $0xe4] ss:$16 sps:$4 sm:$0xff]  }
0x1868   :  { %5934 = vmatprep.subr.bf16.mxu0 %v10449_v16  ;;  %5964 = vmatprep.mubr.bf16.mxu0 %v10835_v63  ;;  %v10478_v16 = vld [vmem:[%s15528_s5 + $0x8] ss:$16 sps:$4 sm:$0xff]  }
0x1869   :  { %6044 = vmatpush1.bf16.msra.mxu1 %v10450_v6 }
0x186a   :  { %6045 = vmatprep.subr.bf16.mxu1 %v10451_v57  ;;  %v10479_v57 = vld [vmem:[%s15528_s5 + $0x1ec] ss:$16 sps:$4 sm:$0xff]  }
0x186b   :  { %5935 = vmatpush1.bf16.msra.mxu0 %v10452_v53  ;;  %v10480_v53 = vld [vmem:[%s15528_s5 + $0xe0] ss:$16 sps:$4 sm:$0xff]  }
0x186c   :  { %5936 = vmatprep.subr.bf16.mxu0 %v10453_v5  ;;  %v10481_v5 = vld [vmem:[%s15528_s5 + $0xc4] ss:$16 sps:$4 sm:$0xff]  }
0x186d   :  { %6046 = vmatpush1.bf16.msra.mxu1 %v10454_v46  ;;  %v10482_v46 = vld [vmem:[%s15528_s5 + $0x1e8] ss:$16 sps:$4 sm:$0xff]  }
0x186e   :  { %6047 = vmatprep.subr.bf16.mxu1 %v10455_v13  ;;  %v10483_v13 = vld [vmem:[%s15528_s5 + $0x1cc] ss:$16 sps:$4 sm:$0xff]  }
0x186f   :  { %5937 = vmatpush1.bf16.msra.mxu0 %v10456_v47  ;;  %v10484_v47 = vld [vmem:[%s15528_s5 + $0xc0] ss:$16 sps:$4 sm:$0xff]  }
0x1870   :  { %5938 = vmatprep.subr.bf16.mxu0 %v10457_v33  ;;  %v10486_v33 = vld [vmem:[%s15528_s5 + $0x1c8] ss:$16 sps:$4 sm:$0xff]  }
0x1871   :  { %6048 = vmatpush1.bf16.msra.mxu1 %v10458_v51  ;;  %v10487_v51 = vld [vmem:[%s15528_s5 + $0x1ac] ss:$16 sps:$4 sm:$0xff]  }
0x1872   :  { %6049 = vmatprep.subr.bf16.mxu1 %v10459_v8  ;;  %v10488_v8 = vld [vmem:[%s15528_s5 + $0xa0] ss:$16 sps:$4 sm:$0xff]  }
0x1873   :  { %5939 = vmatpush1.bf16.msra.mxu0 %v10460_v52  ;;  %v10489_v52 = vld [vmem:[%s15528_s5 + $0x84] ss:$16 sps:$4 sm:$0xff]  }
0x1874   :  { %5940 = vmatprep.subr.bf16.mxu0 %v10461_v36  ;;  %v10490_v36 = vld [vmem:[%s15528_s5 + $0x1a8] ss:$16 sps:$4 sm:$0xff]  }
0x1875   :  { %6050 = vmatpush1.bf16.msra.mxu1 %v10462_v48  ;;  %v10491_v48 = vld [vmem:[%s15528_s5 + $0x18c] ss:$16 sps:$4 sm:$0xff]  }
0x1876   :  { %6051 = vmatprep.subr.bf16.mxu1 %v10463_v2  ;;  %v10492_v2 = vld [vmem:[%s15528_s5 + $0x80] ss:$16 sps:$4 sm:$0xff]  }
0x1877   :  { %5941 = vmatpush1.bf16.msra.mxu0 %v10464_v54  ;;  %v10493_v54 = vld [vmem:[%s15528_s5 + $0x64] ss:$16 sps:$4 sm:$0xff]  }
0x1878   :  { %5942 = vmatprep.subr.bf16.mxu0 %v10465_v28  ;;  %v10494_v28 = vld [vmem:[%s15528_s5 + $0x188] ss:$16 sps:$4 sm:$0xff]  }
0x1879   :  { %6052 = vmatpush1.bf16.msra.mxu1 %v10466_v4  ;;  %v10495_v4 = vld [vmem:[%s15528_s5 + $0x16c] ss:$16 sps:$4 sm:$0xff]  }
0x187a   :  { %6053 = vmatprep.subr.bf16.mxu1 %v10467_v17  ;;  %v10496_v17 = vld [vmem:[%s15528_s5 + $0x60] ss:$16 sps:$4 sm:$0xff]  }
0x187b   :  { %5943 = vmatpush1.bf16.msra.mxu0 %v10468_v35  ;;  %v10497_v35 = vld [vmem:[%s15528_s5 + $0x44] ss:$16 sps:$4 sm:$0xff]  }
0x187c   :  { %5944 = vmatprep.subr.bf16.mxu0 %v10469_v30  ;;  %v10498_v30 = vld [vmem:[%s15528_s5 + $0x168] ss:$16 sps:$4 sm:$0xff]  }
0x187d   :  { %6054 = vmatpush1.bf16.msra.mxu1 %v10470_v39  ;;  %v10499_v39 = vld [vmem:[%s15528_s5 + $0x14c] ss:$16 sps:$4 sm:$0xff]  }
0x187e   :  { %6055 = vmatprep.subr.bf16.mxu1 %v10471_v59  ;;  %v10500_v59 = vld [vmem:[%s15528_s5 + $0x40] ss:$16 sps:$4 sm:$0xff]  }
0x187f   :  { %5945 = vmatpush1.bf16.msra.mxu0 %v10472_v37  ;;  %v10501_v37 = vld [vmem:[%s15528_s5 + $0x24] ss:$16 sps:$4 sm:$0xff]  }
0x1880   :  { %v14054_v1 = vpop.f32.mrf.mxu1  ;;  %5946 = vmatprep.subr.bf16.mxu0 %v10473_v3  ;;  %v10502_v3 = vld [vmem:[%s15528_s5 + $0x148] ss:$16 sps:$4 sm:$0xff]  }
0x1881   :  { %6056 = vmatpush1.bf16.msra.mxu1 %v10474_v11  ;;  %v10503_v11 = vld [vmem:[%s15528_s5 + $0x12c] ss:$16 sps:$4 sm:$0xff]  }
0x1882   :  { %v14062_v44 = vpop.f32.mrf.mxu1  ;;  %6057 = vmatprep.subr.bf16.mxu1 %v10475_v12  ;;  %v10504_v12 = vld [vmem:[%s15528_s5 + $0x20] ss:$16 sps:$4 sm:$0xff]  }
0x1883   :  { %5947 = vmatpush1.bf16.msra.mxu0 %v10476_v41  ;;  %v10505_v41 = vld [vmem:[%s15528_s5 + $0x4] ss:$16 sps:$4 sm:$0xff]  }
0x1884   :  { %v5888_v55 = vpop.f32.mrf.mxu1  ;;  %6002 = vmatprep.subr.bf16.mxu0 %v10477_v56  ;;  %v10507_v56 = vld [vmem:[%s15528_s5 + $0x10c] ss:$16 sps:$4 sm:$0xff]  }
0x1885   :  { %6058 = vmatpush1.bf16.msra.mxu1 %v10478_v16  ;;  %v10506_v55 = vld [vmem:[%s15528_s5 + $0x128] ss:$16 sps:$4 sm:$0xff]   ;;  %v10508_v16 = vld [vmem:[%s15528_s5] ss:$16 sps:$4 sm:$0xff]  }
0x1886   :  { %v5889_v6 = vpop.f32.mrf.mxu1  ;;  %5965 = vmatmul.mubr.bf16.vlgmr.msra.gmra.mxu0 %v13551_v29  ;;  %6059 = vmatprep.subr.bf16.mxu1 %v10479_v57  ;;  %v10509_v57 = vld [vmem:[%s15528_s5 + $0x1e4] ss:$16 sps:$4 sm:$0xff]  }
0x1887   :  { %6003 = vmatpush1.bf16.msra.mxu0 %v10480_v53  ;;  %6034 = vmatprep.mubr.bf16.mxu0 %v13551_v29  ;;  %v10485_v29 = vld [vmem:[%s15528_s5 + $0xa4] ss:$16 sps:$4 sm:$0xff]   ;;  %v10510_v53 = vld [vmem:[%s15528_s5 + $0x108] ss:$16 sps:$4 sm:$0xff]  }
0x1888   :  { %6004 = vmatprep.subr.bf16.mxu0 %v10481_v5  ;;  %v8612_v6 = vld [vmem:[%s15529_s0 + $0x20] sm:$0xff] }
0x1889   :  { %6060 = vmatpush2.bf16.msra.mxu1 %v10482_v46  ;;  %v6001_v5 = vpack.c.bf16 %v8612_v6, %v8612_v6  ;;  %v10511_v46 = vld [vmem:[%s15528_s5 + $0x1e0] ss:$16 sps:$4 sm:$0xff]   ;;  %v10538_v6 = vld [vmem:[%s15530_s7 + $0x48] sm:$0xff]  }
0x188a   :  { %6061 = vmatprep.subr.bf16.mxu1 %v10483_v13  ;;  %v10512_v13 = vld [vmem:[%s15528_s5 + $0x1c4] ss:$16 sps:$4 sm:$0xff]  }
0x188b   :  { %6005 = vmatpush1.bf16.msra.mxu0 %v10484_v47  ;;  %v10513_v47 = vld [vmem:[%s15528_s5 + $0x1c0] ss:$16 sps:$4 sm:$0xff]  }
0x188c   :  { %6006 = vmatprep.subr.bf16.mxu0 %v10485_v29  ;;  %v10514_v29 = vld [vmem:[%s15528_s5 + $0x1a4] ss:$16 sps:$4 sm:$0xff]  }
0x188d   :  { %6062 = vmatpush2.bf16.msra.mxu1 %v10486_v33  ;;  %v10515_v33 = vld [vmem:[%s15528_s5 + $0x1a0] ss:$16 sps:$4 sm:$0xff]  }
0x188e   :  { %6063 = vmatprep.subr.bf16.mxu1 %v10487_v51  ;;  %v10516_v51 = vld [vmem:[%s15528_s5 + $0x184] ss:$16 sps:$4 sm:$0xff]  }
0x188f   :  { %6007 = vmatpush1.bf16.msra.mxu0 %v10488_v8  ;;  %v10517_v8 = vld [vmem:[%s15528_s5 + $0x180] ss:$16 sps:$4 sm:$0xff]  }
0x1890   :  { %6008 = vmatprep.subr.bf16.mxu0 %v10489_v52  ;;  %v10518_v52 = vld [vmem:[%s15528_s5 + $0x164] ss:$16 sps:$4 sm:$0xff]  }
0x1891   :  { %6064 = vmatpush2.bf16.msra.mxu1 %v10490_v36  ;;  %v10519_v36 = vld [vmem:[%s15528_s5 + $0x160] ss:$16 sps:$4 sm:$0xff]  }
0x1892   :  { %6065 = vmatprep.subr.bf16.mxu1 %v10491_v48  ;;  %v10520_v48 = vld [vmem:[%s15528_s5 + $0x144] ss:$16 sps:$4 sm:$0xff]  }
0x1893   :  { %6009 = vmatpush1.bf16.msra.mxu0 %v10492_v2  ;;  %v10521_v2 = vld [vmem:[%s15528_s5 + $0x140] ss:$16 sps:$4 sm:$0xff]  }
0x1894   :  { %6010 = vmatprep.subr.bf16.mxu0 %v10493_v54  ;;  %v10522_v54 = vld [vmem:[%s15528_s5 + $0x124] ss:$16 sps:$4 sm:$0xff]  }
0x1895   :  { %6066 = vmatpush2.bf16.msra.mxu1 %v10494_v28  ;;  %v10523_v28 = vld [vmem:[%s15528_s5 + $0x120] ss:$16 sps:$4 sm:$0xff]  }
0x1896   :  { %6067 = vmatprep.subr.bf16.mxu1 %v10495_v4  ;;  %v10524_v4 = vld [vmem:[%s15528_s5 + $0x104] ss:$16 sps:$4 sm:$0xff]  }
0x1897   :  { %6011 = vmatpush1.bf16.msra.mxu0 %v10496_v17  ;;  %v10525_v17 = vld [vmem:[%s15528_s5 + $0x100] ss:$16 sps:$4 sm:$0xff]  }
0x1898   :  { %6012 = vmatprep.subr.bf16.mxu0 %v10497_v35  ;;  %v10526_v35 = vld [vmem:[%s15530_s7 + $0x78] sm:$0xff]  }
0x1899   :  { %6068 = vmatpush2.bf16.msra.mxu1 %v10498_v30  ;;  %v10527_v30 = vld [vmem:[%s15530_s7 + $0x38] sm:$0xff]  }
0x189a   :  { %6069 = vmatprep.subr.bf16.mxu1 %v10499_v39  ;;  %v10528_v39 = vld [vmem:[%s15530_s7 + $0x70] sm:$0xff]  }
0x189b   :  { %6013 = vmatpush1.bf16.msra.mxu0 %v10500_v59  ;;  %v10529_v59 = vld [vmem:[%s15530_s7 + $0x30] sm:$0xff]  }
0x189c   :  { %6014 = vmatprep.subr.bf16.mxu0 %v10501_v37  ;;  %v10530_v37 = vld [vmem:[%s15530_s7 + $0x68] sm:$0xff]  }
0x189d   :  { %6070 = vmatpush2.bf16.msra.mxu1 %v10502_v3  ;;  %v10531_v3 = vld [vmem:[%s15530_s7 + $0x28] sm:$0xff]  }
0x189e   :  { %6071 = vmatprep.subr.bf16.mxu1 %v10503_v11  ;;  %v10532_v11 = vld [vmem:[%s15530_s7 + $0x60] sm:$0xff]  }
0x189f   :  { %6015 = vmatpush1.bf16.msra.mxu0 %v10504_v12  ;;  %v10533_v12 = vld [vmem:[%s15530_s7 + $0x20] sm:$0xff]  }
0x18a0   :  { %6016 = vmatprep.subr.bf16.mxu0 %v10505_v41  ;;  %v10534_v41 = vld [vmem:[%s15530_s7 + $0x58] sm:$0xff]  }
0x18a1   :  { %6072 = vmatpush2.bf16.msra.mxu1 %v10506_v55  ;;  %v10535_v55 = vld [vmem:[%s15530_s7 + $0x18] sm:$0xff]  }
0x18a2   :  { %6073 = vmatprep.subr.bf16.mxu1 %v10507_v56  ;;  %v10536_v56 = vld [vmem:[%s15530_s7 + $0x50] sm:$0xff]  }
0x18a3   :  { %6017 = vmatpush1.bf16.msra.mxu0 %v10508_v16  ;;  %v10537_v16 = vld [vmem:[%s15530_s7 + $0x10] sm:$0xff]  }
0x18a4   :  { %6018 = vmatprep.subr.bf16.mxu0 %v10509_v57  ;;  %v10539_v57 = vld [vmem:[%s15530_s7 + $0x8] sm:$0xff]  }
0x18a5   :  { %6074 = vmatpush2.bf16.msra.mxu1 %v10510_v53  ;;  %v10540_v53 = vld [vmem:[%s15530_s7 + $0x40] sm:$0xff]  }
0x18a6   :  { %9064 = vmatprep.subr.bf16.mxu1 %v10837_v14 }
0x18a7   :  { %6019 = vmatpush2.bf16.msra.mxu0 %v10511_v46 }
0x18a8   :  { %6020 = vmatprep.subr.bf16.mxu0 %v10512_v13  ;;  %6076 = vmatmul.mubr.bf16.vlgmr.msra.gmra.mxu1 %v6001_v5 }
0x18a9   :  { %9065 = vmatpush3.bf16.msra.mxu1 %v11343_v18  ;;  %9066 = vmatprep.mubr.msk.bf16.mxu1 %vm10838_vm9, %v10837_v14 }
0x18aa   :  { %9070 = vmatprep.subr.bf16.mxu1 %v10837_v14 }
0x18ab   :  { %6021 = vmatpush2.bf16.msra.mxu0 %v10513_v47 }
0x18ac   :  { %6022 = vmatprep.subr.bf16.mxu0 %v10514_v29 }
0x18af   :  { %6023 = vmatpush2.bf16.msra.mxu0 %v10515_v33 }
0x18b0   :  { %6024 = vmatprep.subr.bf16.mxu0 %v10516_v51 }
0x18b3   :  { %6025 = vmatpush2.bf16.msra.mxu0 %v10517_v8 }
0x18b4   :  { %6026 = vmatprep.subr.bf16.mxu0 %v10518_v52 }
0x18b7   :  { %6027 = vmatpush2.bf16.msra.mxu0 %v10519_v36 }
0x18b8   :  { %6028 = vmatprep.subr.bf16.mxu0 %v10520_v48 }
0x18bb   :  { %6029 = vmatpush2.bf16.msra.mxu0 %v10521_v2 }
0x18bc   :  { %6030 = vmatprep.subr.bf16.mxu0 %v10522_v54 }
0x18bf   :  { %6031 = vmatpush2.bf16.msra.mxu0 %v10523_v28 }
0x18c0   :  { %6032 = vmatprep.subr.bf16.mxu0 %v10524_v4 }
0x18c3   :  { %6033 = vmatpush2.bf16.msra.mxu0 %v10525_v17 }
0x18c4   :  { %8796 = vmatprep.subr.bf16.mxu0 %v10526_v35 }
0x18c6   :  { %6035 = vmatmul.mubr.bf16.vlgmr.msra.gmra.mxu0 %v6001_v5  ;;  %v10541_v5 = vld [vmem:[%s15530_s7] sm:$0xff]  }
0x18c7   :  { %8797 = vmatpush3.bf16.msra.mxu0 %v10527_v30 }
0x18c8   :  { %8798 = vmatprep.subr.bf16.mxu0 %v10528_v39 }
0x18cb   :  { %8799 = vmatpush3.bf16.msra.mxu0 %v10529_v59 }
0x18cc   :  { %8800 = vmatprep.subr.bf16.mxu0 %v10530_v37 }
0x18cf   :  { %8801 = vmatpush3.bf16.msra.mxu0 %v10531_v3 }
0x18d0   :  { %8802 = vmatprep.subr.bf16.mxu0 %v10532_v11 }
0x18d3   :  { %8803 = vmatpush3.bf16.msra.mxu0 %v10533_v12 }
0x18d4   :  { %8804 = vmatprep.subr.bf16.mxu0 %v10534_v41 }
0x18d7   :  { %8805 = vmatpush3.bf16.msra.mxu0 %v10535_v55 }
0x18d8   :  { %8806 = vmatprep.subr.bf16.mxu0 %v10536_v56 }
0x18db   :  { %8807 = vmatpush3.bf16.msra.mxu0 %v10537_v16 }
0x18dc   :  { %8808 = vmatprep.subr.bf16.mxu0 %v10538_v6 }
0x18df   :  { %8809 = vmatpush3.bf16.msra.mxu0 %v10539_v57 }
0x18e0   :  { %8810 = vmatprep.subr.bf16.mxu0 %v10540_v53 }
0x18e3   :  { %8811 = vmatpush3.bf16.msra.mxu0 %v10541_v5 }
0x18e4   :  { %9088 = vmatprep.subr.bf16.mxu0 %v10837_v14 }
0x1926   :  { %v5843_v46 = vpop.f32.mrf.mxu0  ;;  %v5925_v13 = vpop.f32.mrf.mxu1 }
0x1927   :  { %v5844_v36 = vadd.f32 %v5843_v46, %v12010_v22  ;;  %v5926_v59 = vadd.f32 %v5925_v13, %v12019_v9 }
0x1928   :  { %v5845_v47 = vpop.f32.mrf.mxu0  ;;  %v5927_v29 = vpop.f32.mrf.mxu1 }
0x1929   :  { %v5885_v48 = vadd.f32 %v14054_v1, %v5844_v36  ;;  %v5928_v28 = vadd.f32 %v5927_v29, %v12015_v62  ;;  %v5846_v11 = vadd.f32 %v5845_v47, %v12023_v49 }
0x192a   :  { %v5847_v33 = vpop.f32.mrf.mxu0  ;;  %v5929_v51 = vpop.f32.mrf.mxu1 }
0x192b   :  { %v8608_v2 = vmul.f32 -1.442695, %v5885_v48  ;;  %v5887_v1 = vadd.f32 %v14062_v44, %v5846_v11 }
0x192c   :  { %v5848_v8 = vpop.f32.mrf.mxu0  ;;  %v5930_v52 = vpop.f32.mrf.mxu1 }
0x192d   :  { %9727 = vpow2.f32 %v8608_v2 }
0x193a   :  { %v9728_v3 = vpop.eup %9727 }
0x193b   :  { %v5976_v41 = vadd.f32 1.0, %v9728_v3 }
0x1946   :  { %v5966_v54 = vpop.f32.mrf.mxu0 }
0x1947   :  { %v5967_v37 = vadd.f32 %v5966_v54, %v5926_v59 }
0x1948   :  { %v5968_v4 = vpop.f32.mrf.mxu0 }
0x1949   :  { %v5969_v17 = vadd.f32 %v5968_v4, %v5928_v28  ;;  %v8609_v12 = vmul.f32 -1.442695, %v5967_v37 }
0x194a   :  { %v5970_v35 = vpop.f32.mrf.mxu0 }
0x194b   :  { %v8610_v30 = vmul.f32 -1.442695, %v5969_v17 }
0x194c   :  { %v5971_v39 = vpop.f32.mrf.mxu0 }
0x194d   :  { %9729 = vpow2.f32 %v8610_v30 }
0x194e   :  { %9731 = vpow2.f32 %v8609_v12 }
0x194f   :  { %9733 = vrcp.f32 %v5976_v41 }
0x1950   :  { %9735 = vtanh.f32 %v5887_v1 }
0x195a   :  { %v9730_v55 = vpop.eup %9729 }
0x195b   :  { %v5989_v56 = vadd.f32 1.0, %v9730_v55  ;;  %v9732_v16 = vpop.eup %9731 }
0x195c   :  { %v9734_v6 = vpop.eup %9733  ;;  %v5983_v46 = vadd.f32 1.0, %v9732_v16 }
0x195d   :  { %9737 = vrcp.f32 %v5989_v56  ;;  %v9736_v53 = vpop.eup %9735 }
0x195e   :  { %v5992_v29 = vmul.f32 %v9736_v53, %v9734_v6  ;;  %9739 = vrcp.f32 %v5983_v46 }
0x1968   :  { %v6077_v57 = vpop.f32.mrf.mxu1 }
0x1969   :  { %v6078_v59 = vadd.f32 %v6077_v57, %v11185_v42 }
0x196a   :  { %v9738_v5 = vpop.eup %9737  ;;  %v6079_v13 = vpop.f32.mrf.mxu1 }
0x196b   :  { %v5993_v47 = vmul.f32 %v9738_v5, %v13532_v58  ;;  %v9740_v52 = vpop.eup %9739  ;;  %v6080_v39 = vadd.f32 %v6079_v13, %v11182_v40 }
0x196c   :  { %v6081_v33 = vpop.f32.mrf.mxu1 }
0x196d   :  { %v14283_v51 = vadd.f32 %v5993_v47, %v5992_v29  ;;  %v8615_v37 = vmul.f32 -1.442695, %v6080_v39 }
0x196e   :  { %v6082_v44 = vpop.f32.mrf.mxu1 }
0x196f   :  { %9741 = vtanh.f32 %v14283_v51  ;;  %v6109_v8 = vpack.c.bf16 %v14283_v51, %v14283_v51 }
0x1971   :  { %6142 = vmatprep.mubr.bf16.mxu0 %v6109_v8 }
0x197c   :  { %v9742_v36 = vpop.eup %9741 }
0x197d   :  { %v14288_v48 = vmul.f32 %v9742_v36, %v9740_v52  ;;  %v10542_v52 = vld [vmem:[%s15534_s8] ss:$0 sm:$0xff] }
0x197f   :  { %8611 = vst [vmem:[%s15541_s13 + $0x18] sm:$0xff] %v14288_v48 }
0x1986   :  { %v6036_v58 = vpop.f32.mrf.mxu0 }
0x1987   :  { %v6037_v2 = vadd.f32 %v6036_v58, %v11168_v26 }
0x1988   :  { %v6038_v54 = vpop.f32.mrf.mxu0 }
0x1989   :  { %v8613_v28 = vmul.f32 -1.442695, %v6037_v2  ;;  %v6039_v4 = vadd.f32 %v6038_v54, %v11171_v27 }
0x198a   :  { %v6040_v17 = vpop.f32.mrf.mxu0 }
0x198b   :  { %9743 = vpow2.f32 %v8613_v28  ;;  %v8614_v35 = vmul.f32 -1.442695, %v6039_v4 }
0x198c   :  { %v6041_v30 = vpop.f32.mrf.mxu0 }
0x198d   :  { %9745 = vpow2.f32 %v8614_v35 }
0x198e   :  { %9747 = vtanh.f32 %v6078_v59 }
0x198f   :  { %9749 = vpow2.f32 %v8615_v37 }
0x1998   :  { %v9744_v3 = vpop.eup %9743 }
0x1999   :  { %v6087_v11 = vadd.f32 1.0, %v9744_v3 }
0x199a   :  { %v9746_v12 = vpop.eup %9745 }
0x199b   :  { %9751 = vrcp.f32 %v6087_v11  ;;  %v6093_v41 = vadd.f32 1.0, %v9746_v12  ;;  %v9748_v1 = vpop.eup %9747  ;;  %v10543_v11 = vld [vmem:[%s15535_s1] sm:$0xff] }
0x199c   :  { %v9750_v55 = vpop.eup %9749 }
0x199d   :  { %9753 = vrcp.f32 %v6093_v41  ;;  %v6100_v6 = vadd.f32 1.0, %v9750_v55 }
0x199f   :  { %9755 = vrcp.f32 %v6100_v6  ;;  %v10545_v6 = vld [vmem:[%s15535_s1 + $0x10] sm:$0xff] }
0x19a8   :  { %v9752_v56 = vpop.eup %9751 }
0x19a9   :  { %v6104_v5 = vmul.f32 %v9752_v56, %v9748_v1  ;;  %v10544_v56 = vld [vmem:[%s15535_s1 + $0x8] sm:$0xff] }
0x19aa   :  { %v9754_v16 = vpop.eup %9753 }
0x19ab   :  { %v6103_v53 = vmul.f32 %v9754_v16, %v13548_v19 }
0x19ac   :  { %v9756_v57 = vpop.eup %9755 }
0x19ad   :  { %v14299_v46 = vadd.f32 %v6104_v5, %v6103_v53 }
0x19af   :  { %9757 = vtanh.f32 %v14299_v46 }
0x19bc   :  { %v9758_v13 = vpop.eup %9757 }
0x19bd   :  { %v6107_v29 = vmul.f32 %v9758_v13, %v9756_v57  ;;  %v10546_v13 = vld [vmem:[%s15535_s1 + $0x20] sm:$0xff] }
0x19bf   :  { %v14302_v47 = vpack.c.bf16 %v6107_v29, %v6107_v29 }
0x19c1   :  { %6143 = vmatmul.mubr.bf16.vlgmr.msra.gmra.mxu0 %v14302_v47 }
0x19c2   :  { %9089 = vmatpush3.bf16.msra.mxu0 %v11370_v45  ;;  %9090 = vmatprep.mubr.msk.bf16.mxu0 %vm10838_vm9, %v10837_v14 }
0x19c3   :  { %9100 = vmatprep.subr.bf16.mxu0 %v10837_v14 }
0x1a81   :  { %v8812_v19 = vpop.f32.mrf.mxu0 }
0x1a83   :  { %v8813_v33 = vpop.f32.mrf.mxu0 }
0x1a84   :  { %v8814_v44 = vadd.f32 %v8813_v33, %v8812_v19 }
0x1a85   :  { %v8815_v8 = vpop.f32.mrf.mxu0 }
0x1a86   :  { %v6145_v36 = vadd.f32 %v10542_v52, %v8814_v44  ;;  %v10547_v44 = vld [vmem:[%s15535_s1 + $0x18] sm:$0xff] }
0x1a87   :  { %v8816_v58 = vpop.f32.mrf.mxu0 }
0x1a88   :  { %v6151_v2 = vcombine.high %v6145_v36, %v6145_v36  ;;  %v6158_v54 = vrot.slane %v6145_v36, %v11204_v7  ;;  %v10548_v58 = vld [vmem:[%s15535_s1 + $0x28] sm:$0xff] }
0x1a8a   :  { %v6165_v28 = vrot.slane %v6151_v2, %v11204_v7  ;;  %v6166_v4 = vcombine.high %v6158_v54, %v6158_v54  ;;  %v6174_v17 = vrot.slane %v6158_v54, %v11204_v7 }
0x1a8c   :  { %v6188_v35 = vrot.slane %v6166_v4, %v11204_v7  ;;  %v6196_v30 = vcombine.high %v6174_v17, %v6174_v17  ;;  %v6181_v39 = vrot.slane %v6165_v28, %v11204_v7  ;;  %v6203_v59 = vrot.slane %v6174_v17, %v11159_v23 }
0x1a8d   :  { %v6167_v41 = vcombine.high %v6165_v28, %v6165_v28  ;;  %v10549_v28 = vld [vmem:[%s15536_s9] ss:$0 sm:$0xff] }
0x1a8e   :  { %v6207_v37 = vrot.slane %v6188_v35, %v11159_v23  ;;  %v6211_v3 = vrot.slane %v6196_v30, %v11159_v23  ;;  %v6240_v12 = vadd.f32 %v10543_v11, %v6203_v59  ;;  %v6198_v1 = vcombine.high %v6188_v35, %v6188_v35  ;;  %v10550_v30 = vld [vmem:[%s15535_s1 + $0x30] sm:$0xff] }
0x1a8f   :  { %v6219_v55 = vrot.slane %v6181_v39, %v11159_v23  ;;  %v6195_v5 = vrot.slane %v6167_v41, %v11204_v7  ;;  %v6197_v19 = vcombine.high %v6181_v39, %v6181_v39 }
0x1a90   :  { %v6241_v16 = vadd.f32 %v10544_v56, %v6207_v37  ;;  %v6242_v53 = vadd.f32 %v10545_v6, %v6211_v3  ;;  %9759 = vtanh.f32 %v6240_v12  ;;  %v6215_v57 = vrot.slane %v6198_v1, %v11159_v23  ;;  %v10551_v3 = vld [vmem:[%s15535_s1 + $0x38] sm:$0xff] }
0x1a91   :  { %v6244_v29 = vadd.f32 %v10546_v13, %v6219_v55  ;;  %v6223_v33 = vrot.slane %v6195_v5, %v11159_v23  ;;  %v6199_v52 = vcombine.high %v6195_v5, %v6195_v5  ;;  %v6227_v36 = vrot.slane %v6197_v19, %v11159_v23 }
0x1a92   :  { %9761 = vtanh.f32 %v6241_v16  ;;  %v6243_v8 = vadd.f32 %v10547_v44, %v6215_v57 }
0x1a93   :  { %9763 = vtanh.f32 %v6242_v53  ;;  %v6245_v2 = vadd.f32 %v10548_v58, %v6223_v33  ;;  %v6231_v35 = vrot.slane %v6199_v52, %v11159_v23  ;;  %v6246_v39 = vadd.f32 %v10550_v30, %v6227_v36 }
0x1a94   :  { %9765 = vtanh.f32 %v6244_v29 }
0x1a95   :  { %9767 = vtanh.f32 %v6243_v8  ;;  %v6247_v11 = vadd.f32 %v10551_v3, %v6231_v35 }
0x1a96   :  { %9769 = vtanh.f32 %v6245_v2 }
0x1a97   :  { %9771 = vtanh.f32 %v6246_v39 }
0x1a98   :  { %9773 = vtanh.f32 %v6247_v11 }
0x1a9d   :  { %v9760_v54 = vpop.eup %9759 }
0x1a9e   :  { %v6256_v4 = vmul.f32 %v10549_v28, %v9760_v54 }
0x1a9f   :  { %v9762_v17 = vpop.eup %9761 }
0x1aa0   :  { %6264 = vadd.xlane.f32.xlu0 %v6256_v4  ;;  %v6257_v59 = vmul.f32 %v10549_v28, %v9762_v17  ;;  %v9764_v37 = vpop.eup %9763 }
0x1aa1   :  { %v6258_v12 = vmul.f32 %v10549_v28, %v9764_v37  ;;  %v9766_v41 = vpop.eup %9765 }
0x1aa2   :  { %6266 = vadd.xlane.f32.xlu1 %v6257_v59  ;;  %v6260_v1 = vmul.f32 %v10549_v28, %v9766_v41  ;;  %v9768_v55 = vpop.eup %9767 }
0x1aa3   :  { %v6259_v56 = vmul.f32 %v10549_v28, %v9768_v55  ;;  %v9770_v16 = vpop.eup %9769 }
0x1aa4   :  { %v6261_v6 = vmul.f32 %v10549_v28, %v9770_v16  ;;  %v9772_v53 = vpop.eup %9771 }
0x1aa5   :  { %v6262_v5 = vmul.f32 %v10549_v28, %v9772_v53  ;;  %v9774_v57 = vpop.eup %9773 }
0x1aa6   :  { %6268 = vadd.xlane.f32.xlu1 %v6258_v12  ;;  %v6263_v13 = vmul.f32 %v10549_v28, %v9774_v57 }
0x1aaa   :  { %6272 = vadd.xlane.f32.xlu1 %v6260_v1 }
0x1aae   :  { %6270 = vadd.xlane.f32.xlu1 %v6259_v56 }
0x1ab2   :  { %6274 = vadd.xlane.f32.xlu1 %v6261_v6 }
0x1ab6   :  { %6276 = vadd.xlane.f32.xlu1 %v6262_v5 }
0x1aba   :  { %6278 = vadd.xlane.f32.xlu1 %v6263_v13 }
0x1b29   :  { %v6265_v44 = vpop.xlane.xlu0 %6264 }
0x1b2a   :  { %v6280_v58 = vadd.f32 %v6265_v44, %v11251_v32 }
0x1b2b   :  { %v6267_v29 = vpop.xlane.xlu1 %6266 }
0x1b2c   :  { %v6281_v52 = vadd.f32 %v6267_v29, %v11251_v32  ;;  %v6299_v28 = vrot.slane %v6280_v58, %v11249_v31 }
0x1b2e   :  { %v6303_v4 = vrot.slane %v6281_v52, %v11249_v31 }
0x1b2f   :  { %v6269_v19 = vpop.xlane.xlu1 %6268 }
0x1b30   :  { %v6282_v36 = vadd.f32 %v6269_v19, %v11251_v32  ;;  %v6328_v37 = vsel %vm1080_vm0, %v6303_v4, %v6299_v28 }
0x1b32   :  { %v6307_v17 = vrot.slane %v6282_v36, %v11249_v31 }
0x1b33   :  { %v6273_v33 = vpop.xlane.xlu1 %6272 }
0x1b34   :  { %v6284_v39 = vadd.f32 %v6273_v33, %v11251_v32  ;;  %v6329_v11 = vsel %vm1082_vm1, %v6307_v17, %v6328_v37 }
0x1b36   :  { %v6315_v1 = vrot.slane %v6284_v39, %v11249_v31 }
0x1b37   :  { %v6271_v8 = vpop.xlane.xlu1 %6270 }
0x1b38   :  { %v6283_v2 = vadd.f32 %v6271_v8, %v11251_v32 }
0x1b3a   :  { %v6311_v35 = vrot.slane %v6283_v2, %v11249_v31 }
0x1b3b   :  { %v6275_v54 = vpop.xlane.xlu1 %6274 }
0x1b3c   :  { %v6285_v30 = vadd.f32 %v6275_v54, %v11251_v32  ;;  %v6330_v12 = vsel %vm1084_vm2, %v6311_v35, %v6329_v11 }
0x1b3d   :  { %v6331_v6 = vsel %vm1086_vm3, %v6315_v1, %v6330_v12 }
0x1b3e   :  { %v6319_v41 = vrot.slane %v6285_v30, %v11249_v31 }
0x1b3f   :  { %v6277_v59 = vpop.xlane.xlu1 %6276 }
0x1b40   :  { %v6286_v3 = vadd.f32 %v6277_v59, %v11251_v32  ;;  %v6332_v53 = vsel %vm1088_vm4, %v6319_v41, %v6331_v6 }
0x1b42   :  { %v6323_v55 = vrot.slane %v6286_v3, %v11249_v31 }
0x1b43   :  { %v6279_v56 = vpop.xlane.xlu1 %6278 }
0x1b44   :  { %v6287_v16 = vadd.f32 %v6279_v56, %v11251_v32  ;;  %v6333_v57 = vsel %vm1090_vm5, %v6323_v55, %v6332_v53 }
0x1b46   :  { %v6327_v5 = vrot.slane %v6287_v16, %v11249_v31 }
0x1b48   :  { %v6334_v13 = vsel %vm1092_vm6, %v6327_v5, %v6333_v57 }
0x1b49   :  { %v6336_v29 = vsel %vm1095_vm7, %v6334_v13, -inf }
0x1b4a   :  { %6337 = vmax.xlane.f32.xlu1 %v6336_v29 }
0x1bd3   :  { %v6338_v19 = vpop.xlane.xlu1 %6337 }
0x1bd4   :  { %v6343_v33 = vrot.slane %v6338_v19, %v11159_v23  ;;  %v6347_v44 = vrot.slane %v6338_v19, %v11165_v25  ;;  %v6351_v8 = vrot.slane %v6338_v19, %v11179_v38  ;;  %v6355_v54 = vrot.slane %v6338_v19, %v11176_v34 }
0x1bd5   :  { %v6363_v4 = vrot.slane %v6338_v19, %v11289_v15  ;;  %v6359_v59 = vrot.slane %v6338_v19, %v11285_v10  ;;  %v6371_v41 = vrot.slane %v6338_v19, %v11278_v0  ;;  %v6367_v56 = vrot.slane %v6338_v19, %v11293_v20 }
0x1bd6   :  { %v6380_v17 = vsub.f32 %v6280_v58, %v6343_v33  ;;  %v6381_v28 = vsub.f32 %v6281_v52, %v6347_v44  ;;  %v6383_v35 = vsub.f32 %v6283_v2, %v6355_v54  ;;  %v6382_v37 = vsub.f32 %v6282_v36, %v6351_v8 }
0x1bd7   :  { %v6385_v1 = vsub.f32 %v6285_v30, %v6363_v4  ;;  %v6384_v6 = vsub.f32 %v6284_v39, %v6359_v59  ;;  %v6387_v5 = vsub.f32 %v6287_v16, %v6371_v41  ;;  %v6386_v52 = vsub.f32 %v6286_v3, %v6367_v56 }
0x1bd8   :  { %v6388_v11 = vmul.f32 1.442695, %v6380_v17  ;;  %v6390_v12 = vmul.f32 1.442695, %v6381_v28  ;;  %v6394_v55 = vmul.f32 1.442695, %v6383_v35 }
0x1bd9   :  { %v6392_v53 = vmul.f32 1.442695, %v6382_v37  ;;  %v6398_v58 = vmul.f32 1.442695, %v6385_v1  ;;  %v6396_v2 = vmul.f32 1.442695, %v6384_v6 }
0x1bda   :  { %9775 = vpow2.f32 %v6388_v11  ;;  %v6402_v36 = vmul.f32 1.442695, %v6387_v5  ;;  %v6400_v57 = vmul.f32 1.442695, %v6386_v52 }
0x1bdb   :  { %9777 = vpow2.f32 %v6390_v12 }
0x1bdc   :  { %9779 = vpow2.f32 %v6394_v55 }
0x1bdd   :  { %9781 = vpow2.f32 %v6392_v53 }
0x1bde   :  { %9783 = vpow2.f32 %v6398_v58 }
0x1bdf   :  { %9785 = vpow2.f32 %v6396_v2 }
0x1be0   :  { %9787 = vpow2.f32 %v6402_v36 }
0x1be1   :  { %9789 = vpow2.f32 %v6400_v57 }
0x1be7   :  { %v9776_v13 = vpop.eup %9775 }
0x1be8   :  { %v9778_v30 = vpop.eup %9777  ;;  %6413 = vperm.xlu0 %9165, %v9776_v13  }
0x1be9   :  { %6416 = vperm.xlu1 %9166, %v9778_v30   ;;  %v14385_v29 = vpop.eup %9779 }
0x1bea   :  { %v9782_v39 = vpop.eup %9781 }
0x1beb   :  { %v14388_v16 = vpop.eup %9783 }
0x1bec   :  { %6422 = vperm.xlu0 %9165, %v14385_v29   ;;  %v14390_v3 = vpop.eup %9785 }
0x1bed   :  { %6419 = vperm.xlu1 %9166, %v9782_v39   ;;  %v14394_v19 = vpop.eup %9787 }
0x1bee   :  { %v14396_v33 = vpop.eup %9789 }
0x1bf0   :  { %6428 = vperm.xlu0 %9165, %v14388_v16  }
0x1bf1   :  { %6425 = vperm.xlu1 %9166, %v14390_v3  }
0x1bf4   :  { %6434 = vperm.xlu0 %9165, %v14394_v19  }
0x1bf5   :  { %6431 = vperm.xlu1 %9166, %v14396_v33  }
0x1c63   :  { %v6414_v44 = vpop.permute.xlu0 %6413 }
0x1c64   :  { %v6417_v8 = vpop.permute.xlu1 %6416  ;;  %v6439_v4 = vrot.slane %v6414_v44, %v11249_v31 }
0x1c65   :  { %v6443_v54 = vrot.slane %v6417_v8, %v11249_v31 }
0x1c67   :  { %v6423_v17 = vpop.permute.xlu0 %6422  ;;  %v6468_v59 = vsel %vm1080_vm0, %v6443_v54, %v6439_v4 }
0x1c68   :  { %v6420_v28 = vpop.permute.xlu1 %6419  ;;  %v6451_v37 = vrot.slane %v6423_v17, %v11249_v31 }
0x1c69   :  { %v6447_v35 = vrot.slane %v6420_v28, %v11249_v31 }
0x1c6b   :  { %v6469_v11 = vsel %vm1082_vm1, %v6447_v35, %v6468_v59  ;;  %v6429_v12 = vpop.permute.xlu0 %6428 }
0x1c6c   :  { %v6426_v41 = vpop.permute.xlu1 %6425  ;;  %v6470_v55 = vsel %vm1084_vm2, %v6451_v37, %v6469_v11  ;;  %v6459_v56 = vrot.slane %v6429_v12, %v11249_v31 }
0x1c6d   :  { %v6455_v1 = vrot.slane %v6426_v41, %v11249_v31 }
0x1c6f   :  { %v6471_v6 = vsel %vm1086_vm3, %v6455_v1, %v6470_v55  ;;  %v6435_v53 = vpop.permute.xlu0 %6434 }
0x1c70   :  { %v6432_v5 = vpop.permute.xlu1 %6431  ;;  %v6467_v58 = vrot.slane %v6435_v53, %v11249_v31  ;;  %v6472_v2 = vsel %vm1088_vm4, %v6459_v56, %v6471_v6 }
0x1c71   :  { %v6463_v52 = vrot.slane %v6432_v5, %v11249_v31 }
0x1c73   :  { %v6473_v36 = vsel %vm1090_vm5, %v6463_v52, %v6472_v2 }
0x1c74   :  { %v6474_v57 = vsel %vm1092_vm6, %v6467_v58, %v6473_v36 }
0x1c75   :  { %v6476_v44 = vsel %vm1095_vm7, %v6474_v57, 0.0 }
0x1c76   :  { %6477 = vadd.xlane.f32.xlu1 %v6476_v44 }
0x1cff   :  { %v6478_v8 = vpop.xlane.xlu1 %6477 }
0x1d00   :  { %v6483_v54 = vrot.slane %v6478_v8, %v11159_v23  ;;  %v6487_v4 = vrot.slane %v6478_v8, %v11165_v25  ;;  %v6491_v17 = vrot.slane %v6478_v8, %v11179_v38  ;;  %v6495_v28 = vrot.slane %v6478_v8, %v11176_v34 }
0x1d01   :  { %v6499_v35 = vrot.slane %v6478_v8, %v11285_v10  ;;  %v6503_v59 = vrot.slane %v6478_v8, %v11289_v15  ;;  %v6507_v12 = vrot.slane %v6478_v8, %v11293_v20  ;;  %v6511_v6 = vrot.slane %v6478_v8, %v11278_v0 }
0x1d02   :  { %9791 = vrcp.f32 %v6483_v54 }
0x1d03   :  { %9793 = vrcp.f32 %v6487_v4 }
0x1d04   :  { %9795 = vrcp.f32 %v6491_v17 }
0x1d05   :  { %9797 = vrcp.f32 %v6495_v28 }
0x1d06   :  { %9799 = vrcp.f32 %v6499_v35 }
0x1d07   :  { %9801 = vrcp.f32 %v6503_v59 }
0x1d08   :  { %9803 = vrcp.f32 %v6507_v12 }
0x1d09   :  { %9805 = vrcp.f32 %v6511_v6 }
0x1d0f   :  { %v9792_v37 = vpop.eup %9791 }
0x1d10   :  { %v9794_v11 = vpop.eup %9793  ;;  %v6521_v41 = vmul.f32 %v9792_v37, %v9776_v13 }
0x1d11   :  { %v9796_v1 = vpop.eup %9795  ;;  %v6523_v55 = vmul.f32 %v9794_v11, %v9778_v30 }
0x1d12   :  { %v6536_v56 = vpack.c.bf16 %v6521_v41, %v6521_v41  ;;  %v6525_v58 = vmul.f32 %v9796_v1, %v9782_v39  ;;  %v9798_v52 = vpop.eup %9797 }
0x1d13   :  { %v6537_v5 = vpack.c.bf16 %v6523_v55, %v6523_v55  ;;  %v6527_v57 = vmul.f32 %v9798_v52, %v14385_v29  ;;  %v9800_v44 = vpop.eup %9799 }
0x1d14   :  { %v6545_v53 = vunpack.c.l.b16 %v6536_v56  ;;  %v6538_v36 = vpack.c.bf16 %v6525_v58, %v6525_v58  ;;  %v6529_v30 = vmul.f32 %v9800_v44, %v14390_v3  ;;  %v9802_v4 = vpop.eup %9801 }
0x1d15   :  { %v6598_v2 = vunpack.c.l.b16 %v6537_v5  ;;  %v6539_v13 = vpack.c.bf16 %v6527_v57, %v6527_v57  ;;  %v6531_v28 = vmul.f32 %v9802_v4, %v14388_v16  ;;  %v9804_v39 = vpop.eup %9803  ;;  %v10552_v4 = vld [vmem:[%s15538_s11 + $0xe4] ss:$16 sps:$4 sm:$0xff]  }
0x1d16   :  { %6547 = vperm.xlu0 %9165, %v6545_v53   ;;  %v6651_v54 = vunpack.c.l.b16 %v6538_v36  ;;  %v6540_v17 = vpack.c.bf16 %v6529_v30, %v6529_v30  ;;  %v6533_v37 = vmul.f32 %v9804_v39, %v14396_v33  ;;  %v9806_v11 = vpop.eup %9805  ;;  %v14459_v39 = vpack.c.bf16 %v14288_v48, %v14288_v48  ;;  %v10553_v48 = vld [vmem:[%s15538_s11 + $0xe0] ss:$16 sps:$4 sm:$0xff]  }
0x1d17   :  { %v6704_v8 = vunpack.c.l.b16 %v6539_v13  ;;  %v6541_v59 = vpack.c.bf16 %v6531_v28, %v6531_v28  ;;  %v6535_v41 = vmul.f32 %v9806_v11, %v14394_v19 }
0x1d18   :  { %v6757_v35 = vunpack.c.l.b16 %v6540_v17  ;;  %v6542_v12 = vpack.c.bf16 %v6533_v37, %v6533_v37 }
0x1d19   :  { %v6810_v29 = vunpack.c.l.b16 %v6541_v59  ;;  %v6543_v1 = vpack.c.bf16 %v6535_v41, %v6535_v41  ;;  %v10554_v59 = vld [vmem:[%s15538_s11 + $0xc4] ss:$16 sps:$4 sm:$0xff]  }
0x1d1a   :  { %6600 = vperm.xlu0 %9165, %v6598_v2   ;;  %v6863_v3 = vunpack.c.l.b16 %v6542_v12  ;;  %v10556_v12 = vld [vmem:[%s15538_s11 + $0xa4] ss:$16 sps:$4 sm:$0xff]  }
0x1d1b   :  { %v6916_v55 = vunpack.c.l.b16 %v6543_v1  ;;  %v10558_v1 = vld [vmem:[%s15538_s11 + $0xa0] ss:$16 sps:$4 sm:$0xff]  }
0x1d1e   :  { %6653 = vperm.xlu0 %9165, %v6651_v54  }
0x1d22   :  { %6706 = vperm.xlu0 %9165, %v6704_v8  }
0x1d26   :  { %6759 = vperm.xlu0 %9165, %v6757_v35  }
0x1d2a   :  { %6812 = vperm.xlu0 %9165, %v6810_v29   ;;  %v10555_v29 = vld [vmem:[%s15538_s11 + $0xc0] ss:$16 sps:$4 sm:$0xff]  }
0x1d2e   :  { %6865 = vperm.xlu0 %9165, %v6863_v3   ;;  %v10557_v3 = vld [vmem:[%s15538_s11 + $0x2e4] ss:$16 sps:$4 sm:$0xff]  }
0x1d32   :  { %6918 = vperm.xlu0 %9165, %v6916_v55   ;;  %v10559_v55 = vld [vmem:[%s15538_s11 + $0x84] ss:$16 sps:$4 sm:$0xff]  }
0x1d91   :  { %v6548_v56 = vpop.permute.xlu0 %6547 }
0x1d92   :  { %v6552_v16 = vrot.slane %v6548_v56, %v11249_v31 }
0x1d94   :  { %v6553_v6 = vpack.c.b16 %v6552_v16, %v6552_v16  ;;  %v10560_v16 = vld [vmem:[%s15538_s11 + $0x80] ss:$16 sps:$4 sm:$0xff]  }
0x1d95   :  { %v6601_v53 = vpop.permute.xlu0 %6600 }
0x1d96   :  { %9067 = vmatmul.mubr.msk.bf16.vlgmr.msra.gmra.mxu1 %vm1095_vm7, %v6553_v6  ;;  %v6605_v19 = vrot.slane %v6601_v53, %v11249_v31  ;;  %v10561_v6 = vld [vmem:[%s15538_s11 + $0x64] ss:$16 sps:$4 sm:$0xff]   ;;  %v10562_v53 = vld [vmem:[%s15538_s11 + $0x2e0] ss:$16 sps:$4 sm:$0xff]  }
0x1d97   :  { %9071 = vmatpush3.bf16.msra.mxu1 %v11380_v43  ;;  %9072 = vmatprep.mubr.msk.bf16.mxu1 %vm10838_vm9, %v10837_v14 }
0x1d98   :  { %9076 = vmatprep.subr.bf16.mxu1 %v10837_v14  ;;  %v6606_v5 = vpack.c.b16 %v6605_v19, %v6605_v19  ;;  %v10563_v19 = vld [vmem:[%s15538_s11 + $0x2c4] ss:$16 sps:$4 sm:$0xff]  }
0x1d99   :  { %v6654_v33 = vpop.permute.xlu0 %6653 }
0x1d9a   :  { %v6658_v52 = vrot.slane %v6654_v33, %v11249_v31  ;;  %v10564_v33 = vld [vmem:[%s15538_s11 + $0x60] ss:$16 sps:$4 sm:$0xff]  }
0x1d9c   :  { %v6659_v57 = vpack.c.b16 %v6658_v52, %v6658_v52  ;;  %v10567_v52 = vld [vmem:[%s15538_s11 + $0x2a4] ss:$16 sps:$4 sm:$0xff]  }
0x1d9d   :  { %v6707_v58 = vpop.permute.xlu0 %6706 }
0x1d9e   :  { %9073 = vmatmul.mubr.msk.bf16.vlgmr.msra.gmra.mxu1 %vm1095_vm7, %v6606_v5  ;;  %v6711_v13 = vrot.slane %v6707_v58, %v11249_v31  ;;  %v10565_v5 = vld [vmem:[%s15538_s11 + $0x44] ss:$16 sps:$4 sm:$0xff]   ;;  %v10566_v58 = vld [vmem:[%s15538_s11 + $0x2c0] ss:$16 sps:$4 sm:$0xff]  }
0x1d9f   :  { %9077 = vmatpush3.bf16.msra.mxu1 %v11392_v50  ;;  %9078 = vmatprep.mubr.msk.bf16.mxu1 %vm10838_vm9, %v10837_v14 }
0x1da0   :  { %9082 = vmatprep.subr.bf16.mxu1 %v10837_v14  ;;  %v6712_v17 = vpack.c.b16 %v6711_v13, %v6711_v13  ;;  %v10573_v13 = vld [vmem:[%s15538_s11 + $0x4] ss:$16 sps:$4 sm:$0xff]  }
0x1da1   :  { %v6760_v2 = vpop.permute.xlu0 %6759 }
0x1da2   :  { %v6764_v36 = vrot.slane %v6760_v2, %v11249_v31  ;;  %v10568_v2 = vld [vmem:[%s15538_s11 + $0x40] ss:$16 sps:$4 sm:$0xff]  }
0x1da4   :  { %v6765_v44 = vpack.c.b16 %v6764_v36, %v6764_v36  ;;  %v10569_v36 = vld [vmem:[%s15538_s11 + $0x24] ss:$16 sps:$4 sm:$0xff]  }
0x1da5   :  { %v6813_v54 = vpop.permute.xlu0 %6812 }
0x1da6   :  { %9079 = vmatmul.mubr.msk.bf16.vlgmr.msra.gmra.mxu1 %vm1095_vm7, %v6659_v57  ;;  %9091 = vmatmul.mubr.msk.bf16.vlgmr.msra.gmra.mxu0 %vm1095_vm7, %v6765_v44  ;;  %v6817_v35 = vrot.slane %v6813_v54, %v11249_v31  ;;  %v10570_v57 = vld [vmem:[%s15538_s11 + $0x2a0] ss:$16 sps:$4 sm:$0xff]   ;;  %v10571_v44 = vld [vmem:[%s15538_s11 + $0x284] ss:$16 sps:$4 sm:$0xff]  }
0x1da7   :  { %9083 = vmatpush3.bf16.msra.mxu1 %v11408_v60  ;;  %9101 = vmatpush3.bf16.msra.mxu0 %v11411_v61  ;;  %v10572_v54 = vld [vmem:[%s15538_s11 + $0x20] ss:$16 sps:$4 sm:$0xff]  }
0x1da8   :  { %9084 = vmatprep.mubr.msk.bf16.mxu1 %vm10838_vm9, %v10837_v14  ;;  %9094 = vmatprep.subr.bf16.mxu1 %v10837_v14  ;;  %v6818_v37 = vpack.c.b16 %v6817_v35, %v6817_v35  ;;  %v10579_v35 = vld [vmem:[%s15538_s11 + $0x244] ss:$16 sps:$4 sm:$0xff]  }
0x1da9   :  { %v6866_v30 = vpop.permute.xlu0 %6865  ;;  %9102 = vmatprep.mubr.msk.bf16.mxu0 %vm10838_vm9, %v10837_v14  ;;  %6993 = vmatprep.subr.bf16.mxu0 %v10552_v4  ;;  %v10575_v4 = vld [vmem:[%s15538_s11 + $0x264] ss:$16 sps:$4 sm:$0xff]  }
0x1daa   :  { %v6870_v8 = vrot.slane %v6866_v30, %v11249_v31  ;;  %v10574_v30 = vld [vmem:[%s15538_s11 + $0x280] ss:$16 sps:$4 sm:$0xff]  }
0x1dac   :  { %v6871_v28 = vpack.c.b16 %v6870_v8, %v6870_v8  ;;  %v10576_v8 = vld [vmem:[%s15538_s11] ss:$16 sps:$4 sm:$0xff]  }
0x1dad   :  { %v6919_v11 = vpop.permute.xlu0 %6918 }
0x1dae   :  { %9085 = vmatmul.mubr.msk.bf16.vlgmr.msra.gmra.mxu1 %vm1095_vm7, %v6712_v17  ;;  %9103 = vmatmul.mubr.msk.bf16.vlgmr.msra.gmra.mxu0 %vm1095_vm7, %v6871_v28  ;;  %v6923_v41 = vrot.slane %v6919_v11, %v11249_v31  ;;  %v10577_v17 = vld [vmem:[%s15538_s11 + $0x1e4] ss:$16 sps:$4 sm:$0xff]   ;;  %v10578_v28 = vld [vmem:[%s15538_s11 + $0x260] ss:$16 sps:$4 sm:$0xff]  }
0x1daf   :  { %9095 = vmatpush3.bf16.msra.mxu1 %v11431_v21  ;;  %7025 = vmatprep.mubr.bf16.mxu0 %v14459_v39  ;;  %v10583_v11 = vld [vmem:[%s15538_s11 + $0x224] ss:$16 sps:$4 sm:$0xff]  }
0x1db0   :  { %9096 = vmatprep.mubr.msk.bf16.mxu1 %vm10838_vm9, %v10837_v14  ;;  %9106 = vmatprep.subr.bf16.mxu1 %v10837_v14  ;;  %v6924_v56 = vpack.c.b16 %v6923_v41, %v6923_v41  ;;  %v10586_v41 = vld [vmem:[%s15538_s11 + $0x220] ss:$16 sps:$4 sm:$0xff]  }
0x1db1   :  { %6994 = vmatpush1.bf16.msra.mxu0 %v10553_v48  ;;  %v10580_v48 = vld [vmem:[%s15538_s11 + $0x1e0] ss:$16 sps:$4 sm:$0xff]  }
0x1db2   :  { %6995 = vmatprep.subr.bf16.mxu0 %v10554_v59  ;;  %v10581_v59 = vld [vmem:[%s15538_s11 + $0x1c4] ss:$16 sps:$4 sm:$0xff]  }
0x1db5   :  { %6996 = vmatpush1.bf16.msra.mxu0 %v10555_v29  ;;  %v10584_v29 = vld [vmem:[%s15538_s11 + $0x1c0] ss:$16 sps:$4 sm:$0xff]  }
0x1db6   :  { %9097 = vmatmul.mubr.msk.bf16.vlgmr.msra.gmra.mxu1 %vm1095_vm7, %v6818_v37  ;;  %6997 = vmatprep.subr.bf16.mxu0 %v10556_v12  ;;  %v10582_v37 = vld [vmem:[%s15538_s11 + $0x240] ss:$16 sps:$4 sm:$0xff]   ;;  %v10585_v12 = vld [vmem:[%s15538_s11 + $0x1a4] ss:$16 sps:$4 sm:$0xff]  }
0x1db7   :  { %9107 = vmatpush3.bf16.msra.mxu1 %v11456_v24  ;;  %9108 = vmatprep.mubr.msk.bf16.mxu1 %vm10838_vm9, %v10837_v14 }
0x1db8   :  { %7034 = vmatprep.subr.bf16.mxu1 %v10557_v3  ;;  %v10587_v3 = vld [vmem:[%s15538_s11 + $0x204] ss:$16 sps:$4 sm:$0xff]  }
0x1db9   :  { %6998 = vmatpush1.bf16.msra.mxu0 %v10558_v1  ;;  %v10588_v1 = vld [vmem:[%s15538_s11 + $0x1a0] ss:$16 sps:$4 sm:$0xff]  }
0x1dba   :  { %6999 = vmatprep.subr.bf16.mxu0 %v10559_v55  ;;  %v10589_v55 = vld [vmem:[%s15538_s11 + $0x184] ss:$16 sps:$4 sm:$0xff]  }
0x1dbd   :  { %7000 = vmatpush1.bf16.msra.mxu0 %v10560_v16  ;;  %v10591_v16 = vld [vmem:[%s15538_s11 + $0xec] ss:$16 sps:$4 sm:$0xff]  }
0x1dbe   :  { %9109 = vmatmul.mubr.msk.bf16.vlgmr.msra.gmra.mxu1 %vm1095_vm7, %v6924_v56  ;;  %7001 = vmatprep.subr.bf16.mxu0 %v10561_v6  ;;  %v10590_v56 = vld [vmem:[%s15538_s11 + $0x200] ss:$16 sps:$4 sm:$0xff]  }
0x1dbf   :  { %7035 = vmatpush1.bf16.msra.mxu1 %v10562_v53  ;;  %7066 = vmatprep.mubr.bf16.mxu1 %v10835_v63  ;;  %v10592_v6 = vld [vmem:[%s15538_s11 + $0x180] ss:$16 sps:$4 sm:$0xff]   ;;  %v10593_v53 = vld [vmem:[%s15538_s11 + $0x164] ss:$16 sps:$4 sm:$0xff]  }
0x1dc0   :  { %7036 = vmatprep.subr.bf16.mxu1 %v10563_v19  ;;  %v10594_v19 = vld [vmem:[%s15538_s11 + $0xe8] ss:$16 sps:$4 sm:$0xff]  }
0x1dc1   :  { %7002 = vmatpush1.bf16.msra.mxu0 %v10564_v33  ;;  %v10595_v33 = vld [vmem:[%s15538_s11 + $0xcc] ss:$16 sps:$4 sm:$0xff]  }
0x1dc2   :  { %7003 = vmatprep.subr.bf16.mxu0 %v10565_v5  ;;  %v10596_v5 = vld [vmem:[%s15538_s11 + $0x160] ss:$16 sps:$4 sm:$0xff]  }
0x1dc3   :  { %7037 = vmatpush1.bf16.msra.mxu1 %v10566_v58  ;;  %v10597_v58 = vld [vmem:[%s15538_s11 + $0x144] ss:$16 sps:$4 sm:$0xff]  }
0x1dc4   :  { %7038 = vmatprep.subr.bf16.mxu1 %v10567_v52  ;;  %v10599_v52 = vld [vmem:[%s15538_s11 + $0xac] ss:$16 sps:$4 sm:$0xff]  }
0x1dc5   :  { %7004 = vmatpush1.bf16.msra.mxu0 %v10568_v2  ;;  %v10600_v2 = vld [vmem:[%s15538_s11 + $0x140] ss:$16 sps:$4 sm:$0xff]  }
0x1dc6   :  { %7005 = vmatprep.subr.bf16.mxu0 %v10569_v36  ;;  %v10601_v36 = vld [vmem:[%s15538_s11 + $0x124] ss:$16 sps:$4 sm:$0xff]  }
0x1dc7   :  { %7039 = vmatpush1.bf16.msra.mxu1 %v10570_v57  ;;  %v10602_v57 = vld [vmem:[%s15538_s11 + $0xa8] ss:$16 sps:$4 sm:$0xff]  }
0x1dc8   :  { %7040 = vmatprep.subr.bf16.mxu1 %v10571_v44  ;;  %v10603_v44 = vld [vmem:[%s15538_s11 + $0x8c] ss:$16 sps:$4 sm:$0xff]  }
0x1dc9   :  { %7006 = vmatpush1.bf16.msra.mxu0 %v10572_v54  ;;  %v10604_v54 = vld [vmem:[%s15538_s11 + $0x120] ss:$16 sps:$4 sm:$0xff]  }
0x1dca   :  { %7007 = vmatprep.subr.bf16.mxu0 %v10573_v13  ;;  %v10605_v13 = vld [vmem:[%s15538_s11 + $0x104] ss:$16 sps:$4 sm:$0xff]  }
0x1dcb   :  { %7041 = vmatpush1.bf16.msra.mxu1 %v10574_v30  ;;  %v10606_v30 = vld [vmem:[%s15538_s11 + $0x88] ss:$16 sps:$4 sm:$0xff]  }
0x1dcc   :  { %7042 = vmatprep.subr.bf16.mxu1 %v10575_v4  ;;  %v10607_v4 = vld [vmem:[%s15538_s11 + $0x6c] ss:$16 sps:$4 sm:$0xff]  }
0x1dcd   :  { %7008 = vmatpush1.bf16.msra.mxu0 %v10576_v8  ;;  %v10608_v8 = vld [vmem:[%s15538_s11 + $0x100] ss:$16 sps:$4 sm:$0xff]  }
0x1dce   :  { %7009 = vmatprep.subr.bf16.mxu0 %v10577_v17  ;;  %v10609_v17 = vld [vmem:[%s15538_s11 + $0x2ec] ss:$16 sps:$4 sm:$0xff]  }
0x1dcf   :  { %7043 = vmatpush1.bf16.msra.mxu1 %v10578_v28  ;;  %v10610_v28 = vld [vmem:[%s15538_s11 + $0x68] ss:$16 sps:$4 sm:$0xff]  }
0x1dd0   :  { %7044 = vmatprep.subr.bf16.mxu1 %v10579_v35  ;;  %v10611_v35 = vld [vmem:[%s15538_s11 + $0x4c] ss:$16 sps:$4 sm:$0xff]  }
0x1dd1   :  { %7010 = vmatpush2.bf16.msra.mxu0 %v10580_v48  ;;  %v10612_v48 = vld [vmem:[%s15538_s11 + $0x48] ss:$16 sps:$4 sm:$0xff]  }
0x1dd2   :  { %7011 = vmatprep.subr.bf16.mxu0 %v10581_v59  ;;  %v10613_v59 = vld [vmem:[%s15538_s11 + $0x2c] ss:$16 sps:$4 sm:$0xff]  }
0x1dd3   :  { %7045 = vmatpush1.bf16.msra.mxu1 %v10582_v37  ;;  %v10614_v37 = vld [vmem:[%s15538_s11 + $0x28] ss:$16 sps:$4 sm:$0xff]  }
0x1dd4   :  { %7046 = vmatprep.subr.bf16.mxu1 %v10583_v11  ;;  %v10615_v11 = vld [vmem:[%s15538_s11 + $0xc] ss:$16 sps:$4 sm:$0xff]  }
0x1dd5   :  { %7012 = vmatpush2.bf16.msra.mxu0 %v10584_v29  ;;  %v10616_v29 = vld [vmem:[%s15538_s11 + $0x8] ss:$16 sps:$4 sm:$0xff]  }
0x1dd6   :  { %7013 = vmatprep.subr.bf16.mxu0 %v10585_v12  ;;  %v10617_v12 = vld [vmem:[%s15538_s11 + $0x1ec] ss:$16 sps:$4 sm:$0xff]  }
0x1dd7   :  { %7047 = vmatpush1.bf16.msra.mxu1 %v10586_v41  ;;  %v10618_v41 = vld [vmem:[%s15538_s11 + $0x1e8] ss:$16 sps:$4 sm:$0xff]  }
0x1dd8   :  { %7048 = vmatprep.subr.bf16.mxu1 %v10587_v3  ;;  %v10619_v3 = vld [vmem:[%s15538_s11 + $0x1cc] ss:$16 sps:$4 sm:$0xff]  }
0x1dd9   :  { %7014 = vmatpush2.bf16.msra.mxu0 %v10588_v1  ;;  %v10620_v1 = vld [vmem:[%s15538_s11 + $0x1c8] ss:$16 sps:$4 sm:$0xff]  }
0x1dda   :  { %7015 = vmatprep.subr.bf16.mxu0 %v10589_v55  ;;  %v10621_v55 = vld [vmem:[%s15538_s11 + $0x1ac] ss:$16 sps:$4 sm:$0xff]  }
0x1ddb   :  { %7049 = vmatpush1.bf16.msra.mxu1 %v10590_v56  ;;  %v10622_v56 = vld [vmem:[%s15538_s11 + $0x1a8] ss:$16 sps:$4 sm:$0xff]  }
0x1ddc   :  { %7075 = vmatprep.subr.bf16.mxu1 %v10591_v16  ;;  %v10623_v16 = vld [vmem:[%s15538_s11 + $0x18c] ss:$16 sps:$4 sm:$0xff]  }
0x1ddd   :  { %7016 = vmatpush2.bf16.msra.mxu0 %v10592_v6  ;;  %v10624_v6 = vld [vmem:[%s15538_s11 + $0x188] ss:$16 sps:$4 sm:$0xff]  }
0x1dde   :  { %7067 = vmatmul.mubr.bf16.vlgmr.msra.gmra.mxu1 %v14302_v47  ;;  %7017 = vmatprep.subr.bf16.mxu0 %v10593_v53  ;;  %v10625_v53 = vld [vmem:[%s15538_s11 + $0x16c] ss:$16 sps:$4 sm:$0xff]  }
0x1ddf   :  { %7107 = vmatprep.mubr.bf16.mxu1 %v14459_v39  ;;  %7076 = vmatpush1.bf16.msra.mxu1 %v10594_v19  ;;  %v10598_v39 = vld [vmem:[%s15538_s11 + $0xc8] ss:$16 sps:$4 sm:$0xff]  }
0x1de0   :  { %7077 = vmatprep.subr.bf16.mxu1 %v10595_v33  ;;  %v10626_v19 = vld [vmem:[%s15538_s11 + $0x168] ss:$16 sps:$4 sm:$0xff]   ;;  %v10627_v33 = vld [vmem:[%s15538_s11 + $0x14c] ss:$16 sps:$4 sm:$0xff]  }
0x1de1   :  { %7018 = vmatpush2.bf16.msra.mxu0 %v10596_v5  ;;  %v10628_v5 = vld [vmem:[%s15538_s11 + $0x148] ss:$16 sps:$4 sm:$0xff]  }
0x1de2   :  { %7019 = vmatprep.subr.bf16.mxu0 %v10597_v58  ;;  %v10629_v58 = vld [vmem:[%s15538_s11 + $0x12c] ss:$16 sps:$4 sm:$0xff]  }
0x1de3   :  { %7078 = vmatpush1.bf16.msra.mxu1 %v10598_v39  ;;  %v10630_v39 = vld [vmem:[%s15538_s11 + $0x128] ss:$16 sps:$4 sm:$0xff]  }
0x1de4   :  { %7079 = vmatprep.subr.bf16.mxu1 %v10599_v52  ;;  %v10631_v52 = vld [vmem:[%s15538_s11 + $0x10c] ss:$16 sps:$4 sm:$0xff]  }
0x1de5   :  { %7020 = vmatpush2.bf16.msra.mxu0 %v10600_v2  ;;  %v10632_v2 = vld [vmem:[%s15538_s11 + $0x108] ss:$16 sps:$4 sm:$0xff]  }
0x1de6   :  { %7021 = vmatprep.subr.bf16.mxu0 %v10601_v36  ;;  %v10633_v36 = vld [vmem:[%s15528_s5 + $0xec] ss:$16 sps:$4 sm:$0xff]  }
0x1de7   :  { %7080 = vmatpush1.bf16.msra.mxu1 %v10602_v57 }
0x1de8   :  { %7081 = vmatprep.subr.bf16.mxu1 %v10603_v44 }
0x1de9   :  { %7022 = vmatpush2.bf16.msra.mxu0 %v10604_v54 }
0x1dea   :  { %7023 = vmatprep.subr.bf16.mxu0 %v10605_v13 }
0x1deb   :  { %7082 = vmatpush1.bf16.msra.mxu1 %v10606_v30 }
0x1dec   :  { %7083 = vmatprep.subr.bf16.mxu1 %v10607_v4 }
0x1ded   :  { %7024 = vmatpush2.bf16.msra.mxu0 %v10608_v8 }
0x1dee   :  { %7116 = vmatprep.subr.bf16.mxu0 %v10609_v17 }
0x1def   :  { %7084 = vmatpush1.bf16.msra.mxu1 %v10610_v28 }
0x1df0   :  { %7085 = vmatprep.subr.bf16.mxu1 %v10611_v35 }
0x1df3   :  { %7086 = vmatpush1.bf16.msra.mxu1 %v10612_v48 }
0x1df4   :  { %7087 = vmatprep.subr.bf16.mxu1 %v10613_v59 }
0x1df7   :  { %7088 = vmatpush1.bf16.msra.mxu1 %v10614_v37 }
0x1df8   :  { %7089 = vmatprep.subr.bf16.mxu1 %v10615_v11 }
0x1dfb   :  { %7090 = vmatpush1.bf16.msra.mxu1 %v10616_v29 }
0x1dfc   :  { %7091 = vmatprep.subr.bf16.mxu1 %v10617_v12 }
0x1dff   :  { %7092 = vmatpush2.bf16.msra.mxu1 %v10618_v41 }
0x1e00   :  { %7093 = vmatprep.subr.bf16.mxu1 %v10619_v3 }
0x1e03   :  { %7094 = vmatpush2.bf16.msra.mxu1 %v10620_v1 }
0x1e04   :  { %7095 = vmatprep.subr.bf16.mxu1 %v10621_v55 }
0x1e07   :  { %7096 = vmatpush2.bf16.msra.mxu1 %v10622_v56 }
0x1e08   :  { %7097 = vmatprep.subr.bf16.mxu1 %v10623_v16 }
0x1e0b   :  { %7098 = vmatpush2.bf16.msra.mxu1 %v10624_v6 }
0x1e0c   :  { %7099 = vmatprep.subr.bf16.mxu1 %v10625_v53 }
0x1e0f   :  { %7100 = vmatpush2.bf16.msra.mxu1 %v10626_v19 }
0x1e10   :  { %7101 = vmatprep.subr.bf16.mxu1 %v10627_v33 }
0x1e13   :  { %7102 = vmatpush2.bf16.msra.mxu1 %v10628_v5 }
0x1e14   :  { %7103 = vmatprep.subr.bf16.mxu1 %v10629_v58 }
0x1e17   :  { %7104 = vmatpush2.bf16.msra.mxu1 %v10630_v39 }
0x1e18   :  { %7105 = vmatprep.subr.bf16.mxu1 %v10631_v52 }
0x1e1b   :  { %7106 = vmatpush2.bf16.msra.mxu1 %v10632_v2 }
0x1e1c   :  { %7227 = vmatprep.subr.bf16.mxu1 %v10633_v36 }
0x1e56   :  { %v6591_v57 = vpop.f32.mrf.mxu1 }
0x1e58   :  { %v9068_v44 = vpop.f32.mrf.mxu1 }
0x1e5a   :  { %v6594_v54 = vpop.f32.mrf.mxu1 }
0x1e5c   :  { %v9069_v13 = vpop.f32.mrf.mxu1 }
0x1e5e   :  { %v6644_v30 = vpop.f32.mrf.mxu1 }
0x1e5f   :  { %v6976_v6 = vrot.slane %v6644_v30, 7 }
0x1e60   :  { %v9074_v4 = vpop.f32.mrf.mxu1 }
0x1e61   :  { %v6977_v39 = vsel %vm1080_vm0, %v6976_v6, %v6591_v57  ;;  %v10641_v6 = vld [vmem:[%s15528_s5 + $0xac] ss:$16 sps:$4 sm:$0xff]  }
0x1e62   :  { %v6647_v8 = vpop.f32.mrf.mxu1 }
0x1e64   :  { %v9075_v17 = vpop.f32.mrf.mxu1 }
0x1e66   :  { %v6697_v28 = vpop.f32.mrf.mxu1  ;;  %v6803_v35 = vpop.f32.mrf.mxu0 }
0x1e67   :  { %v6978_v53 = vrot.slane %v6697_v28, 6  ;;  %v6982_v54 = vrot.slane %v6803_v35, 4  ;;  %v10634_v35 = vld [vmem:[%s15538_s11 + $0x2e8] ss:$16 sps:$4 sm:$0xff]  }
0x1e68   :  { %v9080_v48 = vpop.f32.mrf.mxu1  ;;  %v9092_v59 = vpop.f32.mrf.mxu0 }
0x1e69   :  { %v6979_v52 = vsel %vm1082_vm1, %v6978_v53, %v6977_v39  ;;  %v10642_v53 = vld [vmem:[%s15538_s11 + $0x2a8] ss:$16 sps:$4 sm:$0xff]   ;;  %v10647_v39 = vld [vmem:[%s15538_s11 + $0x26c] ss:$16 sps:$4 sm:$0xff]  }
0x1e6a   :  { %v6700_v37 = vpop.f32.mrf.mxu1  ;;  %v6806_v11 = vpop.f32.mrf.mxu0 }
0x1e6c   :  { %v9081_v29 = vpop.f32.mrf.mxu1  ;;  %v9093_v12 = vpop.f32.mrf.mxu0 }
0x1e6e   :  { %v6750_v41 = vpop.f32.mrf.mxu1  ;;  %v6909_v3 = vpop.f32.mrf.mxu0 }
0x1e6f   :  { %v6980_v5 = vrot.slane %v6750_v41, 5  ;;  %v6986_v17 = vrot.slane %v6909_v3, 2  ;;  %v10635_v41 = vld [vmem:[%s15538_s11 + $0x2cc] ss:$16 sps:$4 sm:$0xff]   ;;  %v10636_v3 = vld [vmem:[%s15528_s5 + $0xe8] ss:$16 sps:$4 sm:$0xff]  }
0x1e70   :  { %v9086_v1 = vpop.f32.mrf.mxu1  ;;  %v9104_v55 = vpop.f32.mrf.mxu0 }
0x1e71   :  { %v6981_v36 = vsel %vm1084_vm2, %v6980_v5, %v6979_v52  ;;  %v10637_v1 = vld [vmem:[%s15528_s5 + $0xcc] ss:$16 sps:$4 sm:$0xff]   ;;  %v10638_v55 = vld [vmem:[%s15538_s11 + $0x2c8] ss:$16 sps:$4 sm:$0xff]  }
0x1e72   :  { %v6753_v56 = vpop.f32.mrf.mxu1  ;;  %v6912_v16 = vpop.f32.mrf.mxu0  ;;  %v6983_v4 = vsel %vm1086_vm3, %v6982_v54, %v6981_v36  ;;  %v10645_v5 = vld [vmem:[%s15528_s5 + $0x8c] ss:$16 sps:$4 sm:$0xff]   ;;  %v10648_v52 = vld [vmem:[%s15528_s5 + $0x88] ss:$16 sps:$4 sm:$0xff]  }
0x1e73   :  { %v10639_v56 = vld [vmem:[%s15538_s11 + $0x2ac] ss:$16 sps:$4 sm:$0xff]   ;;  %v10640_v16 = vld [vmem:[%s15528_s5 + $0xc8] ss:$16 sps:$4 sm:$0xff]  }
0x1e74   :  { %v9087_v19 = vpop.f32.mrf.mxu1  ;;  %v9105_v33 = vpop.f32.mrf.mxu0  ;;  %v10650_v36 = vld [vmem:[%s15538_s11 + $0x268] ss:$16 sps:$4 sm:$0xff]  }
0x1e75   :  { %v10643_v19 = vld [vmem:[%s15538_s11 + $0x28c] ss:$16 sps:$4 sm:$0xff]   ;;  %v10644_v33 = vld [vmem:[%s15528_s5 + $0xa8] ss:$16 sps:$4 sm:$0xff]  }
0x1e76   :  { %v6856_v58 = vpop.f32.mrf.mxu1  ;;  %v10652_v54 = vld [vmem:[%s15528_s5 + $0x68] ss:$16 sps:$4 sm:$0xff]  }
0x1e77   :  { %v6984_v44 = vrot.slane %v6856_v58, 3  ;;  %v10646_v58 = vld [vmem:[%s15538_s11 + $0x288] ss:$16 sps:$4 sm:$0xff]  }
0x1e78   :  { %v9098_v2 = vpop.f32.mrf.mxu1 }
0x1e79   :  { %v6985_v30 = vsel %vm1088_vm4, %v6984_v44, %v6983_v4  ;;  %v10649_v2 = vld [vmem:[%s15528_s5 + $0x6c] ss:$16 sps:$4 sm:$0xff]   ;;  %v10654_v4 = vld [vmem:[%s15538_s11 + $0x248] ss:$16 sps:$4 sm:$0xff]  }
0x1e7a   :  { %v6859_v13 = vpop.f32.mrf.mxu1  ;;  %v6987_v59 = vsel %vm1090_vm5, %v6986_v17, %v6985_v30  ;;  %v10651_v44 = vld [vmem:[%s15538_s11 + $0x24c] ss:$16 sps:$4 sm:$0xff]   ;;  %v10656_v30 = vld [vmem:[%s15528_s5 + $0x48] ss:$16 sps:$4 sm:$0xff]  }
0x1e7b   :  { %v10653_v13 = vld [vmem:[%s15528_s5 + $0x4c] ss:$16 sps:$4 sm:$0xff]  }
0x1e7c   :  { %v9099_v8 = vpop.f32.mrf.mxu1  ;;  %v10657_v17 = vld [vmem:[%s15528_s5 + $0x2c] ss:$16 sps:$4 sm:$0xff]  }
0x1e7d   :  { %v10655_v8 = vld [vmem:[%s15538_s11 + $0x22c] ss:$16 sps:$4 sm:$0xff]  }
0x1e7e   :  { %v6962_v28 = vpop.f32.mrf.mxu1 }
0x1e7f   :  { %v6988_v48 = vrot.slane %v6962_v28, 1  ;;  %v10658_v28 = vld [vmem:[%s15538_s11 + $0x228] ss:$16 sps:$4 sm:$0xff]  }
0x1e80   :  { %v9110_v37 = vpop.f32.mrf.mxu1 }
0x1e81   :  { %v6989_v57 = vsel %vm1092_vm6, %v6988_v48, %v6987_v59  ;;  %v10659_v59 = vld [vmem:[%s15538_s11 + $0x20c] ss:$16 sps:$4 sm:$0xff]   ;;  %v10660_v37 = vld [vmem:[%s15528_s5 + $0x28] ss:$16 sps:$4 sm:$0xff]  }
0x1e82   :  { %v6991_v11 = vpack.c.bf16 %v6989_v57, %v6989_v57  ;;  %v6965_v29 = vpop.f32.mrf.mxu1 }
0x1e83   :  { %v10662_v29 = vld [vmem:[%s15538_s11 + $0x208] ss:$16 sps:$4 sm:$0xff]  }
0x1e84   :  { %v9111_v12 = vpop.f32.mrf.mxu1  ;;  %7026 = vmatmul.mubr.bf16.vlgmr.msra.gmra.mxu0 %v6991_v11  ;;  %7108 = vmatmul.mubr.bf16.vlgmr.msra.gmra.mxu1 %v6991_v11  ;;  %v10661_v11 = vld [vmem:[%s15528_s5 + $0xc] ss:$16 sps:$4 sm:$0xff]  }
0x1e85   :  { %7117 = vmatpush1.bf16.msra.mxu0 %v10634_v35  ;;  %7259 = vmatprep.mubr.bf16.mxu1 %v14302_v47  ;;  %v10663_v35 = vld [vmem:[%s15528_s5 + $0xe4] ss:$16 sps:$4 sm:$0xff]  }
0x1e86   :  { %7118 = vmatprep.subr.bf16.mxu0 %v10635_v41  ;;  %7148 = vmatprep.mubr.bf16.mxu0 %v10835_v63  ;;  %v10664_v41 = vld [vmem:[%s15528_s5 + $0x8] ss:$16 sps:$4 sm:$0xff]  }
0x1e87   :  { %7228 = vmatpush1.bf16.msra.mxu1 %v10636_v3 }
0x1e88   :  { %7229 = vmatprep.subr.bf16.mxu1 %v10637_v1  ;;  %v10665_v1 = vld [vmem:[%s15528_s5 + $0x1ec] ss:$16 sps:$4 sm:$0xff]  }
0x1e89   :  { %7119 = vmatpush1.bf16.msra.mxu0 %v10638_v55  ;;  %v10666_v55 = vld [vmem:[%s15528_s5 + $0xe0] ss:$16 sps:$4 sm:$0xff]  }
0x1e8a   :  { %7120 = vmatprep.subr.bf16.mxu0 %v10639_v56  ;;  %v10667_v56 = vld [vmem:[%s15528_s5 + $0xc4] ss:$16 sps:$4 sm:$0xff]  }
0x1e8b   :  { %7230 = vmatpush1.bf16.msra.mxu1 %v10640_v16  ;;  %v10668_v16 = vld [vmem:[%s15528_s5 + $0x1e8] ss:$16 sps:$4 sm:$0xff]  }
0x1e8c   :  { %7231 = vmatprep.subr.bf16.mxu1 %v10641_v6  ;;  %v10669_v6 = vld [vmem:[%s15528_s5 + $0x1cc] ss:$16 sps:$4 sm:$0xff]  }
0x1e8d   :  { %7121 = vmatpush1.bf16.msra.mxu0 %v10642_v53  ;;  %v10670_v53 = vld [vmem:[%s15528_s5 + $0xc0] ss:$16 sps:$4 sm:$0xff]  }
0x1e8e   :  { %7122 = vmatprep.subr.bf16.mxu0 %v10643_v19  ;;  %v10672_v19 = vld [vmem:[%s15528_s5 + $0x1c8] ss:$16 sps:$4 sm:$0xff]  }
0x1e8f   :  { %7232 = vmatpush1.bf16.msra.mxu1 %v10644_v33  ;;  %v10673_v33 = vld [vmem:[%s15528_s5 + $0x1ac] ss:$16 sps:$4 sm:$0xff]  }
0x1e90   :  { %7233 = vmatprep.subr.bf16.mxu1 %v10645_v5  ;;  %v10674_v5 = vld [vmem:[%s15528_s5 + $0xa0] ss:$16 sps:$4 sm:$0xff]  }
0x1e91   :  { %7123 = vmatpush1.bf16.msra.mxu0 %v10646_v58  ;;  %v10675_v58 = vld [vmem:[%s15528_s5 + $0x84] ss:$16 sps:$4 sm:$0xff]  }
0x1e92   :  { %7124 = vmatprep.subr.bf16.mxu0 %v10647_v39  ;;  %v10676_v39 = vld [vmem:[%s15528_s5 + $0x1a8] ss:$16 sps:$4 sm:$0xff]  }
0x1e93   :  { %7234 = vmatpush1.bf16.msra.mxu1 %v10648_v52  ;;  %v10677_v52 = vld [vmem:[%s15528_s5 + $0x18c] ss:$16 sps:$4 sm:$0xff]  }
0x1e94   :  { %7235 = vmatprep.subr.bf16.mxu1 %v10649_v2  ;;  %v10678_v2 = vld [vmem:[%s15528_s5 + $0x80] ss:$16 sps:$4 sm:$0xff]  }
0x1e95   :  { %7125 = vmatpush1.bf16.msra.mxu0 %v10650_v36  ;;  %v10679_v36 = vld [vmem:[%s15528_s5 + $0x64] ss:$16 sps:$4 sm:$0xff]  }
0x1e96   :  { %7126 = vmatprep.subr.bf16.mxu0 %v10651_v44  ;;  %v10680_v44 = vld [vmem:[%s15528_s5 + $0x188] ss:$16 sps:$4 sm:$0xff]  }
0x1e97   :  { %7236 = vmatpush1.bf16.msra.mxu1 %v10652_v54  ;;  %v10681_v54 = vld [vmem:[%s15528_s5 + $0x16c] ss:$16 sps:$4 sm:$0xff]  }
0x1e98   :  { %7237 = vmatprep.subr.bf16.mxu1 %v10653_v13  ;;  %v10682_v13 = vld [vmem:[%s15528_s5 + $0x60] ss:$16 sps:$4 sm:$0xff]  }
0x1e99   :  { %7127 = vmatpush1.bf16.msra.mxu0 %v10654_v4  ;;  %v10683_v4 = vld [vmem:[%s15528_s5 + $0x44] ss:$16 sps:$4 sm:$0xff]  }
0x1e9a   :  { %7128 = vmatprep.subr.bf16.mxu0 %v10655_v8  ;;  %v10684_v8 = vld [vmem:[%s15528_s5 + $0x168] ss:$16 sps:$4 sm:$0xff]  }
0x1e9b   :  { %7238 = vmatpush1.bf16.msra.mxu1 %v10656_v30  ;;  %v10685_v30 = vld [vmem:[%s15528_s5 + $0x14c] ss:$16 sps:$4 sm:$0xff]  }
0x1e9c   :  { %7239 = vmatprep.subr.bf16.mxu1 %v10657_v17  ;;  %v10686_v17 = vld [vmem:[%s15528_s5 + $0x40] ss:$16 sps:$4 sm:$0xff]  }
0x1e9d   :  { %7129 = vmatpush1.bf16.msra.mxu0 %v10658_v28  ;;  %v10687_v28 = vld [vmem:[%s15528_s5 + $0x24] ss:$16 sps:$4 sm:$0xff]  }
0x1e9e   :  { %v14805_v48 = vpop.f32.mrf.mxu1  ;;  %7130 = vmatprep.subr.bf16.mxu0 %v10659_v59  ;;  %v10688_v59 = vld [vmem:[%s15528_s5 + $0x148] ss:$16 sps:$4 sm:$0xff]  }
0x1e9f   :  { %7240 = vmatpush1.bf16.msra.mxu1 %v10660_v37  ;;  %v10689_v37 = vld [vmem:[%s15528_s5 + $0x12c] ss:$16 sps:$4 sm:$0xff]  }
0x1ea0   :  { %v14813_v57 = vpop.f32.mrf.mxu1  ;;  %7241 = vmatprep.subr.bf16.mxu1 %v10661_v11  ;;  %v10690_v11 = vld [vmem:[%s15528_s5 + $0x20] ss:$16 sps:$4 sm:$0xff]  }
0x1ea1   :  { %7131 = vmatpush1.bf16.msra.mxu0 %v10662_v29  ;;  %v10691_v29 = vld [vmem:[%s15528_s5 + $0x4] ss:$16 sps:$4 sm:$0xff]  }
0x1ea2   :  { %v7072_v12 = vpop.f32.mrf.mxu1  ;;  %7186 = vmatprep.subr.bf16.mxu0 %v10663_v35  ;;  %v10693_v35 = vld [vmem:[%s15528_s5 + $0x10c] ss:$16 sps:$4 sm:$0xff]  }
0x1ea3   :  { %7242 = vmatpush1.bf16.msra.mxu1 %v10664_v41  ;;  %v10692_v12 = vld [vmem:[%s15528_s5 + $0x128] ss:$16 sps:$4 sm:$0xff]   ;;  %v10694_v41 = vld [vmem:[%s15528_s5] ss:$16 sps:$4 sm:$0xff]  }
0x1ea4   :  { %v7073_v3 = vpop.f32.mrf.mxu1  ;;  %7149 = vmatmul.mubr.bf16.vlgmr.msra.gmra.mxu0 %v14302_v47  ;;  %7243 = vmatprep.subr.bf16.mxu1 %v10665_v1  ;;  %v10695_v1 = vld [vmem:[%s15528_s5 + $0x1e4] ss:$16 sps:$4 sm:$0xff]  }
0x1ea5   :  { %7187 = vmatpush1.bf16.msra.mxu0 %v10666_v55  ;;  %7218 = vmatprep.mubr.bf16.mxu0 %v14302_v47  ;;  %v10671_v47 = vld [vmem:[%s15528_s5 + $0xa4] ss:$16 sps:$4 sm:$0xff]   ;;  %v8628_v3 = vld [vmem:[%s15529_s0 + $0x28] sm:$0xff] }
0x1ea6   :  { %7188 = vmatprep.subr.bf16.mxu0 %v10667_v56  ;;  %v10696_v55 = vld [vmem:[%s15528_s5 + $0x108] ss:$16 sps:$4 sm:$0xff]   ;;  %v7185_v56 = vpack.c.bf16 %v8628_v3, %v8628_v3 }
0x1ea7   :  { %7244 = vmatpush2.bf16.msra.mxu1 %v10668_v16  ;;  %v10697_v16 = vld [vmem:[%s15528_s5 + $0x1e0] ss:$16 sps:$4 sm:$0xff]   ;;  %v10725_v3 = vld [vmem:[%s15530_s7 + $0x8] sm:$0xff]  }
0x1ea8   :  { %7245 = vmatprep.subr.bf16.mxu1 %v10669_v6  ;;  %v10698_v6 = vld [vmem:[%s15528_s5 + $0x1c4] ss:$16 sps:$4 sm:$0xff]  }
0x1ea9   :  { %7189 = vmatpush1.bf16.msra.mxu0 %v10670_v53  ;;  %v10699_v53 = vld [vmem:[%s15528_s5 + $0x1c0] ss:$16 sps:$4 sm:$0xff]  }
0x1eaa   :  { %7190 = vmatprep.subr.bf16.mxu0 %v10671_v47  ;;  %v10700_v47 = vld [vmem:[%s15528_s5 + $0x1a4] ss:$16 sps:$4 sm:$0xff]  }
0x1eab   :  { %7246 = vmatpush2.bf16.msra.mxu1 %v10672_v19  ;;  %v10701_v19 = vld [vmem:[%s15528_s5 + $0x1a0] ss:$16 sps:$4 sm:$0xff]  }
0x1eac   :  { %7247 = vmatprep.subr.bf16.mxu1 %v10673_v33  ;;  %v10703_v33 = vld [vmem:[%s15528_s5 + $0x180] ss:$16 sps:$4 sm:$0xff]  }
0x1ead   :  { %7191 = vmatpush1.bf16.msra.mxu0 %v10674_v5  ;;  %v10704_v5 = vld [vmem:[%s15528_s5 + $0x164] ss:$16 sps:$4 sm:$0xff]  }
0x1eae   :  { %7192 = vmatprep.subr.bf16.mxu0 %v10675_v58  ;;  %v10705_v58 = vld [vmem:[%s15528_s5 + $0x160] ss:$16 sps:$4 sm:$0xff]  }
0x1eaf   :  { %7248 = vmatpush2.bf16.msra.mxu1 %v10676_v39  ;;  %v10706_v39 = vld [vmem:[%s15528_s5 + $0x144] ss:$16 sps:$4 sm:$0xff]  }
0x1eb0   :  { %7249 = vmatprep.subr.bf16.mxu1 %v10677_v52  ;;  %v10707_v52 = vld [vmem:[%s15528_s5 + $0x140] ss:$16 sps:$4 sm:$0xff]  }
0x1eb1   :  { %7193 = vmatpush1.bf16.msra.mxu0 %v10678_v2  ;;  %v10708_v2 = vld [vmem:[%s15528_s5 + $0x124] ss:$16 sps:$4 sm:$0xff]  }
0x1eb2   :  { %7194 = vmatprep.subr.bf16.mxu0 %v10679_v36  ;;  %v10709_v36 = vld [vmem:[%s15528_s5 + $0x120] ss:$16 sps:$4 sm:$0xff]  }
0x1eb3   :  { %7250 = vmatpush2.bf16.msra.mxu1 %v10680_v44  ;;  %v10710_v44 = vld [vmem:[%s15528_s5 + $0x104] ss:$16 sps:$4 sm:$0xff]  }
0x1eb4   :  { %7251 = vmatprep.subr.bf16.mxu1 %v10681_v54  ;;  %v10711_v54 = vld [vmem:[%s15528_s5 + $0x100] ss:$16 sps:$4 sm:$0xff]  }
0x1eb5   :  { %7195 = vmatpush1.bf16.msra.mxu0 %v10682_v13  ;;  %v10712_v13 = vld [vmem:[%s15530_s7 + $0x78] sm:$0xff]  }
0x1eb6   :  { %7196 = vmatprep.subr.bf16.mxu0 %v10683_v4  ;;  %v10713_v4 = vld [vmem:[%s15530_s7 + $0x38] sm:$0xff]  }
0x1eb7   :  { %7252 = vmatpush2.bf16.msra.mxu1 %v10684_v8  ;;  %v10714_v8 = vld [vmem:[%s15530_s7 + $0x70] sm:$0xff]  }
0x1eb8   :  { %7253 = vmatprep.subr.bf16.mxu1 %v10685_v30  ;;  %v10715_v30 = vld [vmem:[%s15530_s7 + $0x30] sm:$0xff]  }
0x1eb9   :  { %7197 = vmatpush1.bf16.msra.mxu0 %v10686_v17  ;;  %v10716_v17 = vld [vmem:[%s15530_s7 + $0x68] sm:$0xff]  }
0x1eba   :  { %7198 = vmatprep.subr.bf16.mxu0 %v10687_v28  ;;  %v10717_v28 = vld [vmem:[%s15530_s7 + $0x28] sm:$0xff]  }
0x1ebb   :  { %7254 = vmatpush2.bf16.msra.mxu1 %v10688_v59  ;;  %v10718_v59 = vld [vmem:[%s15530_s7 + $0x60] sm:$0xff]  }
0x1ebc   :  { %7255 = vmatprep.subr.bf16.mxu1 %v10689_v37  ;;  %v10719_v37 = vld [vmem:[%s15530_s7 + $0x20] sm:$0xff]  }
0x1ebd   :  { %7199 = vmatpush1.bf16.msra.mxu0 %v10690_v11  ;;  %v10720_v11 = vld [vmem:[%s15530_s7 + $0x58] sm:$0xff]  }
0x1ebe   :  { %7200 = vmatprep.subr.bf16.mxu0 %v10691_v29  ;;  %v10721_v29 = vld [vmem:[%s15530_s7 + $0x18] sm:$0xff]  }
0x1ebf   :  { %7256 = vmatpush2.bf16.msra.mxu1 %v10692_v12  ;;  %v10722_v12 = vld [vmem:[%s15530_s7 + $0x50] sm:$0xff]  }
0x1ec0   :  { %7257 = vmatprep.subr.bf16.mxu1 %v10693_v35  ;;  %v10723_v35 = vld [vmem:[%s15530_s7 + $0x10] sm:$0xff]  }
0x1ec1   :  { %7201 = vmatpush1.bf16.msra.mxu0 %v10694_v41  ;;  %v10724_v41 = vld [vmem:[%s15530_s7 + $0x48] sm:$0xff]  }
0x1ec2   :  { %7202 = vmatprep.subr.bf16.mxu0 %v10695_v1  ;;  %v10726_v1 = vld [vmem:[%s15530_s7 + $0x40] sm:$0xff]  }
0x1ec3   :  { %7258 = vmatpush2.bf16.msra.mxu1 %v10696_v55  ;;  %v10727_v55 = vld [vmem:[%s15530_s7] sm:$0xff]  }
0x1ec4   :  { %9112 = vmatprep.subr.bf16.mxu1 %v10837_v14 }
0x1ec5   :  { %7203 = vmatpush2.bf16.msra.mxu0 %v10697_v16 }
0x1ec6   :  { %7204 = vmatprep.subr.bf16.mxu0 %v10698_v6  ;;  %7260 = vmatmul.mubr.bf16.vlgmr.msra.gmra.mxu1 %v7185_v56 }
0x1ec7   :  { %9113 = vmatpush3.bf16.msra.mxu1 %v11343_v18  ;;  %9114 = vmatprep.mubr.msk.bf16.mxu1 %vm10838_vm9, %v10837_v14  ;;  %v10702_v18 = vld [vmem:[%s15528_s5 + $0x184] ss:$16 sps:$4 sm:$0xff]  }
0x1ec8   :  { %9118 = vmatprep.subr.bf16.mxu1 %v10837_v14 }
0x1ec9   :  { %7205 = vmatpush2.bf16.msra.mxu0 %v10699_v53 }
0x1eca   :  { %7206 = vmatprep.subr.bf16.mxu0 %v10700_v47 }
0x1ecd   :  { %7207 = vmatpush2.bf16.msra.mxu0 %v10701_v19 }
0x1ece   :  { %7208 = vmatprep.subr.bf16.mxu0 %v10702_v18 }
0x1ed1   :  { %7209 = vmatpush2.bf16.msra.mxu0 %v10703_v33 }
0x1ed2   :  { %7210 = vmatprep.subr.bf16.mxu0 %v10704_v5 }
0x1ed5   :  { %7211 = vmatpush2.bf16.msra.mxu0 %v10705_v58 }
0x1ed6   :  { %7212 = vmatprep.subr.bf16.mxu0 %v10706_v39 }
0x1ed9   :  { %7213 = vmatpush2.bf16.msra.mxu0 %v10707_v52 }
0x1eda   :  { %7214 = vmatprep.subr.bf16.mxu0 %v10708_v2 }
0x1edd   :  { %7215 = vmatpush2.bf16.msra.mxu0 %v10709_v36 }
0x1ede   :  { %7216 = vmatprep.subr.bf16.mxu0 %v10710_v44 }
0x1ee1   :  { %7217 = vmatpush2.bf16.msra.mxu0 %v10711_v54 }
0x1ee2   :  { %8834 = vmatprep.subr.bf16.mxu0 %v10712_v13 }
0x1ee4   :  { %7219 = vmatmul.mubr.bf16.vlgmr.msra.gmra.mxu0 %v7185_v56 }
0x1ee5   :  { %8835 = vmatpush3.bf16.msra.mxu0 %v10713_v4 }
0x1ee6   :  { %8836 = vmatprep.subr.bf16.mxu0 %v10714_v8 }
0x1ee9   :  { %8837 = vmatpush3.bf16.msra.mxu0 %v10715_v30 }
0x1eea   :  { %8838 = vmatprep.subr.bf16.mxu0 %v10716_v17 }
0x1eed   :  { %8839 = vmatpush3.bf16.msra.mxu0 %v10717_v28 }
0x1eee   :  { %8840 = vmatprep.subr.bf16.mxu0 %v10718_v59 }
0x1ef1   :  { %8841 = vmatpush3.bf16.msra.mxu0 %v10719_v37 }
0x1ef2   :  { %8842 = vmatprep.subr.bf16.mxu0 %v10720_v11 }
0x1ef5   :  { %8843 = vmatpush3.bf16.msra.mxu0 %v10721_v29 }
0x1ef6   :  { %8844 = vmatprep.subr.bf16.mxu0 %v10722_v12 }
0x1ef9   :  { %8845 = vmatpush3.bf16.msra.mxu0 %v10723_v35 }
0x1efa   :  { %8846 = vmatprep.subr.bf16.mxu0 %v10724_v41 }
0x1efd   :  { %8847 = vmatpush3.bf16.msra.mxu0 %v10725_v3 }
0x1efe   :  { %8848 = vmatprep.subr.bf16.mxu0 %v10726_v1 }
0x1f01   :  { %8849 = vmatpush3.bf16.msra.mxu0 %v10727_v55 }
0x1f02   :  { %9136 = vmatprep.subr.bf16.mxu0 %v10837_v14 }
0x1f44   :  { %v7027_v56 = vpop.f32.mrf.mxu0  ;;  %v7109_v16 = vpop.f32.mrf.mxu1 }
0x1f45   :  { %v7028_v5 = vadd.f32 %v7027_v56, %v12010_v22  ;;  %v7110_v8 = vadd.f32 %v7109_v16, %v12019_v9 }
0x1f46   :  { %v7029_v6 = vpop.f32.mrf.mxu0  ;;  %v7111_v53 = vpop.f32.mrf.mxu1 }
0x1f47   :  { %v7069_v58 = vadd.f32 %v14805_v48, %v7028_v5  ;;  %v7112_v2 = vadd.f32 %v7111_v53, %v12015_v62  ;;  %v7030_v28 = vadd.f32 %v7029_v6, %v12023_v49 }
0x1f48   :  { %v7031_v47 = vpop.f32.mrf.mxu0  ;;  %v7113_v19 = vpop.f32.mrf.mxu1 }
0x1f49   :  { %v8624_v39 = vmul.f32 -1.442695, %v7069_v58  ;;  %v7071_v48 = vadd.f32 %v14813_v57, %v7030_v28 }
0x1f4a   :  { %v7032_v18 = vpop.f32.mrf.mxu0  ;;  %v7114_v33 = vpop.f32.mrf.mxu1 }
0x1f4b   :  { %9807 = vpow2.f32 %v8624_v39 }
0x1f58   :  { %v9808_v17 = vpop.eup %9807 }
0x1f59   :  { %v7160_v37 = vadd.f32 1.0, %v9808_v17 }
0x1f64   :  { %v7150_v52 = vpop.f32.mrf.mxu0 }
0x1f65   :  { %v7151_v30 = vadd.f32 %v7150_v52, %v7110_v8 }
0x1f66   :  { %v7152_v36 = vpop.f32.mrf.mxu0 }
0x1f67   :  { %v7153_v44 = vadd.f32 %v7152_v36, %v7112_v2  ;;  %v8625_v59 = vmul.f32 -1.442695, %v7151_v30 }
0x1f68   :  { %v7154_v54 = vpop.f32.mrf.mxu0 }
0x1f69   :  { %v8626_v13 = vmul.f32 -1.442695, %v7153_v44 }
0x1f6a   :  { %v7155_v4 = vpop.f32.mrf.mxu0 }
0x1f6b   :  { %9809 = vpow2.f32 %v8626_v13 }
0x1f6c   :  { %9811 = vpow2.f32 %v8625_v59 }
0x1f6d   :  { %9813 = vrcp.f32 %v7160_v37 }
0x1f6e   :  { %9815 = vtanh.f32 %v7071_v48 }
0x1f78   :  { %v9810_v11 = vpop.eup %9809 }
0x1f79   :  { %v7173_v29 = vadd.f32 1.0, %v9810_v11  ;;  %v9812_v12 = vpop.eup %9811 }
0x1f7a   :  { %v9814_v35 = vpop.eup %9813  ;;  %v7167_v55 = vadd.f32 1.0, %v9812_v12 }
0x1f7b   :  { %9817 = vrcp.f32 %v7173_v29  ;;  %v9816_v3 = vpop.eup %9815 }
0x1f7c   :  { %v7176_v16 = vmul.f32 %v9816_v3, %v9814_v35  ;;  %9819 = vrcp.f32 %v7167_v55 }
0x1f86   :  { %v7261_v41 = vpop.f32.mrf.mxu1 }
0x1f87   :  { %v7262_v4 = vadd.f32 %v7261_v41, %v11185_v42 }
0x1f88   :  { %v9818_v1 = vpop.eup %9817  ;;  %v7263_v56 = vpop.f32.mrf.mxu1 }
0x1f89   :  { %v7177_v6 = vmul.f32 %v9818_v1, %v14283_v51  ;;  %v9820_v18 = vpop.eup %9819  ;;  %v7264_v13 = vadd.f32 %v7263_v56, %v11182_v40 }
0x1f8a   :  { %v7265_v53 = vpop.f32.mrf.mxu1 }
0x1f8b   :  { %v15034_v47 = vadd.f32 %v7177_v6, %v7176_v16  ;;  %v8631_v8 = vmul.f32 -1.442695, %v7264_v13  ;;  %v10728_v16 = vld [vmem:[%s15534_s8] ss:$0 sm:$0xff] }
0x1f8c   :  { %v7266_v57 = vpop.f32.mrf.mxu1 }
0x1f8d   :  { %9821 = vtanh.f32 %v15034_v47  ;;  %v7293_v19 = vpack.c.bf16 %v15034_v47, %v15034_v47 }
0x1f8f   :  { %7326 = vmatprep.mubr.bf16.mxu0 %v7293_v19 }
0x1f9a   :  { %v9822_v33 = vpop.eup %9821 }
0x1f9b   :  { %v15039_v5 = vmul.f32 %v9822_v33, %v9820_v18 }
0x1f9d   :  { %8627 = vst [vmem:[%s15541_s13 + $0x20] sm:$0xff] %v15039_v5 }
0x1fa4   :  { %v7220_v51 = vpop.f32.mrf.mxu0 }
0x1fa5   :  { %v7221_v58 = vadd.f32 %v7220_v51, %v11168_v26 }
0x1fa6   :  { %v7222_v39 = vpop.f32.mrf.mxu0 }
0x1fa7   :  { %v8629_v52 = vmul.f32 -1.442695, %v7221_v58  ;;  %v7223_v2 = vadd.f32 %v7222_v39, %v11171_v27 }
0x1fa8   :  { %v7224_v36 = vpop.f32.mrf.mxu0 }
0x1fa9   :  { %9823 = vpow2.f32 %v8629_v52  ;;  %v8630_v44 = vmul.f32 -1.442695, %v7223_v2 }
0x1faa   :  { %v7225_v54 = vpop.f32.mrf.mxu0 }
0x1fab   :  { %9825 = vpow2.f32 %v8630_v44  ;;  %v10729_v44 = vld [vmem:[%s15535_s1] sm:$0xff] }
0x1fac   :  { %9827 = vtanh.f32 %v7262_v4 }
0x1fad   :  { %9829 = vpow2.f32 %v8631_v8 }
0x1fb6   :  { %v9824_v30 = vpop.eup %9823 }
0x1fb7   :  { %v7271_v17 = vadd.f32 1.0, %v9824_v30  ;;  %v10730_v30 = vld [vmem:[%s15535_s1 + $0x8] sm:$0xff] }
0x1fb8   :  { %v9826_v28 = vpop.eup %9825 }
0x1fb9   :  { %9831 = vrcp.f32 %v7271_v17  ;;  %v7277_v26 = vadd.f32 1.0, %v9826_v28  ;;  %v9828_v59 = vpop.eup %9827  ;;  %v10731_v28 = vld [vmem:[%s15535_s1 + $0x10] sm:$0xff] }
0x1fba   :  { %v9830_v27 = vpop.eup %9829 }
0x1fbb   :  { %9833 = vrcp.f32 %v7277_v26  ;;  %v7284_v11 = vadd.f32 1.0, %v9830_v27 }
0x1fbd   :  { %9835 = vrcp.f32 %v7284_v11 }
0x1fc6   :  { %v9832_v37 = vpop.eup %9831 }
0x1fc7   :  { %v7288_v12 = vmul.f32 %v9832_v37, %v9828_v59  ;;  %v10732_v37 = vld [vmem:[%s15535_s1 + $0x20] sm:$0xff] }
0x1fc8   :  { %v9834_v48 = vpop.eup %9833 }
0x1fc9   :  { %v7287_v29 = vmul.f32 %v9834_v48, %v14299_v46 }
0x1fca   :  { %v9836_v42 = vpop.eup %9835 }
0x1fcb   :  { %v7289_v40 = vadd.f32 %v7288_v12, %v7287_v29  ;;  %v10733_v12 = vld [vmem:[%s15535_s1 + $0x18] sm:$0xff] }
0x1fcd   :  { %9837 = vtanh.f32 %v7289_v40 }
0x1fda   :  { %v9838_v35 = vpop.eup %9837 }
0x1fdb   :  { %v7291_v41 = vmul.f32 %v9838_v35, %v9836_v42  ;;  %v10734_v35 = vld [vmem:[%s15535_s1 + $0x28] sm:$0xff] }
0x1fdd   :  { %v15050_v3 = vpack.c.bf16 %v7291_v41, %v7291_v41 }
0x1fdf   :  { %7327 = vmatmul.mubr.bf16.vlgmr.msra.gmra.mxu0 %v15050_v3 }
0x1fe0   :  { %9137 = vmatpush3.bf16.msra.mxu0 %v11370_v45  ;;  %9138 = vmatprep.mubr.msk.bf16.mxu0 %vm10838_vm9, %v10837_v14 }
0x1fe1   :  { %9148 = vmatprep.subr.bf16.mxu0 %v10837_v14 }
0x209f   :  { %v8850_v1 = vpop.f32.mrf.mxu0 }
0x20a1   :  { %v8851_v46 = vpop.f32.mrf.mxu0 }
0x20a2   :  { %v8852_v55 = vadd.f32 %v8851_v46, %v8850_v1  ;;  %v10735_v46 = vld [vmem:[%s15536_s9] ss:$0 sm:$0xff] }
0x20a3   :  { %v8853_v56 = vpop.f32.mrf.mxu0 }
0x20a4   :  { %v7329_v6 = vadd.f32 %v10728_v16, %v8852_v55 }
0x20a5   :  { %v8854_v53 = vpop.f32.mrf.mxu0 }
0x20a6   :  { %v7335_v57 = vcombine.high %v7329_v6, %v7329_v6  ;;  %v7342_v19 = vrot.slane %v7329_v6, %v11204_v7  ;;  %v10736_v6 = vld [vmem:[%s15535_s1 + $0x30] sm:$0xff] }
0x20a8   :  { %v7349_v45 = vrot.slane %v7335_v57, %v11204_v7  ;;  %v7350_v18 = vcombine.high %v7342_v19, %v7342_v19  ;;  %v7358_v33 = vrot.slane %v7342_v19, %v11204_v7 }
0x20aa   :  { %v7372_v51 = vrot.slane %v7350_v18, %v11204_v7  ;;  %v7380_v58 = vcombine.high %v7358_v33, %v7358_v33  ;;  %v7365_v39 = vrot.slane %v7349_v45, %v11204_v7  ;;  %v7387_v52 = vrot.slane %v7358_v33, %v11159_v23 }
0x20ab   :  { %v7351_v13 = vcombine.high %v7349_v45, %v7349_v45  ;;  %v10737_v45 = vld [vmem:[%s15535_s1 + $0x38] sm:$0xff] }
0x20ac   :  { %v7391_v2 = vrot.slane %v7372_v51, %v11159_v23  ;;  %v7395_v36 = vrot.slane %v7380_v58, %v11159_v23  ;;  %v7424_v54 = vadd.f32 %v10729_v44, %v7387_v52  ;;  %v7382_v4 = vcombine.high %v7372_v51, %v7372_v51 }
0x20ad   :  { %v7403_v8 = vrot.slane %v7365_v39, %v11159_v23  ;;  %v7379_v59 = vrot.slane %v7351_v13, %v11204_v7  ;;  %v7381_v11 = vcombine.high %v7365_v39, %v7365_v39 }
0x20ae   :  { %v7425_v17 = vadd.f32 %v10730_v30, %v7391_v2  ;;  %v7426_v26 = vadd.f32 %v10731_v28, %v7395_v36  ;;  %9839 = vtanh.f32 %v7424_v54  ;;  %v7399_v27 = vrot.slane %v7382_v4, %v11159_v23 }
0x20af   :  { %v7428_v48 = vadd.f32 %v10732_v37, %v7403_v8  ;;  %v7407_v29 = vrot.slane %v7379_v59, %v11159_v23  ;;  %v7383_v42 = vcombine.high %v7379_v59, %v7379_v59  ;;  %v7411_v7 = vrot.slane %v7381_v11, %v11159_v23 }
0x20b0   :  { %9841 = vtanh.f32 %v7425_v17  ;;  %v7427_v40 = vadd.f32 %v10733_v12, %v7399_v27 }
0x20b1   :  { %9843 = vtanh.f32 %v7426_v26  ;;  %v7429_v41 = vadd.f32 %v10734_v35, %v7407_v29  ;;  %v7415_v16 = vrot.slane %v7383_v42, %v11159_v23  ;;  %v7430_v53 = vadd.f32 %v10736_v6, %v7411_v7 }
0x20b2   :  { %9845 = vtanh.f32 %v7428_v48 }
0x20b3   :  { %9847 = vtanh.f32 %v7427_v40  ;;  %v7431_v18 = vadd.f32 %v10737_v45, %v7415_v16 }
0x20b4   :  { %9849 = vtanh.f32 %v7429_v41 }
0x20b5   :  { %9851 = vtanh.f32 %v7430_v53 }
0x20b6   :  { %9853 = vtanh.f32 %v7431_v18 }
0x20bb   :  { %v9840_v1 = vpop.eup %9839 }
0x20bc   :  { %v7440_v55 = vmul.f32 %v10735_v46, %v9840_v1 }
0x20bd   :  { %v9842_v56 = vpop.eup %9841 }
0x20be   :  { %7448 = vadd.xlane.f32.xlu0 %v7440_v55  ;;  %v7441_v57 = vmul.f32 %v10735_v46, %v9842_v56  ;;  %v9844_v19 = vpop.eup %9843 }
0x20bf   :  { %v7442_v33 = vmul.f32 %v10735_v46, %v9844_v19  ;;  %v9846_v51 = vpop.eup %9845 }
0x20c0   :  { %7450 = vadd.xlane.f32.xlu1 %v7441_v57  ;;  %v7444_v58 = vmul.f32 %v10735_v46, %v9846_v51  ;;  %v9848_v39 = vpop.eup %9847 }
0x20c1   :  { %v7443_v52 = vmul.f32 %v10735_v46, %v9848_v39  ;;  %v9850_v2 = vpop.eup %9849 }
0x20c2   :  { %v7445_v36 = vmul.f32 %v10735_v46, %v9850_v2  ;;  %v9852_v44 = vpop.eup %9851 }
0x20c3   :  { %v7446_v54 = vmul.f32 %v10735_v46, %v9852_v44  ;;  %v9854_v13 = vpop.eup %9853 }
0x20c4   :  { %7452 = vadd.xlane.f32.xlu1 %v7442_v33  ;;  %v7447_v4 = vmul.f32 %v10735_v46, %v9854_v13 }
0x20c8   :  { %7456 = vadd.xlane.f32.xlu1 %v7444_v58 }
0x20cc   :  { %7454 = vadd.xlane.f32.xlu1 %v7443_v52 }
0x20d0   :  { %7458 = vadd.xlane.f32.xlu1 %v7445_v36 }
0x20d4   :  { %7460 = vadd.xlane.f32.xlu1 %v7446_v54 }
0x20d8   :  { %7462 = vadd.xlane.f32.xlu1 %v7447_v4 }
0x2147   :  { %v7449_v28 = vpop.xlane.xlu0 %7448 }
0x2148   :  { %v7464_v37 = vadd.f32 %v7449_v28, %v11251_v32 }
0x2149   :  { %v7451_v8 = vpop.xlane.xlu1 %7450 }
0x214a   :  { %v7465_v59 = vadd.f32 %v7451_v8, %v11251_v32  ;;  %v7483_v40 = vrot.slane %v7464_v37, %v11249_v31 }
0x214c   :  { %v7487_v29 = vrot.slane %v7465_v59, %v11249_v31 }
0x214d   :  { %v7453_v30 = vpop.xlane.xlu1 %7452 }
0x214e   :  { %v7466_v27 = vadd.f32 %v7453_v30, %v11251_v32  ;;  %v7512_v1 = vsel %vm1080_vm0, %v7487_v29, %v7483_v40 }
0x2150   :  { %v7491_v12 = vrot.slane %v7466_v27, %v11249_v31 }
0x2151   :  { %v7457_v17 = vpop.xlane.xlu1 %7456 }
0x2152   :  { %v7468_v35 = vadd.f32 %v7457_v17, %v11251_v32  ;;  %v7513_v55 = vsel %vm1082_vm1, %v7491_v12, %v7512_v1 }
0x2154   :  { %v7499_v6 = vrot.slane %v7468_v35, %v11249_v31 }
0x2155   :  { %v7455_v26 = vpop.xlane.xlu1 %7454 }
0x2156   :  { %v7467_v48 = vadd.f32 %v7455_v26, %v11251_v32 }
0x2158   :  { %v7495_v42 = vrot.slane %v7467_v48, %v11249_v31 }
0x2159   :  { %v7459_v11 = vpop.xlane.xlu1 %7458 }
0x215a   :  { %v7469_v7 = vadd.f32 %v7459_v11, %v11251_v32  ;;  %v7514_v56 = vsel %vm1084_vm2, %v7495_v42, %v7513_v55 }
0x215b   :  { %v7515_v45 = vsel %vm1086_vm3, %v7499_v6, %v7514_v56 }
0x215c   :  { %v7503_v16 = vrot.slane %v7469_v7, %v11249_v31 }
0x215d   :  { %v7461_v41 = vpop.xlane.xlu1 %7460 }
0x215e   :  { %v7470_v46 = vadd.f32 %v7461_v41, %v11251_v32  ;;  %v7516_v18 = vsel %vm1088_vm4, %v7503_v16, %v7515_v45 }
0x2160   :  { %v7507_v53 = vrot.slane %v7470_v46, %v11249_v31 }
0x2161   :  { %v7463_v57 = vpop.xlane.xlu1 %7462 }
0x2162   :  { %v7471_v19 = vadd.f32 %v7463_v57, %v11251_v32  ;;  %v7517_v51 = vsel %vm1090_vm5, %v7507_v53, %v7516_v18 }
0x2164   :  { %v7511_v33 = vrot.slane %v7471_v19, %v11249_v31 }
0x2166   :  { %v7518_v58 = vsel %vm1092_vm6, %v7511_v33, %v7517_v51 }
0x2167   :  { %v7520_v39 = vsel %vm1095_vm7, %v7518_v58, -inf }
0x2168   :  { %7521 = vmax.xlane.f32.xlu1 %v7520_v39 }
0x21f1   :  { %v7522_v52 = vpop.xlane.xlu1 %7521 }
0x21f2   :  { %v7527_v2 = vrot.slane %v7522_v52, %v11159_v23  ;;  %v7531_v36 = vrot.slane %v7522_v52, %v11165_v25  ;;  %v7535_v32 = vrot.slane %v7522_v52, %v11179_v38  ;;  %v7539_v44 = vrot.slane %v7522_v52, %v11176_v34 }
0x21f3   :  { %v7547_v54 = vrot.slane %v7522_v52, %v11289_v15  ;;  %v7543_v30 = vrot.slane %v7522_v52, %v11285_v10  ;;  %v7555_v11 = vrot.slane %v7522_v52, %v11278_v0  ;;  %v7551_v40 = vrot.slane %v7522_v52, %v11293_v20 }
0x21f4   :  { %v7564_v13 = vsub.f32 %v7464_v37, %v7527_v2  ;;  %v7565_v4 = vsub.f32 %v7465_v59, %v7531_v36  ;;  %v7567_v8 = vsub.f32 %v7467_v48, %v7539_v44  ;;  %v7566_v17 = vsub.f32 %v7466_v27, %v7535_v32 }
0x21f5   :  { %v7569_v29 = vsub.f32 %v7469_v7, %v7547_v54  ;;  %v7568_v42 = vsub.f32 %v7468_v35, %v7543_v30  ;;  %v7571_v1 = vsub.f32 %v7471_v19, %v7555_v11  ;;  %v7570_v59 = vsub.f32 %v7470_v46, %v7551_v40 }
0x21f6   :  { %v7572_v28 = vmul.f32 1.442695, %v7564_v13  ;;  %v7574_v26 = vmul.f32 1.442695, %v7565_v4  ;;  %v7578_v12 = vmul.f32 1.442695, %v7567_v8 }
0x21f7   :  { %v7576_v41 = vmul.f32 1.442695, %v7566_v17  ;;  %v7582_v37 = vmul.f32 1.442695, %v7569_v29  ;;  %v7580_v48 = vmul.f32 1.442695, %v7568_v42 }
0x21f8   :  { %9855 = vpow2.f32 %v7572_v28  ;;  %v7586_v27 = vmul.f32 1.442695, %v7571_v1  ;;  %v7584_v55 = vmul.f32 1.442695, %v7570_v59 }
0x21f9   :  { %9857 = vpow2.f32 %v7574_v26 }
0x21fa   :  { %9859 = vpow2.f32 %v7578_v12 }
0x21fb   :  { %9861 = vpow2.f32 %v7576_v41 }
0x21fc   :  { %9863 = vpow2.f32 %v7582_v37 }
0x21fd   :  { %9865 = vpow2.f32 %v7580_v48 }
0x21fe   :  { %9867 = vpow2.f32 %v7586_v27 }
0x21ff   :  { %9869 = vpow2.f32 %v7584_v55 }
0x2205   :  { %v9856_v56 = vpop.eup %9855 }
0x2206   :  { %v9858_v7 = vpop.eup %9857  ;;  %7597 = vperm.xlu0 %9165, %v9856_v56  }
0x2207   :  { %7600 = vperm.xlu1 %9166, %v9858_v7   ;;  %v15133_v16 = vpop.eup %9859 }
0x2208   :  { %v9862_v35 = vpop.eup %9861 }
0x2209   :  { %v15136_v6 = vpop.eup %9863 }
0x220a   :  { %7606 = vperm.xlu0 %9165, %v15133_v16   ;;  %v15138_v46 = vpop.eup %9865 }
0x220b   :  { %7603 = vperm.xlu1 %9166, %v9862_v35   ;;  %v15142_v53 = vpop.eup %9867 }
0x220c   :  { %v15144_v57 = vpop.eup %9869 }
0x220e   :  { %7612 = vperm.xlu0 %9165, %v15136_v6  }
0x220f   :  { %7609 = vperm.xlu1 %9166, %v15138_v46  }
0x2212   :  { %7618 = vperm.xlu0 %9165, %v15142_v53  }
0x2213   :  { %7615 = vperm.xlu1 %9166, %v15144_v57  }
0x2281   :  { %v7598_v19 = vpop.permute.xlu0 %7597 }
0x2282   :  { %v7601_v45 = vpop.permute.xlu1 %7600  ;;  %v7623_v33 = vrot.slane %v7598_v19, %v11249_v31 }
0x2283   :  { %v7627_v18 = vrot.slane %v7601_v45, %v11249_v31 }
0x2285   :  { %v7607_v51 = vpop.permute.xlu0 %7606  ;;  %v7652_v52 = vsel %vm1080_vm0, %v7627_v18, %v7623_v33 }
0x2286   :  { %v7604_v58 = vpop.permute.xlu1 %7603  ;;  %v7635_v2 = vrot.slane %v7607_v51, %v11249_v31 }
0x2287   :  { %v7631_v39 = vrot.slane %v7604_v58, %v11249_v31 }
0x2289   :  { %v7653_v36 = vsel %vm1082_vm1, %v7631_v39, %v7652_v52  ;;  %v7613_v32 = vpop.permute.xlu0 %7612 }
0x228a   :  { %v7610_v44 = vpop.permute.xlu1 %7609  ;;  %v7654_v13 = vsel %vm1084_vm2, %v7635_v2, %v7653_v36  ;;  %v7643_v4 = vrot.slane %v7613_v32, %v11249_v31 }
0x228b   :  { %v7639_v54 = vrot.slane %v7610_v44, %v11249_v31 }
0x228d   :  { %v7655_v8 = vsel %vm1086_vm3, %v7639_v54, %v7654_v13  ;;  %v7619_v30 = vpop.permute.xlu0 %7618 }
0x228e   :  { %v7616_v17 = vpop.permute.xlu1 %7615  ;;  %v7651_v28 = vrot.slane %v7619_v30, %v11249_v31  ;;  %v7656_v11 = vsel %vm1088_vm4, %v7643_v4, %v7655_v8 }
0x228f   :  { %v7647_v26 = vrot.slane %v7616_v17, %v11249_v31 }
0x2291   :  { %v7657_v29 = vsel %vm1090_vm5, %v7647_v26, %v7656_v11 }
0x2292   :  { %v7658_v12 = vsel %vm1092_vm6, %v7651_v28, %v7657_v29 }
0x2293   :  { %v7660_v40 = vsel %vm1095_vm7, %v7658_v12, 0.0 }
0x2294   :  { %7661 = vadd.xlane.f32.xlu1 %v7660_v40 }
0x231d   :  { %v7662_v42 = vpop.xlane.xlu1 %7661 }
0x231e   :  { %v7667_v41 = vrot.slane %v7662_v42, %v11159_v23  ;;  %v7671_v1 = vrot.slane %v7662_v42, %v11165_v25  ;;  %v7675_v37 = vrot.slane %v7662_v42, %v11179_v38  ;;  %v7679_v59 = vrot.slane %v7662_v42, %v11176_v34 }
0x231f   :  { %v7683_v48 = vrot.slane %v7662_v42, %v11285_v10  ;;  %v7687_v27 = vrot.slane %v7662_v42, %v11289_v15  ;;  %v7691_v45 = vrot.slane %v7662_v42, %v11293_v20  ;;  %v7695_v33 = vrot.slane %v7662_v42, %v11278_v0 }
0x2320   :  { %9871 = vrcp.f32 %v7667_v41 }
0x2321   :  { %9873 = vrcp.f32 %v7671_v1 }
0x2322   :  { %9875 = vrcp.f32 %v7675_v37 }
0x2323   :  { %9877 = vrcp.f32 %v7679_v59 }
0x2324   :  { %9879 = vrcp.f32 %v7683_v48 }
0x2325   :  { %9881 = vrcp.f32 %v7687_v27 }
0x2326   :  { %9883 = vrcp.f32 %v7691_v45  ;;  %v15207_v45 = vpack.c.bf16 %v15039_v5, %v15039_v5  ;;  %v10739_v5 = vld [vmem:[%s15538_s11 + $0xe0] ss:$16 sps:$4 sm:$0xff]  }
0x2327   :  { %9885 = vrcp.f32 %v7695_v33  ;;  %v10742_v33 = vld [vmem:[%s15538_s11 + $0xa4] ss:$16 sps:$4 sm:$0xff]  }
0x232d   :  { %v9872_v55 = vpop.eup %9871 }
0x232e   :  { %v9874_v19 = vpop.eup %9873  ;;  %v7705_v23 = vmul.f32 %v9872_v55, %v9856_v56  ;;  %v10738_v55 = vld [vmem:[%s15538_s11 + $0xe4] ss:$16 sps:$4 sm:$0xff]  }
0x232f   :  { %v9876_v25 = vpop.eup %9875  ;;  %v7707_v18 = vmul.f32 %v9874_v19, %v9858_v7 }
0x2330   :  { %v7720_v38 = vpack.c.bf16 %v7705_v23, %v7705_v23  ;;  %v7709_v58 = vmul.f32 %v9876_v25, %v9862_v35  ;;  %v9878_v10 = vpop.eup %9877  ;;  %v10740_v25 = vld [vmem:[%s15538_s11 + $0xc4] ss:$16 sps:$4 sm:$0xff]  }
0x2331   :  { %v7721_v51 = vpack.c.bf16 %v7707_v18, %v7707_v18  ;;  %v7711_v52 = vmul.f32 %v9878_v10, %v15133_v16  ;;  %v9880_v2 = vpop.eup %9879  ;;  %v10745_v10 = vld [vmem:[%s15538_s11 + $0x84] ss:$16 sps:$4 sm:$0xff]  }
0x2332   :  { %v7729_v34 = vunpack.c.l.b16 %v7720_v38  ;;  %v7722_v39 = vpack.c.bf16 %v7709_v58, %v7709_v58  ;;  %v7713_v7 = vmul.f32 %v9880_v2, %v15138_v46  ;;  %v9882_v36 = vpop.eup %9881  ;;  %v10741_v38 = vld [vmem:[%s15538_s11 + $0xc0] ss:$16 sps:$4 sm:$0xff]   ;;  %v10751_v2 = vld [vmem:[%s15538_s11 + $0x44] ss:$16 sps:$4 sm:$0xff]  }
0x2333   :  { %v7782_v15 = vunpack.c.l.b16 %v7721_v51  ;;  %v7723_v56 = vpack.c.bf16 %v7711_v52, %v7711_v52  ;;  %v7715_v44 = vmul.f32 %v9882_v36, %v15136_v6  ;;  %v9884_v35 = vpop.eup %9883  ;;  %v10743_v51 = vld [vmem:[%s15538_s11 + $0x2e4] ss:$16 sps:$4 sm:$0xff]   ;;  %v10744_v58 = vld [vmem:[%s15538_s11 + $0xa0] ss:$16 sps:$4 sm:$0xff]  }
0x2334   :  { %7731 = vperm.xlu0 %9165, %v7729_v34   ;;  %v7835_v20 = vunpack.c.l.b16 %v7722_v39  ;;  %v7724_v32 = vpack.c.bf16 %v7713_v7, %v7713_v7  ;;  %v7717_v4 = vmul.f32 %v9884_v35, %v15144_v57  ;;  %v9886_v8 = vpop.eup %9885  ;;  %v10749_v39 = vld [vmem:[%s15538_s11 + $0x2c4] ss:$16 sps:$4 sm:$0xff]   ;;  %v10750_v52 = vld [vmem:[%s15538_s11 + $0x60] ss:$16 sps:$4 sm:$0xff]  }
0x2335   :  { %v7888_v0 = vunpack.c.l.b16 %v7723_v56  ;;  %v7725_v13 = vpack.c.bf16 %v7715_v44, %v7715_v44  ;;  %v7719_v17 = vmul.f32 %v9886_v8, %v15142_v53  ;;  %v10753_v56 = vld [vmem:[%s15538_s11 + $0x2a4] ss:$16 sps:$4 sm:$0xff]   ;;  %v10754_v7 = vld [vmem:[%s15538_s11 + $0x40] ss:$16 sps:$4 sm:$0xff]  }
0x2336   :  { %v7941_v54 = vunpack.c.l.b16 %v7724_v32  ;;  %v7726_v30 = vpack.c.bf16 %v7717_v4, %v7717_v4  ;;  %v10755_v36 = vld [vmem:[%s15538_s11 + $0x24] ss:$16 sps:$4 sm:$0xff]   ;;  %v10758_v44 = vld [vmem:[%s15538_s11 + $0x20] ss:$16 sps:$4 sm:$0xff]  }
0x2337   :  { %v7994_v16 = vunpack.c.l.b16 %v7725_v13  ;;  %v7727_v28 = vpack.c.bf16 %v7719_v17, %v7719_v17  ;;  %v10757_v32 = vld [vmem:[%s15538_s11 + $0x284] ss:$16 sps:$4 sm:$0xff]   ;;  %v10762_v4 = vld [vmem:[%s15538_s11] ss:$16 sps:$4 sm:$0xff]  }
0x2338   :  { %7784 = vperm.xlu0 %9165, %v7782_v15   ;;  %v8047_v46 = vunpack.c.l.b16 %v7726_v30  ;;  %v10748_v15 = vld [vmem:[%s15538_s11 + $0x2e0] ss:$16 sps:$4 sm:$0xff]   ;;  %v10759_v35 = vld [vmem:[%s15538_s11 + $0x4] ss:$16 sps:$4 sm:$0xff]  }
0x2339   :  { %v8100_v26 = vunpack.c.l.b16 %v7727_v28  ;;  %v10761_v13 = vld [vmem:[%s15538_s11 + $0x264] ss:$16 sps:$4 sm:$0xff]   ;;  %v10766_v17 = vld [vmem:[%s15538_s11 + $0x1e0] ss:$16 sps:$4 sm:$0xff]  }
0x233a   :  { %v10763_v8 = vld [vmem:[%s15538_s11 + $0x1e4] ss:$16 sps:$4 sm:$0xff]   ;;  %v10768_v28 = vld [vmem:[%s15538_s11 + $0x240] ss:$16 sps:$4 sm:$0xff]  }
0x233b   :  { %v10765_v30 = vld [vmem:[%s15538_s11 + $0x244] ss:$16 sps:$4 sm:$0xff]  }
0x233c   :  { %7837 = vperm.xlu0 %9165, %v7835_v20   ;;  %v10752_v20 = vld [vmem:[%s15538_s11 + $0x2c0] ss:$16 sps:$4 sm:$0xff]  }
0x2340   :  { %7890 = vperm.xlu0 %9165, %v7888_v0   ;;  %v10756_v0 = vld [vmem:[%s15538_s11 + $0x2a0] ss:$16 sps:$4 sm:$0xff]  }
0x2344   :  { %7943 = vperm.xlu0 %9165, %v7941_v54   ;;  %v10760_v54 = vld [vmem:[%s15538_s11 + $0x280] ss:$16 sps:$4 sm:$0xff]  }
0x2348   :  { %7996 = vperm.xlu0 %9165, %v7994_v16   ;;  %v10764_v16 = vld [vmem:[%s15538_s11 + $0x260] ss:$16 sps:$4 sm:$0xff]  }
0x234c   :  { %8049 = vperm.xlu0 %9165, %v8047_v46   ;;  %v10767_v46 = vld [vmem:[%s15538_s11 + $0x1c4] ss:$16 sps:$4 sm:$0xff]  }
0x2350   :  { %8102 = vperm.xlu0 %9165, %v8100_v26   ;;  %v10769_v26 = vld [vmem:[%s15538_s11 + $0x224] ss:$16 sps:$4 sm:$0xff]  }
0x23af   :  { %v7732_v11 = vpop.permute.xlu0 %7731 }
0x23b0   :  { %v7736_v6 = vrot.slane %v7732_v11, %v11249_v31  ;;  %v10770_v11 = vld [vmem:[%s15538_s11 + $0x1c0] ss:$16 sps:$4 sm:$0xff]  }
0x23b2   :  { %v7737_v29 = vpack.c.b16 %v7736_v6, %v7736_v6  ;;  %v10771_v6 = vld [vmem:[%s15538_s11 + $0x1a4] ss:$16 sps:$4 sm:$0xff]  }
0x23b3   :  { %v7785_v12 = vpop.permute.xlu0 %7784 }
0x23b4   :  { %9115 = vmatmul.mubr.msk.bf16.vlgmr.msra.gmra.mxu1 %vm1095_vm7, %v7737_v29  ;;  %v7789_v53 = vrot.slane %v7785_v12, %v11249_v31  ;;  %v10772_v29 = vld [vmem:[%s15538_s11 + $0x220] ss:$16 sps:$4 sm:$0xff]   ;;  %v10773_v12 = vld [vmem:[%s15538_s11 + $0x204] ss:$16 sps:$4 sm:$0xff]  }
0x23b5   :  { %9119 = vmatpush3.bf16.msra.mxu1 %v11380_v43  ;;  %9120 = vmatprep.mubr.msk.bf16.mxu1 %vm10838_vm9, %v10837_v14 }
0x23b6   :  { %9124 = vmatprep.subr.bf16.mxu1 %v10837_v14  ;;  %v7790_v40 = vpack.c.b16 %v7789_v53, %v7789_v53  ;;  %v10774_v53 = vld [vmem:[%s15538_s11 + $0x1a0] ss:$16 sps:$4 sm:$0xff]  }
0x23b7   :  { %v7838_v57 = vpop.permute.xlu0 %7837 }
0x23b8   :  { %v7842_v41 = vrot.slane %v7838_v57, %v11249_v31  ;;  %v10775_v57 = vld [vmem:[%s15538_s11 + $0x184] ss:$16 sps:$4 sm:$0xff]  }
0x23ba   :  { %v7843_v37 = vpack.c.b16 %v7842_v41, %v7842_v41  ;;  %v10778_v41 = vld [vmem:[%s15538_s11 + $0x180] ss:$16 sps:$4 sm:$0xff]  }
0x23bb   :  { %v7891_v42 = vpop.permute.xlu0 %7890 }
0x23bc   :  { %9121 = vmatmul.mubr.msk.bf16.vlgmr.msra.gmra.mxu1 %vm1095_vm7, %v7790_v40  ;;  %v10776_v40 = vld [vmem:[%s15538_s11 + $0x200] ss:$16 sps:$4 sm:$0xff]  }
0x23bd   :  { %9125 = vmatpush3.bf16.msra.mxu1 %v11392_v50  ;;  %9126 = vmatprep.mubr.msk.bf16.mxu1 %vm10838_vm9, %v10837_v14  ;;  %v7895_v50 = vrot.slane %v7891_v42, %v11249_v31  ;;  %v10777_v42 = vld [vmem:[%s15538_s11 + $0xec] ss:$16 sps:$4 sm:$0xff]  }
0x23be   :  { %9130 = vmatprep.subr.bf16.mxu1 %v10837_v14 }
0x23bf   :  { %v7944_v43 = vpop.permute.xlu0 %7943  ;;  %v7896_v19 = vpack.c.b16 %v7895_v50, %v7895_v50  ;;  %v10784_v50 = vld [vmem:[%s15538_s11 + $0xc8] ss:$16 sps:$4 sm:$0xff]  }
0x23c0   :  { %v7948_v1 = vrot.slane %v7944_v43, %v11249_v31  ;;  %v10779_v43 = vld [vmem:[%s15538_s11 + $0x164] ss:$16 sps:$4 sm:$0xff]  }
0x23c2   :  { %v7949_v59 = vpack.c.b16 %v7948_v1, %v7948_v1  ;;  %v10780_v1 = vld [vmem:[%s15538_s11 + $0xe8] ss:$16 sps:$4 sm:$0xff]  }
0x23c3   :  { %v7997_v48 = vpop.permute.xlu0 %7996 }
0x23c4   :  { %9127 = vmatmul.mubr.msk.bf16.vlgmr.msra.gmra.mxu1 %vm1095_vm7, %v7843_v37  ;;  %9139 = vmatmul.mubr.msk.bf16.vlgmr.msra.gmra.mxu0 %vm1095_vm7, %v7949_v59  ;;  %v8001_v23 = vrot.slane %v7997_v48, %v11249_v31  ;;  %v10781_v37 = vld [vmem:[%s15538_s11 + $0xcc] ss:$16 sps:$4 sm:$0xff]   ;;  %v10782_v59 = vld [vmem:[%s15538_s11 + $0x160] ss:$16 sps:$4 sm:$0xff]   ;;  %v10783_v48 = vld [vmem:[%s15538_s11 + $0x144] ss:$16 sps:$4 sm:$0xff]  }
0x23c5   :  { %9131 = vmatpush3.bf16.msra.mxu1 %v11408_v60  ;;  %9149 = vmatpush3.bf16.msra.mxu0 %v11411_v61 }
0x23c6   :  { %9132 = vmatprep.mubr.msk.bf16.mxu1 %vm10838_vm9, %v10837_v14  ;;  %9142 = vmatprep.subr.bf16.mxu1 %v10837_v14 }
0x23c7   :  { %v8050_v27 = vpop.permute.xlu0 %8049  ;;  %9150 = vmatprep.mubr.msk.bf16.mxu0 %vm10838_vm9, %v10837_v14  ;;  %8177 = vmatprep.subr.bf16.mxu0 %v10738_v55  ;;  %v10786_v55 = vld [vmem:[%s15538_s11 + $0x140] ss:$16 sps:$4 sm:$0xff]  }
0x23c8   :  { %v8054_v60 = vrot.slane %v8050_v27, %v11249_v31  ;;  %v10785_v27 = vld [vmem:[%s15538_s11 + $0xac] ss:$16 sps:$4 sm:$0xff]  }
0x23ca   :  { %v8055_v61 = vpack.c.b16 %v8054_v60, %v8054_v60  ;;  %v10787_v60 = vld [vmem:[%s15538_s11 + $0x124] ss:$16 sps:$4 sm:$0xff]  }
0x23cb   :  { %v8103_v18 = vpop.permute.xlu0 %8102 }
0x23cc   :  { %9133 = vmatmul.mubr.msk.bf16.vlgmr.msra.gmra.mxu1 %vm1095_vm7, %v7896_v19  ;;  %9151 = vmatmul.mubr.msk.bf16.vlgmr.msra.gmra.mxu0 %vm1095_vm7, %v8055_v61  ;;  %v8107_v34 = vrot.slane %v8103_v18, %v11249_v31  ;;  %v10746_v31 = vld [vmem:[%s15538_s11 + $0x80] ss:$16 sps:$4 sm:$0xff]   ;;  %v10788_v19 = vld [vmem:[%s15538_s11 + $0xa8] ss:$16 sps:$4 sm:$0xff]   ;;  %v10789_v61 = vld [vmem:[%s15538_s11 + $0x8c] ss:$16 sps:$4 sm:$0xff]  }
0x23cd   :  { %9143 = vmatpush3.bf16.msra.mxu1 %v11431_v21  ;;  %8209 = vmatprep.mubr.bf16.mxu0 %v15207_v45  ;;  %v8002_v21 = vpack.c.b16 %v8001_v23, %v8001_v23  ;;  %v10791_v23 = vld [vmem:[%s15538_s11 + $0x104] ss:$16 sps:$4 sm:$0xff]   ;;  %v10795_v18 = vld [vmem:[%s15538_s11 + $0x2ec] ss:$16 sps:$4 sm:$0xff]  }
0x23ce   :  { %9144 = vmatprep.mubr.msk.bf16.mxu1 %vm10838_vm9, %v10837_v14  ;;  %9154 = vmatprep.subr.bf16.mxu1 %v10837_v14 }
0x23cf   :  { %8178 = vmatpush1.bf16.msra.mxu0 %v10739_v5  ;;  %v10792_v5 = vld [vmem:[%s15538_s11 + $0x88] ss:$16 sps:$4 sm:$0xff]  }
0x23d0   :  { %8179 = vmatprep.subr.bf16.mxu0 %v10740_v25  ;;  %v10793_v25 = vld [vmem:[%s15538_s11 + $0x6c] ss:$16 sps:$4 sm:$0xff]  }
0x23d3   :  { %8180 = vmatpush1.bf16.msra.mxu0 %v10741_v38  ;;  %v10796_v38 = vld [vmem:[%s15538_s11 + $0x68] ss:$16 sps:$4 sm:$0xff]  }
0x23d4   :  { %9145 = vmatmul.mubr.msk.bf16.vlgmr.msra.gmra.mxu1 %vm1095_vm7, %v8002_v21  ;;  %8181 = vmatprep.subr.bf16.mxu0 %v10742_v33  ;;  %v10794_v21 = vld [vmem:[%s15538_s11 + $0x100] ss:$16 sps:$4 sm:$0xff]   ;;  %v10797_v33 = vld [vmem:[%s15538_s11 + $0x4c] ss:$16 sps:$4 sm:$0xff]  }
0x23d5   :  { %9155 = vmatpush3.bf16.msra.mxu1 %v11456_v24  ;;  %9156 = vmatprep.mubr.msk.bf16.mxu1 %vm10838_vm9, %v10837_v14  ;;  %v8108_v24 = vpack.c.b16 %v8107_v34, %v8107_v34  ;;  %v10747_v14 = vld [vmem:[%s15538_s11 + $0x64] ss:$16 sps:$4 sm:$0xff]   ;;  %v10798_v34 = vld [vmem:[%s15538_s11 + $0x48] ss:$16 sps:$4 sm:$0xff]  }
0x23d6   :  { %8218 = vmatprep.subr.bf16.mxu1 %v10743_v51  ;;  %v10799_v51 = vld [vmem:[%s15538_s11 + $0x2c] ss:$16 sps:$4 sm:$0xff]  }
0x23d7   :  { %8182 = vmatpush1.bf16.msra.mxu0 %v10744_v58  ;;  %v10800_v58 = vld [vmem:[%s15538_s11 + $0x28] ss:$16 sps:$4 sm:$0xff]  }
0x23d8   :  { %8183 = vmatprep.subr.bf16.mxu0 %v10745_v10  ;;  %v10801_v10 = vld [vmem:[%s15538_s11 + $0xc] ss:$16 sps:$4 sm:$0xff]  }
0x23db   :  { %8184 = vmatpush1.bf16.msra.mxu0 %v10746_v31  ;;  %v10803_v31 = vld [vmem:[%s15538_s11 + $0x1ec] ss:$16 sps:$4 sm:$0xff]  }
0x23dc   :  { %9157 = vmatmul.mubr.msk.bf16.vlgmr.msra.gmra.mxu1 %vm1095_vm7, %v8108_v24  ;;  %8185 = vmatprep.subr.bf16.mxu0 %v10747_v14  ;;  %v10802_v24 = vld [vmem:[%s15538_s11 + $0x8] ss:$16 sps:$4 sm:$0xff]  }
0x23dd   :  { %8219 = vmatpush1.bf16.msra.mxu1 %v10748_v15  ;;  %8250 = vmatprep.mubr.bf16.mxu1 %v10835_v63  ;;  %v10804_v14 = vld [vmem:[%s15538_s11 + $0x1e8] ss:$16 sps:$4 sm:$0xff]   ;;  %v10805_v15 = vld [vmem:[%s15538_s11 + $0x1cc] ss:$16 sps:$4 sm:$0xff]  }
0x23de   :  { %8220 = vmatprep.subr.bf16.mxu1 %v10749_v39  ;;  %v10806_v39 = vld [vmem:[%s15538_s11 + $0x1c8] ss:$16 sps:$4 sm:$0xff]  }
0x23df   :  { %8186 = vmatpush1.bf16.msra.mxu0 %v10750_v52  ;;  %v10807_v52 = vld [vmem:[%s15538_s11 + $0x1ac] ss:$16 sps:$4 sm:$0xff]  }
0x23e0   :  { %8187 = vmatprep.subr.bf16.mxu0 %v10751_v2  ;;  %v10808_v2 = vld [vmem:[%s15538_s11 + $0x1a8] ss:$16 sps:$4 sm:$0xff]  }
0x23e1   :  { %8221 = vmatpush1.bf16.msra.mxu1 %v10752_v20  ;;  %v10809_v20 = vld [vmem:[%s15538_s11 + $0x18c] ss:$16 sps:$4 sm:$0xff]  }
0x23e2   :  { %8222 = vmatprep.subr.bf16.mxu1 %v10753_v56  ;;  %v10810_v56 = vld [vmem:[%s15538_s11 + $0x188] ss:$16 sps:$4 sm:$0xff]  }
0x23e3   :  { %8188 = vmatpush1.bf16.msra.mxu0 %v10754_v7  ;;  %v10811_v7 = vld [vmem:[%s15538_s11 + $0x16c] ss:$16 sps:$4 sm:$0xff]  }
0x23e4   :  { %8189 = vmatprep.subr.bf16.mxu0 %v10755_v36  ;;  %v10812_v36 = vld [vmem:[%s15538_s11 + $0x168] ss:$16 sps:$4 sm:$0xff]  }
0x23e5   :  { %8223 = vmatpush1.bf16.msra.mxu1 %v10756_v0  ;;  %v10813_v0 = vld [vmem:[%s15538_s11 + $0x14c] ss:$16 sps:$4 sm:$0xff]  }
0x23e6   :  { %8224 = vmatprep.subr.bf16.mxu1 %v10757_v32  ;;  %v10814_v32 = vld [vmem:[%s15538_s11 + $0x148] ss:$16 sps:$4 sm:$0xff]  }
0x23e7   :  { %8190 = vmatpush1.bf16.msra.mxu0 %v10758_v44  ;;  %v10815_v44 = vld [vmem:[%s15538_s11 + $0x12c] ss:$16 sps:$4 sm:$0xff]  }
0x23e8   :  { %8191 = vmatprep.subr.bf16.mxu0 %v10759_v35  ;;  %v10816_v35 = vld [vmem:[%s15538_s11 + $0x128] ss:$16 sps:$4 sm:$0xff]  }
0x23e9   :  { %8225 = vmatpush1.bf16.msra.mxu1 %v10760_v54  ;;  %v10817_v54 = vld [vmem:[%s15538_s11 + $0x10c] ss:$16 sps:$4 sm:$0xff]  }
0x23ea   :  { %8226 = vmatprep.subr.bf16.mxu1 %v10761_v13  ;;  %v10818_v13 = vld [vmem:[%s15538_s11 + $0x108] ss:$16 sps:$4 sm:$0xff]  }
0x23eb   :  { %8192 = vmatpush1.bf16.msra.mxu0 %v10762_v4 }
0x23ec   :  { %8193 = vmatprep.subr.bf16.mxu0 %v10763_v8 }
0x23ed   :  { %8227 = vmatpush1.bf16.msra.mxu1 %v10764_v16 }
0x23ee   :  { %8228 = vmatprep.subr.bf16.mxu1 %v10765_v30 }
0x23ef   :  { %8194 = vmatpush2.bf16.msra.mxu0 %v10766_v17 }
0x23f0   :  { %8195 = vmatprep.subr.bf16.mxu0 %v10767_v46 }
0x23f1   :  { %8229 = vmatpush1.bf16.msra.mxu1 %v10768_v28 }
0x23f2   :  { %8230 = vmatprep.subr.bf16.mxu1 %v10769_v26 }
0x23f3   :  { %8196 = vmatpush2.bf16.msra.mxu0 %v10770_v11 }
0x23f4   :  { %8197 = vmatprep.subr.bf16.mxu0 %v10771_v6 }
0x23f5   :  { %8231 = vmatpush1.bf16.msra.mxu1 %v10772_v29 }
0x23f6   :  { %8232 = vmatprep.subr.bf16.mxu1 %v10773_v12 }
0x23f7   :  { %8198 = vmatpush2.bf16.msra.mxu0 %v10774_v53 }
0x23f8   :  { %8199 = vmatprep.subr.bf16.mxu0 %v10775_v57 }
0x23f9   :  { %8233 = vmatpush1.bf16.msra.mxu1 %v10776_v40 }
0x23fa   :  { %8259 = vmatprep.subr.bf16.mxu1 %v10777_v42 }
0x23fb   :  { %8200 = vmatpush2.bf16.msra.mxu0 %v10778_v41 }
0x23fc   :  { %8251 = vmatmul.mubr.bf16.vlgmr.msra.gmra.mxu1 %v15050_v3  ;;  %8201 = vmatprep.subr.bf16.mxu0 %v10779_v43 }
0x23fd   :  { %8291 = vmatprep.mubr.bf16.mxu1 %v15207_v45  ;;  %8260 = vmatpush1.bf16.msra.mxu1 %v10780_v1  ;;  %v10790_v45 = vld [vmem:[%s15538_s11 + $0x120] ss:$16 sps:$4 sm:$0xff]  }
0x23fe   :  { %8261 = vmatprep.subr.bf16.mxu1 %v10781_v37 }
0x23ff   :  { %8202 = vmatpush2.bf16.msra.mxu0 %v10782_v59 }
0x2400   :  { %8203 = vmatprep.subr.bf16.mxu0 %v10783_v48 }
0x2401   :  { %8262 = vmatpush1.bf16.msra.mxu1 %v10784_v50 }
0x2402   :  { %8263 = vmatprep.subr.bf16.mxu1 %v10785_v27 }
0x2403   :  { %8204 = vmatpush2.bf16.msra.mxu0 %v10786_v55 }
0x2404   :  { %8205 = vmatprep.subr.bf16.mxu0 %v10787_v60 }
0x2405   :  { %8264 = vmatpush1.bf16.msra.mxu1 %v10788_v19 }
0x2406   :  { %8265 = vmatprep.subr.bf16.mxu1 %v10789_v61 }
0x2407   :  { %8206 = vmatpush2.bf16.msra.mxu0 %v10790_v45 }
0x2408   :  { %8207 = vmatprep.subr.bf16.mxu0 %v10791_v23 }
0x2409   :  { %8266 = vmatpush1.bf16.msra.mxu1 %v10792_v5 }
0x240a   :  { %8267 = vmatprep.subr.bf16.mxu1 %v10793_v25 }
0x240b   :  { %8208 = vmatpush2.bf16.msra.mxu0 %v10794_v21 }
0x240c   :  { %8300 = vmatprep.subr.bf16.mxu0 %v10795_v18 }
0x240d   :  { %8268 = vmatpush1.bf16.msra.mxu1 %v10796_v38 }
0x240e   :  { %8269 = vmatprep.subr.bf16.mxu1 %v10797_v33 }
0x2411   :  { %8270 = vmatpush1.bf16.msra.mxu1 %v10798_v34 }
0x2412   :  { %8271 = vmatprep.subr.bf16.mxu1 %v10799_v51 }
0x2415   :  { %8272 = vmatpush1.bf16.msra.mxu1 %v10800_v58 }
0x2416   :  { %8273 = vmatprep.subr.bf16.mxu1 %v10801_v10 }
0x2419   :  { %8274 = vmatpush1.bf16.msra.mxu1 %v10802_v24 }
0x241a   :  { %8275 = vmatprep.subr.bf16.mxu1 %v10803_v31 }
0x241d   :  { %8276 = vmatpush2.bf16.msra.mxu1 %v10804_v14 }
0x241e   :  { %8277 = vmatprep.subr.bf16.mxu1 %v10805_v15 }
0x2421   :  { %8278 = vmatpush2.bf16.msra.mxu1 %v10806_v39 }
0x2422   :  { %8279 = vmatprep.subr.bf16.mxu1 %v10807_v52 }
0x2425   :  { %8280 = vmatpush2.bf16.msra.mxu1 %v10808_v2 }
0x2426   :  { %8281 = vmatprep.subr.bf16.mxu1 %v10809_v20  ;;  %v10819_v20 = vld [vmem:[%s15538_s11 + $0x2e8] ss:$16 sps:$4 sm:$0xff]  }
0x2429   :  { %8282 = vmatpush2.bf16.msra.mxu1 %v10810_v56  ;;  %v10820_v56 = vld [vmem:[%s15538_s11 + $0x2cc] ss:$16 sps:$4 sm:$0xff]  }
0x242a   :  { %8283 = vmatprep.subr.bf16.mxu1 %v10811_v7  ;;  %v10821_v7 = vld [vmem:[%s15538_s11 + $0x2c8] ss:$16 sps:$4 sm:$0xff]  }
0x242d   :  { %8284 = vmatpush2.bf16.msra.mxu1 %v10812_v36  ;;  %v10822_v36 = vld [vmem:[%s15538_s11 + $0x2ac] ss:$16 sps:$4 sm:$0xff]  }
0x242e   :  { %8285 = vmatprep.subr.bf16.mxu1 %v10813_v0  ;;  %v10823_v0 = vld [vmem:[%s15538_s11 + $0x2a8] ss:$16 sps:$4 sm:$0xff]  }
0x2431   :  { %8286 = vmatpush2.bf16.msra.mxu1 %v10814_v32  ;;  %v10825_v32 = vld [vmem:[%s15538_s11 + $0x288] ss:$16 sps:$4 sm:$0xff]  }
0x2432   :  { %8287 = vmatprep.subr.bf16.mxu1 %v10815_v44  ;;  %v10826_v44 = vld [vmem:[%s15538_s11 + $0x26c] ss:$16 sps:$4 sm:$0xff]  }
0x2435   :  { %8288 = vmatpush2.bf16.msra.mxu1 %v10816_v35  ;;  %v10827_v35 = vld [vmem:[%s15538_s11 + $0x268] ss:$16 sps:$4 sm:$0xff]  }
0x2436   :  { %8289 = vmatprep.subr.bf16.mxu1 %v10817_v54  ;;  %v10828_v54 = vld [vmem:[%s15538_s11 + $0x24c] ss:$16 sps:$4 sm:$0xff]  }
0x2439   :  { %8290 = vmatpush2.bf16.msra.mxu1 %v10818_v13  ;;  %v10829_v13 = vld [vmem:[%s15538_s11 + $0x248] ss:$16 sps:$4 sm:$0xff]  }
0x2474   :  { %v7775_v4 = vpop.f32.mrf.mxu1 }
0x2476   :  { %v9116_v8 = vpop.f32.mrf.mxu1 }
0x2477   :  { %v10831_v8 = vld [vmem:[%s15538_s11 + $0x228] ss:$16 sps:$4 sm:$0xff]  }
0x2478   :  { %v7778_v16 = vpop.f32.mrf.mxu1 }
0x247a   :  { %v9117_v30 = vpop.f32.mrf.mxu1 }
0x247b   :  { %v10832_v30 = vld [vmem:[%s15538_s11 + $0x20c] ss:$16 sps:$4 sm:$0xff]  }
0x247c   :  { %v7828_v17 = vpop.f32.mrf.mxu1 }
0x247d   :  { %v8160_v50 = vrot.slane %v7828_v17, 7 }
0x247e   :  { %v9122_v46 = vpop.f32.mrf.mxu1 }
0x247f   :  { %v8161_v45 = vsel %vm1080_vm0, %v8160_v50, %v7775_v4  ;;  %v10830_v4 = vld [vmem:[%s15538_s11 + $0x22c] ss:$16 sps:$4 sm:$0xff]   ;;  %v10833_v46 = vld [vmem:[%s15538_s11 + $0x208] ss:$16 sps:$4 sm:$0xff]  }
0x2480   :  { %v7831_v28 = vpop.f32.mrf.mxu1 }
0x2482   :  { %v9123_v26 = vpop.f32.mrf.mxu1 }
0x2484   :  { %v7881_v11 = vpop.f32.mrf.mxu1  ;;  %v7987_v6 = vpop.f32.mrf.mxu0 }
0x2485   :  { %v8162_v27 = vrot.slane %v7881_v11, 6  ;;  %v8166_v18 = vrot.slane %v7987_v6, 4 }
0x2486   :  { %v9128_v29 = vpop.f32.mrf.mxu1  ;;  %v9140_v12 = vpop.f32.mrf.mxu0 }
0x2487   :  { %v8163_v23 = vsel %vm1082_vm1, %v8162_v27, %v8161_v45 }
0x2488   :  { %v7884_v53 = vpop.f32.mrf.mxu1  ;;  %v7990_v57 = vpop.f32.mrf.mxu0 }
0x248a   :  { %v9129_v40 = vpop.f32.mrf.mxu1  ;;  %v9141_v42 = vpop.f32.mrf.mxu0 }
0x248c   :  { %v7934_v41 = vpop.f32.mrf.mxu1  ;;  %v8093_v43 = vpop.f32.mrf.mxu0 }
0x248d   :  { %v8164_v19 = vrot.slane %v7934_v41, 5  ;;  %v8170_v58 = vrot.slane %v8093_v43, 2 }
0x248e   :  { %v9134_v1 = vpop.f32.mrf.mxu1  ;;  %v9152_v37 = vpop.f32.mrf.mxu0 }
0x248f   :  { %v8165_v25 = vsel %vm1084_vm2, %v8164_v19, %v8163_v23 }
0x2490   :  { %v7937_v59 = vpop.f32.mrf.mxu1  ;;  %v8096_v48 = vpop.f32.mrf.mxu0  ;;  %v8167_v33 = vsel %vm1086_vm3, %v8166_v18, %v8165_v25 }
0x2492   :  { %v9135_v55 = vpop.f32.mrf.mxu1  ;;  %v9153_v60 = vpop.f32.mrf.mxu0 }
0x2494   :  { %v8040_v61 = vpop.f32.mrf.mxu1 }
0x2495   :  { %v8168_v21 = vrot.slane %v8040_v61, 3 }
0x2496   :  { %v9146_v5 = vpop.f32.mrf.mxu1 }
0x2497   :  { %v8169_v51 = vsel %vm1088_vm4, %v8168_v21, %v8167_v33 }
0x2498   :  { %v8043_v38 = vpop.f32.mrf.mxu1  ;;  %v8171_v31 = vsel %vm1090_vm5, %v8170_v58, %v8169_v51 }
0x249a   :  { %v9147_v34 = vpop.f32.mrf.mxu1 }
0x249c   :  { %v8146_v10 = vpop.f32.mrf.mxu1 }
0x249d   :  { %v8172_v24 = vrot.slane %v8146_v10, 1 }
0x249e   :  { %v9158_v14 = vpop.f32.mrf.mxu1 }
0x249f   :  { %v8173_v15 = vsel %vm1092_vm6, %v8172_v24, %v8171_v31 }
0x24a0   :  { %v8175_v39 = vpack.c.bf16 %v8173_v15, %v8173_v15  ;;  %v8149_v52 = vpop.f32.mrf.mxu1 }
0x24a2   :  { %v9159_v2 = vpop.f32.mrf.mxu1  ;;  %8210 = vmatmul.mubr.bf16.vlgmr.msra.gmra.mxu0 %v8175_v39  ;;  %8292 = vmatmul.mubr.bf16.vlgmr.msra.gmra.mxu1 %v8175_v39 }
0x24a3   :  { %8301 = vmatpush1.bf16.msra.mxu0 %v10819_v20  ;;  %8332 = vmatprep.mubr.bf16.mxu0 %v10835_v63  ;;  %v10824_v63 = vld [vmem:[%s15538_s11 + $0x28c] ss:$16 sps:$4 sm:$0xff]  }
0x24a4   :  { %8302 = vmatprep.subr.bf16.mxu0 %v10820_v56 }
0x24a7   :  { %8303 = vmatpush1.bf16.msra.mxu0 %v10821_v7 }
0x24a8   :  { %8304 = vmatprep.subr.bf16.mxu0 %v10822_v36 }
0x24ab   :  { %8305 = vmatpush1.bf16.msra.mxu0 %v10823_v0 }
0x24ac   :  { %8306 = vmatprep.subr.bf16.mxu0 %v10824_v63 }
0x24af   :  { %8307 = vmatpush1.bf16.msra.mxu0 %v10825_v32 }
0x24b0   :  { %8308 = vmatprep.subr.bf16.mxu0 %v10826_v44 }
0x24b3   :  { %8309 = vmatpush1.bf16.msra.mxu0 %v10827_v35 }
0x24b4   :  { %8310 = vmatprep.subr.bf16.mxu0 %v10828_v54 }
0x24b7   :  { %8311 = vmatpush1.bf16.msra.mxu0 %v10829_v13 }
0x24b8   :  { %8312 = vmatprep.subr.bf16.mxu0 %v10830_v4 }
0x24bb   :  { %8313 = vmatpush1.bf16.msra.mxu0 %v10831_v8 }
0x24bc   :  { %v8252_v16 = vpop.f32.mrf.mxu1  ;;  %8314 = vmatprep.subr.bf16.mxu0 %v10832_v30 }
0x24be   :  { %v8254_v17 = vpop.f32.mrf.mxu1 }
0x24bf   :  { %8315 = vmatpush1.bf16.msra.mxu0 %v10833_v46 }
0x24c0   :  { %v8256_v28 = vpop.f32.mrf.mxu1 }
0x24c2   :  { %v8257_v26 = vpop.f32.mrf.mxu1  ;;  %8333 = vmatmul.mubr.bf16.vlgmr.msra.gmra.mxu0 %v15050_v3 }
0x2562   :  { %v8211_v11 = vpop.f32.mrf.mxu0  ;;  %v8293_v6 = vpop.f32.mrf.mxu1 }
0x2563   :  { %v8212_v41 = vadd.f32 %v8211_v11, %v12010_v22  ;;  %v8294_v60 = vadd.f32 %v8293_v6, %v12019_v9 }
0x2564   :  { %v8213_v29 = vpop.f32.mrf.mxu0  ;;  %v8295_v12 = vpop.f32.mrf.mxu1 }
0x2565   :  { %v8253_v43 = vadd.f32 %v8252_v16, %v8212_v41  ;;  %v8296_v59 = vadd.f32 %v8295_v12, %v12015_v62  ;;  %v8214_v45 = vadd.f32 %v8213_v29, %v12023_v49 }
0x2566   :  { %v8215_v53 = vpop.f32.mrf.mxu0  ;;  %v8297_v57 = vpop.f32.mrf.mxu1 }
0x2567   :  { %v8640_v1 = vmul.f32 -1.442695, %v8253_v43  ;;  %v8255_v5 = vadd.f32 %v8254_v17, %v8214_v45 }
0x2568   :  { %v8216_v40 = vpop.f32.mrf.mxu0  ;;  %v8298_v42 = vpop.f32.mrf.mxu1 }
0x2569   :  { %9887 = vpow2.f32 %v8640_v1 }
0x2576   :  { %v9888_v61 = vpop.eup %9887 }
0x2577   :  { %v8344_v22 = vadd.f32 1.0, %v9888_v61 }
0x2582   :  { %v8334_v37 = vpop.f32.mrf.mxu0 }
0x2583   :  { %v8335_v19 = vadd.f32 %v8334_v37, %v8294_v60 }
0x2584   :  { %v8336_v48 = vpop.f32.mrf.mxu0 }
0x2585   :  { %v8337_v50 = vadd.f32 %v8336_v48, %v8296_v59  ;;  %v8641_v23 = vmul.f32 -1.442695, %v8335_v19 }
0x2586   :  { %v8338_v27 = vpop.f32.mrf.mxu0 }
0x2587   :  { %v8642_v3 = vmul.f32 -1.442695, %v8337_v50 }
0x2588   :  { %v8339_v55 = vpop.f32.mrf.mxu0 }
0x2589   :  { %9889 = vpow2.f32 %v8642_v3 }
0x258a   :  { %9891 = vpow2.f32 %v8641_v23 }
0x258b   :  { %9893 = vrcp.f32 %v8344_v22 }
0x258c   :  { %9895 = vtanh.f32 %v8255_v5 }
0x2596   :  { %v9890_v25 = vpop.eup %9889 }
0x2597   :  { %v8357_v21 = vadd.f32 1.0, %v9890_v25  ;;  %v9892_v62 = vpop.eup %9891 }
0x2598   :  { %v9894_v18 = vpop.eup %9893  ;;  %v8351_v34 = vadd.f32 1.0, %v9892_v62 }
0x2599   :  { %9897 = vrcp.f32 %v8357_v21  ;;  %v9896_v38 = vpop.eup %9895 }
0x259a   :  { %v8360_v51 = vmul.f32 %v9896_v38, %v9894_v18  ;;  %9899 = vrcp.f32 %v8351_v34 }
0x25a6   :  { %v9898_v33 = vpop.eup %9897 }
0x25a7   :  { %v8361_v9 = vmul.f32 %v9898_v33, %v15034_v47  ;;  %v9900_v49 = vpop.eup %9899 }
0x25a9   :  { %v8362_v58 = vadd.f32 %v8361_v9, %v8360_v51 }
0x25ab   :  { %9901 = vtanh.f32 %v8362_v58 }
0x25b8   :  { %v9902_v10 = vpop.eup %9901 }
0x25b9   :  { %v8364_v24 = vmul.f32 %v9902_v10, %v9900_v49 }
0x25bb   :  { %8643 = vst [vmem:[%s15541_s13 + $0x28] sm:$0xff] %v8364_v24 }

</bundles_post_ra>
